<compile_context>
chip_gen: v7x
topology: tpu7x:2x2x1
jax: 0.10.0
libtpu: 0.0.40
codegen_flags: <defaults>
</compile_context>

<pallas_src>
import functools

import numpy as np
import jax
import jax.numpy as jnp
from jax.experimental import pallas as pl
from jax.experimental.pallas import tpu as pltpu


# ---------------------------------------------------------------------------
# small shared helpers
# ---------------------------------------------------------------------------

def _layernorm(x, g, b, eps=1e-5):
    x = x.astype(jnp.float32)
    mu = jnp.mean(x, axis=-1, keepdims=True)
    var = jnp.mean(jnp.square(x - mu), axis=-1, keepdims=True)
    return (x - mu) * jax.lax.rsqrt(var + eps) * g + b


# ---------------------------------------------------------------------------
# generic linear kernels (frontend / predictor glue)
# ---------------------------------------------------------------------------

def _linear_kernel(x_ref, w_ref, b_ref, o_ref, *, act, use_bf16):
    x = x_ref[...]
    w = w_ref[...]
    if use_bf16:
        x = x.astype(jnp.bfloat16)
        w = w.astype(jnp.bfloat16)
    y = jnp.dot(x, w, preferred_element_type=jnp.float32) + b_ref[...]
    if act == "silu":
        y = y * jax.nn.sigmoid(y)
    elif act == "relu":
        y = jnp.maximum(y, 0.0)
    elif act == "log10":
        y = jnp.log10(y + 1e-10)
    o_ref[...] = y.astype(o_ref.dtype)


def pallas_linear(x, w, b, act="none", use_bf16=True, tile_m=512):
    """y = act(x @ w + b).  bf16 MXU operands by default, f32 accumulation.
    M-tiled grid path (weights resident) for large matmuls."""
    lead = x.shape[:-1]
    K = x.shape[-1]
    N = w.shape[1]
    M = int(np.prod(lead)) if lead else 1
    x2 = x.reshape(M, K)
    b2 = b.reshape(1, N)
    kern = functools.partial(_linear_kernel, act=act, use_bf16=use_bf16)
    if M <= 2 * tile_m:
        out = pl.pallas_call(
            kern, out_shape=jax.ShapeDtypeStruct((M, N), jnp.float32))(x2, w, b2)
    else:
        n_blk = (M + tile_m - 1) // tile_m
        Mp = n_blk * tile_m
        xp = jnp.pad(x2, ((0, Mp - M), (0, 0)))
        out = pl.pallas_call(
            kern,
            grid=(n_blk,),
            in_specs=[pl.BlockSpec((tile_m, K), lambda i: (i, 0)),
                      pl.BlockSpec((K, N), lambda i: (0, 0)),
                      pl.BlockSpec((1, N), lambda i: (0, 0))],
            out_specs=pl.BlockSpec((tile_m, N), lambda i: (i, 0)),
            out_shape=jax.ShapeDtypeStruct((Mp, N), jnp.float32),
            compiler_params=pltpu.CompilerParams(
                dimension_semantics=("parallel",)),
        )(xp, w, b2)
        out = out[:M]
    return out.reshape(*lead, N)


def _linear_ln_kernel(x_ref, w_ref, b_ref, g_ref, beta_ref, o_ref, *, eps):
    y = jnp.dot(x_ref[...].astype(jnp.bfloat16), w_ref[...].astype(jnp.bfloat16),
                preferred_element_type=jnp.float32) + b_ref[...]
    o_ref[...] = _layernorm(y, g_ref[...], beta_ref[...], eps).astype(o_ref.dtype)


def pallas_linear_ln(x, w, b, g, beta, eps=1e-5, tile_m=512):
    """Fused (x @ w + b) followed by LayerNorm over the output dim (M-tiled)."""
    lead = x.shape[:-1]
    K = x.shape[-1]
    N = w.shape[1]
    M = int(np.prod(lead)) if lead else 1
    x2 = x.reshape(M, K)
    args = (w, b.reshape(1, N), g.reshape(1, N), beta.reshape(1, N))
    kern = functools.partial(_linear_ln_kernel, eps=eps)
    if M <= 2 * tile_m:
        out = pl.pallas_call(
            kern, out_shape=jax.ShapeDtypeStruct((M, N), jnp.float32))(x2, *args)
    else:
        n_blk = (M + tile_m - 1) // tile_m
        Mp = n_blk * tile_m
        xp = jnp.pad(x2, ((0, Mp - M), (0, 0)))
        out = pl.pallas_call(
            kern,
            grid=(n_blk,),
            in_specs=[pl.BlockSpec((tile_m, K), lambda i: (i, 0)),
                      pl.BlockSpec((K, N), lambda i: (0, 0)),
                      pl.BlockSpec((1, N), lambda i: (0, 0)),
                      pl.BlockSpec((1, N), lambda i: (0, 0)),
                      pl.BlockSpec((1, N), lambda i: (0, 0))],
            out_specs=pl.BlockSpec((tile_m, N), lambda i: (i, 0)),
            out_shape=jax.ShapeDtypeStruct((Mp, N), jnp.float32),
            compiler_params=pltpu.CompilerParams(
                dimension_semantics=("parallel",)),
        )(xp, *args)
        out = out[:M]
    return out.reshape(*lead, N)


# ---------------------------------------------------------------------------
# fused Conformer STACK kernel: one pallas_call for all layers, grid = (B, L)
# ---------------------------------------------------------------------------

def _conformer_stack_kernel(*refs, num_heads, time_valid):
    x_ref, maskf_ref, bias_ref = refs[0], refs[1], refs[2]
    p = refs[3:-2]
    o_ref, acc_ref = refs[-2], refs[-1]
    assert len(p) == 36

    (ff1_lng, ff1_lnb, ff1_w1, ff1_b1, ff1_w2, ff1_b2,
     att_lng, att_lnb, wq, wk, wv, bq, bk, bv, wo, bo,
     cv_lng, cv_lnb, cv_wa, cv_ba, cv_wb, cv_bb, cv_dww, cv_dwb,
     cv_ng, cv_nb, cv_pw2w, cv_pw2b,
     ff2_lng, ff2_lnb, ff2_w1, ff2_b1, ff2_w2, ff2_b2,
     fin_g, fin_b) = p

    layer = pl.program_id(1)

    @pl.when(layer == 0)
    def _():
        acc_ref[...] = x_ref[0].astype(jnp.float32)

    x = acc_ref[...]                       # [T, D] f32, VMEM-resident across layers
    maskf = maskf_ref[0]                   # [T, 1]  (1.0 inside sequence, 0.0 outside)
    bias = bias_ref[0]                     # [1, T]  (0 valid key, -1e9 padded key)
    T, D = x.shape

    def ff_module(h, lng, lnb, w1, b1, w2, b2):
        y = _layernorm(h, lng[0], lnb[0])
        z = jnp.dot(y.astype(jnp.bfloat16), w1[0],
                    preferred_element_type=jnp.float32) + b1[0]
        z = z * jax.nn.sigmoid(z)          # SiLU (f32 on VPU)
        return jnp.dot(z.astype(jnp.bfloat16), w2[0],
                       preferred_element_type=jnp.float32) + b2[0]

    # ---- 0.5 * FF1 + residual -------------------------------------------------
    x = x + 0.5 * ff_module(x, ff1_lng, ff1_lnb, ff1_w1, ff1_b1, ff1_w2, ff1_b2)

    # ---- MHSA: fused QKV projections (wide matmuls) + per-head softmax ---------
    dh = D // num_heads
    y = _layernorm(x, att_lng[0], att_lnb[0])
    yb = y.astype(jnp.bfloat16)
    # 1/sqrt(dh) is pre-folded into wq/bq at parameter-prep time.
    q = jnp.dot(yb, wq[0], preferred_element_type=jnp.float32) + bq[0]   # [T, D]
    k = jnp.dot(yb, wk[0], preferred_element_type=jnp.float32) + bk[0]
    v = jnp.dot(yb, wv[0], preferred_element_type=jnp.float32) + bv[0]
    heads = []
    for h in range(num_heads):
        sl = slice(h * dh, (h + 1) * dh)
        s = jnp.einsum("qd,kd->qk", q[:, sl].astype(jnp.bfloat16),
                       k[:, sl].astype(jnp.bfloat16),
                       preferred_element_type=jnp.float32) + bias
        m = jnp.max(s, axis=-1, keepdims=True)
        e = jnp.exp(s - m)
        denom = jnp.maximum(jnp.sum(e, axis=-1, keepdims=True), 1e-30)
        pmat = e / denom
        heads.append(jnp.dot(pmat.astype(jnp.bfloat16),
                             v[:, sl].astype(jnp.bfloat16),
                             preferred_element_type=jnp.float32))        # [T, dh]
    att = jnp.concatenate(heads, axis=-1)                                # [T, D]
    x = x + jnp.dot(att.astype(jnp.bfloat16), wo[0],
                    preferred_element_type=jnp.float32) + bo[0]

    # ---- masked_fill outside the sequence --------------------------------------
    x = x * maskf

    # ---- Conv module ------------------------------------------------------------
    y = _layernorm(x, cv_lng[0], cv_lnb[0])
    yb = y.astype(jnp.bfloat16)
    a = jnp.dot(yb, cv_wa[0], preferred_element_type=jnp.float32) + cv_ba[0]
    g = jnp.dot(yb, cv_wb[0], preferred_element_type=jnp.float32) + cv_bb[0]
    y = a * jax.nn.sigmoid(g)              # pointwise conv1 + GLU (two lane-dense matmuls)

    # depthwise 'same' conv over time: pltpu.roll (XLU) + edge mask + VPU MAC
    t_idx = jax.lax.broadcasted_iota(jnp.int32, (T, D), 0)
    if time_valid < T:
        # frames beyond the true (unpadded) frame count act as the conv's zero padding
        y = jnp.where(t_idx < time_valid, y, 0.0)
    dww = cv_dww[0]                        # [K, D]
    Kc = dww.shape[0]
    pad = (Kc - 1) // 2
    conv_out = jnp.zeros_like(y)
    for kk in range(Kc):
        s_off = kk - pad
        if s_off == 0:
            shifted = y
        else:
            shifted = pltpu.roll(y, shift=(-s_off) % T, axis=0)
        valid = jnp.logical_and(t_idx + s_off >= 0, t_idx + s_off < T)
        conv_out = conv_out + jnp.where(valid, shifted, 0.0) * dww[kk:kk + 1, :]
    conv_out = conv_out + cv_dwb[0]
    y = _layernorm(conv_out, cv_ng[0], cv_nb[0])     # LayerNormNC over channels
    y = y * jax.nn.sigmoid(y)                        # SiLU
    y = jnp.dot(y.astype(jnp.bfloat16), cv_pw2w[0],
                preferred_element_type=jnp.float32) + cv_pw2b[0]
    x = x + y

    # ---- 0.5 * FF2 + residual, final LayerNorm ----------------------------------
    x = x + 0.5 * ff_module(x, ff2_lng, ff2_lnb, ff2_w1, ff2_b1, ff2_w2, ff2_b2)
    x = _layernorm(x, fin_g[0], fin_b[0])

    acc_ref[...] = x

    @pl.when(layer == pl.num_programs(1) - 1)
    def _():
        o_ref[...] = x[None, :, :].astype(o_ref.dtype)


def _layer_spec(arr):
    nd = arr.ndim
    return pl.BlockSpec((1,) + tuple(arr.shape[1:]),
                        lambda b, l, _n=nd: (l,) + (0,) * (_n - 1))


def conformer_stack_fused(x, maskf, bias_kp, stacked, num_heads, time_valid):
    B, T, D = x.shape
    L = stacked[0].shape[0]
    in_specs = [pl.BlockSpec((1, T, D), lambda b, l: (b, 0, 0)),
                pl.BlockSpec((1, T, 1), lambda b, l: (b, 0, 0)),
                pl.BlockSpec((1, 1, T), lambda b, l: (b, 0, 0))]
    in_specs += [_layer_spec(a) for a in stacked]
    return pl.pallas_call(
        functools.partial(_conformer_stack_kernel,
                          num_heads=num_heads, time_valid=time_valid),
        grid=(B, L),
        in_specs=in_specs,
        out_specs=pl.BlockSpec((1, T, D), lambda b, l: (b, 0, 0)),
        out_shape=jax.ShapeDtypeStruct((B, T, D), jnp.float32),
        scratch_shapes=[pltpu.VMEM((T, D), jnp.float32)],
        compiler_params=pltpu.CompilerParams(
            dimension_semantics=("parallel", "arbitrary")),
    )(x, maskf, bias_kp, *stacked)


# ---------------------------------------------------------------------------
# fused encoder epilogue: enc_out linear + CTC linear + log_softmax (M-tiled)
# ---------------------------------------------------------------------------

def _encoder_epilogue_kernel(x_ref, ew_ref, eb_ref, cw_ref, cb_ref, enc_ref, ctc_ref):
    xb = x_ref[...].astype(jnp.bfloat16)
    enc_ref[...] = (jnp.dot(xb, ew_ref[...], preferred_element_type=jnp.float32)
                    + eb_ref[...]).astype(enc_ref.dtype)
    logits = jnp.dot(xb, cw_ref[...], preferred_element_type=jnp.float32) + cb_ref[...]
    m = jnp.max(logits, axis=-1, keepdims=True)
    s = logits - m
    lse = jnp.log(jnp.sum(jnp.exp(s), axis=-1, keepdims=True))
    ctc_ref[...] = (s - lse).astype(ctc_ref.dtype)


def pallas_encoder_epilogue(x, ew, eb, cw, cb, tile_m=512):
    B, T, D = x.shape
    M = B * T
    J = ew.shape[1]
    Vp = cw.shape[1]
    x2 = x.reshape(M, D)
    if M <= tile_m:
        enc, ctc = pl.pallas_call(
            _encoder_epilogue_kernel,
            out_shape=(jax.ShapeDtypeStruct((M, J), jnp.float32),
                       jax.ShapeDtypeStruct((M, Vp), jnp.float32)),
        )(x2, ew, eb, cw, cb)
    else:
        n_blk = (M + tile_m - 1) // tile_m
        Mp = n_blk * tile_m
        xp = jnp.pad(x2, ((0, Mp - M), (0, 0)))
        enc, ctc = pl.pallas_call(
            _encoder_epilogue_kernel,
            grid=(n_blk,),
            in_specs=[pl.BlockSpec((tile_m, D), lambda i: (i, 0)),
                      pl.BlockSpec((D, J), lambda i: (0, 0)),
                      pl.BlockSpec((1, J), lambda i: (0, 0)),
                      pl.BlockSpec((D, Vp), lambda i: (0, 0)),
                      pl.BlockSpec((1, Vp), lambda i: (0, 0))],
            out_specs=(pl.BlockSpec((tile_m, J), lambda i: (i, 0)),
                       pl.BlockSpec((tile_m, Vp), lambda i: (i, 0))),
            out_shape=(jax.ShapeDtypeStruct((Mp, J), jnp.float32),
                       jax.ShapeDtypeStruct((Mp, Vp), jnp.float32)),
            compiler_params=pltpu.CompilerParams(
                dimension_semantics=("parallel",)),
        )(xp, ew, eb, cw, cb)
        enc, ctc = enc[:M], ctc[:M]
    return enc.reshape(B, T, J), ctc.reshape(B, T, Vp)


# ---------------------------------------------------------------------------
# joiner (vocab padded to 128 lanes; sliced back outside)
# ---------------------------------------------------------------------------

def _joiner_kernel(src_ref, tgt_ref, w_ref, b_ref, o_ref):
    src = src_ref[0]                                  # [T, J]
    w = w_ref[...]
    b = b_ref[...]
    U = tgt_ref.shape[1]
    for u in range(U):
        h = jnp.maximum(src + tgt_ref[0, u:u + 1, :], 0.0)      # relu(join)  [T, J]
        y = jnp.dot(h.astype(jnp.bfloat16), w,
                    preferred_element_type=jnp.float32) + b     # [T, Vp]
        o_ref[0, u] = y.astype(o_ref.dtype)


def pallas_joiner(src, tgt, w, b):
    B, T, J = src.shape
    U = tgt.shape[1]
    Vp = w.shape[1]
    out = pl.pallas_call(
        _joiner_kernel,
        grid=(B,),
        in_specs=[pl.BlockSpec((1, T, J), lambda i: (i, 0, 0)),
                  pl.BlockSpec((1, U, J), lambda i: (i, 0, 0)),
                  pl.BlockSpec((J, Vp), lambda i: (0, 0)),
                  pl.BlockSpec((1, Vp), lambda i: (0, 0))],
        out_specs=pl.BlockSpec((1, U, T, Vp), lambda i: (i, 0, 0, 0)),
        out_shape=jax.ShapeDtypeStruct((B, U, T, Vp), jnp.float32),
        compiler_params=pltpu.CompilerParams(dimension_semantics=("parallel",)),
    )(src, tgt, w, b)
    return jnp.transpose(out, (0, 2, 1, 3))           # [B, T, U, Vp]


# ---------------------------------------------------------------------------
# LSTM (single [B,H]@[H,4H] recurrent matmul per step, unrolled loop)
# ---------------------------------------------------------------------------

def _lstm_kernel(xg_ref, whh_ref, o_ref):
    U, B, H4 = xg_ref.shape
    H = H4 // 4
    Wb = whh_ref[...]                                 # [H, 4H] bf16 (hoisted once)

    def body(t, carry):
        h, c = carry
        g = xg_ref[t] + jnp.dot(h.astype(jnp.bfloat16), Wb,
                                preferred_element_type=jnp.float32)       # [B, 4H]
        i = jax.nn.sigmoid(g[:, 0 * H:1 * H])
        f = jax.nn.sigmoid(g[:, 1 * H:2 * H])
        gg = jnp.tanh(g[:, 2 * H:3 * H])
        o = jax.nn.sigmoid(g[:, 3 * H:4 * H])
        c = f * c + i * gg
        h = o * jnp.tanh(c)
        o_ref[t] = h
        return (h, c)

    jax.lax.fori_loop(0, U, body,
                      (jnp.zeros((B, H), jnp.float32),
                       jnp.zeros((B, H), jnp.float32)),
                      unroll=True)


def pallas_lstm(xg, w_hh):
    """xg: [U, B, 4H] precomputed x @ W_ih + biases (gate order i,f,g,o); w_hh: [H, 4H]."""
    U, B, H4 = xg.shape
    return pl.pallas_call(
        _lstm_kernel,
        out_shape=jax.ShapeDtypeStruct((U, B, H4 // 4), jnp.float32),
    )(xg, w_hh)


# ---------------------------------------------------------------------------
# Plain-JAX glue: feature extraction, patches (gather-free), parameter init
# ---------------------------------------------------------------------------

def mel_filterbank(n_mels, n_fft, sr=16000, fmin=0.0, fmax=8000.0):
    def hz_to_mel(f):
        return 2595.0 * np.log10(1.0 + f / 700.0)

    def mel_to_hz(m):
        return 700.0 * (10.0 ** (m / 2595.0) - 1.0)

    n_freqs = n_fft // 2 + 1
    mels = np.linspace(hz_to_mel(fmin), hz_to_mel(fmax), n_mels + 2)
    hz = mel_to_hz(mels)
    bins = np.floor((n_fft + 1) * hz / sr).astype(np.int64)
    fb = np.zeros((n_freqs, n_mels), dtype=np.float32)
    for m in range(1, n_mels + 1):
        l, c, r = int(bins[m - 1]), int(bins[m]), int(bins[m + 1])
        for k in range(l, c):
            if c > l:
                fb[k, m - 1] = (k - l) / (c - l)
        for k in range(c, r):
            if r > c:
                fb[k, m - 1] = (r - k) / (r - c)
    # the Nyquist row is structurally zero for fmax = sr/2; drop it -> lane-aligned K=128
    return jnp.asarray(fb[: n_fft // 2])


def log_mel_features(audio, lengths, mel_fb, n_fft, hop):
    """LogMelFeatureExtractionV1-style features (centered STFT, hann, power, mel, log10)."""
    B, S = audio.shape
    pad = n_fft // 2
    ap = jnp.pad(audio, ((0, 0), (pad, pad)))
    # gather-free STFT framing via identity-kernel patches (exact: 0/1 weights)
    patches = jax.lax.conv_general_dilated_patches(
        ap[:, None, :], filter_shape=(n_fft,), window_strides=(hop,),
        padding="VALID", precision=jax.lax.Precision.HIGHEST)     # [B, n_fft, T']
    frames = jnp.transpose(patches, (0, 2, 1))                    # [B, T', n_fft]
    window = jnp.asarray(np.hanning(n_fft), dtype=jnp.float32)
    frames = frames * window[None, None, :]
    power = jnp.abs(jnp.fft.rfft(frames, axis=-1)) ** 2           # [B, T', n_fft//2+1]
    power = power[..., : mel_fb.shape[0]]                         # drop zero-weight Nyquist bin
    # mel projection kept in f32 (low-energy bins + log10 are precision sensitive)
    logmel = pallas_linear(power, mel_fb,
                           jnp.zeros((mel_fb.shape[1],), jnp.float32),
                           act="log10", use_bf16=False)
    feat_len = lengths // hop + 1
    return logmel, feat_len


def extract_patches_nhwc(x, kh, kw, sh, sw, ph, pw):
    """x: [B, T, F, C] -> patches [B, To, Fo, kh*kw*C] via kh*kw static strided slices."""
    B, T, F, C = x.shape
    xp = jnp.pad(x, ((0, 0), (ph, ph), (pw, pw), (0, 0)))
    To = (T + 2 * ph - kh) // sh + 1
    Fo = (F + 2 * pw - kw) // sw + 1
    slabs = []
    for i in range(kh):
        for j in range(kw):
            slab = jax.lax.slice(
                xp, (0, i, j, 0),
                (B, i + (To - 1) * sh + 1, j + (Fo - 1) * sw + 1, C),
                (1, sh, sw, 1))
            slabs.append(slab)
    p = jnp.concatenate(slabs, axis=-1)                            # ordering (kh, kw, C)
    return p, To, Fo


def stack_block_params(blocks, num_heads):
    """Stack per-block params along a leading L axis; fold 1/sqrt(dh) into wq/bq."""
    d = blocks[0]["mhsa"]["wq"].shape[0]
    dh = d // num_heads
    scale = 1.0 / float(np.sqrt(dh))
    order = [
        ("ff1", "ln_g"), ("ff1", "ln_b"), ("ff1", "w1"), ("ff1", "b1"),
        ("ff1", "w2"), ("ff1", "b2"),
        ("mhsa", "ln_g"), ("mhsa", "ln_b"), ("mhsa", "wq"), ("mhsa", "wk"),
        ("mhsa", "wv"), ("mhsa", "bq"), ("mhsa", "bk"), ("mhsa", "bv"),
        ("mhsa", "wo"), ("mhsa", "bo"),
        ("conv", "ln_g"), ("conv", "ln_b"), ("conv", "wa"), ("conv", "ba"),
        ("conv", "wb"), ("conv", "bb"), ("conv", "dw_w"), ("conv", "dw_b"),
        ("conv", "norm_g"), ("conv", "norm_b"), ("conv", "pw2_w"), ("conv", "pw2_b"),
        ("ff2", "ln_g"), ("ff2", "ln_b"), ("ff2", "w1"), ("ff2", "b1"),
        ("ff2", "w2"), ("ff2", "b2"),
        ("final_ln", "g"), ("final_ln", "b"),
    ]
    stacked = []
    for grp, name in order:
        arrs = [blk[grp][name] for blk in blocks]
        if grp == "mhsa" and name in ("wq", "bq"):
            arrs = [(a.astype(jnp.float32) * scale).astype(a.dtype) for a in arrs]
        stacked.append(jnp.stack(arrs, axis=0))
    return stacked


def init_params(key, cfg):
    d, ffd, K = cfg["conformer_size"], cfg["ff_dim"], cfg["conv_kernel_size"]
    H = cfg["num_heads"]
    n_mels, c1, c2 = cfg["n_mels"], cfg["c1"], cfg["c2"]
    J = cfg["joiner_dim"]
    V = cfg["label_target_size"] + 1
    Vp = ((V + 127) // 128) * 128                    # lane-dense padded vocab
    E, Hl = cfg["pred_embed_dim"], cfg["lstm_hidden"]
    keys = iter(jax.random.split(key, 512))
    bf16 = jnp.bfloat16

    def dense(shape, dtype=jnp.float32, scale=0.02):
        return (scale * jax.random.normal(next(keys), shape, dtype=jnp.float32)).astype(dtype)

    def ones(*s):
        return jnp.ones(s, jnp.float32)

    def zeros(*s):
        return jnp.zeros(s, jnp.float32)

    def ff_params():
        return dict(ln_g=ones(1, d), ln_b=zeros(1, d),
                    w1=dense((d, ffd), bf16), b1=zeros(1, ffd),
                    w2=dense((ffd, d), bf16), b2=zeros(1, d))

    def block():
        return dict(
            ff1=ff_params(),
            mhsa=dict(ln_g=ones(1, d), ln_b=zeros(1, d),
                      wq=dense((d, d), bf16), wk=dense((d, d), bf16),
                      wv=dense((d, d), bf16),
                      bq=zeros(1, d), bk=zeros(1, d), bv=zeros(1, d),
                      wo=dense((d, d), bf16), bo=zeros(1, d)),
            conv=dict(ln_g=ones(1, d), ln_b=zeros(1, d),
                      wa=dense((d, d), bf16), ba=zeros(1, d),
                      wb=dense((d, d), bf16), bb=zeros(1, d),
                      dw_w=dense((K, d)), dw_b=zeros(1, d),
                      norm_g=ones(1, d), norm_b=zeros(1, d),
                      pw2_w=dense((d, d), bf16), pw2_b=zeros(1, d)),
            ff2=ff_params(),
            final_ln=dict(g=ones(1, d), b=zeros(1, d)),
        )

    blocks = [block() for _ in range(cfg["num_layers"])]
    block_stack = stack_block_params(blocks, H)

    ctc_w = jnp.zeros((d, Vp), jnp.float32).at[:, :V].set(dense((d, V))).astype(bf16)
    ctc_b = jnp.full((1, Vp), -1e9, jnp.float32).at[:, :V].set(0.0)
    joiner_w = jnp.zeros((J, Vp), jnp.float32).at[:, :V].set(dense((J, V))).astype(bf16)
    joiner_b = zeros(1, Vp)

    return dict(
        mel_fb=mel_filterbank(n_mels, cfg["n_fft"]),
        frontend=dict(conv1_w=dense((3 * 3 * 1, c1), bf16), conv1_b=zeros(c1),
                      conv2_w=dense((3 * 3 * c1, c2), bf16), conv2_b=zeros(c2),
                      lin_w=dense((n_mels * c2, d), bf16), lin_b=zeros(d)),
        block_stack=block_stack,
        enc_out_w=dense((d, J), bf16), enc_out_b=zeros(1, J),
        ctc_w=ctc_w, ctc_b=ctc_b,
        predictor=dict(embed=dense((V, E)),
                       w_ih=dense((E, 4 * Hl), bf16), b_gates=zeros(4 * Hl),
                       w_hh=dense((Hl, 4 * Hl), bf16),
                       lin_w=dense((Hl, J), bf16), lin_b=zeros(J),
                       ln_g=ones(1, J), ln_b=zeros(1, J)),
        joiner_w=joiner_w, joiner_b=joiner_b,
    )


# ---------------------------------------------------------------------------
# Model components
# ---------------------------------------------------------------------------

def frontend(x, lengths, p):
    """VGG-style subsampling frontend (2x stride-2 3x3 convs + linear)."""
    # TODO(synk): exact GenericFrontendV2 / VGG4LayerActFrontendV1 configs are unknown;
    # this uses an equivalent 4x time-subsampling conv frontend (conv via im2col + MXU matmul).
    B, T, F = x.shape
    x = x[..., None]                                           # NHWC, C=1
    patches, T1, F1 = extract_patches_nhwc(x, 3, 3, 2, 1, 1, 1)
    h = pallas_linear(patches, p["conv1_w"], p["conv1_b"], act="silu")   # [B,T1,F1,c1]
    patches, T2, F2 = extract_patches_nhwc(h, 3, 3, 2, 1, 1, 1)
    h = pallas_linear(patches, p["conv2_w"], p["conv2_b"], act="silu")   # [B,T2,F2,c2]
    h = h.reshape(B, T2, F2 * h.shape[-1])
    h = pallas_linear(h, p["lin_w"], p["lin_b"])                          # [B,T2,d]
    l1 = (lengths - 1) // 2 + 1
    l2 = (l1 - 1) // 2 + 1
    mask = jnp.arange(T2)[None, :] < l2[:, None]
    return h, mask


def predictor(labels, labels_len, p):
    # TODO(synk): torchaudio-style blank/SOS prepend and multi-layer LSTM omitted (1-layer LSTM).
    emb = p["embed"][labels]                                   # [B, U, E]
    xg = pallas_linear(emb, p["w_ih"], p["b_gates"])           # [B, U, 4H]
    xg = xg.transpose(1, 0, 2)                                 # [U, B, 4H]
    h = pallas_lstm(xg, p["w_hh"])                             # [U, B, H]
    h = h.transpose(1, 0, 2)                                   # [B, U, H]
    out = pallas_linear_ln(h, p["lin_w"], p["lin_b"], p["ln_g"], p["ln_b"])
    return out, labels_len


def model_forward(params, raw_audio, raw_audio_len, labels, labels_len, cfg):
    """Model.forward, Mode.OFFLINE (no chunking / lookahead; SpecAugment disabled at eval)."""
    # TODO(synk): SpecAugment is training-only and skipped (eval path of extract_features).
    audio = jnp.squeeze(raw_audio, axis=-1)
    feats, feat_len = log_mel_features(audio, raw_audio_len, params["mel_fb"],
                                       cfg["n_fft"], cfg["hop"])
    x, mask = frontend(feats, feat_len, params["frontend"])
    B, T, D = x.shape

    # pad time to a sublane multiple (8): keeps rolls / stores aligned inside the stack
    Tp = ((T + 7) // 8) * 8
    if Tp != T:
        x = jnp.pad(x, ((0, 0), (0, Tp - T), (0, 0)))
        mask_p = jnp.pad(mask, ((0, 0), (0, Tp - T)))
    else:
        mask_p = mask
    maskf = mask_p[:, :, None].astype(jnp.float32)                          # [B, Tp, 1]
    bias_kp = jnp.where(mask_p, 0.0, -1e9).astype(jnp.float32)[:, None, :]  # [B, 1, Tp]

    # all conformer blocks in ONE pallas_call, activations resident in VMEM across layers
    x = conformer_stack_fused(x, maskf, bias_kp, params["block_stack"],
                              cfg["num_heads"], time_valid=T)
    conformer_out = x[:, :T]
    conformer_out_lengths = jnp.sum(mask.astype(jnp.int32), axis=1)

    # fused epilogue: encoder_out_linear + CTC linear + log_softmax (single HBM read)
    enc_joiner_in, ctc_lp_pad = pallas_encoder_epilogue(
        conformer_out, params["enc_out_w"], params["enc_out_b"],
        params["ctc_w"], params["ctc_b"])

    predict_out, _ = predictor(labels, labels_len, params["predictor"])

    joiner_pad = pallas_joiner(enc_joiner_in, predict_out,
                               params["joiner_w"], params["joiner_b"])

    V = cfg["label_target_size"] + 1
    output_logits = joiner_pad[..., :V]
    ctc_logprobs = ctc_lp_pad[..., :V]
    return output_logits, conformer_out_lengths, ctc_logprobs


# ---------------------------------------------------------------------------
# Main
# ---------------------------------------------------------------------------

if __name__ == "__main__":
    cfg = dict(
        num_layers=2,
        conformer_size=128,        # lane-dense D
        ff_dim=256,
        num_heads=4,
        conv_kernel_size=7,
        n_mels=64,
        c1=8,
        c2=16,
        joiner_dim=128,            # lane-dense J
        label_target_size=30,      # vocab = label_target_size + 1 (blank)
        pred_embed_dim=64,
        lstm_hidden=64,
        n_fft=256,
        hop=160,
    )

    key = jax.random.PRNGKey(0)
    pkey, akey, lkey = jax.random.split(key, 3)
    params = init_params(pkey, cfg)

    raw_audio = jax.random.normal(akey, (2, 3200, 1), dtype=jnp.float32)   # [B, T, 1]
    raw_audio_len = jnp.array([3200, 2400], dtype=jnp.int32)               # [B]
    labels = jax.random.randint(lkey, (2, 5), 0, cfg["label_target_size"]) # [B, N]
    labels_len = jnp.array([5, 3], dtype=jnp.int32)                        # [B]

    fwd = jax.jit(functools.partial(model_forward, cfg=cfg))
    output_logits, src_len, ctc_logprobs = fwd(params, raw_audio, raw_audio_len,
                                               labels, labels_len)
    jax.block_until_ready((output_logits, src_len, ctc_logprobs))

    assert output_logits.shape == (2, 6, 5, cfg["label_target_size"] + 1)
    assert ctc_logprobs.shape == (2, 6, cfg["label_target_size"] + 1)
    print("KERNEL_OK")
</pallas_src>

<mosaic_0001>
module attributes {stable_mosaic.version = 11 : i64} {
  func.func @_linear_kernel(%arg0: memref<42x128xf32, #tpu.memory_space<vmem>>, %arg1: memref<128x64xf32, #tpu.memory_space<vmem>>, %arg2: memref<1x64xf32, #tpu.memory_space<vmem>>, %arg3: memref<42x64xf32, #tpu.memory_space<vmem>>) attributes {dimension_semantics = [], scalar_prefetch = 0 : i64, scratch_operands = 0 : i64, tpu.core_type = #tpu.core_type<tc>} {
    %c0 = arith.constant 0 : index
    %c0_0 = arith.constant 0 : index
    %0 = vector.load %arg0[%c0, %c0_0] : memref<42x128xf32, #tpu.memory_space<vmem>>, vector<42x128xf32>
    %c0_1 = arith.constant 0 : index
    %c0_2 = arith.constant 0 : index
    %1 = vector.load %arg1[%c0_1, %c0_2] : memref<128x64xf32, #tpu.memory_space<vmem>>, vector<128x64xf32>
    %cst = arith.constant dense<0.000000e+00> : vector<42x64xf32>
    %2 = tpu.matmul %0, %1, %cst {dimension_numbers = #tpu.dot_dimension_numbers<[1], [0], [0], [1], [0, 0, 1, 1], [], []>} : vector<42x128xf32>, vector<128x64xf32>, vector<42x64xf32> -> vector<42x64xf32>
    %c0_3 = arith.constant 0 : index
    %c0_4 = arith.constant 0 : index
    %3 = vector.load %arg2[%c0_3, %c0_4] : memref<1x64xf32, #tpu.memory_space<vmem>>, vector<1x64xf32>
    %4 = vector.broadcast %3 : vector<1x64xf32> to vector<42x64xf32>
    %5 = arith.addf %2, %4 : vector<42x64xf32>
    %cst_5 = arith.constant 1.000000e-10 : f32
    %6 = vector.broadcast %cst_5 : f32 to vector<42x64xf32>
    %7 = arith.addf %5, %6 : vector<42x64xf32>
    %8 = math.log %7 : vector<42x64xf32>
    %cst_6 = arith.constant 0.434294492 : f32
    %9 = vector.broadcast %cst_6 : f32 to vector<42x64xf32>
    %10 = arith.mulf %8, %9 : vector<42x64xf32>
    %c0_7 = arith.constant 0 : index
    %c0_8 = arith.constant 0 : index
    %11 = vector.load %arg3[%c0_7, %c0_8] : memref<42x64xf32, #tpu.memory_space<vmem>>, vector<42x64xf32>
    tpu.vector_store %arg3[%c0_7, %c0_8], %10 {strides = array<i32>} : memref<42x64xf32, #tpu.memory_space<vmem>>, vector<42x64xf32>,
    return
  }
}

module attributes {stable_mosaic.version = 11 : i64} {
  func.func @_linear_kernel(%arg0: i32, %arg1: memref<512x9xf32, #tpu.memory_space<vmem>>, %arg2: memref<9x8xbf16, #tpu.memory_space<vmem>>, %arg3: memref<1x8xf32, #tpu.memory_space<vmem>>, %arg4: memref<512x8xf32, #tpu.memory_space<vmem>>) attributes {dimension_semantics = [#tpu.dimension_semantics<parallel>], iteration_bounds = array<i64: 3>, scalar_prefetch = 0 : i64, scratch_operands = 0 : i64, tpu.core_type = #tpu.core_type<tc>, window_params = [{transform_indices = @transform_0, window_bounds = array<i64: 512, 9>}, {pipeline_mode = #tpu.pipeline_mode<synchronous>, transform_indices = @transform_1, window_bounds = array<i64: 9, 8>}, {pipeline_mode = #tpu.pipeline_mode<synchronous>, transform_indices = @transform_2, window_bounds = array<i64: 1, 8>}, {transform_indices = @transform_3, window_bounds = array<i64: 512, 8>}]} {
    %c0 = arith.constant 0 : index
    %c0_0 = arith.constant 0 : index
    %0 = vector.load %arg1[%c0, %c0_0] : memref<512x9xf32, #tpu.memory_space<vmem>>, vector<512x9xf32>
    %c0_1 = arith.constant 0 : index
    %c0_2 = arith.constant 0 : index
    %1 = vector.load %arg2[%c0_1, %c0_2] : memref<9x8xbf16, #tpu.memory_space<vmem>>, vector<9x8xbf16>
    %2 = arith.truncf %0 : vector<512x9xf32> to vector<512x9xbf16>
    %cst = arith.constant dense<0.000000e+00> : vector<512x8xf32>
    %3 = tpu.matmul %2, %1, %cst {dimension_numbers = #tpu.dot_dimension_numbers<[1], [0], [0], [1], [0, 0, 1, 1], [], []>} : vector<512x9xbf16>, vector<9x8xbf16>, vector<512x8xf32> -> vector<512x8xf32>
    %c0_3 = arith.constant 0 : index
    %c0_4 = arith.constant 0 : index
    %4 = vector.load %arg3[%c0_3, %c0_4] : memref<1x8xf32, #tpu.memory_space<vmem>>, vector<1x8xf32>
    %5 = vector.broadcast %4 : vector<1x8xf32> to vector<512x8xf32>
    %6 = arith.addf %3, %5 : vector<512x8xf32>
    %7 = arith.negf %6 : vector<512x8xf32>
    %8 = math.exp %7 : vector<512x8xf32>
    %cst_5 = arith.constant 1.000000e+00 : f32
    %9 = vector.broadcast %cst_5 : f32 to vector<512x8xf32>
    %10 = arith.addf %9, %8 : vector<512x8xf32>
    %11 = arith.divf %9, %10 : vector<512x8xf32>
    %12 = arith.mulf %6, %11 : vector<512x8xf32>
    %c0_6 = arith.constant 0 : index
    %c0_7 = arith.constant 0 : index
    %13 = vector.load %arg4[%c0_6, %c0_7] : memref<512x8xf32, #tpu.memory_space<vmem>>, vector<512x8xf32>
    tpu.vector_store %arg4[%c0_6, %c0_7], %12 {strides = array<i32>} : memref<512x8xf32, #tpu.memory_space<vmem>>, vector<512x8xf32>,
    return
  }
  func.func @transform_0(%arg0: i32) -> (i32, i32) {
    %c0_i32 = arith.constant 0 : i32
    %c0_i32_0 = arith.constant 0 : i32
    return %arg0, %c0_i32 : i32, i32
  }
  func.func @transform_1(%arg0: i32) -> (i32, i32) {
    %c0_i32 = arith.constant 0 : i32
    %c0_i32_0 = arith.constant 0 : i32
    %c0_i32_1 = arith.constant 0 : i32
    return %c0_i32, %c0_i32_0 : i32, i32
  }
  func.func @transform_2(%arg0: i32) -> (i32, i32) {
    %c0_i32 = arith.constant 0 : i32
    %c0_i32_0 = arith.constant 0 : i32
    %c0_i32_1 = arith.constant 0 : i32
    return %c0_i32, %c0_i32_0 : i32, i32
  }
  func.func @transform_3(%arg0: i32) -> (i32, i32) {
    %c0_i32 = arith.constant 0 : i32
    %c0_i32_0 = arith.constant 0 : i32
    return %arg0, %c0_i32 : i32, i32
  }
}

module attributes {stable_mosaic.version = 11 : i64} {
  func.func @_linear_kernel(%arg0: memref<768x72xf32, #tpu.memory_space<vmem>>, %arg1: memref<72x16xbf16, #tpu.memory_space<vmem>>, %arg2: memref<1x16xf32, #tpu.memory_space<vmem>>, %arg3: memref<768x16xf32, #tpu.memory_space<vmem>>) attributes {dimension_semantics = [], scalar_prefetch = 0 : i64, scratch_operands = 0 : i64, tpu.core_type = #tpu.core_type<tc>} {
    %c0 = arith.constant 0 : index
    %c0_0 = arith.constant 0 : index
    %0 = vector.load %arg0[%c0, %c0_0] : memref<768x72xf32, #tpu.memory_space<vmem>>, vector<768x72xf32>
    %c0_1 = arith.constant 0 : index
    %c0_2 = arith.constant 0 : index
    %1 = vector.load %arg1[%c0_1, %c0_2] : memref<72x16xbf16, #tpu.memory_space<vmem>>, vector<72x16xbf16>
    %2 = arith.truncf %0 : vector<768x72xf32> to vector<768x72xbf16>
    %cst = arith.constant dense<0.000000e+00> : vector<768x16xf32>
    %3 = tpu.matmul %2, %1, %cst {dimension_numbers = #tpu.dot_dimension_numbers<[1], [0], [0], [1], [0, 0, 1, 1], [], []>} : vector<768x72xbf16>, vector<72x16xbf16>, vector<768x16xf32> -> vector<768x16xf32>
    %c0_3 = arith.constant 0 : index
    %c0_4 = arith.constant 0 : index
    %4 = vector.load %arg2[%c0_3, %c0_4] : memref<1x16xf32, #tpu.memory_space<vmem>>, vector<1x16xf32>
    %5 = vector.broadcast %4 : vector<1x16xf32> to vector<768x16xf32>
    %6 = arith.addf %3, %5 : vector<768x16xf32>
    %7 = arith.negf %6 : vector<768x16xf32>
    %8 = math.exp %7 : vector<768x16xf32>
    %cst_5 = arith.constant 1.000000e+00 : f32
    %9 = vector.broadcast %cst_5 : f32 to vector<768x16xf32>
    %10 = arith.addf %9, %8 : vector<768x16xf32>
    %11 = arith.divf %9, %10 : vector<768x16xf32>
    %12 = arith.mulf %6, %11 : vector<768x16xf32>
    %c0_6 = arith.constant 0 : index
    %c0_7 = arith.constant 0 : index
    %13 = vector.load %arg3[%c0_6, %c0_7] : memref<768x16xf32, #tpu.memory_space<vmem>>, vector<768x16xf32>
    tpu.vector_store %arg3[%c0_6, %c0_7], %12 {strides = array<i32>} : memref<768x16xf32, #tpu.memory_space<vmem>>, vector<768x16xf32>,
    return
  }
}

module attributes {stable_mosaic.version = 11 : i64} {
  func.func @_linear_kernel(%arg0: memref<12x1024xf32, #tpu.memory_space<vmem>>, %arg1: memref<1024x128xbf16, #tpu.memory_space<vmem>>, %arg2: memref<1x128xf32, #tpu.memory_space<vmem>>, %arg3: memref<12x128xf32, #tpu.memory_space<vmem>>) attributes {dimension_semantics = [], scalar_prefetch = 0 : i64, scratch_operands = 0 : i64, tpu.core_type = #tpu.core_type<tc>} {
    %c0 = arith.constant 0 : index
    %c0_0 = arith.constant 0 : index
    %0 = vector.load %arg0[%c0, %c0_0] : memref<12x1024xf32, #tpu.memory_space<vmem>>, vector<12x1024xf32>
    %c0_1 = arith.constant 0 : index
    %c0_2 = arith.constant 0 : index
    %1 = vector.load %arg1[%c0_1, %c0_2] : memref<1024x128xbf16, #tpu.memory_space<vmem>>, vector<1024x128xbf16>
    %2 = arith.truncf %0 : vector<12x1024xf32> to vector<12x1024xbf16>
    %cst = arith.constant dense<0.000000e+00> : vector<12x128xf32>
    %3 = tpu.matmul %2, %1, %cst {dimension_numbers = #tpu.dot_dimension_numbers<[1], [0], [0], [1], [0, 0, 1, 1], [], []>} : vector<12x1024xbf16>, vector<1024x128xbf16>, vector<12x128xf32> -> vector<12x128xf32>
    %c0_3 = arith.constant 0 : index
    %c0_4 = arith.constant 0 : index
    %4 = vector.load %arg2[%c0_3, %c0_4] : memref<1x128xf32, #tpu.memory_space<vmem>>, vector<1x128xf32>
    %5 = vector.broadcast %4 : vector<1x128xf32> to vector<12x128xf32>
    %6 = arith.addf %3, %5 : vector<12x128xf32>
    %c0_5 = arith.constant 0 : index
    %c0_6 = arith.constant 0 : index
    %7 = vector.load %arg3[%c0_5, %c0_6] : memref<12x128xf32, #tpu.memory_space<vmem>>, vector<12x128xf32>
    tpu.vector_store %arg3[%c0_5, %c0_6], %6 {strides = array<i32>} : memref<12x128xf32, #tpu.memory_space<vmem>>, vector<12x128xf32>,
    return
  }
}

module attributes {stable_mosaic.version = 11 : i64} {
  func.func @_encoder_epilogue_kernel(%arg0: memref<12x128xf32, #tpu.memory_space<vmem>>, %arg1: memref<128x128xbf16, #tpu.memory_space<vmem>>, %arg2: memref<1x128xf32, #tpu.memory_space<vmem>>, %arg3: memref<128x128xbf16, #tpu.memory_space<vmem>>, %arg4: memref<1x128xf32, #tpu.memory_space<vmem>>, %arg5: memref<12x128xf32, #tpu.memory_space<vmem>>, %arg6: memref<12x128xf32, #tpu.memory_space<vmem>>) attributes {dimension_semantics = [], scalar_prefetch = 0 : i64, scratch_operands = 0 : i64, tpu.core_type = #tpu.core_type<tc>} {
    %c0 = arith.constant 0 : index
    %c0_0 = arith.constant 0 : index
    %0 = vector.load %arg0[%c0, %c0_0] : memref<12x128xf32, #tpu.memory_space<vmem>>, vector<12x128xf32>
    %1 = arith.truncf %0 : vector<12x128xf32> to vector<12x128xbf16>
    %c0_1 = arith.constant 0 : index
    %c0_2 = arith.constant 0 : index
    %2 = vector.load %arg1[%c0_1, %c0_2] : memref<128x128xbf16, #tpu.memory_space<vmem>>, vector<128x128xbf16>
    %cst = arith.constant dense<0.000000e+00> : vector<12x128xf32>
    %3 = tpu.matmul %1, %2, %cst {dimension_numbers = #tpu.dot_dimension_numbers<[1], [0], [0], [1], [0, 0, 1, 1], [], []>} : vector<12x128xbf16>, vector<128x128xbf16>, vector<12x128xf32> -> vector<12x128xf32>
    %c0_3 = arith.constant 0 : index
    %c0_4 = arith.constant 0 : index
    %4 = vector.load %arg2[%c0_3, %c0_4] : memref<1x128xf32, #tpu.memory_space<vmem>>, vector<1x128xf32>
    %5 = vector.broadcast %4 : vector<1x128xf32> to vector<12x128xf32>
    %6 = arith.addf %3, %5 : vector<12x128xf32>
    %c0_5 = arith.constant 0 : index
    %c0_6 = arith.constant 0 : index
    %7 = vector.load %arg5[%c0_5, %c0_6] : memref<12x128xf32, #tpu.memory_space<vmem>>, vector<12x128xf32>
    tpu.vector_store %arg5[%c0_5, %c0_6], %6 {strides = array<i32>} : memref<12x128xf32, #tpu.memory_space<vmem>>, vector<12x128xf32>,
    %c0_7 = arith.constant 0 : index
    %c0_8 = arith.constant 0 : index
    %8 = vector.load %arg3[%c0_7, %c0_8] : memref<128x128xbf16, #tpu.memory_space<vmem>>, vector<128x128xbf16>
    %cst_9 = arith.constant dense<0.000000e+00> : vector<12x128xf32>
    %9 = tpu.matmul %1, %8, %cst_9 {dimension_numbers = #tpu.dot_dimension_numbers<[1], [0], [0], [1], [0, 0, 1, 1], [], []>} : vector<12x128xbf16>, vector<128x128xbf16>, vector<12x128xf32> -> vector<12x128xf32>
    %c0_10 = arith.constant 0 : index
    %c0_11 = arith.constant 0 : index
    %10 = vector.load %arg4[%c0_10, %c0_11] : memref<1x128xf32, #tpu.memory_space<vmem>>, vector<1x128xf32>
    %11 = vector.broadcast %10 : vector<1x128xf32> to vector<12x128xf32>
    %12 = arith.addf %9, %11 : vector<12x128xf32>
    %cst_12 = arith.constant dense<0xFF800000> : vector<12xf32>
    %13 = vector.multi_reduction <maximumf>, %12, %cst_12 [1] : vector<12x128xf32> to vector<12xf32>
    %14 = vector.shape_cast %13 : vector<12xf32> to vector<12x1xf32>
    %15 = vector.broadcast %14 : vector<12x1xf32> to vector<12x128xf32>
    %16 = arith.subf %12, %15 : vector<12x128xf32>
    %17 = math.exp %16 : vector<12x128xf32>
    %cst_13 = arith.constant dense<0.000000e+00> : vector<12xf32>
    %18 = vector.multi_reduction <add>, %17, %cst_13 [1] : vector<12x128xf32> to vector<12xf32>
    %19 = vector.shape_cast %18 : vector<12xf32> to vector<12x1xf32>
    %20 = math.log %19 : vector<12x1xf32>
    %21 = vector.broadcast %20 : vector<12x1xf32> to vector<12x128xf32>
    %22 = arith.subf %16, %21 : vector<12x128xf32>
    %c0_14 = arith.constant 0 : index
    %c0_15 = arith.constant 0 : index
    %23 = vector.load %arg6[%c0_14, %c0_15] : memref<12x128xf32, #tpu.memory_space<vmem>>, vector<12x128xf32>
    tpu.vector_store %arg6[%c0_14, %c0_15], %22 {strides = array<i32>} : memref<12x128xf32, #tpu.memory_space<vmem>>, vector<12x128xf32>,
    return
  }
}

module attributes {stable_mosaic.version = 11 : i64} {
  func.func @_linear_kernel(%arg0: memref<10x64xf32, #tpu.memory_space<vmem>>, %arg1: memref<64x256xbf16, #tpu.memory_space<vmem>>, %arg2: memref<1x256xf32, #tpu.memory_space<vmem>>, %arg3: memref<10x256xf32, #tpu.memory_space<vmem>>) attributes {dimension_semantics = [], scalar_prefetch = 0 : i64, scratch_operands = 0 : i64, tpu.core_type = #tpu.core_type<tc>} {
    %c0 = arith.constant 0 : index
    %c0_0 = arith.constant 0 : index
    %0 = vector.load %arg0[%c0, %c0_0] : memref<10x64xf32, #tpu.memory_space<vmem>>, vector<10x64xf32>
    %c0_1 = arith.constant 0 : index
    %c0_2 = arith.constant 0 : index
    %1 = vector.load %arg1[%c0_1, %c0_2] : memref<64x256xbf16, #tpu.memory_space<vmem>>, vector<64x256xbf16>
    %2 = arith.truncf %0 : vector<10x64xf32> to vector<10x64xbf16>
    %cst = arith.constant dense<0.000000e+00> : vector<10x256xf32>
    %3 = tpu.matmul %2, %1, %cst {dimension_numbers = #tpu.dot_dimension_numbers<[1], [0], [0], [1], [0, 0, 1, 1], [], []>} : vector<10x64xbf16>, vector<64x256xbf16>, vector<10x256xf32> -> vector<10x256xf32>
    %c0_3 = arith.constant 0 : index
    %c0_4 = arith.constant 0 : index
    %4 = vector.load %arg2[%c0_3, %c0_4] : memref<1x256xf32, #tpu.memory_space<vmem>>, vector<1x256xf32>
    %5 = vector.broadcast %4 : vector<1x256xf32> to vector<10x256xf32>
    %6 = arith.addf %3, %5 : vector<10x256xf32>
    %c0_5 = arith.constant 0 : index
    %c0_6 = arith.constant 0 : index
    %7 = vector.load %arg3[%c0_5, %c0_6] : memref<10x256xf32, #tpu.memory_space<vmem>>, vector<10x256xf32>
    tpu.vector_store %arg3[%c0_5, %c0_6], %6 {strides = array<i32>} : memref<10x256xf32, #tpu.memory_space<vmem>>, vector<10x256xf32>,
    return
  }
}

module attributes {stable_mosaic.version = 11 : i64} {
  func.func @_conformer_stack_kernel(%arg0: i32, %arg1: i32, %arg2: memref<1x8x128xf32, #tpu.memory_space<vmem>>, %arg3: memref<1x8x1xf32, #tpu.memory_space<vmem>>, %arg4: memref<1x1x8xf32, #tpu.memory_space<vmem>>, %arg5: memref<1x1x128xf32, #tpu.memory_space<vmem>>, %arg6: memref<1x1x128xf32, #tpu.memory_space<vmem>>, %arg7: memref<1x128x256xbf16, #tpu.memory_space<vmem>>, %arg8: memref<1x1x256xf32, #tpu.memory_space<vmem>>, %arg9: memref<1x256x128xbf16, #tpu.memory_space<vmem>>, %arg10: memref<1x1x128xf32, #tpu.memory_space<vmem>>, %arg11: memref<1x1x128xf32, #tpu.memory_space<vmem>>, %arg12: memref<1x1x128xf32, #tpu.memory_space<vmem>>, %arg13: memref<1x128x128xbf16, #tpu.memory_space<vmem>>, %arg14: memref<1x128x128xbf16, #tpu.memory_space<vmem>>, %arg15: memref<1x128x128xbf16, #tpu.memory_space<vmem>>, %arg16: memref<1x1x128xf32, #tpu.memory_space<vmem>>, %arg17: memref<1x1x128xf32, #tpu.memory_space<vmem>>, %arg18: memref<1x1x128xf32, #tpu.memory_space<vmem>>, %arg19: memref<1x128x128xbf16, #tpu.memory_space<vmem>>, %arg20: memref<1x1x128xf32, #tpu.memory_space<vmem>>, %arg21: memref<1x1x128xf32, #tpu.memory_space<vmem>>, %arg22: memref<1x1x128xf32, #tpu.memory_space<vmem>>, %arg23: memref<1x128x128xbf16, #tpu.memory_space<vmem>>, %arg24: memref<1x1x128xf32, #tpu.memory_space<vmem>>, %arg25: memref<1x128x128xbf16, #tpu.memory_space<vmem>>, %arg26: memref<1x1x128xf32, #tpu.memory_space<vmem>>, %arg27: memref<1x7x128xf32, #tpu.memory_space<vmem>>, %arg28: memref<1x1x128xf32, #tpu.memory_space<vmem>>, %arg29: memref<1x1x128xf32, #tpu.memory_space<vmem>>, %arg30: memref<1x1x128xf32, #tpu.memory_space<vmem>>, %arg31: memref<1x128x128xbf16, #tpu.memory_space<vmem>>, %arg32: memref<1x1x128xf32, #tpu.memory_space<vmem>>, %arg33: memref<1x1x128xf32, #tpu.memory_space<vmem>>, %arg34: memref<1x1x128xf32, #tpu.memory_space<vmem>>, %arg35: memref<1x128x256xbf16, #tpu.memory_space<vmem>>, %arg36: memref<1x1x256xf32, #tpu.memory_space<vmem>>, %arg37: memref<1x256x128xbf16, #tpu.memory_space<vmem>>, %arg38: memref<1x1x128xf32, #tpu.memory_space<vmem>>, %arg39: memref<1x1x128xf32, #tpu.memory_space<vmem>>, %arg40: memref<1x1x128xf32, #tpu.memory_space<vmem>>, %arg41: memref<1x8x128xf32, #tpu.memory_space<vmem>>, %arg42: memref<8x128xf32, #tpu.memory_space<vmem>>) attributes {dimension_semantics = [#tpu.dimension_semantics<parallel>, #tpu.dimension_semantics<arbitrary>], iteration_bounds = array<i64: 2, 2>, scalar_prefetch = 0 : i64, scratch_operands = 1 : i64, tpu.core_type = #tpu.core_type<tc>, window_params = [{transform_indices = @transform_0, window_bounds = array<i64: 1, 8, 128>}, {transform_indices = @transform_1, window_bounds = array<i64: 1, 8, 1>}, {transform_indices = @transform_2, window_bounds = array<i64: 1, 1, 8>}, {transform_indices = @transform_3, window_bounds = array<i64: 1, 1, 128>}, {transform_indices = @transform_4, window_bounds = array<i64: 1, 1, 128>}, {transform_indices = @transform_5, window_bounds = array<i64: 1, 128, 256>}, {transform_indices = @transform_6, window_bounds = array<i64: 1, 1, 256>}, {transform_indices = @transform_7, window_bounds = array<i64: 1, 256, 128>}, {transform_indices = @transform_8, window_bounds = array<i64: 1, 1, 128>}, {transform_indices = @transform_9, window_bounds = array<i64: 1, 1, 128>}, {transform_indices = @transform_10, window_bounds = array<i64: 1, 1, 128>}, {transform_indices = @transform_11, window_bounds = array<i64: 1, 128, 128>}, {transform_indices = @transform_12, window_bounds = array<i64: 1, 128, 128>}, {transform_indices = @transform_13, window_bounds = array<i64: 1, 128, 128>}, {transform_indices = @transform_14, window_bounds = array<i64: 1, 1, 128>}, {transform_indices = @transform_15, window_bounds = array<i64: 1, 1, 128>}, {transform_indices = @transform_16, window_bounds = array<i64: 1, 1, 128>}, {transform_indices = @transform_17, window_bounds = array<i64: 1, 128, 128>}, {transform_indices = @transform_18, window_bounds = array<i64: 1, 1, 128>}, {transform_indices = @transform_19, window_bounds = array<i64: 1, 1, 128>}, {transform_indices = @transform_20, window_bounds = array<i64: 1, 1, 128>}, {transform_indices = @transform_21, window_bounds = array<i64: 1, 128, 128>}, {transform_indices = @transform_22, window_bounds = array<i64: 1, 1, 128>}, {transform_indices = @transform_23, window_bounds = array<i64: 1, 128, 128>}, {transform_indices = @transform_24, window_bounds = array<i64: 1, 1, 128>}, {transform_indices = @transform_25, window_bounds = array<i64: 1, 7, 128>}, {transform_indices = @transform_26, window_bounds = array<i64: 1, 1, 128>}, {transform_indices = @transform_27, window_bounds = array<i64: 1, 1, 128>}, {transform_indices = @transform_28, window_bounds = array<i64: 1, 1, 128>}, {transform_indices = @transform_29, window_bounds = array<i64: 1, 128, 128>}, {transform_indices = @transform_30, window_bounds = array<i64: 1, 1, 128>}, {transform_indices = @transform_31, window_bounds = array<i64: 1, 1, 128>}, {transform_indices = @transform_32, window_bounds = array<i64: 1, 1, 128>}, {transform_indices = @transform_33, window_bounds = array<i64: 1, 128, 256>}, {transform_indices = @transform_34, window_bounds = array<i64: 1, 1, 256>}, {transform_indices = @transform_35, window_bounds = array<i64: 1, 256, 128>}, {transform_indices = @transform_36, window_bounds = array<i64: 1, 1, 128>}, {transform_indices = @transform_37, window_bounds = array<i64: 1, 1, 128>}, {transform_indices = @transform_38, window_bounds = array<i64: 1, 1, 128>}, {transform_indices = @transform_39, window_bounds = array<i64: 1, 8, 128>}]} {
    %c0_i32 = arith.constant 0 : i32
    %0 = arith.cmpi eq, %arg1, %c0_i32 : i32
    %1 = arith.extui %0 : i1 to i32
    %c0_i32_0 = arith.constant 0 : i32
    %2 = arith.cmpi ne, %1, %c0_i32_0 : i32
    scf.if %2 {
      %c0_220 = arith.constant 0 : index
      %c0_221 = arith.constant 0 : index
      %c0_222 = arith.constant 0 : index
      %499 = vector.load %arg2[%c0_220, %c0_221, %c0_222] : memref<1x8x128xf32, #tpu.memory_space<vmem>>, vector<1x8x128xf32>
      %500 = vector.shape_cast %499 : vector<1x8x128xf32> to vector<8x128xf32>
      %c0_223 = arith.constant 0 : index
      %c0_224 = arith.constant 0 : index
      %501 = vector.load %arg42[%c0_223, %c0_224] : memref<8x128xf32, #tpu.memory_space<vmem>>, vector<8x128xf32>
      tpu.vector_store %arg42[%c0_223, %c0_224], %500 {strides = array<i32>} : memref<8x128xf32, #tpu.memory_space<vmem>>, vector<8x128xf32>,
    } else {
    }
    %c0 = arith.constant 0 : index
    %c0_1 = arith.constant 0 : index
    %3 = vector.load %arg42[%c0, %c0_1] : memref<8x128xf32, #tpu.memory_space<vmem>>, vector<8x128xf32>
    %c0_2 = arith.constant 0 : index
    %c0_3 = arith.constant 0 : index
    %c0_4 = arith.constant 0 : index
    %4 = vector.load %arg3[%c0_2, %c0_3, %c0_4] : memref<1x8x1xf32, #tpu.memory_space<vmem>>, vector<1x8x1xf32>
    %5 = vector.shape_cast %4 : vector<1x8x1xf32> to vector<8x1xf32>
    %c0_5 = arith.constant 0 : index
    %c0_6 = arith.constant 0 : index
    %c0_7 = arith.constant 0 : index
    %6 = vector.load %arg4[%c0_5, %c0_6, %c0_7] : memref<1x1x8xf32, #tpu.memory_space<vmem>>, vector<1x1x8xf32>
    %7 = vector.shape_cast %6 : vector<1x1x8xf32> to vector<1x8xf32>
    %c0_8 = arith.constant 0 : index
    %c0_9 = arith.constant 0 : index
    %c0_10 = arith.constant 0 : index
    %8 = vector.load %arg5[%c0_8, %c0_9, %c0_10] : memref<1x1x128xf32, #tpu.memory_space<vmem>>, vector<1x1x128xf32>
    %9 = vector.shape_cast %8 : vector<1x1x128xf32> to vector<1x128xf32>
    %c0_11 = arith.constant 0 : index
    %c0_12 = arith.constant 0 : index
    %c0_13 = arith.constant 0 : index
    %10 = vector.load %arg6[%c0_11, %c0_12, %c0_13] : memref<1x1x128xf32, #tpu.memory_space<vmem>>, vector<1x1x128xf32>
    %11 = vector.shape_cast %10 : vector<1x1x128xf32> to vector<1x128xf32>
    %cst = arith.constant dense<0.000000e+00> : vector<8xf32>
    %12 = vector.multi_reduction <add>, %3, %cst [1] : vector<8x128xf32> to vector<8xf32>
    %13 = vector.shape_cast %12 : vector<8xf32> to vector<8x1xf32>
    %cst_14 = arith.constant 1.280000e+02 : f32
    %14 = vector.broadcast %cst_14 : f32 to vector<8x1xf32>
    %15 = arith.divf %13, %14 : vector<8x1xf32>
    %16 = vector.broadcast %15 : vector<8x1xf32> to vector<8x128xf32>
    %17 = arith.subf %3, %16 : vector<8x128xf32>
    %18 = arith.mulf %17, %17 : vector<8x128xf32>
    %cst_15 = arith.constant dense<0.000000e+00> : vector<8xf32>
    %19 = vector.multi_reduction <add>, %18, %cst_15 [1] : vector<8x128xf32> to vector<8xf32>
    %20 = vector.shape_cast %19 : vector<8xf32> to vector<8x1xf32>
    %cst_16 = arith.constant 1.280000e+02 : f32
    %21 = vector.broadcast %cst_16 : f32 to vector<8x1xf32>
    %22 = arith.divf %20, %21 : vector<8x1xf32>
    %23 = vector.broadcast %15 : vector<8x1xf32> to vector<8x128xf32>
    %24 = arith.subf %3, %23 : vector<8x128xf32>
    %cst_17 = arith.constant 9.99999974E-6 : f32
    %25 = vector.broadcast %cst_17 : f32 to vector<8x1xf32>
    %26 = arith.addf %22, %25 : vector<8x1xf32>
    %27 = math.rsqrt %26 : vector<8x1xf32>
    %28 = vector.broadcast %27 : vector<8x1xf32> to vector<8x128xf32>
    %29 = arith.mulf %24, %28 : vector<8x128xf32>
    %30 = vector.broadcast %9 : vector<1x128xf32> to vector<8x128xf32>
    %31 = arith.mulf %29, %30 : vector<8x128xf32>
    %32 = vector.broadcast %11 : vector<1x128xf32> to vector<8x128xf32>
    %33 = arith.addf %31, %32 : vector<8x128xf32>
    %34 = arith.truncf %33 : vector<8x128xf32> to vector<8x128xbf16>
    %c0_18 = arith.constant 0 : index
    %c0_19 = arith.constant 0 : index
    %c0_20 = arith.constant 0 : index
    %35 = vector.load %arg7[%c0_18, %c0_19, %c0_20] : memref<1x128x256xbf16, #tpu.memory_space<vmem>>, vector<1x128x256xbf16>
    %36 = vector.shape_cast %35 : vector<1x128x256xbf16> to vector<128x256xbf16>
    %cst_21 = arith.constant dense<0.000000e+00> : vector<8x256xf32>
    %37 = tpu.matmul %34, %36, %cst_21 {dimension_numbers = #tpu.dot_dimension_numbers<[1], [0], [0], [1], [0, 0, 1, 1], [], []>} : vector<8x128xbf16>, vector<128x256xbf16>, vector<8x256xf32> -> vector<8x256xf32>
    %c0_22 = arith.constant 0 : index
    %c0_23 = arith.constant 0 : index
    %c0_24 = arith.constant 0 : index
    %38 = vector.load %arg8[%c0_22, %c0_23, %c0_24] : memref<1x1x256xf32, #tpu.memory_space<vmem>>, vector<1x1x256xf32>
    %39 = vector.shape_cast %38 : vector<1x1x256xf32> to vector<1x256xf32>
    %40 = vector.broadcast %39 : vector<1x256xf32> to vector<8x256xf32>
    %41 = arith.addf %37, %40 : vector<8x256xf32>
    %42 = arith.negf %41 : vector<8x256xf32>
    %43 = math.exp %42 : vector<8x256xf32>
    %cst_25 = arith.constant 1.000000e+00 : f32
    %44 = vector.broadcast %cst_25 : f32 to vector<8x256xf32>
    %45 = arith.addf %44, %43 : vector<8x256xf32>
    %46 = arith.divf %44, %45 : vector<8x256xf32>
    %47 = arith.mulf %41, %46 : vector<8x256xf32>
    %48 = arith.truncf %47 : vector<8x256xf32> to vector<8x256xbf16>
    %c0_26 = arith.constant 0 : index
    %c0_27 = arith.constant 0 : index
    %c0_28 = arith.constant 0 : index
    %49 = vector.load %arg9[%c0_26, %c0_27, %c0_28] : memref<1x256x128xbf16, #tpu.memory_space<vmem>>, vector<1x256x128xbf16>
    %50 = vector.shape_cast %49 : vector<1x256x128xbf16> to vector<256x128xbf16>
    %cst_29 = arith.constant dense<0.000000e+00> : vector<8x128xf32>
    %51 = tpu.matmul %48, %50, %cst_29 {dimension_numbers = #tpu.dot_dimension_numbers<[1], [0], [0], [1], [0, 0, 1, 1], [], []>} : vector<8x256xbf16>, vector<256x128xbf16>, vector<8x128xf32> -> vector<8x128xf32>
    %c0_30 = arith.constant 0 : index
    %c0_31 = arith.constant 0 : index
    %c0_32 = arith.constant 0 : index
    %52 = vector.load %arg10[%c0_30, %c0_31, %c0_32] : memref<1x1x128xf32, #tpu.memory_space<vmem>>, vector<1x1x128xf32>
    %53 = vector.shape_cast %52 : vector<1x1x128xf32> to vector<1x128xf32>
    %54 = vector.broadcast %53 : vector<1x128xf32> to vector<8x128xf32>
    %55 = arith.addf %51, %54 : vector<8x128xf32>
    %cst_33 = arith.constant 5.000000e-01 : f32
    %56 = vector.broadcast %cst_33 : f32 to vector<8x128xf32>
    %57 = arith.mulf %56, %55 : vector<8x128xf32>
    %58 = arith.addf %3, %57 : vector<8x128xf32>
    %c0_34 = arith.constant 0 : index
    %c0_35 = arith.constant 0 : index
    %c0_36 = arith.constant 0 : index
    %59 = vector.load %arg11[%c0_34, %c0_35, %c0_36] : memref<1x1x128xf32, #tpu.memory_space<vmem>>, vector<1x1x128xf32>
    %60 = vector.shape_cast %59 : vector<1x1x128xf32> to vector<1x128xf32>
    %c0_37 = arith.constant 0 : index
    %c0_38 = arith.constant 0 : index
    %c0_39 = arith.constant 0 : index
    %61 = vector.load %arg12[%c0_37, %c0_38, %c0_39] : memref<1x1x128xf32, #tpu.memory_space<vmem>>, vector<1x1x128xf32>
    %62 = vector.shape_cast %61 : vector<1x1x128xf32> to vector<1x128xf32>
    %cst_40 = arith.constant dense<0.000000e+00> : vector<8xf32>
    %63 = vector.multi_reduction <add>, %58, %cst_40 [1] : vector<8x128xf32> to vector<8xf32>
    %64 = vector.shape_cast %63 : vector<8xf32> to vector<8x1xf32>
    %cst_41 = arith.constant 1.280000e+02 : f32
    %65 = vector.broadcast %cst_41 : f32 to vector<8x1xf32>
    %66 = arith.divf %64, %65 : vector<8x1xf32>
    %67 = vector.broadcast %66 : vector<8x1xf32> to vector<8x128xf32>
    %68 = arith.subf %58, %67 : vector<8x128xf32>
    %69 = arith.mulf %68, %68 : vector<8x128xf32>
    %cst_42 = arith.constant dense<0.000000e+00> : vector<8xf32>
    %70 = vector.multi_reduction <add>, %69, %cst_42 [1] : vector<8x128xf32> to vector<8xf32>
    %71 = vector.shape_cast %70 : vector<8xf32> to vector<8x1xf32>
    %cst_43 = arith.constant 1.280000e+02 : f32
    %72 = vector.broadcast %cst_43 : f32 to vector<8x1xf32>
    %73 = arith.divf %71, %72 : vector<8x1xf32>
    %74 = vector.broadcast %66 : vector<8x1xf32> to vector<8x128xf32>
    %75 = arith.subf %58, %74 : vector<8x128xf32>
    %cst_44 = arith.constant 9.99999974E-6 : f32
    %76 = vector.broadcast %cst_44 : f32 to vector<8x1xf32>
    %77 = arith.addf %73, %76 : vector<8x1xf32>
    %78 = math.rsqrt %77 : vector<8x1xf32>
    %79 = vector.broadcast %78 : vector<8x1xf32> to vector<8x128xf32>
    %80 = arith.mulf %75, %79 : vector<8x128xf32>
    %81 = vector.broadcast %60 : vector<1x128xf32> to vector<8x128xf32>
    %82 = arith.mulf %80, %81 : vector<8x128xf32>
    %83 = vector.broadcast %62 : vector<1x128xf32> to vector<8x128xf32>
    %84 = arith.addf %82, %83 : vector<8x128xf32>
    %85 = arith.truncf %84 : vector<8x128xf32> to vector<8x128xbf16>
    %c0_45 = arith.constant 0 : index
    %c0_46 = arith.constant 0 : index
    %c0_47 = arith.constant 0 : index
    %86 = vector.load %arg13[%c0_45, %c0_46, %c0_47] : memref<1x128x128xbf16, #tpu.memory_space<vmem>>, vector<1x128x128xbf16>
    %87 = vector.shape_cast %86 : vector<1x128x128xbf16> to vector<128x128xbf16>
    %cst_48 = arith.constant dense<0.000000e+00> : vector<8x128xf32>
    %88 = tpu.matmul %85, %87, %cst_48 {dimension_numbers = #tpu.dot_dimension_numbers<[1], [0], [0], [1], [0, 0, 1, 1], [], []>} : vector<8x128xbf16>, vector<128x128xbf16>, vector<8x128xf32> -> vector<8x128xf32>
    %c0_49 = arith.constant 0 : index
    %c0_50 = arith.constant 0 : index
    %c0_51 = arith.constant 0 : index
    %89 = vector.load %arg16[%c0_49, %c0_50, %c0_51] : memref<1x1x128xf32, #tpu.memory_space<vmem>>, vector<1x1x128xf32>
    %90 = vector.shape_cast %89 : vector<1x1x128xf32> to vector<1x128xf32>
    %91 = vector.broadcast %90 : vector<1x128xf32> to vector<8x128xf32>
    %92 = arith.addf %88, %91 : vector<8x128xf32>
    %c0_52 = arith.constant 0 : index
    %c0_53 = arith.constant 0 : index
    %c0_54 = arith.constant 0 : index
    %93 = vector.load %arg14[%c0_52, %c0_53, %c0_54] : memref<1x128x128xbf16, #tpu.memory_space<vmem>>, vector<1x128x128xbf16>
    %94 = vector.shape_cast %93 : vector<1x128x128xbf16> to vector<128x128xbf16>
    %cst_55 = arith.constant dense<0.000000e+00> : vector<8x128xf32>
    %95 = tpu.matmul %85, %94, %cst_55 {dimension_numbers = #tpu.dot_dimension_numbers<[1], [0], [0], [1], [0, 0, 1, 1], [], []>} : vector<8x128xbf16>, vector<128x128xbf16>, vector<8x128xf32> -> vector<8x128xf32>
    %c0_56 = arith.constant 0 : index
    %c0_57 = arith.constant 0 : index
    %c0_58 = arith.constant 0 : index
    %96 = vector.load %arg17[%c0_56, %c0_57, %c0_58] : memref<1x1x128xf32, #tpu.memory_space<vmem>>, vector<1x1x128xf32>
    %97 = vector.shape_cast %96 : vector<1x1x128xf32> to vector<1x128xf32>
    %98 = vector.broadcast %97 : vector<1x128xf32> to vector<8x128xf32>
    %99 = arith.addf %95, %98 : vector<8x128xf32>
    %c0_59 = arith.constant 0 : index
    %c0_60 = arith.constant 0 : index
    %c0_61 = arith.constant 0 : index
    %100 = vector.load %arg15[%c0_59, %c0_60, %c0_61] : memref<1x128x128xbf16, #tpu.memory_space<vmem>>, vector<1x128x128xbf16>
    %101 = vector.shape_cast %100 : vector<1x128x128xbf16> to vector<128x128xbf16>
    %cst_62 = arith.constant dense<0.000000e+00> : vector<8x128xf32>
    %102 = tpu.matmul %85, %101, %cst_62 {dimension_numbers = #tpu.dot_dimension_numbers<[1], [0], [0], [1], [0, 0, 1, 1], [], []>} : vector<8x128xbf16>, vector<128x128xbf16>, vector<8x128xf32> -> vector<8x128xf32>
    %c0_63 = arith.constant 0 : index
    %c0_64 = arith.constant 0 : index
    %c0_65 = arith.constant 0 : index
    %103 = vector.load %arg18[%c0_63, %c0_64, %c0_65] : memref<1x1x128xf32, #tpu.memory_space<vmem>>, vector<1x1x128xf32>
    %104 = vector.shape_cast %103 : vector<1x1x128xf32> to vector<1x128xf32>
    %105 = vector.broadcast %104 : vector<1x128xf32> to vector<8x128xf32>
    %106 = arith.addf %102, %105 : vector<8x128xf32>
    %107 = vector.extract_strided_slice %92 {offsets = [0, 0], sizes = [8, 32], strides = [1, 1]} : vector<8x128xf32> to vector<8x32xf32>
    %108 = arith.truncf %107 : vector<8x32xf32> to vector<8x32xbf16>
    %109 = vector.extract_strided_slice %99 {offsets = [0, 0], sizes = [8, 32], strides = [1, 1]} : vector<8x128xf32> to vector<8x32xf32>
    %110 = arith.truncf %109 : vector<8x32xf32> to vector<8x32xbf16>
    "tpu.trace_start"() <{level = 10 : i32, message = "qd,kd->qk"}> : () -> ()
    %cst_66 = arith.constant dense<0.000000e+00> : vector<8x8xf32>
    %111 = tpu.matmul %108, %110, %cst_66 {dimension_numbers = #tpu.dot_dimension_numbers<[1], [1], [0], [0], [0, 0, 1, 0], [], []>} : vector<8x32xbf16>, vector<8x32xbf16>, vector<8x8xf32> -> vector<8x8xf32>
    "tpu.trace_stop"() : () -> ()
    %112 = vector.broadcast %7 : vector<1x8xf32> to vector<8x8xf32>
    %113 = arith.addf %111, %112 : vector<8x8xf32>
    %cst_67 = arith.constant dense<0xFF800000> : vector<8xf32>
    %114 = vector.multi_reduction <maximumf>, %113, %cst_67 [1] : vector<8x8xf32> to vector<8xf32>
    %115 = vector.shape_cast %114 : vector<8xf32> to vector<8x1xf32>
    %116 = vector.broadcast %115 : vector<8x1xf32> to vector<8x8xf32>
    %117 = arith.subf %113, %116 : vector<8x8xf32>
    %118 = math.exp %117 : vector<8x8xf32>
    %cst_68 = arith.constant dense<0.000000e+00> : vector<8xf32>
    %119 = vector.multi_reduction <add>, %118, %cst_68 [1] : vector<8x8xf32> to vector<8xf32>
    %120 = vector.shape_cast %119 : vector<8xf32> to vector<8x1xf32>
    %cst_69 = arith.constant 1.000000e-30 : f32
    %121 = vector.broadcast %cst_69 : f32 to vector<8x1xf32>
    %122 = arith.maximumf %120, %121 : vector<8x1xf32>
    %123 = vector.broadcast %122 : vector<8x1xf32> to vector<8x8xf32>
    %124 = arith.divf %118, %123 : vector<8x8xf32>
    %125 = arith.truncf %124 : vector<8x8xf32> to vector<8x8xbf16>
    %126 = vector.extract_strided_slice %106 {offsets = [0, 0], sizes = [8, 32], strides = [1, 1]} : vector<8x128xf32> to vector<8x32xf32>
    %127 = arith.truncf %126 : vector<8x32xf32> to vector<8x32xbf16>
    %cst_70 = arith.constant dense<0.000000e+00> : vector<8x32xf32>
    %128 = tpu.matmul %125, %127, %cst_70 {dimension_numbers = #tpu.dot_dimension_numbers<[1], [0], [0], [1], [0, 0, 1, 1], [], []>} : vector<8x8xbf16>, vector<8x32xbf16>, vector<8x32xf32> -> vector<8x32xf32>
    %129 = vector.extract_strided_slice %92 {offsets = [0, 32], sizes = [8, 32], strides = [1, 1]} : vector<8x128xf32> to vector<8x32xf32>
    %130 = arith.truncf %129 : vector<8x32xf32> to vector<8x32xbf16>
    %131 = vector.extract_strided_slice %99 {offsets = [0, 32], sizes = [8, 32], strides = [1, 1]} : vector<8x128xf32> to vector<8x32xf32>
    %132 = arith.truncf %131 : vector<8x32xf32> to vector<8x32xbf16>
    "tpu.trace_start"() <{level = 10 : i32, message = "qd,kd->qk"}> : () -> ()
    %cst_71 = arith.constant dense<0.000000e+00> : vector<8x8xf32>
    %133 = tpu.matmul %130, %132, %cst_71 {dimension_numbers = #tpu.dot_dimension_numbers<[1], [1], [0], [0], [0, 0, 1, 0], [], []>} : vector<8x32xbf16>, vector<8x32xbf16>, vector<8x8xf32> -> vector<8x8xf32>
    "tpu.trace_stop"() : () -> ()
    %134 = vector.broadcast %7 : vector<1x8xf32> to vector<8x8xf32>
    %135 = arith.addf %133, %134 : vector<8x8xf32>
    %cst_72 = arith.constant dense<0xFF800000> : vector<8xf32>
    %136 = vector.multi_reduction <maximumf>, %135, %cst_72 [1] : vector<8x8xf32> to vector<8xf32>
    %137 = vector.shape_cast %136 : vector<8xf32> to vector<8x1xf32>
    %138 = vector.broadcast %137 : vector<8x1xf32> to vector<8x8xf32>
    %139 = arith.subf %135, %138 : vector<8x8xf32>
    %140 = math.exp %139 : vector<8x8xf32>
    %cst_73 = arith.constant dense<0.000000e+00> : vector<8xf32>
    %141 = vector.multi_reduction <add>, %140, %cst_73 [1] : vector<8x8xf32> to vector<8xf32>
    %142 = vector.shape_cast %141 : vector<8xf32> to vector<8x1xf32>
    %cst_74 = arith.constant 1.000000e-30 : f32
    %143 = vector.broadcast %cst_74 : f32 to vector<8x1xf32>
    %144 = arith.maximumf %142, %143 : vector<8x1xf32>
    %145 = vector.broadcast %144 : vector<8x1xf32> to vector<8x8xf32>
    %146 = arith.divf %140, %145 : vector<8x8xf32>
    %147 = arith.truncf %146 : vector<8x8xf32> to vector<8x8xbf16>
    %148 = vector.extract_strided_slice %106 {offsets = [0, 32], sizes = [8, 32], strides = [1, 1]} : vector<8x128xf32> to vector<8x32xf32>
    %149 = arith.truncf %148 : vector<8x32xf32> to vector<8x32xbf16>
    %cst_75 = arith.constant dense<0.000000e+00> : vector<8x32xf32>
    %150 = tpu.matmul %147, %149, %cst_75 {dimension_numbers = #tpu.dot_dimension_numbers<[1], [0], [0], [1], [0, 0, 1, 1], [], []>} : vector<8x8xbf16>, vector<8x32xbf16>, vector<8x32xf32> -> vector<8x32xf32>
    %151 = vector.extract_strided_slice %92 {offsets = [0, 64], sizes = [8, 32], strides = [1, 1]} : vector<8x128xf32> to vector<8x32xf32>
    %152 = arith.truncf %151 : vector<8x32xf32> to vector<8x32xbf16>
    %153 = vector.extract_strided_slice %99 {offsets = [0, 64], sizes = [8, 32], strides = [1, 1]} : vector<8x128xf32> to vector<8x32xf32>
    %154 = arith.truncf %153 : vector<8x32xf32> to vector<8x32xbf16>
    "tpu.trace_start"() <{level = 10 : i32, message = "qd,kd->qk"}> : () -> ()
    %cst_76 = arith.constant dense<0.000000e+00> : vector<8x8xf32>
    %155 = tpu.matmul %152, %154, %cst_76 {dimension_numbers = #tpu.dot_dimension_numbers<[1], [1], [0], [0], [0, 0, 1, 0], [], []>} : vector<8x32xbf16>, vector<8x32xbf16>, vector<8x8xf32> -> vector<8x8xf32>
    "tpu.trace_stop"() : () -> ()
    %156 = vector.broadcast %7 : vector<1x8xf32> to vector<8x8xf32>
    %157 = arith.addf %155, %156 : vector<8x8xf32>
    %cst_77 = arith.constant dense<0xFF800000> : vector<8xf32>
    %158 = vector.multi_reduction <maximumf>, %157, %cst_77 [1] : vector<8x8xf32> to vector<8xf32>
    %159 = vector.shape_cast %158 : vector<8xf32> to vector<8x1xf32>
    %160 = vector.broadcast %159 : vector<8x1xf32> to vector<8x8xf32>
    %161 = arith.subf %157, %160 : vector<8x8xf32>
    %162 = math.exp %161 : vector<8x8xf32>
    %cst_78 = arith.constant dense<0.000000e+00> : vector<8xf32>
    %163 = vector.multi_reduction <add>, %162, %cst_78 [1] : vector<8x8xf32> to vector<8xf32>
    %164 = vector.shape_cast %163 : vector<8xf32> to vector<8x1xf32>
    %cst_79 = arith.constant 1.000000e-30 : f32
    %165 = vector.broadcast %cst_79 : f32 to vector<8x1xf32>
    %166 = arith.maximumf %164, %165 : vector<8x1xf32>
    %167 = vector.broadcast %166 : vector<8x1xf32> to vector<8x8xf32>
    %168 = arith.divf %162, %167 : vector<8x8xf32>
    %169 = arith.truncf %168 : vector<8x8xf32> to vector<8x8xbf16>
    %170 = vector.extract_strided_slice %106 {offsets = [0, 64], sizes = [8, 32], strides = [1, 1]} : vector<8x128xf32> to vector<8x32xf32>
    %171 = arith.truncf %170 : vector<8x32xf32> to vector<8x32xbf16>
    %cst_80 = arith.constant dense<0.000000e+00> : vector<8x32xf32>
    %172 = tpu.matmul %169, %171, %cst_80 {dimension_numbers = #tpu.dot_dimension_numbers<[1], [0], [0], [1], [0, 0, 1, 1], [], []>} : vector<8x8xbf16>, vector<8x32xbf16>, vector<8x32xf32> -> vector<8x32xf32>
    %173 = vector.extract_strided_slice %92 {offsets = [0, 96], sizes = [8, 32], strides = [1, 1]} : vector<8x128xf32> to vector<8x32xf32>
    %174 = arith.truncf %173 : vector<8x32xf32> to vector<8x32xbf16>
    %175 = vector.extract_strided_slice %99 {offsets = [0, 96], sizes = [8, 32], strides = [1, 1]} : vector<8x128xf32> to vector<8x32xf32>
    %176 = arith.truncf %175 : vector<8x32xf32> to vector<8x32xbf16>
    "tpu.trace_start"() <{level = 10 : i32, message = "qd,kd->qk"}> : () -> ()
    %cst_81 = arith.constant dense<0.000000e+00> : vector<8x8xf32>
    %177 = tpu.matmul %174, %176, %cst_81 {dimension_numbers = #tpu.dot_dimension_numbers<[1], [1], [0], [0], [0, 0, 1, 0], [], []>} : vector<8x32xbf16>, vector<8x32xbf16>, vector<8x8xf32> -> vector<8x8xf32>
    "tpu.trace_stop"() : () -> ()
    %178 = vector.broadcast %7 : vector<1x8xf32> to vector<8x8xf32>
    %179 = arith.addf %177, %178 : vector<8x8xf32>
    %cst_82 = arith.constant dense<0xFF800000> : vector<8xf32>
    %180 = vector.multi_reduction <maximumf>, %179, %cst_82 [1] : vector<8x8xf32> to vector<8xf32>
    %181 = vector.shape_cast %180 : vector<8xf32> to vector<8x1xf32>
    %182 = vector.broadcast %181 : vector<8x1xf32> to vector<8x8xf32>
    %183 = arith.subf %179, %182 : vector<8x8xf32>
    %184 = math.exp %183 : vector<8x8xf32>
    %cst_83 = arith.constant dense<0.000000e+00> : vector<8xf32>
    %185 = vector.multi_reduction <add>, %184, %cst_83 [1] : vector<8x8xf32> to vector<8xf32>
    %186 = vector.shape_cast %185 : vector<8xf32> to vector<8x1xf32>
    %cst_84 = arith.constant 1.000000e-30 : f32
    %187 = vector.broadcast %cst_84 : f32 to vector<8x1xf32>
    %188 = arith.maximumf %186, %187 : vector<8x1xf32>
    %189 = vector.broadcast %188 : vector<8x1xf32> to vector<8x8xf32>
    %190 = arith.divf %184, %189 : vector<8x8xf32>
    %191 = arith.truncf %190 : vector<8x8xf32> to vector<8x8xbf16>
    %192 = vector.extract_strided_slice %106 {offsets = [0, 96], sizes = [8, 32], strides = [1, 1]} : vector<8x128xf32> to vector<8x32xf32>
    %193 = arith.truncf %192 : vector<8x32xf32> to vector<8x32xbf16>
    %cst_85 = arith.constant dense<0.000000e+00> : vector<8x32xf32>
    %194 = tpu.matmul %191, %193, %cst_85 {dimension_numbers = #tpu.dot_dimension_numbers<[1], [0], [0], [1], [0, 0, 1, 1], [], []>} : vector<8x8xbf16>, vector<8x32xbf16>, vector<8x32xf32> -> vector<8x32xf32>
    %195 = tpu.concatenate %128, %150, %172, %194 in 1 : vector<8x32xf32>, vector<8x32xf32>, vector<8x32xf32>, vector<8x32xf32> -> vector<8x128xf32>
    %196 = arith.truncf %195 : vector<8x128xf32> to vector<8x128xbf16>
    %c0_86 = arith.constant 0 : index
    %c0_87 = arith.constant 0 : index
    %c0_88 = arith.constant 0 : index
    %197 = vector.load %arg19[%c0_86, %c0_87, %c0_88] : memref<1x128x128xbf16, #tpu.memory_space<vmem>>, vector<1x128x128xbf16>
    %198 = vector.shape_cast %197 : vector<1x128x128xbf16> to vector<128x128xbf16>
    %cst_89 = arith.constant dense<0.000000e+00> : vector<8x128xf32>
    %199 = tpu.matmul %196, %198, %cst_89 {dimension_numbers = #tpu.dot_dimension_numbers<[1], [0], [0], [1], [0, 0, 1, 1], [], []>} : vector<8x128xbf16>, vector<128x128xbf16>, vector<8x128xf32> -> vector<8x128xf32>
    %200 = arith.addf %58, %199 : vector<8x128xf32>
    %c0_90 = arith.constant 0 : index
    %c0_91 = arith.constant 0 : index
    %c0_92 = arith.constant 0 : index
    %201 = vector.load %arg20[%c0_90, %c0_91, %c0_92] : memref<1x1x128xf32, #tpu.memory_space<vmem>>, vector<1x1x128xf32>
    %202 = vector.shape_cast %201 : vector<1x1x128xf32> to vector<1x128xf32>
    %203 = vector.broadcast %202 : vector<1x128xf32> to vector<8x128xf32>
    %204 = arith.addf %200, %203 : vector<8x128xf32>
    %205 = vector.broadcast %5 : vector<8x1xf32> to vector<8x128xf32>
    %206 = arith.mulf %204, %205 : vector<8x128xf32>
    %c0_93 = arith.constant 0 : index
    %c0_94 = arith.constant 0 : index
    %c0_95 = arith.constant 0 : index
    %207 = vector.load %arg21[%c0_93, %c0_94, %c0_95] : memref<1x1x128xf32, #tpu.memory_space<vmem>>, vector<1x1x128xf32>
    %208 = vector.shape_cast %207 : vector<1x1x128xf32> to vector<1x128xf32>
    %c0_96 = arith.constant 0 : index
    %c0_97 = arith.constant 0 : index
    %c0_98 = arith.constant 0 : index
    %209 = vector.load %arg22[%c0_96, %c0_97, %c0_98] : memref<1x1x128xf32, #tpu.memory_space<vmem>>, vector<1x1x128xf32>
    %210 = vector.shape_cast %209 : vector<1x1x128xf32> to vector<1x128xf32>
    %cst_99 = arith.constant dense<0.000000e+00> : vector<8xf32>
    %211 = vector.multi_reduction <add>, %206, %cst_99 [1] : vector<8x128xf32> to vector<8xf32>
    %212 = vector.shape_cast %211 : vector<8xf32> to vector<8x1xf32>
    %cst_100 = arith.constant 1.280000e+02 : f32
    %213 = vector.broadcast %cst_100 : f32 to vector<8x1xf32>
    %214 = arith.divf %212, %213 : vector<8x1xf32>
    %215 = vector.broadcast %214 : vector<8x1xf32> to vector<8x128xf32>
    %216 = arith.subf %206, %215 : vector<8x128xf32>
    %217 = arith.mulf %216, %216 : vector<8x128xf32>
    %cst_101 = arith.constant dense<0.000000e+00> : vector<8xf32>
    %218 = vector.multi_reduction <add>, %217, %cst_101 [1] : vector<8x128xf32> to vector<8xf32>
    %219 = vector.shape_cast %218 : vector<8xf32> to vector<8x1xf32>
    %cst_102 = arith.constant 1.280000e+02 : f32
    %220 = vector.broadcast %cst_102 : f32 to vector<8x1xf32>
    %221 = arith.divf %219, %220 : vector<8x1xf32>
    %222 = vector.broadcast %214 : vector<8x1xf32> to vector<8x128xf32>
    %223 = arith.subf %206, %222 : vector<8x128xf32>
    %cst_103 = arith.constant 9.99999974E-6 : f32
    %224 = vector.broadcast %cst_103 : f32 to vector<8x1xf32>
    %225 = arith.addf %221, %224 : vector<8x1xf32>
    %226 = math.rsqrt %225 : vector<8x1xf32>
    %227 = vector.broadcast %226 : vector<8x1xf32> to vector<8x128xf32>
    %228 = arith.mulf %223, %227 : vector<8x128xf32>
    %229 = vector.broadcast %208 : vector<1x128xf32> to vector<8x128xf32>
    %230 = arith.mulf %228, %229 : vector<8x128xf32>
    %231 = vector.broadcast %210 : vector<1x128xf32> to vector<8x128xf32>
    %232 = arith.addf %230, %231 : vector<8x128xf32>
    %233 = arith.truncf %232 : vector<8x128xf32> to vector<8x128xbf16>
    %c0_104 = arith.constant 0 : index
    %c0_105 = arith.constant 0 : index
    %c0_106 = arith.constant 0 : index
    %234 = vector.load %arg23[%c0_104, %c0_105, %c0_106] : memref<1x128x128xbf16, #tpu.memory_space<vmem>>, vector<1x128x128xbf16>
    %235 = vector.shape_cast %234 : vector<1x128x128xbf16> to vector<128x128xbf16>
    %cst_107 = arith.constant dense<0.000000e+00> : vector<8x128xf32>
    %236 = tpu.matmul %233, %235, %cst_107 {dimension_numbers = #tpu.dot_dimension_numbers<[1], [0], [0], [1], [0, 0, 1, 1], [], []>} : vector<8x128xbf16>, vector<128x128xbf16>, vector<8x128xf32> -> vector<8x128xf32>
    %c0_108 = arith.constant 0 : index
    %c0_109 = arith.constant 0 : index
    %c0_110 = arith.constant 0 : index
    %237 = vector.load %arg24[%c0_108, %c0_109, %c0_110] : memref<1x1x128xf32, #tpu.memory_space<vmem>>, vector<1x1x128xf32>
    %238 = vector.shape_cast %237 : vector<1x1x128xf32> to vector<1x128xf32>
    %239 = vector.broadcast %238 : vector<1x128xf32> to vector<8x128xf32>
    %240 = arith.addf %236, %239 : vector<8x128xf32>
    %c0_111 = arith.constant 0 : index
    %c0_112 = arith.constant 0 : index
    %c0_113 = arith.constant 0 : index
    %241 = vector.load %arg25[%c0_111, %c0_112, %c0_113] : memref<1x128x128xbf16, #tpu.memory_space<vmem>>, vector<1x128x128xbf16>
    %242 = vector.shape_cast %241 : vector<1x128x128xbf16> to vector<128x128xbf16>
    %cst_114 = arith.constant dense<0.000000e+00> : vector<8x128xf32>
    %243 = tpu.matmul %233, %242, %cst_114 {dimension_numbers = #tpu.dot_dimension_numbers<[1], [0], [0], [1], [0, 0, 1, 1], [], []>} : vector<8x128xbf16>, vector<128x128xbf16>, vector<8x128xf32> -> vector<8x128xf32>
    %c0_115 = arith.constant 0 : index
    %c0_116 = arith.constant 0 : index
    %c0_117 = arith.constant 0 : index
    %244 = vector.load %arg26[%c0_115, %c0_116, %c0_117] : memref<1x1x128xf32, #tpu.memory_space<vmem>>, vector<1x1x128xf32>
    %245 = vector.shape_cast %244 : vector<1x1x128xf32> to vector<1x128xf32>
    %246 = vector.broadcast %245 : vector<1x128xf32> to vector<8x128xf32>
    %247 = arith.addf %243, %246 : vector<8x128xf32>
    %248 = arith.negf %247 : vector<8x128xf32>
    %249 = math.exp %248 : vector<8x128xf32>
    %cst_118 = arith.constant 1.000000e+00 : f32
    %250 = vector.broadcast %cst_118 : f32 to vector<8x128xf32>
    %251 = arith.addf %250, %249 : vector<8x128xf32>
    %252 = arith.divf %250, %251 : vector<8x128xf32>
    %253 = arith.mulf %240, %252 : vector<8x128xf32>
    %254 = tpu.iota {dimensions = array<i32: 0>} : vector<8x128xi32>
    %c6_i32 = arith.constant 6 : i32
    %255 = vector.broadcast %c6_i32 : i32 to vector<8x128xi32>
    %256 = arith.cmpi slt, %254, %255 : vector<8x128xi32>
    %cst_119 = arith.constant 0.000000e+00 : f32
    %257 = vector.broadcast %cst_119 : f32 to vector<8x128xf32>
    %258 = arith.select %256, %253, %257 : vector<8x128xi1>, vector<8x128xf32>
    %c0_120 = arith.constant 0 : index
    %c0_121 = arith.constant 0 : index
    %c0_122 = arith.constant 0 : index
    %259 = vector.load %arg27[%c0_120, %c0_121, %c0_122] : memref<1x7x128xf32, #tpu.memory_space<vmem>>, vector<1x7x128xf32>
    %260 = vector.shape_cast %259 : vector<1x7x128xf32> to vector<7x128xf32>
    %cst_123 = arith.constant 0.000000e+00 : f32
    %261 = vector.broadcast %cst_123 : f32 to vector<8x128xf32>
    %c3_i32 = arith.constant 3 : i32
    %262 = tpu.dynamic_rotate %258 by %c3_i32 dim 0 : vector<8x128xf32>, i32 -> vector<8x128xf32>
    %c-3_i32 = arith.constant -3 : i32
    %263 = vector.broadcast %c-3_i32 : i32 to vector<8x128xi32>
    %264 = arith.addi %254, %263 : vector<8x128xi32>
    %c0_i32_124 = arith.constant 0 : i32
    %265 = vector.broadcast %c0_i32_124 : i32 to vector<8x128xi32>
    %266 = arith.cmpi sge, %264, %265 : vector<8x128xi32>
    %c-3_i32_125 = arith.constant -3 : i32
    %267 = vector.broadcast %c-3_i32_125 : i32 to vector<8x128xi32>
    %268 = arith.addi %254, %267 : vector<8x128xi32>
    %c8_i32 = arith.constant 8 : i32
    %269 = vector.broadcast %c8_i32 : i32 to vector<8x128xi32>
    %270 = arith.cmpi slt, %268, %269 : vector<8x128xi32>
    %271 = arith.andi %266, %270 : vector<8x128xi1>
    %cst_126 = arith.constant 0.000000e+00 : f32
    %272 = vector.broadcast %cst_126 : f32 to vector<8x128xf32>
    %273 = arith.select %271, %262, %272 : vector<8x128xi1>, vector<8x128xf32>
    %274 = vector.extract_strided_slice %260 {offsets = [0, 0], sizes = [1, 128], strides = [1, 1]} : vector<7x128xf32> to vector<1x128xf32>
    %275 = vector.broadcast %274 : vector<1x128xf32> to vector<8x128xf32>
    %276 = arith.mulf %273, %275 : vector<8x128xf32>
    %277 = arith.addf %261, %276 : vector<8x128xf32>
    %c2_i32 = arith.constant 2 : i32
    %278 = tpu.dynamic_rotate %258 by %c2_i32 dim 0 : vector<8x128xf32>, i32 -> vector<8x128xf32>
    %c-2_i32 = arith.constant -2 : i32
    %279 = vector.broadcast %c-2_i32 : i32 to vector<8x128xi32>
    %280 = arith.addi %254, %279 : vector<8x128xi32>
    %c0_i32_127 = arith.constant 0 : i32
    %281 = vector.broadcast %c0_i32_127 : i32 to vector<8x128xi32>
    %282 = arith.cmpi sge, %280, %281 : vector<8x128xi32>
    %c-2_i32_128 = arith.constant -2 : i32
    %283 = vector.broadcast %c-2_i32_128 : i32 to vector<8x128xi32>
    %284 = arith.addi %254, %283 : vector<8x128xi32>
    %c8_i32_129 = arith.constant 8 : i32
    %285 = vector.broadcast %c8_i32_129 : i32 to vector<8x128xi32>
    %286 = arith.cmpi slt, %284, %285 : vector<8x128xi32>
    %287 = arith.andi %282, %286 : vector<8x128xi1>
    %cst_130 = arith.constant 0.000000e+00 : f32
    %288 = vector.broadcast %cst_130 : f32 to vector<8x128xf32>
    %289 = arith.select %287, %278, %288 : vector<8x128xi1>, vector<8x128xf32>
    %290 = vector.extract_strided_slice %260 {offsets = [1, 0], sizes = [1, 128], strides = [1, 1]} : vector<7x128xf32> to vector<1x128xf32>
    %291 = vector.broadcast %290 : vector<1x128xf32> to vector<8x128xf32>
    %292 = arith.mulf %289, %291 : vector<8x128xf32>
    %293 = arith.addf %277, %292 : vector<8x128xf32>
    %c1_i32 = arith.constant 1 : i32
    %294 = tpu.dynamic_rotate %258 by %c1_i32 dim 0 : vector<8x128xf32>, i32 -> vector<8x128xf32>
    %c-1_i32 = arith.constant -1 : i32
    %295 = vector.broadcast %c-1_i32 : i32 to vector<8x128xi32>
    %296 = arith.addi %254, %295 : vector<8x128xi32>
    %c0_i32_131 = arith.constant 0 : i32
    %297 = vector.broadcast %c0_i32_131 : i32 to vector<8x128xi32>
    %298 = arith.cmpi sge, %296, %297 : vector<8x128xi32>
    %c-1_i32_132 = arith.constant -1 : i32
    %299 = vector.broadcast %c-1_i32_132 : i32 to vector<8x128xi32>
    %300 = arith.addi %254, %299 : vector<8x128xi32>
    %c8_i32_133 = arith.constant 8 : i32
    %301 = vector.broadcast %c8_i32_133 : i32 to vector<8x128xi32>
    %302 = arith.cmpi slt, %300, %301 : vector<8x128xi32>
    %303 = arith.andi %298, %302 : vector<8x128xi1>
    %cst_134 = arith.constant 0.000000e+00 : f32
    %304 = vector.broadcast %cst_134 : f32 to vector<8x128xf32>
    %305 = arith.select %303, %294, %304 : vector<8x128xi1>, vector<8x128xf32>
    %306 = vector.extract_strided_slice %260 {offsets = [2, 0], sizes = [1, 128], strides = [1, 1]} : vector<7x128xf32> to vector<1x128xf32>
    %307 = vector.broadcast %306 : vector<1x128xf32> to vector<8x128xf32>
    %308 = arith.mulf %305, %307 : vector<8x128xf32>
    %309 = arith.addf %293, %308 : vector<8x128xf32>
    %c0_i32_135 = arith.constant 0 : i32
    %310 = vector.broadcast %c0_i32_135 : i32 to vector<8x128xi32>
    %311 = arith.addi %254, %310 : vector<8x128xi32>
    %c0_i32_136 = arith.constant 0 : i32
    %312 = vector.broadcast %c0_i32_136 : i32 to vector<8x128xi32>
    %313 = arith.cmpi sge, %311, %312 : vector<8x128xi32>
    %c0_i32_137 = arith.constant 0 : i32
    %314 = vector.broadcast %c0_i32_137 : i32 to vector<8x128xi32>
    %315 = arith.addi %254, %314 : vector<8x128xi32>
    %c8_i32_138 = arith.constant 8 : i32
    %316 = vector.broadcast %c8_i32_138 : i32 to vector<8x128xi32>
    %317 = arith.cmpi slt, %315, %316 : vector<8x128xi32>
    %318 = arith.andi %313, %317 : vector<8x128xi1>
    %cst_139 = arith.constant 0.000000e+00 : f32
    %319 = vector.broadcast %cst_139 : f32 to vector<8x128xf32>
    %320 = arith.select %318, %258, %319 : vector<8x128xi1>, vector<8x128xf32>
    %321 = vector.extract_strided_slice %260 {offsets = [3, 0], sizes = [1, 128], strides = [1, 1]} : vector<7x128xf32> to vector<1x128xf32>
    %322 = vector.broadcast %321 : vector<1x128xf32> to vector<8x128xf32>
    %323 = arith.mulf %320, %322 : vector<8x128xf32>
    %324 = arith.addf %309, %323 : vector<8x128xf32>
    %c7_i32 = arith.constant 7 : i32
    %325 = tpu.dynamic_rotate %258 by %c7_i32 dim 0 : vector<8x128xf32>, i32 -> vector<8x128xf32>
    %c1_i32_140 = arith.constant 1 : i32
    %326 = vector.broadcast %c1_i32_140 : i32 to vector<8x128xi32>
    %327 = arith.addi %254, %326 : vector<8x128xi32>
    %c0_i32_141 = arith.constant 0 : i32
    %328 = vector.broadcast %c0_i32_141 : i32 to vector<8x128xi32>
    %329 = arith.cmpi sge, %327, %328 : vector<8x128xi32>
    %c1_i32_142 = arith.constant 1 : i32
    %330 = vector.broadcast %c1_i32_142 : i32 to vector<8x128xi32>
    %331 = arith.addi %254, %330 : vector<8x128xi32>
    %c8_i32_143 = arith.constant 8 : i32
    %332 = vector.broadcast %c8_i32_143 : i32 to vector<8x128xi32>
    %333 = arith.cmpi slt, %331, %332 : vector<8x128xi32>
    %334 = arith.andi %329, %333 : vector<8x128xi1>
    %cst_144 = arith.constant 0.000000e+00 : f32
    %335 = vector.broadcast %cst_144 : f32 to vector<8x128xf32>
    %336 = arith.select %334, %325, %335 : vector<8x128xi1>, vector<8x128xf32>
    %337 = vector.extract_strided_slice %260 {offsets = [4, 0], sizes = [1, 128], strides = [1, 1]} : vector<7x128xf32> to vector<1x128xf32>
    %338 = vector.broadcast %337 : vector<1x128xf32> to vector<8x128xf32>
    %339 = arith.mulf %336, %338 : vector<8x128xf32>
    %340 = arith.addf %324, %339 : vector<8x128xf32>
    %c6_i32_145 = arith.constant 6 : i32
    %341 = tpu.dynamic_rotate %258 by %c6_i32_145 dim 0 : vector<8x128xf32>, i32 -> vector<8x128xf32>
    %c2_i32_146 = arith.constant 2 : i32
    %342 = vector.broadcast %c2_i32_146 : i32 to vector<8x128xi32>
    %343 = arith.addi %254, %342 : vector<8x128xi32>
    %c0_i32_147 = arith.constant 0 : i32
    %344 = vector.broadcast %c0_i32_147 : i32 to vector<8x128xi32>
    %345 = arith.cmpi sge, %343, %344 : vector<8x128xi32>
    %c2_i32_148 = arith.constant 2 : i32
    %346 = vector.broadcast %c2_i32_148 : i32 to vector<8x128xi32>
    %347 = arith.addi %254, %346 : vector<8x128xi32>
    %c8_i32_149 = arith.constant 8 : i32
    %348 = vector.broadcast %c8_i32_149 : i32 to vector<8x128xi32>
    %349 = arith.cmpi slt, %347, %348 : vector<8x128xi32>
    %350 = arith.andi %345, %349 : vector<8x128xi1>
    %cst_150 = arith.constant 0.000000e+00 : f32
    %351 = vector.broadcast %cst_150 : f32 to vector<8x128xf32>
    %352 = arith.select %350, %341, %351 : vector<8x128xi1>, vector<8x128xf32>
    %353 = vector.extract_strided_slice %260 {offsets = [5, 0], sizes = [1, 128], strides = [1, 1]} : vector<7x128xf32> to vector<1x128xf32>
    %354 = vector.broadcast %353 : vector<1x128xf32> to vector<8x128xf32>
    %355 = arith.mulf %352, %354 : vector<8x128xf32>
    %356 = arith.addf %340, %355 : vector<8x128xf32>
    %c5_i32 = arith.constant 5 : i32
    %357 = tpu.dynamic_rotate %258 by %c5_i32 dim 0 : vector<8x128xf32>, i32 -> vector<8x128xf32>
    %c3_i32_151 = arith.constant 3 : i32
    %358 = vector.broadcast %c3_i32_151 : i32 to vector<8x128xi32>
    %359 = arith.addi %254, %358 : vector<8x128xi32>
    %c0_i32_152 = arith.constant 0 : i32
    %360 = vector.broadcast %c0_i32_152 : i32 to vector<8x128xi32>
    %361 = arith.cmpi sge, %359, %360 : vector<8x128xi32>
    %c3_i32_153 = arith.constant 3 : i32
    %362 = vector.broadcast %c3_i32_153 : i32 to vector<8x128xi32>
    %363 = arith.addi %254, %362 : vector<8x128xi32>
    %c8_i32_154 = arith.constant 8 : i32
    %364 = vector.broadcast %c8_i32_154 : i32 to vector<8x128xi32>
    %365 = arith.cmpi slt, %363, %364 : vector<8x128xi32>
    %366 = arith.andi %361, %365 : vector<8x128xi1>
    %cst_155 = arith.constant 0.000000e+00 : f32
    %367 = vector.broadcast %cst_155 : f32 to vector<8x128xf32>
    %368 = arith.select %366, %357, %367 : vector<8x128xi1>, vector<8x128xf32>
    %369 = vector.extract_strided_slice %260 {offsets = [6, 0], sizes = [1, 128], strides = [1, 1]} : vector<7x128xf32> to vector<1x128xf32>
    %370 = vector.broadcast %369 : vector<1x128xf32> to vector<8x128xf32>
    %371 = arith.mulf %368, %370 : vector<8x128xf32>
    %372 = arith.addf %356, %371 : vector<8x128xf32>
    %c0_156 = arith.constant 0 : index
    %c0_157 = arith.constant 0 : index
    %c0_158 = arith.constant 0 : index
    %373 = vector.load %arg28[%c0_156, %c0_157, %c0_158] : memref<1x1x128xf32, #tpu.memory_space<vmem>>, vector<1x1x128xf32>
    %374 = vector.shape_cast %373 : vector<1x1x128xf32> to vector<1x128xf32>
    %375 = vector.broadcast %374 : vector<1x128xf32> to vector<8x128xf32>
    %376 = arith.addf %372, %375 : vector<8x128xf32>
    %c0_159 = arith.constant 0 : index
    %c0_160 = arith.constant 0 : index
    %c0_161 = arith.constant 0 : index
    %377 = vector.load %arg29[%c0_159, %c0_160, %c0_161] : memref<1x1x128xf32, #tpu.memory_space<vmem>>, vector<1x1x128xf32>
    %378 = vector.shape_cast %377 : vector<1x1x128xf32> to vector<1x128xf32>
    %c0_162 = arith.constant 0 : index
    %c0_163 = arith.constant 0 : index
    %c0_164 = arith.constant 0 : index
    %379 = vector.load %arg30[%c0_162, %c0_163, %c0_164] : memref<1x1x128xf32, #tpu.memory_space<vmem>>, vector<1x1x128xf32>
    %380 = vector.shape_cast %379 : vector<1x1x128xf32> to vector<1x128xf32>
    %cst_165 = arith.constant dense<0.000000e+00> : vector<8xf32>
    %381 = vector.multi_reduction <add>, %376, %cst_165 [1] : vector<8x128xf32> to vector<8xf32>
    %382 = vector.shape_cast %381 : vector<8xf32> to vector<8x1xf32>
    %cst_166 = arith.constant 1.280000e+02 : f32
    %383 = vector.broadcast %cst_166 : f32 to vector<8x1xf32>
    %384 = arith.divf %382, %383 : vector<8x1xf32>
    %385 = vector.broadcast %384 : vector<8x1xf32> to vector<8x128xf32>
    %386 = arith.subf %376, %385 : vector<8x128xf32>
    %387 = arith.mulf %386, %386 : vector<8x128xf32>
    %cst_167 = arith.constant dense<0.000000e+00> : vector<8xf32>
    %388 = vector.multi_reduction <add>, %387, %cst_167 [1] : vector<8x128xf32> to vector<8xf32>
    %389 = vector.shape_cast %388 : vector<8xf32> to vector<8x1xf32>
    %cst_168 = arith.constant 1.280000e+02 : f32
    %390 = vector.broadcast %cst_168 : f32 to vector<8x1xf32>
    %391 = arith.divf %389, %390 : vector<8x1xf32>
    %392 = vector.broadcast %384 : vector<8x1xf32> to vector<8x128xf32>
    %393 = arith.subf %376, %392 : vector<8x128xf32>
    %cst_169 = arith.constant 9.99999974E-6 : f32
    %394 = vector.broadcast %cst_169 : f32 to vector<8x1xf32>
    %395 = arith.addf %391, %394 : vector<8x1xf32>
    %396 = math.rsqrt %395 : vector<8x1xf32>
    %397 = vector.broadcast %396 : vector<8x1xf32> to vector<8x128xf32>
    %398 = arith.mulf %393, %397 : vector<8x128xf32>
    %399 = vector.broadcast %378 : vector<1x128xf32> to vector<8x128xf32>
    %400 = arith.mulf %398, %399 : vector<8x128xf32>
    %401 = vector.broadcast %380 : vector<1x128xf32> to vector<8x128xf32>
    %402 = arith.addf %400, %401 : vector<8x128xf32>
    %403 = arith.negf %402 : vector<8x128xf32>
    %404 = math.exp %403 : vector<8x128xf32>
    %cst_170 = arith.constant 1.000000e+00 : f32
    %405 = vector.broadcast %cst_170 : f32 to vector<8x128xf32>
    %406 = arith.addf %405, %404 : vector<8x128xf32>
    %407 = arith.divf %405, %406 : vector<8x128xf32>
    %408 = arith.mulf %402, %407 : vector<8x128xf32>
    %409 = arith.truncf %408 : vector<8x128xf32> to vector<8x128xbf16>
    %c0_171 = arith.constant 0 : index
    %c0_172 = arith.constant 0 : index
    %c0_173 = arith.constant 0 : index
    %410 = vector.load %arg31[%c0_171, %c0_172, %c0_173] : memref<1x128x128xbf16, #tpu.memory_space<vmem>>, vector<1x128x128xbf16>
    %411 = vector.shape_cast %410 : vector<1x128x128xbf16> to vector<128x128xbf16>
    %cst_174 = arith.constant dense<0.000000e+00> : vector<8x128xf32>
    %412 = tpu.matmul %409, %411, %cst_174 {dimension_numbers = #tpu.dot_dimension_numbers<[1], [0], [0], [1], [0, 0, 1, 1], [], []>} : vector<8x128xbf16>, vector<128x128xbf16>, vector<8x128xf32> -> vector<8x128xf32>
    %c0_175 = arith.constant 0 : index
    %c0_176 = arith.constant 0 : index
    %c0_177 = arith.constant 0 : index
    %413 = vector.load %arg32[%c0_175, %c0_176, %c0_177] : memref<1x1x128xf32, #tpu.memory_space<vmem>>, vector<1x1x128xf32>
    %414 = vector.shape_cast %413 : vector<1x1x128xf32> to vector<1x128xf32>
    %415 = vector.broadcast %414 : vector<1x128xf32> to vector<8x128xf32>
    %416 = arith.addf %412, %415 : vector<8x128xf32>
    %417 = arith.addf %206, %416 : vector<8x128xf32>
    %c0_178 = arith.constant 0 : index
    %c0_179 = arith.constant 0 : index
    %c0_180 = arith.constant 0 : index
    %418 = vector.load %arg33[%c0_178, %c0_179, %c0_180] : memref<1x1x128xf32, #tpu.memory_space<vmem>>, vector<1x1x128xf32>
    %419 = vector.shape_cast %418 : vector<1x1x128xf32> to vector<1x128xf32>
    %c0_181 = arith.constant 0 : index
    %c0_182 = arith.constant 0 : index
    %c0_183 = arith.constant 0 : index
    %420 = vector.load %arg34[%c0_181, %c0_182, %c0_183] : memref<1x1x128xf32, #tpu.memory_space<vmem>>, vector<1x1x128xf32>
    %421 = vector.shape_cast %420 : vector<1x1x128xf32> to vector<1x128xf32>
    %cst_184 = arith.constant dense<0.000000e+00> : vector<8xf32>
    %422 = vector.multi_reduction <add>, %417, %cst_184 [1] : vector<8x128xf32> to vector<8xf32>
    %423 = vector.shape_cast %422 : vector<8xf32> to vector<8x1xf32>
    %cst_185 = arith.constant 1.280000e+02 : f32
    %424 = vector.broadcast %cst_185 : f32 to vector<8x1xf32>
    %425 = arith.divf %423, %424 : vector<8x1xf32>
    %426 = vector.broadcast %425 : vector<8x1xf32> to vector<8x128xf32>
    %427 = arith.subf %417, %426 : vector<8x128xf32>
    %428 = arith.mulf %427, %427 : vector<8x128xf32>
    %cst_186 = arith.constant dense<0.000000e+00> : vector<8xf32>
    %429 = vector.multi_reduction <add>, %428, %cst_186 [1] : vector<8x128xf32> to vector<8xf32>
    %430 = vector.shape_cast %429 : vector<8xf32> to vector<8x1xf32>
    %cst_187 = arith.constant 1.280000e+02 : f32
    %431 = vector.broadcast %cst_187 : f32 to vector<8x1xf32>
    %432 = arith.divf %430, %431 : vector<8x1xf32>
    %433 = vector.broadcast %425 : vector<8x1xf32> to vector<8x128xf32>
    %434 = arith.subf %417, %433 : vector<8x128xf32>
    %cst_188 = arith.constant 9.99999974E-6 : f32
    %435 = vector.broadcast %cst_188 : f32 to vector<8x1xf32>
    %436 = arith.addf %432, %435 : vector<8x1xf32>
    %437 = math.rsqrt %436 : vector<8x1xf32>
    %438 = vector.broadcast %437 : vector<8x1xf32> to vector<8x128xf32>
    %439 = arith.mulf %434, %438 : vector<8x128xf32>
    %440 = vector.broadcast %419 : vector<1x128xf32> to vector<8x128xf32>
    %441 = arith.mulf %439, %440 : vector<8x128xf32>
    %442 = vector.broadcast %421 : vector<1x128xf32> to vector<8x128xf32>
    %443 = arith.addf %441, %442 : vector<8x128xf32>
    %444 = arith.truncf %443 : vector<8x128xf32> to vector<8x128xbf16>
    %c0_189 = arith.constant 0 : index
    %c0_190 = arith.constant 0 : index
    %c0_191 = arith.constant 0 : index
    %445 = vector.load %arg35[%c0_189, %c0_190, %c0_191] : memref<1x128x256xbf16, #tpu.memory_space<vmem>>, vector<1x128x256xbf16>
    %446 = vector.shape_cast %445 : vector<1x128x256xbf16> to vector<128x256xbf16>
    %cst_192 = arith.constant dense<0.000000e+00> : vector<8x256xf32>
    %447 = tpu.matmul %444, %446, %cst_192 {dimension_numbers = #tpu.dot_dimension_numbers<[1], [0], [0], [1], [0, 0, 1, 1], [], []>} : vector<8x128xbf16>, vector<128x256xbf16>, vector<8x256xf32> -> vector<8x256xf32>
    %c0_193 = arith.constant 0 : index
    %c0_194 = arith.constant 0 : index
    %c0_195 = arith.constant 0 : index
    %448 = vector.load %arg36[%c0_193, %c0_194, %c0_195] : memref<1x1x256xf32, #tpu.memory_space<vmem>>, vector<1x1x256xf32>
    %449 = vector.shape_cast %448 : vector<1x1x256xf32> to vector<1x256xf32>
    %450 = vector.broadcast %449 : vector<1x256xf32> to vector<8x256xf32>
    %451 = arith.addf %447, %450 : vector<8x256xf32>
    %452 = arith.negf %451 : vector<8x256xf32>
    %453 = math.exp %452 : vector<8x256xf32>
    %cst_196 = arith.constant 1.000000e+00 : f32
    %454 = vector.broadcast %cst_196 : f32 to vector<8x256xf32>
    %455 = arith.addf %454, %453 : vector<8x256xf32>
    %456 = arith.divf %454, %455 : vector<8x256xf32>
    %457 = arith.mulf %451, %456 : vector<8x256xf32>
    %458 = arith.truncf %457 : vector<8x256xf32> to vector<8x256xbf16>
    %c0_197 = arith.constant 0 : index
    %c0_198 = arith.constant 0 : index
    %c0_199 = arith.constant 0 : index
    %459 = vector.load %arg37[%c0_197, %c0_198, %c0_199] : memref<1x256x128xbf16, #tpu.memory_space<vmem>>, vector<1x256x128xbf16>
    %460 = vector.shape_cast %459 : vector<1x256x128xbf16> to vector<256x128xbf16>
    %cst_200 = arith.constant dense<0.000000e+00> : vector<8x128xf32>
    %461 = tpu.matmul %458, %460, %cst_200 {dimension_numbers = #tpu.dot_dimension_numbers<[1], [0], [0], [1], [0, 0, 1, 1], [], []>} : vector<8x256xbf16>, vector<256x128xbf16>, vector<8x128xf32> -> vector<8x128xf32>
    %c0_201 = arith.constant 0 : index
    %c0_202 = arith.constant 0 : index
    %c0_203 = arith.constant 0 : index
    %462 = vector.load %arg38[%c0_201, %c0_202, %c0_203] : memref<1x1x128xf32, #tpu.memory_space<vmem>>, vector<1x1x128xf32>
    %463 = vector.shape_cast %462 : vector<1x1x128xf32> to vector<1x128xf32>
    %464 = vector.broadcast %463 : vector<1x128xf32> to vector<8x128xf32>
    %465 = arith.addf %461, %464 : vector<8x128xf32>
    %cst_204 = arith.constant 5.000000e-01 : f32
    %466 = vector.broadcast %cst_204 : f32 to vector<8x128xf32>
    %467 = arith.mulf %466, %465 : vector<8x128xf32>
    %468 = arith.addf %417, %467 : vector<8x128xf32>
    %c0_205 = arith.constant 0 : index
    %c0_206 = arith.constant 0 : index
    %c0_207 = arith.constant 0 : index
    %469 = vector.load %arg39[%c0_205, %c0_206, %c0_207] : memref<1x1x128xf32, #tpu.memory_space<vmem>>, vector<1x1x128xf32>
    %470 = vector.shape_cast %469 : vector<1x1x128xf32> to vector<1x128xf32>
    %c0_208 = arith.constant 0 : index
    %c0_209 = arith.constant 0 : index
    %c0_210 = arith.constant 0 : index
    %471 = vector.load %arg40[%c0_208, %c0_209, %c0_210] : memref<1x1x128xf32, #tpu.memory_space<vmem>>, vector<1x1x128xf32>
    %472 = vector.shape_cast %471 : vector<1x1x128xf32> to vector<1x128xf32>
    %cst_211 = arith.constant dense<0.000000e+00> : vector<8xf32>
    %473 = vector.multi_reduction <add>, %468, %cst_211 [1] : vector<8x128xf32> to vector<8xf32>
    %474 = vector.shape_cast %473 : vector<8xf32> to vector<8x1xf32>
    %cst_212 = arith.constant 1.280000e+02 : f32
    %475 = vector.broadcast %cst_212 : f32 to vector<8x1xf32>
    %476 = arith.divf %474, %475 : vector<8x1xf32>
    %477 = vector.broadcast %476 : vector<8x1xf32> to vector<8x128xf32>
    %478 = arith.subf %468, %477 : vector<8x128xf32>
    %479 = arith.mulf %478, %478 : vector<8x128xf32>
    %cst_213 = arith.constant dense<0.000000e+00> : vector<8xf32>
    %480 = vector.multi_reduction <add>, %479, %cst_213 [1] : vector<8x128xf32> to vector<8xf32>
    %481 = vector.shape_cast %480 : vector<8xf32> to vector<8x1xf32>
    %cst_214 = arith.constant 1.280000e+02 : f32
    %482 = vector.broadcast %cst_214 : f32 to vector<8x1xf32>
    %483 = arith.divf %481, %482 : vector<8x1xf32>
    %484 = vector.broadcast %476 : vector<8x1xf32> to vector<8x128xf32>
    %485 = arith.subf %468, %484 : vector<8x128xf32>
    %cst_215 = arith.constant 9.99999974E-6 : f32
    %486 = vector.broadcast %cst_215 : f32 to vector<8x1xf32>
    %487 = arith.addf %483, %486 : vector<8x1xf32>
    %488 = math.rsqrt %487 : vector<8x1xf32>
    %489 = vector.broadcast %488 : vector<8x1xf32> to vector<8x128xf32>
    %490 = arith.mulf %485, %489 : vector<8x128xf32>
    %491 = vector.broadcast %470 : vector<1x128xf32> to vector<8x128xf32>
    %492 = arith.mulf %490, %491 : vector<8x128xf32>
    %493 = vector.broadcast %472 : vector<1x128xf32> to vector<8x128xf32>
    %494 = arith.addf %492, %493 : vector<8x128xf32>
    %c0_216 = arith.constant 0 : index
    %c0_217 = arith.constant 0 : index
    %495 = vector.load %arg42[%c0_216, %c0_217] : memref<8x128xf32, #tpu.memory_space<vmem>>, vector<8x128xf32>
    tpu.vector_store %arg42[%c0_216, %c0_217], %494 {strides = array<i32>} : memref<8x128xf32, #tpu.memory_space<vmem>>, vector<8x128xf32>,
    %c1_i32_218 = arith.constant 1 : i32
    %496 = arith.cmpi eq, %arg1, %c1_i32_218 : i32
    %497 = arith.extui %496 : i1 to i32
    %c0_i32_219 = arith.constant 0 : i32
    %498 = arith.cmpi ne, %497, %c0_i32_219 : i32
    scf.if %498 {
      %499 = vector.shape_cast %494 : vector<8x128xf32> to vector<1x8x128xf32>
      %c0_220 = arith.constant 0 : index
      %c0_221 = arith.constant 0 : index
      %c0_222 = arith.constant 0 : index
      %500 = vector.load %arg41[%c0_220, %c0_221, %c0_222] : memref<1x8x128xf32, #tpu.memory_space<vmem>>, vector<1x8x128xf32>
      tpu.vector_store %arg41[%c0_220, %c0_221, %c0_222], %499 {strides = array<i32>} : memref<1x8x128xf32, #tpu.memory_space<vmem>>, vector<1x8x128xf32>,
    } else {
    }
    return
  }
  func.func @transform_0(%arg0: i32, %arg1: i32) -> (i32, i32, i32) {
    %c0_i32 = arith.constant 0 : i32
    %c0_i32_0 = arith.constant 0 : i32
    %c0_i32_1 = arith.constant 0 : i32
    return %arg0, %c0_i32, %c0_i32_0 : i32, i32, i32
  }
  func.func @transform_1(%arg0: i32, %arg1: i32) -> (i32, i32, i32) {
    %c0_i32 = arith.constant 0 : i32
    %c0_i32_0 = arith.constant 0 : i32
    %c0_i32_1 = arith.constant 0 : i32
    return %arg0, %c0_i32, %c0_i32_0 : i32, i32, i32
  }
  func.func @transform_2(%arg0: i32, %arg1: i32) -> (i32, i32, i32) {
    %c0_i32 = arith.constant 0 : i32
    %c0_i32_0 = arith.constant 0 : i32
    %c0_i32_1 = arith.constant 0 : i32
    return %arg0, %c0_i32, %c0_i32_0 : i32, i32, i32
  }
  func.func @transform_3(%arg0: i32, %arg1: i32) -> (i32, i32, i32) {
    %c0_i32 = arith.constant 0 : i32
    %c0_i32_0 = arith.constant 0 : i32
    %c0_i32_1 = arith.constant 0 : i32
    return %arg1, %c0_i32, %c0_i32_0 : i32, i32, i32
  }
  func.func @transform_4(%arg0: i32, %arg1: i32) -> (i32, i32, i32) {
    %c0_i32 = arith.constant 0 : i32
    %c0_i32_0 = arith.constant 0 : i32
    %c0_i32_1 = arith.constant 0 : i32
    return %arg1, %c0_i32, %c0_i32_0 : i32, i32, i32
  }
  func.func @transform_5(%arg0: i32, %arg1: i32) -> (i32, i32, i32) {
    %c0_i32 = arith.constant 0 : i32
    %c0_i32_0 = arith.constant 0 : i32
    %c0_i32_1 = arith.constant 0 : i32
    return %arg1, %c0_i32, %c0_i32_0 : i32, i32, i32
  }
  func.func @transform_6(%arg0: i32, %arg1: i32) -> (i32, i32, i32) {
    %c0_i32 = arith.constant 0 : i32
    %c0_i32_0 = arith.constant 0 : i32
    %c0_i32_1 = arith.constant 0 : i32
    return %arg1, %c0_i32, %c0_i32_0 : i32, i32, i32
  }
  func.func @transform_7(%arg0: i32, %arg1: i32) -> (i32, i32, i32) {
    %c0_i32 = arith.constant 0 : i32
    %c0_i32_0 = arith.constant 0 : i32
    %c0_i32_1 = arith.constant 0 : i32
    return %arg1, %c0_i32, %c0_i32_0 : i32, i32, i32
  }
  func.func @transform_8(%arg0: i32, %arg1: i32) -> (i32, i32, i32) {
    %c0_i32 = arith.constant 0 : i32
    %c0_i32_0 = arith.constant 0 : i32
    %c0_i32_1 = arith.constant 0 : i32
    return %arg1, %c0_i32, %c0_i32_0 : i32, i32, i32
  }
  func.func @transform_9(%arg0: i32, %arg1: i32) -> (i32, i32, i32) {
    %c0_i32 = arith.constant 0 : i32
    %c0_i32_0 = arith.constant 0 : i32
    %c0_i32_1 = arith.constant 0 : i32
    return %arg1, %c0_i32, %c0_i32_0 : i32, i32, i32
  }
  func.func @transform_10(%arg0: i32, %arg1: i32) -> (i32, i32, i32) {
    %c0_i32 = arith.constant 0 : i32
    %c0_i32_0 = arith.constant 0 : i32
    %c0_i32_1 = arith.constant 0 : i32
    return %arg1, %c0_i32, %c0_i32_0 : i32, i32, i32
  }
  func.func @transform_11(%arg0: i32, %arg1: i32) -> (i32, i32, i32) {
    %c0_i32 = arith.constant 0 : i32
    %c0_i32_0 = arith.constant 0 : i32
    %c0_i32_1 = arith.constant 0 : i32
    return %arg1, %c0_i32, %c0_i32_0 : i32, i32, i32
  }
  func.func @transform_12(%arg0: i32, %arg1: i32) -> (i32, i32, i32) {
    %c0_i32 = arith.constant 0 : i32
    %c0_i32_0 = arith.constant 0 : i32
    %c0_i32_1 = arith.constant 0 : i32
    return %arg1, %c0_i32, %c0_i32_0 : i32, i32, i32
  }
  func.func @transform_13(%arg0: i32, %arg1: i32) -> (i32, i32, i32) {
    %c0_i32 = arith.constant 0 : i32
    %c0_i32_0 = arith.constant 0 : i32
    %c0_i32_1 = arith.constant 0 : i32
    return %arg1, %c0_i32, %c0_i32_0 : i32, i32, i32
  }
  func.func @transform_14(%arg0: i32, %arg1: i32) -> (i32, i32, i32) {
    %c0_i32 = arith.constant 0 : i32
    %c0_i32_0 = arith.constant 0 : i32
    %c0_i32_1 = arith.constant 0 : i32
    return %arg1, %c0_i32, %c0_i32_0 : i32, i32, i32
  }
  func.func @transform_15(%arg0: i32, %arg1: i32) -> (i32, i32, i32) {
    %c0_i32 = arith.constant 0 : i32
    %c0_i32_0 = arith.constant 0 : i32
    %c0_i32_1 = arith.constant 0 : i32
    return %arg1, %c0_i32, %c0_i32_0 : i32, i32, i32
  }
  func.func @transform_16(%arg0: i32, %arg1: i32) -> (i32, i32, i32) {
    %c0_i32 = arith.constant 0 : i32
    %c0_i32_0 = arith.constant 0 : i32
    %c0_i32_1 = arith.constant 0 : i32
    return %arg1, %c0_i32, %c0_i32_0 : i32, i32, i32
  }
  func.func @transform_17(%arg0: i32, %arg1: i32) -> (i32, i32, i32) {
    %c0_i32 = arith.constant 0 : i32
    %c0_i32_0 = arith.constant 0 : i32
    %c0_i32_1 = arith.constant 0 : i32
    return %arg1, %c0_i32, %c0_i32_0 : i32, i32, i32
  }
  func.func @transform_18(%arg0: i32, %arg1: i32) -> (i32, i32, i32) {
    %c0_i32 = arith.constant 0 : i32
    %c0_i32_0 = arith.constant 0 : i32
    %c0_i32_1 = arith.constant 0 : i32
    return %arg1, %c0_i32, %c0_i32_0 : i32, i32, i32
  }
  func.func @transform_19(%arg0: i32, %arg1: i32) -> (i32, i32, i32) {
    %c0_i32 = arith.constant 0 : i32
    %c0_i32_0 = arith.constant 0 : i32
    %c0_i32_1 = arith.constant 0 : i32
    return %arg1, %c0_i32, %c0_i32_0 : i32, i32, i32
  }
  func.func @transform_20(%arg0: i32, %arg1: i32) -> (i32, i32, i32) {
    %c0_i32 = arith.constant 0 : i32
    %c0_i32_0 = arith.constant 0 : i32
    %c0_i32_1 = arith.constant 0 : i32
    return %arg1, %c0_i32, %c0_i32_0 : i32, i32, i32
  }
  func.func @transform_21(%arg0: i32, %arg1: i32) -> (i32, i32, i32) {
    %c0_i32 = arith.constant 0 : i32
    %c0_i32_0 = arith.constant 0 : i32
    %c0_i32_1 = arith.constant 0 : i32
    return %arg1, %c0_i32, %c0_i32_0 : i32, i32, i32
  }
  func.func @transform_22(%arg0: i32, %arg1: i32) -> (i32, i32, i32) {
    %c0_i32 = arith.constant 0 : i32
    %c0_i32_0 = arith.constant 0 : i32
    %c0_i32_1 = arith.constant 0 : i32
    return %arg1, %c0_i32, %c0_i32_0 : i32, i32, i32
  }
  func.func @transform_23(%arg0: i32, %arg1: i32) -> (i32, i32, i32) {
    %c0_i32 = arith.constant 0 : i32
    %c0_i32_0 = arith.constant 0 : i32
    %c0_i32_1 = arith.constant 0 : i32
    return %arg1, %c0_i32, %c0_i32_0 : i32, i32, i32
  }
  func.func @transform_24(%arg0: i32, %arg1: i32) -> (i32, i32, i32) {
    %c0_i32 = arith.constant 0 : i32
    %c0_i32_0 = arith.constant 0 : i32
    %c0_i32_1 = arith.constant 0 : i32
    return %arg1, %c0_i32, %c0_i32_0 : i32, i32, i32
  }
  func.func @transform_25(%arg0: i32, %arg1: i32) -> (i32, i32, i32) {
    %c0_i32 = arith.constant 0 : i32
    %c0_i32_0 = arith.constant 0 : i32
    %c0_i32_1 = arith.constant 0 : i32
    return %arg1, %c0_i32, %c0_i32_0 : i32, i32, i32
  }
  func.func @transform_26(%arg0: i32, %arg1: i32) -> (i32, i32, i32) {
    %c0_i32 = arith.constant 0 : i32
    %c0_i32_0 = arith.constant 0 : i32
    %c0_i32_1 = arith.constant 0 : i32
    return %arg1, %c0_i32, %c0_i32_0 : i32, i32, i32
  }
  func.func @transform_27(%arg0: i32, %arg1: i32) -> (i32, i32, i32) {
    %c0_i32 = arith.constant 0 : i32
    %c0_i32_0 = arith.constant 0 : i32
    %c0_i32_1 = arith.constant 0 : i32
    return %arg1, %c0_i32, %c0_i32_0 : i32, i32, i32
  }
  func.func @transform_28(%arg0: i32, %arg1: i32) -> (i32, i32, i32) {
    %c0_i32 = arith.constant 0 : i32
    %c0_i32_0 = arith.constant 0 : i32
    %c0_i32_1 = arith.constant 0 : i32
    return %arg1, %c0_i32, %c0_i32_0 : i32, i32, i32
  }
  func.func @transform_29(%arg0: i32, %arg1: i32) -> (i32, i32, i32) {
    %c0_i32 = arith.constant 0 : i32
    %c0_i32_0 = arith.constant 0 : i32
    %c0_i32_1 = arith.constant 0 : i32
    return %arg1, %c0_i32, %c0_i32_0 : i32, i32, i32
  }
  func.func @transform_30(%arg0: i32, %arg1: i32) -> (i32, i32, i32) {
    %c0_i32 = arith.constant 0 : i32
    %c0_i32_0 = arith.constant 0 : i32
    %c0_i32_1 = arith.constant 0 : i32
    return %arg1, %c0_i32, %c0_i32_0 : i32, i32, i32
  }
  func.func @transform_31(%arg0: i32, %arg1: i32) -> (i32, i32, i32) {
    %c0_i32 = arith.constant 0 : i32
    %c0_i32_0 = arith.constant 0 : i32
    %c0_i32_1 = arith.constant 0 : i32
    return %arg1, %c0_i32, %c0_i32_0 : i32, i32, i32
  }
  func.func @transform_32(%arg0: i32, %arg1: i32) -> (i32, i32, i32) {
    %c0_i32 = arith.constant 0 : i32
    %c0_i32_0 = arith.constant 0 : i32
    %c0_i32_1 = arith.constant 0 : i32
    return %arg1, %c0_i32, %c0_i32_0 : i32, i32, i32
  }
  func.func @transform_33(%arg0: i32, %arg1: i32) -> (i32, i32, i32) {
    %c0_i32 = arith.constant 0 : i32
    %c0_i32_0 = arith.constant 0 : i32
    %c0_i32_1 = arith.constant 0 : i32
    return %arg1, %c0_i32, %c0_i32_0 : i32, i32, i32
  }
  func.func @transform_34(%arg0: i32, %arg1: i32) -> (i32, i32, i32) {
    %c0_i32 = arith.constant 0 : i32
    %c0_i32_0 = arith.constant 0 : i32
    %c0_i32_1 = arith.constant 0 : i32
    return %arg1, %c0_i32, %c0_i32_0 : i32, i32, i32
  }
  func.func @transform_35(%arg0: i32, %arg1: i32) -> (i32, i32, i32) {
    %c0_i32 = arith.constant 0 : i32
    %c0_i32_0 = arith.constant 0 : i32
    %c0_i32_1 = arith.constant 0 : i32
    return %arg1, %c0_i32, %c0_i32_0 : i32, i32, i32
  }
  func.func @transform_36(%arg0: i32, %arg1: i32) -> (i32, i32, i32) {
    %c0_i32 = arith.constant 0 : i32
    %c0_i32_0 = arith.constant 0 : i32
    %c0_i32_1 = arith.constant 0 : i32
    return %arg1, %c0_i32, %c0_i32_0 : i32, i32, i32
  }
  func.func @transform_37(%arg0: i32, %arg1: i32) -> (i32, i32, i32) {
    %c0_i32 = arith.constant 0 : i32
    %c0_i32_0 = arith.constant 0 : i32
    %c0_i32_1 = arith.constant 0 : i32
    return %arg1, %c0_i32, %c0_i32_0 : i32, i32, i32
  }
  func.func @transform_38(%arg0: i32, %arg1: i32) -> (i32, i32, i32) {
    %c0_i32 = arith.constant 0 : i32
    %c0_i32_0 = arith.constant 0 : i32
    %c0_i32_1 = arith.constant 0 : i32
    return %arg1, %c0_i32, %c0_i32_0 : i32, i32, i32
  }
  func.func @transform_39(%arg0: i32, %arg1: i32) -> (i32, i32, i32) {
    %c0_i32 = arith.constant 0 : i32
    %c0_i32_0 = arith.constant 0 : i32
    %c0_i32_1 = arith.constant 0 : i32
    return %arg0, %c0_i32, %c0_i32_0 : i32, i32, i32
  }
}

module attributes {stable_mosaic.version = 11 : i64} {
  func.func @_lstm_kernel(%arg0: memref<5x2x256xf32, #tpu.memory_space<vmem>>, %arg1: memref<64x256xbf16, #tpu.memory_space<vmem>>, %arg2: memref<5x2x64xf32, #tpu.memory_space<vmem>>) attributes {dimension_semantics = [], scalar_prefetch = 0 : i64, scratch_operands = 0 : i64, tpu.core_type = #tpu.core_type<tc>} {
    %c0 = arith.constant 0 : index
    %c0_0 = arith.constant 0 : index
    %0 = vector.load %arg1[%c0, %c0_0] : memref<64x256xbf16, #tpu.memory_space<vmem>>, vector<64x256xbf16>
    %cst = arith.constant 0.000000e+00 : f32
    %1 = vector.broadcast %cst : f32 to vector<2x64xf32>
    %cst_1 = arith.constant 0.000000e+00 : f32
    %2 = vector.broadcast %cst_1 : f32 to vector<2x64xf32>
    %c0_i32 = arith.constant 0 : i32
    %3 = arith.index_cast %c0_i32 : i32 to index
    %c0_2 = arith.constant 0 : index
    %c0_3 = arith.constant 0 : index
    %4 = vector.load %arg0[%3, %c0_2, %c0_3] : memref<5x2x256xf32, #tpu.memory_space<vmem>>, vector<1x2x256xf32>
    %5 = vector.shape_cast %4 : vector<1x2x256xf32> to vector<2x256xf32>
    %6 = arith.truncf %1 : vector<2x64xf32> to vector<2x64xbf16>
    %cst_4 = arith.constant dense<0.000000e+00> : vector<2x256xf32>
    %7 = tpu.matmul %6, %0, %cst_4 {dimension_numbers = #tpu.dot_dimension_numbers<[1], [0], [0], [1], [0, 0, 1, 1], [], []>} : vector<2x64xbf16>, vector<64x256xbf16>, vector<2x256xf32> -> vector<2x256xf32>
    %8 = arith.addf %5, %7 : vector<2x256xf32>
    %9 = vector.extract_strided_slice %8 {offsets = [0, 0], sizes = [2, 64], strides = [1, 1]} : vector<2x256xf32> to vector<2x64xf32>
    %10 = arith.negf %9 : vector<2x64xf32>
    %11 = math.exp %10 : vector<2x64xf32>
    %cst_5 = arith.constant 1.000000e+00 : f32
    %12 = vector.broadcast %cst_5 : f32 to vector<2x64xf32>
    %13 = arith.addf %12, %11 : vector<2x64xf32>
    %14 = arith.divf %12, %13 : vector<2x64xf32>
    %15 = vector.extract_strided_slice %8 {offsets = [0, 64], sizes = [2, 64], strides = [1, 1]} : vector<2x256xf32> to vector<2x64xf32>
    %16 = arith.negf %15 : vector<2x64xf32>
    %17 = math.exp %16 : vector<2x64xf32>
    %cst_6 = arith.constant 1.000000e+00 : f32
    %18 = vector.broadcast %cst_6 : f32 to vector<2x64xf32>
    %19 = arith.addf %18, %17 : vector<2x64xf32>
    %20 = arith.divf %18, %19 : vector<2x64xf32>
    %21 = vector.extract_strided_slice %8 {offsets = [0, 128], sizes = [2, 64], strides = [1, 1]} : vector<2x256xf32> to vector<2x64xf32>
    %22 = math.tanh %21 : vector<2x64xf32>
    %23 = vector.extract_strided_slice %8 {offsets = [0, 192], sizes = [2, 64], strides = [1, 1]} : vector<2x256xf32> to vector<2x64xf32>
    %24 = arith.negf %23 : vector<2x64xf32>
    %25 = math.exp %24 : vector<2x64xf32>
    %cst_7 = arith.constant 1.000000e+00 : f32
    %26 = vector.broadcast %cst_7 : f32 to vector<2x64xf32>
    %27 = arith.addf %26, %25 : vector<2x64xf32>
    %28 = arith.divf %26, %27 : vector<2x64xf32>
    %29 = arith.mulf %20, %2 : vector<2x64xf32>
    %30 = arith.mulf %14, %22 : vector<2x64xf32>
    %31 = arith.addf %29, %30 : vector<2x64xf32>
    %32 = math.tanh %31 : vector<2x64xf32>
    %33 = arith.mulf %28, %32 : vector<2x64xf32>
    %34 = arith.index_cast %c0_i32 : i32 to index
    %c0_8 = arith.constant 0 : index
    %c0_9 = arith.constant 0 : index
    %35 = vector.load %arg2[%34, %c0_8, %c0_9] : memref<5x2x64xf32, #tpu.memory_space<vmem>>, vector<1x2x64xf32>
    %36 = vector.shape_cast %35 : vector<1x2x64xf32> to vector<2x64xf32>
    %37 = vector.shape_cast %33 : vector<2x64xf32> to vector<1x2x64xf32>
    tpu.vector_store %arg2[%34, %c0_8, %c0_9], %37 {strides = array<i32>} : memref<5x2x64xf32, #tpu.memory_space<vmem>>, vector<1x2x64xf32>,
    %c1_i32 = arith.constant 1 : i32
    %38 = arith.index_cast %c1_i32 : i32 to index
    %c0_10 = arith.constant 0 : index
    %c0_11 = arith.constant 0 : index
    %39 = vector.load %arg0[%38, %c0_10, %c0_11] : memref<5x2x256xf32, #tpu.memory_space<vmem>>, vector<1x2x256xf32>
    %40 = vector.shape_cast %39 : vector<1x2x256xf32> to vector<2x256xf32>
    %41 = arith.truncf %33 : vector<2x64xf32> to vector<2x64xbf16>
    %cst_12 = arith.constant dense<0.000000e+00> : vector<2x256xf32>
    %42 = tpu.matmul %41, %0, %cst_12 {dimension_numbers = #tpu.dot_dimension_numbers<[1], [0], [0], [1], [0, 0, 1, 1], [], []>} : vector<2x64xbf16>, vector<64x256xbf16>, vector<2x256xf32> -> vector<2x256xf32>
    %43 = arith.addf %40, %42 : vector<2x256xf32>
    %44 = vector.extract_strided_slice %43 {offsets = [0, 0], sizes = [2, 64], strides = [1, 1]} : vector<2x256xf32> to vector<2x64xf32>
    %45 = arith.negf %44 : vector<2x64xf32>
    %46 = math.exp %45 : vector<2x64xf32>
    %cst_13 = arith.constant 1.000000e+00 : f32
    %47 = vector.broadcast %cst_13 : f32 to vector<2x64xf32>
    %48 = arith.addf %47, %46 : vector<2x64xf32>
    %49 = arith.divf %47, %48 : vector<2x64xf32>
    %50 = vector.extract_strided_slice %43 {offsets = [0, 64], sizes = [2, 64], strides = [1, 1]} : vector<2x256xf32> to vector<2x64xf32>
    %51 = arith.negf %50 : vector<2x64xf32>
    %52 = math.exp %51 : vector<2x64xf32>
    %cst_14 = arith.constant 1.000000e+00 : f32
    %53 = vector.broadcast %cst_14 : f32 to vector<2x64xf32>
    %54 = arith.addf %53, %52 : vector<2x64xf32>
    %55 = arith.divf %53, %54 : vector<2x64xf32>
    %56 = vector.extract_strided_slice %43 {offsets = [0, 128], sizes = [2, 64], strides = [1, 1]} : vector<2x256xf32> to vector<2x64xf32>
    %57 = math.tanh %56 : vector<2x64xf32>
    %58 = vector.extract_strided_slice %43 {offsets = [0, 192], sizes = [2, 64], strides = [1, 1]} : vector<2x256xf32> to vector<2x64xf32>
    %59 = arith.negf %58 : vector<2x64xf32>
    %60 = math.exp %59 : vector<2x64xf32>
    %cst_15 = arith.constant 1.000000e+00 : f32
    %61 = vector.broadcast %cst_15 : f32 to vector<2x64xf32>
    %62 = arith.addf %61, %60 : vector<2x64xf32>
    %63 = arith.divf %61, %62 : vector<2x64xf32>
    %64 = arith.mulf %55, %31 : vector<2x64xf32>
    %65 = arith.mulf %49, %57 : vector<2x64xf32>
    %66 = arith.addf %64, %65 : vector<2x64xf32>
    %67 = math.tanh %66 : vector<2x64xf32>
    %68 = arith.mulf %63, %67 : vector<2x64xf32>
    %69 = arith.index_cast %c1_i32 : i32 to index
    %c0_16 = arith.constant 0 : index
    %c0_17 = arith.constant 0 : index
    %70 = vector.load %arg2[%69, %c0_16, %c0_17] : memref<5x2x64xf32, #tpu.memory_space<vmem>>, vector<1x2x64xf32>
    %71 = vector.shape_cast %70 : vector<1x2x64xf32> to vector<2x64xf32>
    %72 = vector.shape_cast %68 : vector<2x64xf32> to vector<1x2x64xf32>
    tpu.vector_store %arg2[%69, %c0_16, %c0_17], %72 {strides = array<i32>} : memref<5x2x64xf32, #tpu.memory_space<vmem>>, vector<1x2x64xf32>,
    %c2_i32 = arith.constant 2 : i32
    %73 = arith.index_cast %c2_i32 : i32 to index
    %c0_18 = arith.constant 0 : index
    %c0_19 = arith.constant 0 : index
    %74 = vector.load %arg0[%73, %c0_18, %c0_19] : memref<5x2x256xf32, #tpu.memory_space<vmem>>, vector<1x2x256xf32>
    %75 = vector.shape_cast %74 : vector<1x2x256xf32> to vector<2x256xf32>
    %76 = arith.truncf %68 : vector<2x64xf32> to vector<2x64xbf16>
    %cst_20 = arith.constant dense<0.000000e+00> : vector<2x256xf32>
    %77 = tpu.matmul %76, %0, %cst_20 {dimension_numbers = #tpu.dot_dimension_numbers<[1], [0], [0], [1], [0, 0, 1, 1], [], []>} : vector<2x64xbf16>, vector<64x256xbf16>, vector<2x256xf32> -> vector<2x256xf32>
    %78 = arith.addf %75, %77 : vector<2x256xf32>
    %79 = vector.extract_strided_slice %78 {offsets = [0, 0], sizes = [2, 64], strides = [1, 1]} : vector<2x256xf32> to vector<2x64xf32>
    %80 = arith.negf %79 : vector<2x64xf32>
    %81 = math.exp %80 : vector<2x64xf32>
    %cst_21 = arith.constant 1.000000e+00 : f32
    %82 = vector.broadcast %cst_21 : f32 to vector<2x64xf32>
    %83 = arith.addf %82, %81 : vector<2x64xf32>
    %84 = arith.divf %82, %83 : vector<2x64xf32>
    %85 = vector.extract_strided_slice %78 {offsets = [0, 64], sizes = [2, 64], strides = [1, 1]} : vector<2x256xf32> to vector<2x64xf32>
    %86 = arith.negf %85 : vector<2x64xf32>
    %87 = math.exp %86 : vector<2x64xf32>
    %cst_22 = arith.constant 1.000000e+00 : f32
    %88 = vector.broadcast %cst_22 : f32 to vector<2x64xf32>
    %89 = arith.addf %88, %87 : vector<2x64xf32>
    %90 = arith.divf %88, %89 : vector<2x64xf32>
    %91 = vector.extract_strided_slice %78 {offsets = [0, 128], sizes = [2, 64], strides = [1, 1]} : vector<2x256xf32> to vector<2x64xf32>
    %92 = math.tanh %91 : vector<2x64xf32>
    %93 = vector.extract_strided_slice %78 {offsets = [0, 192], sizes = [2, 64], strides = [1, 1]} : vector<2x256xf32> to vector<2x64xf32>
    %94 = arith.negf %93 : vector<2x64xf32>
    %95 = math.exp %94 : vector<2x64xf32>
    %cst_23 = arith.constant 1.000000e+00 : f32
    %96 = vector.broadcast %cst_23 : f32 to vector<2x64xf32>
    %97 = arith.addf %96, %95 : vector<2x64xf32>
    %98 = arith.divf %96, %97 : vector<2x64xf32>
    %99 = arith.mulf %90, %66 : vector<2x64xf32>
    %100 = arith.mulf %84, %92 : vector<2x64xf32>
    %101 = arith.addf %99, %100 : vector<2x64xf32>
    %102 = math.tanh %101 : vector<2x64xf32>
    %103 = arith.mulf %98, %102 : vector<2x64xf32>
    %104 = arith.index_cast %c2_i32 : i32 to index
    %c0_24 = arith.constant 0 : index
    %c0_25 = arith.constant 0 : index
    %105 = vector.load %arg2[%104, %c0_24, %c0_25] : memref<5x2x64xf32, #tpu.memory_space<vmem>>, vector<1x2x64xf32>
    %106 = vector.shape_cast %105 : vector<1x2x64xf32> to vector<2x64xf32>
    %107 = vector.shape_cast %103 : vector<2x64xf32> to vector<1x2x64xf32>
    tpu.vector_store %arg2[%104, %c0_24, %c0_25], %107 {strides = array<i32>} : memref<5x2x64xf32, #tpu.memory_space<vmem>>, vector<1x2x64xf32>,
    %c3_i32 = arith.constant 3 : i32
    %108 = arith.index_cast %c3_i32 : i32 to index
    %c0_26 = arith.constant 0 : index
    %c0_27 = arith.constant 0 : index
    %109 = vector.load %arg0[%108, %c0_26, %c0_27] : memref<5x2x256xf32, #tpu.memory_space<vmem>>, vector<1x2x256xf32>
    %110 = vector.shape_cast %109 : vector<1x2x256xf32> to vector<2x256xf32>
    %111 = arith.truncf %103 : vector<2x64xf32> to vector<2x64xbf16>
    %cst_28 = arith.constant dense<0.000000e+00> : vector<2x256xf32>
    %112 = tpu.matmul %111, %0, %cst_28 {dimension_numbers = #tpu.dot_dimension_numbers<[1], [0], [0], [1], [0, 0, 1, 1], [], []>} : vector<2x64xbf16>, vector<64x256xbf16>, vector<2x256xf32> -> vector<2x256xf32>
    %113 = arith.addf %110, %112 : vector<2x256xf32>
    %114 = vector.extract_strided_slice %113 {offsets = [0, 0], sizes = [2, 64], strides = [1, 1]} : vector<2x256xf32> to vector<2x64xf32>
    %115 = arith.negf %114 : vector<2x64xf32>
    %116 = math.exp %115 : vector<2x64xf32>
    %cst_29 = arith.constant 1.000000e+00 : f32
    %117 = vector.broadcast %cst_29 : f32 to vector<2x64xf32>
    %118 = arith.addf %117, %116 : vector<2x64xf32>
    %119 = arith.divf %117, %118 : vector<2x64xf32>
    %120 = vector.extract_strided_slice %113 {offsets = [0, 64], sizes = [2, 64], strides = [1, 1]} : vector<2x256xf32> to vector<2x64xf32>
    %121 = arith.negf %120 : vector<2x64xf32>
    %122 = math.exp %121 : vector<2x64xf32>
    %cst_30 = arith.constant 1.000000e+00 : f32
    %123 = vector.broadcast %cst_30 : f32 to vector<2x64xf32>
    %124 = arith.addf %123, %122 : vector<2x64xf32>
    %125 = arith.divf %123, %124 : vector<2x64xf32>
    %126 = vector.extract_strided_slice %113 {offsets = [0, 128], sizes = [2, 64], strides = [1, 1]} : vector<2x256xf32> to vector<2x64xf32>
    %127 = math.tanh %126 : vector<2x64xf32>
    %128 = vector.extract_strided_slice %113 {offsets = [0, 192], sizes = [2, 64], strides = [1, 1]} : vector<2x256xf32> to vector<2x64xf32>
    %129 = arith.negf %128 : vector<2x64xf32>
    %130 = math.exp %129 : vector<2x64xf32>
    %cst_31 = arith.constant 1.000000e+00 : f32
    %131 = vector.broadcast %cst_31 : f32 to vector<2x64xf32>
    %132 = arith.addf %131, %130 : vector<2x64xf32>
    %133 = arith.divf %131, %132 : vector<2x64xf32>
    %134 = arith.mulf %125, %101 : vector<2x64xf32>
    %135 = arith.mulf %119, %127 : vector<2x64xf32>
    %136 = arith.addf %134, %135 : vector<2x64xf32>
    %137 = math.tanh %136 : vector<2x64xf32>
    %138 = arith.mulf %133, %137 : vector<2x64xf32>
    %139 = arith.index_cast %c3_i32 : i32 to index
    %c0_32 = arith.constant 0 : index
    %c0_33 = arith.constant 0 : index
    %140 = vector.load %arg2[%139, %c0_32, %c0_33] : memref<5x2x64xf32, #tpu.memory_space<vmem>>, vector<1x2x64xf32>
    %141 = vector.shape_cast %140 : vector<1x2x64xf32> to vector<2x64xf32>
    %142 = vector.shape_cast %138 : vector<2x64xf32> to vector<1x2x64xf32>
    tpu.vector_store %arg2[%139, %c0_32, %c0_33], %142 {strides = array<i32>} : memref<5x2x64xf32, #tpu.memory_space<vmem>>, vector<1x2x64xf32>,
    %c4_i32 = arith.constant 4 : i32
    %143 = arith.index_cast %c4_i32 : i32 to index
    %c0_34 = arith.constant 0 : index
    %c0_35 = arith.constant 0 : index
    %144 = vector.load %arg0[%143, %c0_34, %c0_35] : memref<5x2x256xf32, #tpu.memory_space<vmem>>, vector<1x2x256xf32>
    %145 = vector.shape_cast %144 : vector<1x2x256xf32> to vector<2x256xf32>
    %146 = arith.truncf %138 : vector<2x64xf32> to vector<2x64xbf16>
    %cst_36 = arith.constant dense<0.000000e+00> : vector<2x256xf32>
    %147 = tpu.matmul %146, %0, %cst_36 {dimension_numbers = #tpu.dot_dimension_numbers<[1], [0], [0], [1], [0, 0, 1, 1], [], []>} : vector<2x64xbf16>, vector<64x256xbf16>, vector<2x256xf32> -> vector<2x256xf32>
    %148 = arith.addf %145, %147 : vector<2x256xf32>
    %149 = vector.extract_strided_slice %148 {offsets = [0, 0], sizes = [2, 64], strides = [1, 1]} : vector<2x256xf32> to vector<2x64xf32>
    %150 = arith.negf %149 : vector<2x64xf32>
    %151 = math.exp %150 : vector<2x64xf32>
    %cst_37 = arith.constant 1.000000e+00 : f32
    %152 = vector.broadcast %cst_37 : f32 to vector<2x64xf32>
    %153 = arith.addf %152, %151 : vector<2x64xf32>
    %154 = arith.divf %152, %153 : vector<2x64xf32>
    %155 = vector.extract_strided_slice %148 {offsets = [0, 64], sizes = [2, 64], strides = [1, 1]} : vector<2x256xf32> to vector<2x64xf32>
    %156 = arith.negf %155 : vector<2x64xf32>
    %157 = math.exp %156 : vector<2x64xf32>
    %cst_38 = arith.constant 1.000000e+00 : f32
    %158 = vector.broadcast %cst_38 : f32 to vector<2x64xf32>
    %159 = arith.addf %158, %157 : vector<2x64xf32>
    %160 = arith.divf %158, %159 : vector<2x64xf32>
    %161 = vector.extract_strided_slice %148 {offsets = [0, 128], sizes = [2, 64], strides = [1, 1]} : vector<2x256xf32> to vector<2x64xf32>
    %162 = math.tanh %161 : vector<2x64xf32>
    %163 = vector.extract_strided_slice %148 {offsets = [0, 192], sizes = [2, 64], strides = [1, 1]} : vector<2x256xf32> to vector<2x64xf32>
    %164 = arith.negf %163 : vector<2x64xf32>
    %165 = math.exp %164 : vector<2x64xf32>
    %cst_39 = arith.constant 1.000000e+00 : f32
    %166 = vector.broadcast %cst_39 : f32 to vector<2x64xf32>
    %167 = arith.addf %166, %165 : vector<2x64xf32>
    %168 = arith.divf %166, %167 : vector<2x64xf32>
    %169 = arith.mulf %160, %136 : vector<2x64xf32>
    %170 = arith.mulf %154, %162 : vector<2x64xf32>
    %171 = arith.addf %169, %170 : vector<2x64xf32>
    %172 = math.tanh %171 : vector<2x64xf32>
    %173 = arith.mulf %168, %172 : vector<2x64xf32>
    %174 = arith.index_cast %c4_i32 : i32 to index
    %c0_40 = arith.constant 0 : index
    %c0_41 = arith.constant 0 : index
    %175 = vector.load %arg2[%174, %c0_40, %c0_41] : memref<5x2x64xf32, #tpu.memory_space<vmem>>, vector<1x2x64xf32>
    %176 = vector.shape_cast %175 : vector<1x2x64xf32> to vector<2x64xf32>
    %177 = vector.shape_cast %173 : vector<2x64xf32> to vector<1x2x64xf32>
    tpu.vector_store %arg2[%174, %c0_40, %c0_41], %177 {strides = array<i32>} : memref<5x2x64xf32, #tpu.memory_space<vmem>>, vector<1x2x64xf32>,
    %c5_i32 = arith.constant 5 : i32
    return
  }
}

module attributes {stable_mosaic.version = 11 : i64} {
  func.func @_linear_ln_kernel(%arg0: memref<10x64xf32, #tpu.memory_space<vmem>>, %arg1: memref<64x128xbf16, #tpu.memory_space<vmem>>, %arg2: memref<1x128xf32, #tpu.memory_space<vmem>>, %arg3: memref<1x128xf32, #tpu.memory_space<vmem>>, %arg4: memref<1x128xf32, #tpu.memory_space<vmem>>, %arg5: memref<10x128xf32, #tpu.memory_space<vmem>>) attributes {dimension_semantics = [], scalar_prefetch = 0 : i64, scratch_operands = 0 : i64, tpu.core_type = #tpu.core_type<tc>} {
    %c0 = arith.constant 0 : index
    %c0_0 = arith.constant 0 : index
    %0 = vector.load %arg0[%c0, %c0_0] : memref<10x64xf32, #tpu.memory_space<vmem>>, vector<10x64xf32>
    %1 = arith.truncf %0 : vector<10x64xf32> to vector<10x64xbf16>
    %c0_1 = arith.constant 0 : index
    %c0_2 = arith.constant 0 : index
    %2 = vector.load %arg1[%c0_1, %c0_2] : memref<64x128xbf16, #tpu.memory_space<vmem>>, vector<64x128xbf16>
    %cst = arith.constant dense<0.000000e+00> : vector<10x128xf32>
    %3 = tpu.matmul %1, %2, %cst {dimension_numbers = #tpu.dot_dimension_numbers<[1], [0], [0], [1], [0, 0, 1, 1], [], []>} : vector<10x64xbf16>, vector<64x128xbf16>, vector<10x128xf32> -> vector<10x128xf32>
    %c0_3 = arith.constant 0 : index
    %c0_4 = arith.constant 0 : index
    %4 = vector.load %arg2[%c0_3, %c0_4] : memref<1x128xf32, #tpu.memory_space<vmem>>, vector<1x128xf32>
    %5 = vector.broadcast %4 : vector<1x128xf32> to vector<10x128xf32>
    %6 = arith.addf %3, %5 : vector<10x128xf32>
    %c0_5 = arith.constant 0 : index
    %c0_6 = arith.constant 0 : index
    %7 = vector.load %arg3[%c0_5, %c0_6] : memref<1x128xf32, #tpu.memory_space<vmem>>, vector<1x128xf32>
    %c0_7 = arith.constant 0 : index
    %c0_8 = arith.constant 0 : index
    %8 = vector.load %arg4[%c0_7, %c0_8] : memref<1x128xf32, #tpu.memory_space<vmem>>, vector<1x128xf32>
    %cst_9 = arith.constant dense<0.000000e+00> : vector<10xf32>
    %9 = vector.multi_reduction <add>, %6, %cst_9 [1] : vector<10x128xf32> to vector<10xf32>
    %10 = vector.shape_cast %9 : vector<10xf32> to vector<10x1xf32>
    %cst_10 = arith.constant 1.280000e+02 : f32
    %11 = vector.broadcast %cst_10 : f32 to vector<10x1xf32>
    %12 = arith.divf %10, %11 : vector<10x1xf32>
    %13 = vector.broadcast %12 : vector<10x1xf32> to vector<10x128xf32>
    %14 = arith.subf %6, %13 : vector<10x128xf32>
    %15 = arith.mulf %14, %14 : vector<10x128xf32>
    %cst_11 = arith.constant dense<0.000000e+00> : vector<10xf32>
    %16 = vector.multi_reduction <add>, %15, %cst_11 [1] : vector<10x128xf32> to vector<10xf32>
    %17 = vector.shape_cast %16 : vector<10xf32> to vector<10x1xf32>
    %cst_12 = arith.constant 1.280000e+02 : f32
    %18 = vector.broadcast %cst_12 : f32 to vector<10x1xf32>
    %19 = arith.divf %17, %18 : vector<10x1xf32>
    %20 = vector.broadcast %12 : vector<10x1xf32> to vector<10x128xf32>
    %21 = arith.subf %6, %20 : vector<10x128xf32>
    %cst_13 = arith.constant 9.99999974E-6 : f32
    %22 = vector.broadcast %cst_13 : f32 to vector<10x1xf32>
    %23 = arith.addf %19, %22 : vector<10x1xf32>
    %24 = math.rsqrt %23 : vector<10x1xf32>
    %25 = vector.broadcast %24 : vector<10x1xf32> to vector<10x128xf32>
    %26 = arith.mulf %21, %25 : vector<10x128xf32>
    %27 = vector.broadcast %7 : vector<1x128xf32> to vector<10x128xf32>
    %28 = arith.mulf %26, %27 : vector<10x128xf32>
    %29 = vector.broadcast %8 : vector<1x128xf32> to vector<10x128xf32>
    %30 = arith.addf %28, %29 : vector<10x128xf32>
    %c0_14 = arith.constant 0 : index
    %c0_15 = arith.constant 0 : index
    %31 = vector.load %arg5[%c0_14, %c0_15] : memref<10x128xf32, #tpu.memory_space<vmem>>, vector<10x128xf32>
    tpu.vector_store %arg5[%c0_14, %c0_15], %30 {strides = array<i32>} : memref<10x128xf32, #tpu.memory_space<vmem>>, vector<10x128xf32>,
    return
  }
}

module attributes {stable_mosaic.version = 11 : i64} {
  func.func @_joiner_kernel(%arg0: i32, %arg1: memref<1x6x128xf32, #tpu.memory_space<vmem>>, %arg2: memref<1x5x128xf32, #tpu.memory_space<vmem>>, %arg3: memref<128x128xbf16, #tpu.memory_space<vmem>>, %arg4: memref<1x128xf32, #tpu.memory_space<vmem>>, %arg5: memref<1x5x6x128xf32, #tpu.memory_space<vmem>>) attributes {dimension_semantics = [#tpu.dimension_semantics<parallel>], iteration_bounds = array<i64: 2>, scalar_prefetch = 0 : i64, scratch_operands = 0 : i64, tpu.core_type = #tpu.core_type<tc>, window_params = [{transform_indices = @transform_0, window_bounds = array<i64: 1, 6, 128>}, {transform_indices = @transform_1, window_bounds = array<i64: 1, 5, 128>}, {pipeline_mode = #tpu.pipeline_mode<synchronous>, transform_indices = @transform_2, window_bounds = array<i64: 128, 128>}, {pipeline_mode = #tpu.pipeline_mode<synchronous>, transform_indices = @transform_3, window_bounds = array<i64: 1, 128>}, {transform_indices = @transform_4, window_bounds = array<i64: 1, 5, 6, 128>}]} {
    %c0 = arith.constant 0 : index
    %c0_0 = arith.constant 0 : index
    %c0_1 = arith.constant 0 : index
    %0 = vector.load %arg1[%c0, %c0_0, %c0_1] : memref<1x6x128xf32, #tpu.memory_space<vmem>>, vector<1x6x128xf32>
    %1 = vector.shape_cast %0 : vector<1x6x128xf32> to vector<6x128xf32>
    %c0_2 = arith.constant 0 : index
    %c0_3 = arith.constant 0 : index
    %2 = vector.load %arg3[%c0_2, %c0_3] : memref<128x128xbf16, #tpu.memory_space<vmem>>, vector<128x128xbf16>
    %c0_4 = arith.constant 0 : index
    %c0_5 = arith.constant 0 : index
    %3 = vector.load %arg4[%c0_4, %c0_5] : memref<1x128xf32, #tpu.memory_space<vmem>>, vector<1x128xf32>
    %c0_6 = arith.constant 0 : index
    %c0_7 = arith.constant 0 : index
    %c0_8 = arith.constant 0 : index
    %4 = vector.load %arg2[%c0_6, %c0_7, %c0_8] : memref<1x5x128xf32, #tpu.memory_space<vmem>>, vector<1x1x128xf32>
    %5 = vector.shape_cast %4 : vector<1x1x128xf32> to vector<1x128xf32>
    %6 = vector.broadcast %5 : vector<1x128xf32> to vector<6x128xf32>
    %7 = arith.addf %1, %6 : vector<6x128xf32>
    %cst = arith.constant 0.000000e+00 : f32
    %8 = vector.broadcast %cst : f32 to vector<6x128xf32>
    %9 = arith.maximumf %7, %8 : vector<6x128xf32>
    %10 = arith.truncf %9 : vector<6x128xf32> to vector<6x128xbf16>
    %cst_9 = arith.constant dense<0.000000e+00> : vector<6x128xf32>
    %11 = tpu.matmul %10, %2, %cst_9 {dimension_numbers = #tpu.dot_dimension_numbers<[1], [0], [0], [1], [0, 0, 1, 1], [], []>} : vector<6x128xbf16>, vector<128x128xbf16>, vector<6x128xf32> -> vector<6x128xf32>
    %12 = vector.broadcast %3 : vector<1x128xf32> to vector<6x128xf32>
    %13 = arith.addf %11, %12 : vector<6x128xf32>
    %c0_10 = arith.constant 0 : index
    %c0_11 = arith.constant 0 : index
    %c0_12 = arith.constant 0 : index
    %c0_13 = arith.constant 0 : index
    %14 = vector.load %arg5[%c0_10, %c0_11, %c0_12, %c0_13] : memref<1x5x6x128xf32, #tpu.memory_space<vmem>>, vector<1x1x6x128xf32>
    %15 = vector.shape_cast %14 : vector<1x1x6x128xf32> to vector<6x128xf32>
    %16 = vector.shape_cast %13 : vector<6x128xf32> to vector<1x1x6x128xf32>
    tpu.vector_store %arg5[%c0_10, %c0_11, %c0_12, %c0_13], %16 {strides = array<i32>} : memref<1x5x6x128xf32, #tpu.memory_space<vmem>>, vector<1x1x6x128xf32>,
    %c0_14 = arith.constant 0 : index
    %c1 = arith.constant 1 : index
    %c0_15 = arith.constant 0 : index
    %17 = vector.load %arg2[%c0_14, %c1, %c0_15] : memref<1x5x128xf32, #tpu.memory_space<vmem>>, vector<1x1x128xf32>
    %18 = vector.shape_cast %17 : vector<1x1x128xf32> to vector<1x128xf32>
    %19 = vector.broadcast %18 : vector<1x128xf32> to vector<6x128xf32>
    %20 = arith.addf %1, %19 : vector<6x128xf32>
    %cst_16 = arith.constant 0.000000e+00 : f32
    %21 = vector.broadcast %cst_16 : f32 to vector<6x128xf32>
    %22 = arith.maximumf %20, %21 : vector<6x128xf32>
    %23 = arith.truncf %22 : vector<6x128xf32> to vector<6x128xbf16>
    %cst_17 = arith.constant dense<0.000000e+00> : vector<6x128xf32>
    %24 = tpu.matmul %23, %2, %cst_17 {dimension_numbers = #tpu.dot_dimension_numbers<[1], [0], [0], [1], [0, 0, 1, 1], [], []>} : vector<6x128xbf16>, vector<128x128xbf16>, vector<6x128xf32> -> vector<6x128xf32>
    %25 = vector.broadcast %3 : vector<1x128xf32> to vector<6x128xf32>
    %26 = arith.addf %24, %25 : vector<6x128xf32>
    %c0_18 = arith.constant 0 : index
    %c1_19 = arith.constant 1 : index
    %c0_20 = arith.constant 0 : index
    %c0_21 = arith.constant 0 : index
    %27 = vector.load %arg5[%c0_18, %c1_19, %c0_20, %c0_21] : memref<1x5x6x128xf32, #tpu.memory_space<vmem>>, vector<1x1x6x128xf32>
    %28 = vector.shape_cast %27 : vector<1x1x6x128xf32> to vector<6x128xf32>
    %29 = vector.shape_cast %26 : vector<6x128xf32> to vector<1x1x6x128xf32>
    tpu.vector_store %arg5[%c0_18, %c1_19, %c0_20, %c0_21], %29 {strides = array<i32>} : memref<1x5x6x128xf32, #tpu.memory_space<vmem>>, vector<1x1x6x128xf32>,
    %c0_22 = arith.constant 0 : index
    %c2 = arith.constant 2 : index
    %c0_23 = arith.constant 0 : index
    %30 = vector.load %arg2[%c0_22, %c2, %c0_23] : memref<1x5x128xf32, #tpu.memory_space<vmem>>, vector<1x1x128xf32>
    %31 = vector.shape_cast %30 : vector<1x1x128xf32> to vector<1x128xf32>
    %32 = vector.broadcast %31 : vector<1x128xf32> to vector<6x128xf32>
    %33 = arith.addf %1, %32 : vector<6x128xf32>
    %cst_24 = arith.constant 0.000000e+00 : f32
    %34 = vector.broadcast %cst_24 : f32 to vector<6x128xf32>
    %35 = arith.maximumf %33, %34 : vector<6x128xf32>
    %36 = arith.truncf %35 : vector<6x128xf32> to vector<6x128xbf16>
    %cst_25 = arith.constant dense<0.000000e+00> : vector<6x128xf32>
    %37 = tpu.matmul %36, %2, %cst_25 {dimension_numbers = #tpu.dot_dimension_numbers<[1], [0], [0], [1], [0, 0, 1, 1], [], []>} : vector<6x128xbf16>, vector<128x128xbf16>, vector<6x128xf32> -> vector<6x128xf32>
    %38 = vector.broadcast %3 : vector<1x128xf32> to vector<6x128xf32>
    %39 = arith.addf %37, %38 : vector<6x128xf32>
    %c0_26 = arith.constant 0 : index
    %c2_27 = arith.constant 2 : index
    %c0_28 = arith.constant 0 : index
    %c0_29 = arith.constant 0 : index
    %40 = vector.load %arg5[%c0_26, %c2_27, %c0_28, %c0_29] : memref<1x5x6x128xf32, #tpu.memory_space<vmem>>, vector<1x1x6x128xf32>
    %41 = vector.shape_cast %40 : vector<1x1x6x128xf32> to vector<6x128xf32>
    %42 = vector.shape_cast %39 : vector<6x128xf32> to vector<1x1x6x128xf32>
    tpu.vector_store %arg5[%c0_26, %c2_27, %c0_28, %c0_29], %42 {strides = array<i32>} : memref<1x5x6x128xf32, #tpu.memory_space<vmem>>, vector<1x1x6x128xf32>,
    %c0_30 = arith.constant 0 : index
    %c3 = arith.constant 3 : index
    %c0_31 = arith.constant 0 : index
    %43 = vector.load %arg2[%c0_30, %c3, %c0_31] : memref<1x5x128xf32, #tpu.memory_space<vmem>>, vector<1x1x128xf32>
    %44 = vector.shape_cast %43 : vector<1x1x128xf32> to vector<1x128xf32>
    %45 = vector.broadcast %44 : vector<1x128xf32> to vector<6x128xf32>
    %46 = arith.addf %1, %45 : vector<6x128xf32>
    %cst_32 = arith.constant 0.000000e+00 : f32
    %47 = vector.broadcast %cst_32 : f32 to vector<6x128xf32>
    %48 = arith.maximumf %46, %47 : vector<6x128xf32>
    %49 = arith.truncf %48 : vector<6x128xf32> to vector<6x128xbf16>
    %cst_33 = arith.constant dense<0.000000e+00> : vector<6x128xf32>
    %50 = tpu.matmul %49, %2, %cst_33 {dimension_numbers = #tpu.dot_dimension_numbers<[1], [0], [0], [1], [0, 0, 1, 1], [], []>} : vector<6x128xbf16>, vector<128x128xbf16>, vector<6x128xf32> -> vector<6x128xf32>
    %51 = vector.broadcast %3 : vector<1x128xf32> to vector<6x128xf32>
    %52 = arith.addf %50, %51 : vector<6x128xf32>
    %c0_34 = arith.constant 0 : index
    %c3_35 = arith.constant 3 : index
    %c0_36 = arith.constant 0 : index
    %c0_37 = arith.constant 0 : index
    %53 = vector.load %arg5[%c0_34, %c3_35, %c0_36, %c0_37] : memref<1x5x6x128xf32, #tpu.memory_space<vmem>>, vector<1x1x6x128xf32>
    %54 = vector.shape_cast %53 : vector<1x1x6x128xf32> to vector<6x128xf32>
    %55 = vector.shape_cast %52 : vector<6x128xf32> to vector<1x1x6x128xf32>
    tpu.vector_store %arg5[%c0_34, %c3_35, %c0_36, %c0_37], %55 {strides = array<i32>} : memref<1x5x6x128xf32, #tpu.memory_space<vmem>>, vector<1x1x6x128xf32>,
    %c0_38 = arith.constant 0 : index
    %c4 = arith.constant 4 : index
    %c0_39 = arith.constant 0 : index
    %56 = vector.load %arg2[%c0_38, %c4, %c0_39] : memref<1x5x128xf32, #tpu.memory_space<vmem>>, vector<1x1x128xf32>
    %57 = vector.shape_cast %56 : vector<1x1x128xf32> to vector<1x128xf32>
    %58 = vector.broadcast %57 : vector<1x128xf32> to vector<6x128xf32>
    %59 = arith.addf %1, %58 : vector<6x128xf32>
    %cst_40 = arith.constant 0.000000e+00 : f32
    %60 = vector.broadcast %cst_40 : f32 to vector<6x128xf32>
    %61 = arith.maximumf %59, %60 : vector<6x128xf32>
    %62 = arith.truncf %61 : vector<6x128xf32> to vector<6x128xbf16>
    %cst_41 = arith.constant dense<0.000000e+00> : vector<6x128xf32>
    %63 = tpu.matmul %62, %2, %cst_41 {dimension_numbers = #tpu.dot_dimension_numbers<[1], [0], [0], [1], [0, 0, 1, 1], [], []>} : vector<6x128xbf16>, vector<128x128xbf16>, vector<6x128xf32> -> vector<6x128xf32>
    %64 = vector.broadcast %3 : vector<1x128xf32> to vector<6x128xf32>
    %65 = arith.addf %63, %64 : vector<6x128xf32>
    %c0_42 = arith.constant 0 : index
    %c4_43 = arith.constant 4 : index
    %c0_44 = arith.constant 0 : index
    %c0_45 = arith.constant 0 : index
    %66 = vector.load %arg5[%c0_42, %c4_43, %c0_44, %c0_45] : memref<1x5x6x128xf32, #tpu.memory_space<vmem>>, vector<1x1x6x128xf32>
    %67 = vector.shape_cast %66 : vector<1x1x6x128xf32> to vector<6x128xf32>
    %68 = vector.shape_cast %65 : vector<6x128xf32> to vector<1x1x6x128xf32>
    tpu.vector_store %arg5[%c0_42, %c4_43, %c0_44, %c0_45], %68 {strides = array<i32>} : memref<1x5x6x128xf32, #tpu.memory_space<vmem>>, vector<1x1x6x128xf32>,
    return
  }
  func.func @transform_0(%arg0: i32) -> (i32, i32, i32) {
    %c0_i32 = arith.constant 0 : i32
    %c0_i32_0 = arith.constant 0 : i32
    %c0_i32_1 = arith.constant 0 : i32
    return %arg0, %c0_i32, %c0_i32_0 : i32, i32, i32
  }
  func.func @transform_1(%arg0: i32) -> (i32, i32, i32) {
    %c0_i32 = arith.constant 0 : i32
    %c0_i32_0 = arith.constant 0 : i32
    %c0_i32_1 = arith.constant 0 : i32
    return %arg0, %c0_i32, %c0_i32_0 : i32, i32, i32
  }
  func.func @transform_2(%arg0: i32) -> (i32, i32) {
    %c0_i32 = arith.constant 0 : i32
    %c0_i32_0 = arith.constant 0 : i32
    %c0_i32_1 = arith.constant 0 : i32
    return %c0_i32, %c0_i32_0 : i32, i32
  }
  func.func @transform_3(%arg0: i32) -> (i32, i32) {
    %c0_i32 = arith.constant 0 : i32
    %c0_i32_0 = arith.constant 0 : i32
    %c0_i32_1 = arith.constant 0 : i32
    return %c0_i32, %c0_i32_0 : i32, i32
  }
  func.func @transform_4(%arg0: i32) -> (i32, i32, i32, i32) {
    %c0_i32 = arith.constant 0 : i32
    %c0_i32_0 = arith.constant 0 : i32
    %c0_i32_1 = arith.constant 0 : i32
    %c0_i32_2 = arith.constant 0 : i32
    return %arg0, %c0_i32, %c0_i32_0, %c0_i32_1 : i32, i32, i32, i32
  }
}

</mosaic_0001>

<bundles_post_ra>
// kernel: model_forward.10
= control target key start
LH: loop header
LB: loop body
LE: loop exit
PB: predicated region body
PF: predicated region fallthrough
CT: control target
= control target key end

     0   :  { %vm162_vm0 = vcmask 523264   ;;  %vm168_vm1 = vcmask 517120   ;;  %s410_s1 = inlined_call_operand.vmem [shape: f32[128,64], index: 1, kind: input, shape index: {}]   ;;  %s411_s0 = inlined_call_operand.vmem [shape: f32[42,128], index: 0, kind: input, shape index: {}]   ;;  %s412_s2 = inlined_call_operand.vmem [shape: f32[1,64], index: 2, kind: input, shape index: {}]   ;;  %s413_s3 = inlined_call_operand.vmem [shape: f32[42,64], index: 3, kind: output, shape index: {}]  }
   0x1   :  { %v20_v0 = vld [vmem:[%s410_s1] sm:$0xff]  ;;  %v21_v1 = vld [vmem:[%s410_s1 + $0x8] sm:$0xff]  ;;  %v22_v2 = vld [vmem:[%s410_s1 + $0x10] sm:$0xff] }
   0x2   :  { %v238_v3 = vpack.c.bf16 %v21_v1, %v20_v0  ;;  %v23_v4 = vld [vmem:[%s410_s1 + $0x18] sm:$0xff]  ;;  %v24_v6 = vld [vmem:[%s410_s1 + $0x20] sm:$0xff]  ;;  %v25_v7 = vld [vmem:[%s410_s1 + $0x28] sm:$0xff] }
   0x3   :  { %v242_v5 = vpack.c.bf16 %v23_v4, %v22_v2  ;;  %v246_v8 = vpack.c.bf16 %v25_v7, %v24_v6  ;;  %v16_v9 = vld [vmem:[%s411_s0 + $0x10] sm:$0xff]  ;;  %v27_v11 = vld [vmem:[%s410_s1 + $0x38] sm:$0xff]  ;;  %v14_v12 = vld [vmem:[%s411_s0] sm:$0xff] }
   0x4   :  { %270 = vmatprep.subr.bf16.mxu1 %v238_v3  ;;  %239 = vmatprep.subr.bf16.mxu0 %v238_v3  ;;  %v26_v10 = vld [vmem:[%s410_s1 + $0x30] sm:$0xff]  ;;  %v28_v14 = vld [vmem:[%s410_s1 + $0x40] sm:$0xff]  ;;  %v29_v15 = vld [vmem:[%s410_s1 + $0x48] sm:$0xff] }
   0x5   :  { %278 = vmatpush3.bf16.msra.mxu1 %v238_v3  ;;  %241 = vmatpush3.bf16.msra.mxu0 %v238_v3  ;;  %v250_v13 = vpack.c.bf16 %v27_v11, %v26_v10  ;;  %v254_v16 = vpack.c.bf16 %v29_v15, %v28_v14  ;;  %v30_v17 = vld [vmem:[%s410_s1 + $0x50] sm:$0xff]  ;;  %v31_v18 = vld [vmem:[%s410_s1 + $0x58] sm:$0xff]  ;;  %v32_v20 = vld [vmem:[%s410_s1 + $0x60] sm:$0xff] }
   0x6   :  { %271 = vmatprep.subr.bf16.mxu1 %v242_v5  ;;  %243 = vmatprep.subr.bf16.mxu0 %v242_v5  ;;  %v258_v19 = vpack.c.bf16 %v31_v18, %v30_v17  ;;  %v33_v21 = vld [vmem:[%s410_s1 + $0x68] sm:$0xff]  ;;  %v34_v23 = vld [vmem:[%s410_s1 + $0x70] sm:$0xff]  ;;  %v35_v24 = vld [vmem:[%s410_s1 + $0x78] sm:$0xff] }
   0x7   :  { %232 = vmatprep.mubr.f32.mxu1 %v16_v9  ;;  %229 = vmatprep.mubr.f32.mxu0 %v14_v12  ;;  %v262_v22 = vpack.c.bf16 %v33_v21, %v32_v20  ;;  %v266_v25 = vpack.c.bf16 %v35_v24, %v34_v23  ;;  %v17_v26 = vld [vmem:[%s411_s0 + $0x18] sm:$0xff]  ;;  %v15_v27 = vld [vmem:[%s411_s0 + $0x8] sm:$0xff]  ;;  %v18_v28 = vld [vmem:[%s411_s0 + $0x20] sm:$0xff] }
   0x8   :  { %v19_v29 = vld [vmem:[%s411_s0 + $0x28] sm:$0x3]  ;;  %v174_v30 = vld [vmem:[%s412_s2] ss:$0 sm:$0xff] }
   0x9   :  { %279 = vmatpush3.bf16.msra.mxu1 %v242_v5  ;;  %245 = vmatpush3.bf16.msra.mxu0 %v242_v5 }
   0xa   :  { %272 = vmatprep.subr.bf16.mxu1 %v246_v8  ;;  %247 = vmatprep.subr.bf16.mxu0 %v246_v8 }
   0xd   :  { %280 = vmatpush3.bf16.msra.mxu1 %v246_v8  ;;  %249 = vmatpush3.bf16.msra.mxu0 %v246_v8 }
   0xe   :  { %273 = vmatprep.subr.bf16.mxu1 %v250_v13  ;;  %251 = vmatprep.subr.bf16.mxu0 %v250_v13 }
  0x11   :  { %281 = vmatpush3.bf16.msra.mxu1 %v250_v13  ;;  %253 = vmatpush3.bf16.msra.mxu0 %v250_v13 }
  0x12   :  { %274 = vmatprep.subr.bf16.mxu1 %v254_v16  ;;  %255 = vmatprep.subr.bf16.mxu0 %v254_v16 }
  0x15   :  { %282 = vmatpush3.bf16.msra.mxu1 %v254_v16  ;;  %257 = vmatpush3.bf16.msra.mxu0 %v254_v16 }
  0x16   :  { %275 = vmatprep.subr.bf16.mxu1 %v258_v19  ;;  %259 = vmatprep.subr.bf16.mxu0 %v258_v19 }
  0x19   :  { %283 = vmatpush3.bf16.msra.mxu1 %v258_v19  ;;  %261 = vmatpush3.bf16.msra.mxu0 %v258_v19 }
  0x1a   :  { %276 = vmatprep.subr.bf16.mxu1 %v262_v22  ;;  %263 = vmatprep.subr.bf16.mxu0 %v262_v22 }
  0x1d   :  { %284 = vmatpush3.bf16.msra.mxu1 %v262_v22  ;;  %265 = vmatpush3.bf16.msra.mxu0 %v262_v22 }
  0x1e   :  { %277 = vmatprep.subr.bf16.mxu1 %v266_v25  ;;  %267 = vmatprep.subr.bf16.mxu0 %v266_v25 }
  0x21   :  { %285 = vmatpush3.bf16.msra.mxu1 %v266_v25  ;;  %269 = vmatpush3.bf16.msra.mxu0 %v266_v25 }
  0x24   :  { %233 = vmatmul.mubr.f32.vlgmr.msra.gmra.mrb[0].mxu1 %v17_v26  ;;  %230 = vmatmul.mubr.f32.vlgmr.msra.gmra.mrb[0].mxu0 %v15_v27 }
  0x25   :  { %235 = vmatprep.mubr.f32.mxu1 %v18_v28 }
  0x28   :  { %236 = vmatmul.mubr.f32.gmra.mrb[2].mxu1 %v19_v29 }
  0xf7   :  { %v234_v31 = vpop.f32.mrb[0].mxu1  ;;  %v231_v32 = vpop.f32.mrb[0].mxu0 }
  0xf8   :  { %v125_v33 = vadd.f32 %v234_v31, %v174_v30  ;;  %v119_v34 = vpop.f32.mrb[1].mxu1  ;;  %v115_v35 = vadd.f32 %v231_v32, %v174_v30  ;;  %v109_v36 = vpop.f32.mrb[1].mxu0 }
  0xf9   :  { %v120_v37 = vadd.f32 %v174_v30, %v119_v34  ;;  %v110_v38 = vadd.f32 %v174_v30, %v109_v36 }
  0xfa   :  { %v141_v39 = vadd.f32 1e-10, %v125_v33  ;;  %v139_v40 = vadd.f32 1e-10, %v115_v35 }
  0xfb   :  { %v140_v41 = vadd.f32 1e-10, %v120_v37  ;;  %v138_v42 = vadd.f32 1e-10, %v110_v38  ;;  %v237_v43 = vpop.f32.mrb[2].mxu1 }
  0xfc   :  { %286 = vlog2.f32 %v141_v39  ;;  %v135_v44 = vadd.f32 %v237_v43, %v174_v30  ;;  %v129_v45 = vpop.f32.mrb[3].mxu1 }
  0xfd   :  { %288 = vlog2.f32 %v140_v41  ;;  %v130_v46 = vadd.f32 %v174_v30, %v129_v45 }
  0xfe   :  { %290 = vlog2.f32 %v139_v40  ;;  %v143_v47 = vadd.f32 1e-10, %v135_v44 }
  0xff   :  { %292 = vlog2.f32 %v138_v42  ;;  %v142_v48 = vadd.f32 1e-10, %v130_v46 }
 0x100   :  { %294 = vlog2.f32 %v143_v47 }
 0x101   :  { %296 = vlog2.f32 %v142_v48 }
 0x106   :  { %v287_v49 = vpop.eup %286 }
 0x107   :  { %v289_v50 = vpop.eup %288  ;;  %v151_v51 = vmul.f32 0.6931472, %v287_v49 }
 0x108   :  { %v291_v52 = vpop.eup %290  ;;  %v149_v53 = vmul.f32 0.6931472, %v289_v50 }
 0x109   :  { %v293_v54 = vpop.eup %292  ;;  %v159_v55 = vmul.f32 0.4342945, %v151_v51  ;;  %v147_v56 = vmul.f32 0.6931472, %v291_v52 }
 0x10a   :  { %v295_v57 = vpop.eup %294  ;;  %v158_v58 = vmul.f32 0.4342945, %v149_v53  ;;  %v145_v59 = vmul.f32 0.6931472, %v293_v54 }
 0x10b   :  { %v297_v60 = vpop.eup %296  ;;  %166 = vst.msk [vmem:[%s413_s3 + $0x18] sm:$0xff] %vm162_vm0, %v159_v55  ;;  %v157_v61 = vmul.f32 0.4342945, %v147_v56  ;;  %v155_v62 = vmul.f32 0.6931472, %v295_v57 }
 0x10c   :  { %165 = vst.msk [vmem:[%s413_s3 + $0x10] sm:$0xff] %vm162_vm0, %v158_v58  ;;  %v156_v63 = vmul.f32 0.4342945, %v145_v59  ;;  %v153_v0 = vmul.f32 0.6931472, %v297_v60 }
 0x10d   :  { %164 = vst.msk [vmem:[%s413_s3 + $0x8] sm:$0xff] %vm162_vm0, %v157_v61  ;;  %v161_v1 = vmul.f32 0.4342945, %v155_v62 }
 0x10e   :  { %163 = vst.msk [vmem:[%s413_s3] sm:$0xff] %vm162_vm0, %v156_v63  ;;  %v160_v2 = vmul.f32 0.4342945, %v153_v0 }
 0x10f   :  { %169 = vst.msk [vmem:[%s413_s3 + $0x28] sm:$0x3] %vm168_vm1, %v161_v1 }
 0x110   :  { %167 = vst.msk [vmem:[%s413_s3 + $0x20] sm:$0xff] %vm162_vm0, %v160_v2 }

// kernel: model_forward.11
= control target key start
LH: loop header
LB: loop body
LE: loop exit
PB: predicated region body
PF: predicated region fallthrough
CT: control target
= control target key end

     0   :  { %s1752_s12 = smov 0   ;;  %s2401_s0 = inlined_call_operand.vmem [shape: f32[1536,9], index: 0, kind: input, shape index: {}]   ;;  %s2402_s1 = inlined_call_operand.vmem [shape: bf16[9,8], index: 1, kind: input, shape index: {}]   ;;  %s2403_s2 = inlined_call_operand.vmem [shape: f32[1,8], index: 2, kind: input, shape index: {}]   ;;  %s2404_s3 = inlined_call_operand.vmem [shape: f32[1536,8], index: 3, kind: output, shape index: {}]  }
   0x1 LB: > { %s1247_s13 = sadd.s32 4294967295, %s1729_s12   ;;  %p1251_p0 = scmp.ge.s32.totalorder %s1729_s12, 1  ;;  %s1729_s12 = sphi %s1752_s12, %s13_s12  }
   0x2   : > { %p138_p1 = scmp.lt.s32.totalorder %s1729_s12, 4 }
   0x4   : > { %p139_p2 = pnand %p1251_p0, %p138_p1 }
   0x5   : > { %v1466_v0 = vld [vmem:[%s2402_s1] sm:$0x1f] (!%p139_p2)   ;;  %vm382_vm0 = vcmask (!%p139_p2), 1043456   ;;  %vm383_vm1 = vcmask (!%p139_p2), 1044480   ;;  %s1252_s16 = sshll.u32 (!%p139_p2), %s1247_s13, 6  ;;  %v1731_v1 = vmov (!%p139_p2), 65535  }
   0x6   : > { %142 = sbr.rel (%p139_p2) target bundleno = 381 (0x17d), region = 32  ;;  %v384_v2 = vsel (!%p139_p2), %vm382_vm0, 4294967295, %v1731_v1  ;;  %p163_p3 = scmp.lt.s32.totalorder (!%p139_p2), %s1252_s16, 191  ;;  %vm285_vm2 = vcmask (!%p139_p2), 72704   ;;  %vm1126_vm3 = vcmask (!%p139_p2), 64512  }
   0x7   : > { %v385_v3 = vsel (!%p139_p2), %vm383_vm1, %v384_v2, 0 }
   0x8   : > { %v387_v4 = vand.u32 (!%p139_p2), %v1466_v0, %v385_v3 }
   0xa   : > { %1389 = vmatprep.subr.bf16.mxu0 (!%p139_p2), %v387_v4  ;;  %1455 = vmatprep.subr.bf16.mxu1 (!%p139_p2), %v387_v4 }
   0xb   : > { %1390 = vmatpush3.bf16.msra.mxu0 (!%p139_p2), %v387_v4  ;;  %1456 = vmatpush3.bf16.msra.mxu1 (!%p139_p2), %v387_v4 }
   0xd   : > { %s2406_s16 = smov (!%p163_p3, %s1252_s16), 191 }
   0xe   : > { %s1253_s17 = sshll.u32 %s2406_s16, 3 }
   0xf   : > { %s1771_s20 = scalar_lea.vmem %s2401_s0, %s1253_s17  ;;  %s1967_s25 = scalar_lea.vmem %s2404_s3, %s1253_s17 }
  0x10   : > { %v175_v5 = vld [vmem:[%s1771_s20] sm:$0xff]  ;;  %v176_v6 = vld [vmem:[%s1771_s20 + $0x8] sm:$0xff]  ;;  %v177_v10 = vld [vmem:[%s1771_s20 + $0x10] sm:$0xff] }
  0x11   : > { %v207_v7 = vld [vmem:[%s1771_s20 + $0x100] sm:$0xff]  ;;  %v241_v8 = vpack.c.bf16 %v176_v6, %v175_v5  ;;  %v208_v9 = vld [vmem:[%s1771_s20 + $0x108] sm:$0xff]  ;;  %v178_v11 = vld [vmem:[%s1771_s20 + $0x18] sm:$0xff] }
  0x12   : > { %v257_v12 = vpack.c.bf16 %v208_v9, %v207_v7  ;;  %v242_v13 = vpack.c.bf16 %v178_v11, %v177_v10  ;;  %v209_v14 = vld [vmem:[%s1771_s20 + $0x110] sm:$0xff]  ;;  %v210_v15 = vld [vmem:[%s1771_s20 + $0x118] sm:$0xff]  ;;  %v179_v16 = vld [vmem:[%s1771_s20 + $0x20] sm:$0xff] }
  0x13   : > { %1391 = vmatprep.mubr.msk.bf16.mxu0 %vm285_vm2, %v241_v8  ;;  %v258_v17 = vpack.c.bf16 %v210_v15, %v209_v14  ;;  %v180_v18 = vld [vmem:[%s1771_s20 + $0x28] sm:$0xff]  ;;  %v211_v19 = vld [vmem:[%s1771_s20 + $0x120] sm:$0xff]  ;;  %v181_v23 = vld [vmem:[%s1771_s20 + $0x30] sm:$0xff] }
  0x14   : > { %v212_v20 = vld [vmem:[%s1771_s20 + $0x128] sm:$0xff]  ;;  %1423 = vmatprep.mubr.msk.bf16.mxu1 %vm285_vm2, %v257_v12  ;;  %1392 = vmatmul.mubr.msk.bf16.vlgmr.msra.gmra.mrb[0].mxu0 %vm285_vm2, %v242_v13  ;;  %v243_v21 = vpack.c.bf16 %v180_v18, %v179_v16  ;;  %v182_v24 = vld [vmem:[%s1771_s20 + $0x38] sm:$0xff]  ;;  %v213_v25 = vld [vmem:[%s1771_s20 + $0x130] sm:$0xff] }
  0x15   : > { %v259_v22 = vpack.c.bf16 %v212_v20, %v211_v19  ;;  %1424 = vmatmul.mubr.msk.bf16.vlgmr.msra.gmra.mrb[0].mxu1 %vm285_vm2, %v258_v17  ;;  %v214_v26 = vld [vmem:[%s1771_s20 + $0x138] sm:$0xff]  ;;  %v183_v27 = vld [vmem:[%s1771_s20 + $0x40] sm:$0xff]  ;;  %v184_v28 = vld [vmem:[%s1771_s20 + $0x48] sm:$0xff]  ;;  %v244_v31 = vpack.c.bf16 %v182_v24, %v181_v23 }
  0x16   : > { %1395 = vmatprep.mubr.msk.bf16.mxu0 %vm285_vm2, %v243_v21  ;;  %v215_v29 = vld [vmem:[%s1771_s20 + $0x140] sm:$0xff]  ;;  %v216_v30 = vld [vmem:[%s1771_s20 + $0x148] sm:$0xff]  ;;  %v260_v32 = vpack.c.bf16 %v214_v26, %v213_v25  ;;  %v245_v33 = vpack.c.bf16 %v184_v28, %v183_v27  ;;  %v185_v35 = vld [vmem:[%s1771_s20 + $0x50] sm:$0xff] }
  0x17   : > { %1427 = vmatprep.mubr.msk.bf16.mxu1 %vm285_vm2, %v259_v22  ;;  %v261_v34 = vpack.c.bf16 %v216_v30, %v215_v29  ;;  %v186_v36 = vld [vmem:[%s1771_s20 + $0x58] sm:$0xff]  ;;  %v217_v37 = vld [vmem:[%s1771_s20 + $0x150] sm:$0xff]  ;;  %v187_v39 = vld [vmem:[%s1771_s20 + $0x60] sm:$0xff] }
  0x18   : > { %v218_v38 = vld [vmem:[%s1771_s20 + $0x158] sm:$0xff]  ;;  %v188_v40 = vld [vmem:[%s1771_s20 + $0x68] sm:$0xff]  ;;  %v219_v41 = vld [vmem:[%s1771_s20 + $0x160] sm:$0xff]  ;;  %v246_v43 = vpack.c.bf16 %v186_v36, %v185_v35 }
  0x19   : > { %v220_v42 = vld [vmem:[%s1771_s20 + $0x168] sm:$0xff]  ;;  %v262_v44 = vpack.c.bf16 %v218_v38, %v217_v37  ;;  %v247_v45 = vpack.c.bf16 %v188_v40, %v187_v39  ;;  %v189_v47 = vld [vmem:[%s1771_s20 + $0x70] sm:$0xff]  ;;  %v190_v48 = vld [vmem:[%s1771_s20 + $0x78] sm:$0xff] }
  0x1a   : > { %v263_v46 = vpack.c.bf16 %v220_v42, %v219_v41  ;;  %v221_v49 = vld [vmem:[%s1771_s20 + $0x170] sm:$0xff]  ;;  %v222_v50 = vld [vmem:[%s1771_s20 + $0x178] sm:$0xff]  ;;  %v191_v51 = vld [vmem:[%s1771_s20 + $0x80] sm:$0xff]  ;;  %v248_v55 = vpack.c.bf16 %v190_v48, %v189_v47 }
  0x1b   : > { %v192_v52 = vld [vmem:[%s1771_s20 + $0x88] sm:$0xff]  ;;  %v223_v53 = vld [vmem:[%s1771_s20 + $0x180] sm:$0xff]  ;;  %v264_v56 = vpack.c.bf16 %v222_v50, %v221_v49  ;;  %v193_v59 = vld [vmem:[%s1771_s20 + $0x90] sm:$0xff] }
  0x1c   : > { %1396 = vmatmul.mubr.msk.bf16.gmra.mrb[4].mxu0 %vm285_vm2, %v244_v31  ;;  %v224_v54 = vld [vmem:[%s1771_s20 + $0x188] sm:$0xff]  ;;  %v249_v57 = vpack.c.bf16 %v192_v52, %v191_v51  ;;  %v194_v60 = vld [vmem:[%s1771_s20 + $0x98] sm:$0xff]  ;;  %v225_v61 = vld [vmem:[%s1771_s20 + $0x190] sm:$0xff] }
  0x1d   : > { %1428 = vmatmul.mubr.msk.bf16.gmra.mrb[4].mxu1 %vm285_vm2, %v260_v32  ;;  %1399 = vmatprep.mubr.msk.bf16.mxu0 %vm285_vm2, %v245_v33  ;;  %v265_v58 = vpack.c.bf16 %v224_v54, %v223_v53  ;;  %v226_v62 = vld [vmem:[%s1771_s20 + $0x198] sm:$0xff]  ;;  %v195_v63 = vld [vmem:[%s1771_s20 + $0xa0] sm:$0xff]  ;;  %v196_v0 = vld [vmem:[%s1771_s20 + $0xa8] sm:$0xff]  ;;  %v250_v3 = vpack.c.bf16 %v194_v60, %v193_v59 }
  0x1e   : > { %1431 = vmatprep.mubr.msk.bf16.mxu1 %vm285_vm2, %v261_v34  ;;  %v227_v1 = vld [vmem:[%s1771_s20 + $0x1a0] sm:$0xff]  ;;  %v228_v2 = vld [vmem:[%s1771_s20 + $0x1a8] sm:$0xff]  ;;  %v266_v4 = vpack.c.bf16 %v226_v62, %v225_v61  ;;  %v251_v5 = vpack.c.bf16 %v196_v0, %v195_v63  ;;  %v197_v7 = vld [vmem:[%s1771_s20 + $0xb0] sm:$0xff] }
  0x1f   : > { %v267_v6 = vpack.c.bf16 %v228_v2, %v227_v1  ;;  %v198_v8 = vld [vmem:[%s1771_s20 + $0xb8] sm:$0xff]  ;;  %v229_v9 = vld [vmem:[%s1771_s20 + $0x1b0] sm:$0xff]  ;;  %v199_v11 = vld [vmem:[%s1771_s20 + $0xc0] sm:$0xff] }
  0x20   : > { %v230_v10 = vld [vmem:[%s1771_s20 + $0x1b8] sm:$0xff]  ;;  %v200_v12 = vld [vmem:[%s1771_s20 + $0xc8] sm:$0xff]  ;;  %v231_v13 = vld [vmem:[%s1771_s20 + $0x1c0] sm:$0xff]  ;;  %v252_v15 = vpack.c.bf16 %v198_v8, %v197_v7 }
  0x21   : > { %v232_v14 = vld [vmem:[%s1771_s20 + $0x1c8] sm:$0xff]  ;;  %v268_v16 = vpack.c.bf16 %v230_v10, %v229_v9  ;;  %v253_v17 = vpack.c.bf16 %v200_v12, %v199_v11  ;;  %v201_v19 = vld [vmem:[%s1771_s20 + $0xd0] sm:$0xff]  ;;  %v202_v20 = vld [vmem:[%s1771_s20 + $0xd8] sm:$0xff] }
  0x22   : > { %v269_v18 = vpack.c.bf16 %v232_v14, %v231_v13  ;;  %v233_v21 = vld [vmem:[%s1771_s20 + $0x1d0] sm:$0xff]  ;;  %v234_v22 = vld [vmem:[%s1771_s20 + $0x1d8] sm:$0xff]  ;;  %v203_v23 = vld [vmem:[%s1771_s20 + $0xe0] sm:$0xff]  ;;  %v254_v27 = vpack.c.bf16 %v202_v20, %v201_v19 }
  0x23   : > { %v204_v24 = vld [vmem:[%s1771_s20 + $0xe8] sm:$0xff]  ;;  %v235_v25 = vld [vmem:[%s1771_s20 + $0x1e0] sm:$0xff]  ;;  %v270_v28 = vpack.c.bf16 %v234_v22, %v233_v21  ;;  %v205_v31 = vld [vmem:[%s1771_s20 + $0xf0] sm:$0xff] }
  0x24   : > { %1400 = vmatmul.mubr.msk.bf16.gmra.mrb[8].mxu0 %vm285_vm2, %v246_v43  ;;  %v236_v26 = vld [vmem:[%s1771_s20 + $0x1e8] sm:$0xff]  ;;  %v255_v29 = vpack.c.bf16 %v204_v24, %v203_v23  ;;  %v206_v32 = vld [vmem:[%s1771_s20 + $0xf8] sm:$0xff]  ;;  %v237_v33 = vld [vmem:[%s1771_s20 + $0x1f0] sm:$0xff] }
  0x25   : > { %1432 = vmatmul.mubr.msk.bf16.gmra.mrb[8].mxu1 %vm285_vm2, %v262_v44  ;;  %1403 = vmatprep.mubr.msk.bf16.mxu0 %vm285_vm2, %v247_v45  ;;  %v271_v30 = vpack.c.bf16 %v236_v26, %v235_v25  ;;  %v238_v34 = vld [vmem:[%s1771_s20 + $0x1f8] sm:$0xff]  ;;  %v256_v35 = vpack.c.bf16 %v206_v32, %v205_v31  ;;  %v1872_v37 = vld [vmem:[%s2403_s2] ss:$0 sm:$0xff] }
  0x26   : > { %1435 = vmatprep.mubr.msk.bf16.mxu1 %vm285_vm2, %v263_v46  ;;  %v272_v36 = vpack.c.bf16 %v238_v34, %v237_v33 }
  0x2c   : > { %1404 = vmatmul.mubr.msk.bf16.gmra.mrb[12].mxu0 %vm285_vm2, %v248_v55 }
  0x2d   : > { %1436 = vmatmul.mubr.msk.bf16.gmra.mrb[12].mxu1 %vm285_vm2, %v264_v56  ;;  %1407 = vmatprep.mubr.msk.bf16.mxu0 %vm285_vm2, %v249_v57 }
  0x2e   : > { %1439 = vmatprep.mubr.msk.bf16.mxu1 %vm285_vm2, %v265_v58 }
  0x34   : > { %1408 = vmatmul.mubr.msk.bf16.gmra.mrb[16].mxu0 %vm285_vm2, %v250_v3 }
  0x35   : > { %1440 = vmatmul.mubr.msk.bf16.gmra.mrb[16].mxu1 %vm285_vm2, %v266_v4  ;;  %1411 = vmatprep.mubr.msk.bf16.mxu0 %vm285_vm2, %v251_v5 }
  0x36   : > { %1443 = vmatprep.mubr.msk.bf16.mxu1 %vm285_vm2, %v267_v6 }
  0x3c   : > { %1412 = vmatmul.mubr.msk.bf16.gmra.mrb[20].mxu0 %vm285_vm2, %v252_v15 }
  0x3d   : > { %1444 = vmatmul.mubr.msk.bf16.gmra.mrb[20].mxu1 %vm285_vm2, %v268_v16  ;;  %1415 = vmatprep.mubr.msk.bf16.mxu0 %vm285_vm2, %v253_v17 }
  0x3e   : > { %1447 = vmatprep.mubr.msk.bf16.mxu1 %vm285_vm2, %v269_v18 }
  0x44   : > { %1416 = vmatmul.mubr.msk.bf16.gmra.mrb[24].mxu0 %vm285_vm2, %v254_v27 }
  0x45   : > { %1448 = vmatmul.mubr.msk.bf16.gmra.mrb[24].mxu1 %vm285_vm2, %v270_v28  ;;  %1419 = vmatprep.mubr.msk.bf16.mxu0 %vm285_vm2, %v255_v29 }
  0x46   : > { %1451 = vmatprep.mubr.msk.bf16.mxu1 %vm285_vm2, %v271_v30 }
  0x4c   : > { %1420 = vmatmul.mubr.msk.bf16.gmra.mrb[28].mxu0 %vm285_vm2, %v256_v35 }
  0x4d   : > { %1452 = vmatmul.mubr.msk.bf16.gmra.mrb[28].mxu1 %vm285_vm2, %v272_v36 }
  0xe7   : > { %v1393_v38 = vpop.f32.mrb[0].mxu0 }
  0xe8   : > { %v1875_v39 = vadd.f32 %v1393_v38, %v1872_v37  ;;  %v1425_v40 = vpop.f32.mrb[0].mxu1  ;;  %v423_v41 = vpop.f32.mrb[1].mxu0 }
  0xe9   : > { %v1878_v42 = vadd.f32 %v1425_v40, %v1872_v37  ;;  %v1881_v43 = vadd.f32 %v1872_v37, %v423_v41  ;;  %v551_v44 = vpop.f32.mrb[1].mxu1  ;;  %v1394_v45 = vpop.f32.mrb[2].mxu0 }
  0xea   : > { %v1292_v46 = vmul.f32 -1.442695, %v1875_v39  ;;  %v1885_v47 = vadd.f32 %v1872_v37, %v551_v44  ;;  %v1888_v48 = vadd.f32 %v1394_v45, %v1872_v37  ;;  %v1426_v49 = vpop.f32.mrb[2].mxu1  ;;  %v426_v50 = vpop.f32.mrb[3].mxu0 }
  0xeb   : > { %v1324_v51 = vmul.f32 -1.442695, %v1878_v42  ;;  %v1290_v52 = vmul.f32 -1.442695, %v1881_v43  ;;  %v1893_v53 = vadd.f32 %v1426_v49, %v1872_v37  ;;  %v1896_v54 = vadd.f32 %v1872_v37, %v426_v50  ;;  %v554_v55 = vpop.f32.mrb[3].mxu1 }
  0xec   : > { %1467 = vpow2.f32 %v1292_v46  ;;  %v1322_v56 = vmul.f32 -1.442695, %v1885_v47  ;;  %v1293_v57 = vmul.f32 -1.442695, %v1888_v48  ;;  %v1901_v58 = vadd.f32 %v1872_v37, %v554_v55 }
  0xed   : > { %1469 = vpow2.f32 %v1324_v51  ;;  %v1325_v59 = vmul.f32 -1.442695, %v1893_v53  ;;  %v1291_v60 = vmul.f32 -1.442695, %v1896_v54 }
  0xee   : > { %1471 = vpow2.f32 %v1290_v52  ;;  %v1323_v61 = vmul.f32 -1.442695, %v1901_v58 }
  0xef   : > { %1473 = vpow2.f32 %v1322_v56  ;;  %v1397_v62 = vpop.f32.mrb[4].mxu0 }
  0xf0   : > { %1475 = vpow2.f32 %v1293_v57  ;;  %v1907_v63 = vadd.f32 %v1397_v62, %v1872_v37  ;;  %v1429_v0 = vpop.f32.mrb[4].mxu1  ;;  %v439_v1 = vpop.f32.mrb[5].mxu0 }
  0xf1   : > { %1477 = vpow2.f32 %v1325_v59  ;;  %v1910_v2 = vadd.f32 %v1429_v0, %v1872_v37  ;;  %v1913_v3 = vadd.f32 %v1872_v37, %v439_v1  ;;  %v567_v4 = vpop.f32.mrb[5].mxu1  ;;  %v1398_v5 = vpop.f32.mrb[6].mxu0 }
  0xf2   : > { %1479 = vpow2.f32 %v1291_v60  ;;  %v1296_v6 = vmul.f32 -1.442695, %v1907_v63  ;;  %v1917_v7 = vadd.f32 %v1872_v37, %v567_v4  ;;  %v1920_v8 = vadd.f32 %v1398_v5, %v1872_v37  ;;  %v1430_v9 = vpop.f32.mrb[6].mxu1  ;;  %v442_v10 = vpop.f32.mrb[7].mxu0 }
  0xf3   : > { %1481 = vpow2.f32 %v1323_v61  ;;  %v1328_v11 = vmul.f32 -1.442695, %v1910_v2  ;;  %v1294_v12 = vmul.f32 -1.442695, %v1913_v3  ;;  %v570_v13 = vpop.f32.mrb[7].mxu1  ;;  %v1933_v45 = vadd.f32 %v1430_v9, %v1872_v37 }
  0xf4   : > { %1483 = vpow2.f32 %v1296_v6  ;;  %v1326_v14 = vmul.f32 -1.442695, %v1917_v7  ;;  %v1297_v15 = vmul.f32 -1.442695, %v1920_v8  ;;  %v1936_v50 = vadd.f32 %v1872_v37, %v442_v10 }
  0xf5   : > { %1485 = vpow2.f32 %v1328_v11  ;;  %v1941_v56 = vadd.f32 %v1872_v37, %v570_v13  ;;  %v1329_v6 = vmul.f32 -1.442695, %v1933_v45 }
  0xf6   : > { %v1468_v16 = vpop.eup %1467  ;;  %1487 = vpow2.f32 %v1294_v12 }
  0xf7   : > { %v1470_v17 = vpop.eup %1469  ;;  %v872_v18 = vadd.f32 1.0, %v1468_v16  ;;  %1489 = vpow2.f32 %v1326_v14  ;;  %v1401_v19 = vpop.f32.mrb[8].mxu0  ;;  %v1295_v14 = vmul.f32 -1.442695, %v1936_v50 }
  0xf8   : > { %v1472_v20 = vpop.eup %1471  ;;  %v904_v21 = vadd.f32 1.0, %v1470_v17  ;;  %1491 = vpow2.f32 %v1297_v15  ;;  %v1433_v22 = vpop.f32.mrb[8].mxu1  ;;  %v1948_v62 = vadd.f32 %v1401_v19, %v1872_v37  ;;  %v1327_v19 = vmul.f32 -1.442695, %v1941_v56 }
  0xf9   : > { %v455_v23 = vpop.f32.mrb[9].mxu0  ;;  %v1474_v24 = vpop.eup %1473  ;;  %1493 = vrcp.f32 %v872_v18  ;;  %v870_v25 = vadd.f32 1.0, %v1472_v20  ;;  %v1956_v9 = vadd.f32 %v1433_v22, %v1872_v37 }
  0xfa   : > { %v583_v26 = vpop.f32.mrb[9].mxu1  ;;  %v1402_v27 = vpop.f32.mrb[10].mxu0  ;;  %1495 = vrcp.f32 %v904_v21  ;;  %v902_v29 = vadd.f32 1.0, %v1474_v24  ;;  %v1971_v15 = vadd.f32 %v1872_v37, %v455_v23  ;;  %v1300_v24 = vmul.f32 -1.442695, %v1948_v62 }
  0xfb   : > { %v1476_v28 = vpop.eup %1475  ;;  %v1926_v30 = vpop.f32.mrb[10].mxu1  ;;  %1497 = vrcp.f32 %v870_v25  ;;  %v1978_v20 = vadd.f32 %v1872_v37, %v583_v26  ;;  %v1983_v23 = vadd.f32 %v1402_v27, %v1872_v37 }
  0xfc   : > { %v1928_v31 = vpop.f32.mrb[11].mxu0  ;;  %v1478_v32 = vpop.eup %1477  ;;  %v873_v33 = vadd.f32 1.0, %v1476_v28  ;;  %1499 = vrcp.f32 %v902_v29  ;;  %v1332_v28 = vmul.f32 -1.442695, %v1956_v9  ;;  %v1991_v26 = vadd.f32 %v1926_v30, %v1872_v37 }
  0xfd   : > { %v1930_v34 = vpop.f32.mrb[11].mxu1  ;;  %v1480_v35 = vpop.eup %1479  ;;  %v905_v36 = vadd.f32 1.0, %v1478_v32  ;;  %v1298_v27 = vmul.f32 -1.442695, %v1971_v15  ;;  %v1999_v32 = vadd.f32 %v1872_v37, %v1928_v31 }
  0xfe   : > { %v1482_v38 = vpop.eup %1481  ;;  %1501 = vrcp.f32 %v873_v33  ;;  %v871_v40 = vadd.f32 1.0, %v1480_v35  ;;  %v1330_v35 = vmul.f32 -1.442695, %v1978_v20 }
  0xff   : > { %v1484_v41 = vpop.eup %1483  ;;  %1503 = vrcp.f32 %v905_v36  ;;  %v903_v44 = vadd.f32 1.0, %v1482_v38  ;;  %v1938_v51 = vpop.f32.mrb[12].mxu0 }
 0x100   : > { %v1486_v46 = vpop.eup %1485  ;;  %1505 = vrcp.f32 %v871_v40  ;;  %v876_v49 = vadd.f32 1.0, %v1484_v41  ;;  %v1943_v57 = vpop.f32.mrb[12].mxu1  ;;  %v2021_v41 = vadd.f32 %v1938_v51, %v1872_v37 }
 0x101   : > { %v1488_v52 = vpop.eup %1487  ;;  %1507 = vrcp.f32 %v903_v44  ;;  %v908_v55 = vadd.f32 1.0, %v1486_v46  ;;  %v1945_v59 = vpop.f32.mrb[13].mxu0 }
 0x102   : > { %v1490_v60 = vpop.eup %1489  ;;  %1509 = vrcp.f32 %v876_v49  ;;  %v874_v61 = vadd.f32 1.0, %v1488_v52  ;;  %v1950_v0 = vpop.f32.mrb[13].mxu1  ;;  %v2033_v52 = vadd.f32 %v1943_v57, %v1872_v37 }
 0x103   : > { %v1952_v1 = vpop.f32.mrb[14].mxu0  ;;  %v1492_v4 = vpop.eup %1491  ;;  %1511 = vrcp.f32 %v908_v55  ;;  %v906_v5 = vadd.f32 1.0, %v1490_v60 }
 0x104   : > { %v1958_v10 = vpop.f32.mrb[14].mxu1  ;;  %v1960_v11 = vpop.f32.mrb[15].mxu0  ;;  %1513 = vrcp.f32 %v874_v61  ;;  %v877_v13 = vadd.f32 1.0, %v1492_v4 }
 0x105   : > { %v1494_v12 = vpop.eup %1493  ;;  %v1973_v16 = vpop.f32.mrb[15].mxu1  ;;  %1515 = vrcp.f32 %v906_v5 }
 0x106   : > { %v1496_v17 = vpop.eup %1495  ;;  %v1064_v18 = vmul.f32 %v1494_v12, %v1875_v39  ;;  %1517 = vrcp.f32 %v877_v13  ;;  %v2047_v12 = vadd.f32 %v1872_v37, %v1945_v59  ;;  %v1336_v59 = vmul.f32 -1.442695, %v2033_v52 }
 0x107   : > { %v1498_v21 = vpop.eup %1497  ;;  %v1096_v22 = vmul.f32 %v1496_v17, %v1878_v42  ;;  %1519 = vpow2.f32 %v1329_v6 }
 0x108   : > { %v1500_v25 = vpop.eup %1499  ;;  %1129 = vst.msk [vmem:[%s1967_s25 + $0x10] sm:$0xff] %vm1126_vm3, %v1064_v18  ;;  %v1062_v39 = vmul.f32 %v1498_v21, %v1881_v43  ;;  %1521 = vpow2.f32 %v1295_v14  ;;  %v2001_v43 = vpop.f32.mrb[16].mxu0  ;;  %v1304_v14 = vmul.f32 -1.442695, %v2021_v41 }
 0x109   : > { %v1502_v42 = vpop.eup %1501  ;;  %1161 = vst.msk [vmem:[%s1967_s25 + $0x110] sm:$0xff] %vm1126_vm3, %v1096_v22  ;;  %v1094_v29 = vmul.f32 %v1500_v25, %v1885_v47  ;;  %1523 = vpow2.f32 %v1327_v19  ;;  %v2009_v47 = vadd.f32 %v1872_v37, %v1930_v34  ;;  %v2011_v36 = vpop.f32.mrb[16].mxu1  ;;  %v2068_v22 = vadd.f32 %v1872_v37, %v1950_v0 }
 0x10a   : > { %v1504_v33 = vpop.eup %1503  ;;  %1127 = vst.msk [vmem:[%s1967_s25] sm:$0xff] %vm1126_vm3, %v1062_v39  ;;  %v1065_v30 = vmul.f32 %v1502_v42, %v1888_v48  ;;  %v2013_v38 = vpop.f32.mrb[17].mxu0  ;;  %1525 = vpow2.f32 %v1300_v24  ;;  %v1301_v48 = vmul.f32 -1.442695, %v1983_v23 }
 0x10b   : > { %v1506_v31 = vpop.eup %1505  ;;  %1159 = vst.msk [vmem:[%s1967_s25 + $0x100] sm:$0xff] %vm1126_vm3, %v1094_v29  ;;  %v1097_v40 = vmul.f32 %v1504_v33, %v1893_v53  ;;  %v2023_v44 = vpop.f32.mrb[17].mxu1  ;;  %1527 = vpow2.f32 %v1332_v28  ;;  %v1333_v53 = vmul.f32 -1.442695, %v1991_v26  ;;  %v1331_v6 = vmul.f32 -1.442695, %v2009_v47 }
 0x10c   : > { %v2025_v34 = vpop.f32.mrb[18].mxu0  ;;  %v1508_v46 = vpop.eup %1507  ;;  %1130 = vst.msk [vmem:[%s1967_s25 + $0x18] sm:$0xff] %vm1126_vm3, %v1065_v30  ;;  %v1063_v49 = vmul.f32 %v1506_v31, %v1896_v54  ;;  %1529 = vpow2.f32 %v1298_v27  ;;  %v1299_v54 = vmul.f32 -1.442695, %v1999_v32  ;;  %v2087_v31 = vmul.f32 -1.442695, %v2047_v12 }
 0x10d   : > { %v2035_v51 = vpop.f32.mrb[18].mxu1  ;;  %v490_v55 = vpop.f32.mrb[19].mxu0  ;;  %1162 = vst.msk [vmem:[%s1967_s25 + $0x118] sm:$0xff] %vm1126_vm3, %v1097_v40  ;;  %v1095_v61 = vmul.f32 %v1508_v46, %v1901_v58  ;;  %1531 = vpow2.f32 %v1330_v35 }
 0x10e   : > { %v1510_v60 = vpop.eup %1509  ;;  %v618_v4 = vpop.f32.mrb[19].mxu1  ;;  %1128 = vst.msk [vmem:[%s1967_s25 + $0x8] sm:$0xff] %vm1126_vm3, %v1063_v49  ;;  %1533 = vpow2.f32 %v1301_v48  ;;  %v2054_v17 = vadd.f32 %v1872_v37, %v490_v55  ;;  %v2093_v55 = vmul.f32 -1.442695, %v2068_v22 }
 0x10f   : > { %v1512_v5 = vpop.eup %1511  ;;  %v1068_v57 = vmul.f32 %v1510_v60, %v1907_v63  ;;  %1160 = vst.msk [vmem:[%s1967_s25 + $0x108] sm:$0xff] %vm1126_vm3, %v1095_v61  ;;  %1535 = vpow2.f32 %v1333_v53  ;;  %v2061_v19 = vadd.f32 %v1872_v37, %v618_v4  ;;  %v1413_v24 = vpop.f32.mrb[20].mxu0  ;;  %v2097_v60 = vadd.f32 %v1952_v1, %v1872_v37 }
 0x110   : > { %v1514_v13 = vpop.eup %1513  ;;  %v1100_v58 = vmul.f32 %v1512_v5, %v1910_v2  ;;  %1537 = vpow2.f32 %v1299_v54  ;;  %v2074_v39 = vadd.f32 %v1413_v24, %v1872_v37  ;;  %v1445_v28 = vpop.f32.mrb[20].mxu1  ;;  %v2101_v5 = vadd.f32 %v1958_v10, %v1872_v37 }
 0x111   : > { %v1516_v63 = vpop.eup %1515  ;;  %1133 = vst.msk [vmem:[%s1967_s25 + $0x30] sm:$0xff] %vm1126_vm3, %v1068_v57  ;;  %v1066_v18 = vmul.f32 %v1514_v13, %v1913_v3  ;;  %1539 = vpow2.f32 %v1331_v6  ;;  %v503_v42 = vpop.f32.mrb[21].mxu0  ;;  %v2079_v0 = vadd.f32 %v1445_v28, %v1872_v37  ;;  %v2124_v24 = vadd.f32 %v1872_v37, %v1973_v16 }
 0x112   : > { %v1518_v2 = vpop.eup %1517  ;;  %1165 = vst.msk [vmem:[%s1967_s25 + $0x130] sm:$0xff] %vm1126_vm3, %v1100_v58  ;;  %v1098_v21 = vmul.f32 %v1516_v63, %v1917_v7  ;;  %1541 = vpow2.f32 %v1304_v14  ;;  %v2082_v27 = vadd.f32 %v1872_v37, %v503_v42  ;;  %v631_v33 = vpop.f32.mrb[21].mxu1 }
 0x113   : > { %v1520_v25 = vpop.eup %1519  ;;  %1131 = vst.msk [vmem:[%s1967_s25 + $0x20] sm:$0xff] %vm1126_vm3, %v1066_v18  ;;  %v1069_v3 = vmul.f32 %v1518_v2, %v1920_v8  ;;  %v1414_v30 = vpop.f32.mrb[22].mxu0  ;;  %1543 = vpow2.f32 %v1336_v59  ;;  %v2090_v40 = vadd.f32 %v1872_v37, %v631_v33  ;;  %v2114_v18 = vadd.f32 %v1872_v37, %v1960_v11 }
 0x114   : > { %v1522_v29 = vpop.eup %1521  ;;  %1163 = vst.msk [vmem:[%s1967_s25 + $0x120] sm:$0xff] %vm1126_vm3, %v1098_v21  ;;  %v909_v7 = vadd.f32 1.0, %v1520_v25  ;;  %v1446_v48 = vpop.f32.mrb[22].mxu1  ;;  %v2104_v57 = vadd.f32 %v1414_v30, %v1872_v37  ;;  %v2120_v21 = vmul.f32 -1.442695, %v2097_v60 }
 0x115   : > { %v1524_v8 = vpop.eup %1523  ;;  %1134 = vst.msk [vmem:[%s1967_s25 + $0x38] sm:$0xff] %vm1126_vm3, %v1069_v3  ;;  %v875_v35 = vadd.f32 1.0, %v1522_v29  ;;  %v506_v46 = vpop.f32.mrb[23].mxu0  ;;  %v2107_v58 = vadd.f32 %v1446_v48, %v1872_v37  ;;  %v2127_v11 = vmul.f32 -1.442695, %v2101_v5 }
 0x116   : > { %v1526_v49 = vpop.eup %1525  ;;  %1545 = vrcp.f32 %v909_v7  ;;  %v907_v53 = vadd.f32 1.0, %v1524_v8  ;;  %v634_v61 = vpop.f32.mrb[23].mxu1  ;;  %v2110_v1 = vadd.f32 %v1872_v37, %v506_v46 }
 0x117   : > { %v1528_v54 = vpop.eup %1527  ;;  %1547 = vrcp.f32 %v875_v35  ;;  %v880_v4 = vadd.f32 1.0, %v1526_v49  ;;  %v2117_v10 = vadd.f32 %v1872_v37, %v634_v61  ;;  %v1417_v25 = vpop.f32.mrb[24].mxu0 }
 0x118   : > { %v1530_v6 = vpop.eup %1529  ;;  %1549 = vrcp.f32 %v907_v53  ;;  %v912_v13 = vadd.f32 1.0, %v1528_v54  ;;  %v2130_v42 = vadd.f32 %v1417_v25, %v1872_v37  ;;  %v1449_v29 = vpop.f32.mrb[24].mxu1  ;;  %v2139_v53 = vmul.f32 -1.442695, %v2114_v18 }
 0x119   : > { %v1532_v14 = vpop.eup %1531  ;;  %1551 = vrcp.f32 %v880_v4  ;;  %v878_v63 = vadd.f32 1.0, %v1530_v6  ;;  %v519_v7 = vpop.f32.mrb[25].mxu0  ;;  %v2133_v8 = vadd.f32 %v1449_v29, %v1872_v37 }
 0x11a   : > { %v1534_v59 = vpop.eup %1533  ;;  %1553 = vrcp.f32 %v912_v13  ;;  %v910_v2 = vadd.f32 1.0, %v1532_v14  ;;  %v2136_v16 = vadd.f32 %v1872_v37, %v519_v7  ;;  %v647_v35 = vpop.f32.mrb[25].mxu1  ;;  %v2145_v14 = vmul.f32 -1.442695, %v2124_v24 }
 0x11b   : > { %v1536_v3 = vpop.eup %1535  ;;  %1555 = vrcp.f32 %v878_v63  ;;  %v881_v28 = vadd.f32 1.0, %v1534_v59  ;;  %v1418_v48 = vpop.f32.mrb[26].mxu0  ;;  %v2142_v61 = vadd.f32 %v1872_v37, %v647_v35  ;;  %v2149_v63 = vadd.f32 %v2001_v43, %v1872_v37 }
 0x11c   : > { %v1538_v33 = vpop.eup %1537  ;;  %1557 = vrcp.f32 %v910_v2  ;;  %v913_v30 = vadd.f32 1.0, %v1536_v3  ;;  %v1450_v54 = vpop.f32.mrb[26].mxu1  ;;  %v2153_v3 = vadd.f32 %v2011_v36, %v1872_v37  ;;  %v2167_v36 = vadd.f32 %v1872_v37, %v2013_v38 }
 0x11d   : > { %v1540_v46 = vpop.eup %1539  ;;  %1559 = vrcp.f32 %v881_v28  ;;  %v879_v49 = vadd.f32 1.0, %v1538_v33  ;;  %v522_v4 = vpop.f32.mrb[27].mxu0  ;;  %v2156_v28 = vadd.f32 %v1418_v48, %v1872_v37  ;;  %v2159_v33 = vadd.f32 %v1450_v54, %v1872_v37 }
 0x11e   : > { %v1542_v6 = vpop.eup %1541  ;;  %1561 = vrcp.f32 %v913_v30  ;;  %v911_v13 = vadd.f32 1.0, %v1540_v46  ;;  %v650_v59 = vpop.f32.mrb[27].mxu1  ;;  %v2162_v43 = vadd.f32 %v1872_v37, %v522_v4  ;;  %v1308_v54 = vmul.f32 -1.442695, %v2149_v63 }
 0x11f   : > { %v1544_v2 = vpop.eup %1543  ;;  %1563 = vrcp.f32 %v879_v49  ;;  %v884_v25 = vadd.f32 1.0, %v1542_v6  ;;  %v2170_v48 = vadd.f32 %v1872_v37, %v650_v59  ;;  %v2176_v4 = vadd.f32 %v1872_v37, %v2023_v44 }
 0x120   : > { %v1546_v29 = vpop.eup %1545  ;;  %1565 = vrcp.f32 %v911_v13  ;;  %v916_v7 = vadd.f32 1.0, %v1544_v2  ;;  %v1340_v13 = vmul.f32 -1.442695, %v2153_v3  ;;  %v1453_v59 = vpop.f32.mrb[28].mxu1 }
 0x121   : > { %v1548_v30 = vpop.eup %1547  ;;  %v1101_v35 = vmul.f32 %v1546_v29, %v1933_v45  ;;  %1567 = vrcp.f32 %v884_v25  ;;  %v1421_v45 = vpop.f32.mrb[28].mxu0  ;;  %v2191_v29 = vadd.f32 %v1453_v59, %v1872_v37 }
 0x122   : > { %v1550_v46 = vpop.eup %1549  ;;  %v1067_v49 = vmul.f32 %v1548_v30, %v1936_v50  ;;  %1569 = vrcp.f32 %v916_v7  ;;  %v2184_v50 = vadd.f32 %v1421_v45, %v1872_v37  ;;  %v535_v2 = vpop.f32.mrb[29].mxu0 }
 0x123   : > { %v1552_v6 = vpop.eup %1551  ;;  %1166 = vst.msk [vmem:[%s1967_s25 + $0x138] sm:$0xff] %vm1126_vm3, %v1101_v35  ;;  %v1099_v38 = vmul.f32 %v1550_v46, %v1941_v56  ;;  %1571 = vpow2.f32 %v2087_v31  ;;  %v2194_v56 = vadd.f32 %v1872_v37, %v535_v2  ;;  %v663_v31 = vpop.f32.mrb[29].mxu1 }
 0x124   : > { %v1554_v25 = vpop.eup %1553  ;;  %1132 = vst.msk [vmem:[%s1967_s25 + $0x28] sm:$0xff] %vm1126_vm3, %v1067_v49  ;;  %v1072_v44 = vmul.f32 %v1552_v6, %v1948_v62  ;;  %1573 = vpow2.f32 %v2093_v55  ;;  %v1422_v7 = vpop.f32.mrb[30].mxu0  ;;  %v2202_v62 = vadd.f32 %v2025_v34, %v1872_v37  ;;  %v2205_v55 = vadd.f32 %v1872_v37, %v663_v31 }
 0x125   : > { %v1556_v30 = vpop.eup %1555  ;;  %1164 = vst.msk [vmem:[%s1967_s25 + $0x128] sm:$0xff] %vm1126_vm3, %v1099_v38  ;;  %v1104_v35 = vmul.f32 %v1554_v25, %v1956_v9  ;;  %1575 = vpow2.f32 %v2120_v21  ;;  %v1454_v46 = vpop.f32.mrb[30].mxu1  ;;  %v1306_v9 = vmul.f32 -1.442695, %v2167_v36  ;;  %v2214_v34 = vadd.f32 %v2035_v51, %v1872_v37 }
 0x126   : > { %v538_v49 = vpop.f32.mrb[31].mxu0  ;;  %v1558_v45 = vpop.eup %1557  ;;  %1137 = vst.msk [vmem:[%s1967_s25 + $0x50] sm:$0xff] %vm1126_vm3, %v1072_v44  ;;  %v1070_v6 = vmul.f32 %v1556_v30, %v1971_v15  ;;  %1577 = vpow2.f32 %v2127_v11  ;;  %v1338_v15 = vmul.f32 -1.442695, %v2176_v4  ;;  %v2222_v11 = vadd.f32 %v1422_v7, %v1872_v37 }
 0x127   : > { %v666_v21 = vpop.f32.mrb[31].mxu1  ;;  %v1560_v38 = vpop.eup %1559  ;;  %1169 = vst.msk [vmem:[%s1967_s25 + $0x150] sm:$0xff] %vm1126_vm3, %v1104_v35  ;;  %v1102_v59 = vmul.f32 %v1558_v45, %v1978_v20  ;;  %1579 = vpow2.f32 %v2139_v53  ;;  %v2229_v25 = vadd.f32 %v1454_v46, %v1872_v37  ;;  %v2232_v20 = vadd.f32 %v1872_v37, %v538_v49 }
 0x128   : > { %v1562_v2 = vpop.eup %1561  ;;  %1135 = vst.msk [vmem:[%s1967_s25 + $0x40] sm:$0xff] %vm1126_vm3, %v1070_v6  ;;  %v1073_v51 = vmul.f32 %v1560_v38, %v1983_v23  ;;  %1581 = vpow2.f32 %v2145_v14  ;;  %v1309_v31 = vmul.f32 -1.442695, %v2202_v62  ;;  %v2239_v23 = vadd.f32 %v1872_v37, %v666_v21 }
 0x129   : > { %v1564_v53 = vpop.eup %1563  ;;  %1167 = vst.msk [vmem:[%s1967_s25 + $0x140] sm:$0xff] %vm1126_vm3, %v1102_v59  ;;  %v1105_v44 = vmul.f32 %v1562_v2, %v1991_v26  ;;  %1583 = vpow2.f32 %v1308_v54  ;;  %v1341_v30 = vmul.f32 -1.442695, %v2214_v34  ;;  %v1307_v37 = vmul.f32 -1.442695, %v2054_v17 }
 0x12a   : > { %v1566_v14 = vpop.eup %1565  ;;  %1138 = vst.msk [vmem:[%s1967_s25 + $0x58] sm:$0xff] %vm1126_vm3, %v1073_v51  ;;  %v1071_v7 = vmul.f32 %v1564_v53, %v1999_v32  ;;  %1585 = vpow2.f32 %v1340_v13 }
 0x12b   : > { %v1568_v35 = vpop.eup %1567  ;;  %1170 = vst.msk [vmem:[%s1967_s25 + $0x158] sm:$0xff] %vm1126_vm3, %v1105_v44  ;;  %v1103_v26 = vmul.f32 %v1566_v14, %v2009_v47  ;;  %1587 = vpow2.f32 %v1306_v9 }
 0x12c   : > { %v1570_v54 = vpop.eup %1569  ;;  %1136 = vst.msk [vmem:[%s1967_s25 + $0x48] sm:$0xff] %vm1126_vm3, %v1071_v7  ;;  %v1076_v46 = vmul.f32 %v1568_v35, %v2021_v41  ;;  %1589 = vpow2.f32 %v1338_v15 }
 0x12d   : > { %v1572_v32 = vpop.eup %1571  ;;  %1168 = vst.msk [vmem:[%s1967_s25 + $0x148] sm:$0xff] %vm1126_vm3, %v1103_v26  ;;  %v1108_v13 = vmul.f32 %v1570_v54, %v2033_v52  ;;  %1591 = vpow2.f32 %v1309_v31 }
 0x12e   : > { %v1574_v49 = vpop.eup %1573  ;;  %1141 = vst.msk [vmem:[%s1967_s25 + $0x70] sm:$0xff] %vm1126_vm3, %v1076_v46  ;;  %v882_v47 = vadd.f32 1.0, %v1572_v32  ;;  %1593 = vpow2.f32 %v1341_v30  ;;  %v1339_v32 = vmul.f32 -1.442695, %v2061_v19 }
 0x12f   : > { %v1576_v45 = vpop.eup %1575  ;;  %1173 = vst.msk [vmem:[%s1967_s25 + $0x170] sm:$0xff] %vm1126_vm3, %v1108_v13  ;;  %v914_v6 = vadd.f32 1.0, %v1574_v49  ;;  %1595 = vpow2.f32 %v1307_v37 }
 0x130   : > { %v1578_v9 = vpop.eup %1577  ;;  %1597 = vrcp.f32 %v882_v47  ;;  %v885_v41 = vadd.f32 1.0, %v1576_v45  ;;  %v1312_v47 = vmul.f32 -1.442695, %v2074_v39 }
 0x131   : > { %v1580_v21 = vpop.eup %1579  ;;  %1599 = vrcp.f32 %v914_v6  ;;  %v917_v38 = vadd.f32 1.0, %v1578_v9  ;;  %v1344_v9 = vmul.f32 -1.442695, %v2079_v0 }
 0x132   : > { %v1582_v59 = vpop.eup %1581  ;;  %1601 = vrcp.f32 %v885_v41  ;;  %v883_v52 = vadd.f32 1.0, %v1580_v21 }
 0x133   : > { %v1584_v15 = vpop.eup %1583  ;;  %1603 = vrcp.f32 %v917_v38  ;;  %v915_v2 = vadd.f32 1.0, %v1582_v59  ;;  %v1310_v38 = vmul.f32 -1.442695, %v2082_v27 }
 0x134   : > { %v1586_v51 = vpop.eup %1585  ;;  %1605 = vrcp.f32 %v883_v52  ;;  %v888_v53 = vadd.f32 1.0, %v1584_v15  ;;  %v1342_v15 = vmul.f32 -1.442695, %v2090_v40 }
 0x135   : > { %v1588_v44 = vpop.eup %1587  ;;  %1607 = vrcp.f32 %v915_v2  ;;  %v920_v31 = vadd.f32 1.0, %v1586_v51 }
 0x136   : > { %v1590_v14 = vpop.eup %1589  ;;  %1609 = vrcp.f32 %v888_v53  ;;  %v886_v7 = vadd.f32 1.0, %v1588_v44 }
 0x137   : > { %v1592_v30 = vpop.eup %1591  ;;  %1611 = vrcp.f32 %v920_v31  ;;  %v918_v35 = vadd.f32 1.0, %v1590_v14 }
 0x138   : > { %v1594_v26 = vpop.eup %1593  ;;  %1613 = vrcp.f32 %v886_v7  ;;  %v889_v37 = vadd.f32 1.0, %v1592_v30 }
 0x139   : > { %v1596_v54 = vpop.eup %1595  ;;  %1615 = vrcp.f32 %v918_v35  ;;  %v921_v46 = vadd.f32 1.0, %v1594_v26 }
 0x13a   : > { %v1598_v13 = vpop.eup %1597  ;;  %1617 = vrcp.f32 %v889_v37  ;;  %v887_v49 = vadd.f32 1.0, %v1596_v54 }
 0x13b   : > { %v1600_v45 = vpop.eup %1599  ;;  %v1074_v6 = vmul.f32 %v1598_v13, %v2047_v12  ;;  %1619 = vrcp.f32 %v921_v46 }
 0x13c   : > { %v1602_v41 = vpop.eup %1601  ;;  %v1106_v21 = vmul.f32 %v1600_v45, %v2068_v22  ;;  %1621 = vrcp.f32 %v887_v49  ;;  %v1313_v22 = vmul.f32 -1.442695, %v2104_v57 }
 0x13d   : > { %v1604_v59 = vpop.eup %1603  ;;  %1139 = vst.msk [vmem:[%s1967_s25 + $0x60] sm:$0xff] %vm1126_vm3, %v1074_v6  ;;  %v1077_v52 = vmul.f32 %v1602_v41, %v2097_v60  ;;  %1623 = vpow2.f32 %v1339_v32  ;;  %v1345_v60 = vmul.f32 -1.442695, %v2107_v58 }
 0x13e   : > { %v1606_v12 = vpop.eup %1605  ;;  %1171 = vst.msk [vmem:[%s1967_s25 + $0x160] sm:$0xff] %vm1126_vm3, %v1106_v21  ;;  %v1109_v2 = vmul.f32 %v1604_v59, %v2101_v5  ;;  %1625 = vpow2.f32 %v1312_v47  ;;  %v1311_v5 = vmul.f32 -1.442695, %v2110_v1 }
 0x13f   : > { %v1608_v51 = vpop.eup %1607  ;;  %1142 = vst.msk [vmem:[%s1967_s25 + $0x78] sm:$0xff] %vm1126_vm3, %v1077_v52  ;;  %v1075_v53 = vmul.f32 %v1606_v12, %v2114_v18  ;;  %1627 = vpow2.f32 %v1344_v9  ;;  %v1343_v18 = vmul.f32 -1.442695, %v2117_v10 }
 0x140   : > { %v1610_v44 = vpop.eup %1609  ;;  %1174 = vst.msk [vmem:[%s1967_s25 + $0x178] sm:$0xff] %vm1126_vm3, %v1109_v2  ;;  %v1107_v31 = vmul.f32 %v1608_v51, %v2124_v24  ;;  %1629 = vpow2.f32 %v1310_v38  ;;  %v1316_v24 = vmul.f32 -1.442695, %v2130_v42 }
 0x141   : > { %v1612_v14 = vpop.eup %1611  ;;  %1140 = vst.msk [vmem:[%s1967_s25 + $0x68] sm:$0xff] %vm1126_vm3, %v1075_v53  ;;  %v1080_v7 = vmul.f32 %v1610_v44, %v2149_v63  ;;  %1631 = vpow2.f32 %v1342_v15  ;;  %v1348_v63 = vmul.f32 -1.442695, %v2133_v8 }
 0x142   : > { %v1614_v30 = vpop.eup %1613  ;;  %1172 = vst.msk [vmem:[%s1967_s25 + $0x168] sm:$0xff] %vm1126_vm3, %v1107_v31  ;;  %v1112_v35 = vmul.f32 %v1612_v14, %v2153_v3  ;;  %1633 = vpow2.f32 %v1313_v22  ;;  %v1314_v3 = vmul.f32 -1.442695, %v2136_v16 }
 0x143   : > { %v1616_v26 = vpop.eup %1615  ;;  %1145 = vst.msk [vmem:[%s1967_s25 + $0x90] sm:$0xff] %vm1126_vm3, %v1080_v7  ;;  %v1078_v37 = vmul.f32 %v1614_v30, %v2167_v36  ;;  %1635 = vpow2.f32 %v1345_v60  ;;  %v1346_v36 = vmul.f32 -1.442695, %v2142_v61 }
 0x144   : > { %v1618_v54 = vpop.eup %1617  ;;  %1177 = vst.msk [vmem:[%s1967_s25 + $0x190] sm:$0xff] %vm1126_vm3, %v1112_v35  ;;  %v1110_v46 = vmul.f32 %v1616_v26, %v2176_v4  ;;  %1637 = vpow2.f32 %v1311_v5  ;;  %v1317_v35 = vmul.f32 -1.442695, %v2156_v28 }
 0x145   : > { %v1620_v32 = vpop.eup %1619  ;;  %1143 = vst.msk [vmem:[%s1967_s25 + $0x80] sm:$0xff] %vm1126_vm3, %v1078_v37  ;;  %v1081_v13 = vmul.f32 %v1618_v54, %v2202_v62  ;;  %1639 = vpow2.f32 %v1343_v18  ;;  %v1349_v37 = vmul.f32 -1.442695, %v2159_v33 }
 0x146   : > { %v1622_v49 = vpop.eup %1621  ;;  %1175 = vst.msk [vmem:[%s1967_s25 + $0x180] sm:$0xff] %vm1126_vm3, %v1110_v46  ;;  %v1113_v47 = vmul.f32 %v1620_v32, %v2214_v34  ;;  %1641 = vpow2.f32 %v1316_v24  ;;  %v1315_v46 = vmul.f32 -1.442695, %v2162_v43 }
 0x147   : > { %v1624_v4 = vpop.eup %1623  ;;  %1146 = vst.msk [vmem:[%s1967_s25 + $0x98] sm:$0xff] %vm1126_vm3, %v1081_v13  ;;  %v1079_v45 = vmul.f32 %v1622_v49, %v2054_v17  ;;  %1643 = vpow2.f32 %v1348_v63  ;;  %v1347_v13 = vmul.f32 -1.442695, %v2170_v48 }
 0x148   : > { %v1626_v6 = vpop.eup %1625  ;;  %1178 = vst.msk [vmem:[%s1967_s25 + $0x198] sm:$0xff] %vm1126_vm3, %v1113_v47  ;;  %v919_v62 = vadd.f32 1.0, %v1624_v4  ;;  %1645 = vpow2.f32 %v1314_v3  ;;  %v1320_v47 = vmul.f32 -1.442695, %v2184_v50 }
 0x149   : > { %v1628_v9 = vpop.eup %1627  ;;  %1144 = vst.msk [vmem:[%s1967_s25 + $0x88] sm:$0xff] %vm1126_vm3, %v1079_v45  ;;  %v892_v41 = vadd.f32 1.0, %v1626_v6  ;;  %1647 = vpow2.f32 %v1346_v36 }
 0x14a   : > { %v1630_v21 = vpop.eup %1629  ;;  %1649 = vrcp.f32 %v919_v62  ;;  %v924_v34 = vadd.f32 1.0, %v1628_v9 }
 0x14b   : > { %v1632_v38 = vpop.eup %1631  ;;  %1651 = vrcp.f32 %v892_v41  ;;  %v890_v59 = vadd.f32 1.0, %v1630_v21 }
 0x14c   : > { %v1634_v52 = vpop.eup %1633  ;;  %1653 = vrcp.f32 %v924_v34  ;;  %v922_v17 = vadd.f32 1.0, %v1632_v38 }
 0x14d   : > { %v1636_v15 = vpop.eup %1635  ;;  %1655 = vrcp.f32 %v890_v59  ;;  %v893_v12 = vadd.f32 1.0, %v1634_v52 }
 0x14e   : > { %v1638_v2 = vpop.eup %1637  ;;  %1657 = vrcp.f32 %v922_v17  ;;  %v925_v22 = vadd.f32 1.0, %v1636_v15 }
 0x14f   : > { %v1640_v51 = vpop.eup %1639  ;;  %1659 = vrcp.f32 %v893_v12  ;;  %v891_v53 = vadd.f32 1.0, %v1638_v2 }
 0x150   : > { %v1642_v60 = vpop.eup %1641  ;;  %1661 = vrcp.f32 %v925_v22  ;;  %v923_v44 = vadd.f32 1.0, %v1640_v51 }
 0x151   : > { %v1644_v31 = vpop.eup %1643  ;;  %1663 = vrcp.f32 %v891_v53  ;;  %v896_v5 = vadd.f32 1.0, %v1642_v60 }
 0x152   : > { %v1646_v14 = vpop.eup %1645  ;;  %1665 = vrcp.f32 %v923_v44  ;;  %v928_v7 = vadd.f32 1.0, %v1644_v31 }
 0x153   : > { %v1648_v18 = vpop.eup %1647  ;;  %1667 = vrcp.f32 %v896_v5  ;;  %v894_v30 = vadd.f32 1.0, %v1646_v14 }
 0x154   : > { %v1650_v24 = vpop.eup %1649  ;;  %1669 = vrcp.f32 %v928_v7  ;;  %v926_v26 = vadd.f32 1.0, %v1648_v18 }
 0x155   : > { %v1652_v63 = vpop.eup %1651  ;;  %v1111_v54 = vmul.f32 %v1650_v24, %v2061_v19  ;;  %1671 = vrcp.f32 %v894_v30 }
 0x156   : > { %v1654_v3 = vpop.eup %1653  ;;  %v1084_v32 = vmul.f32 %v1652_v63, %v2074_v39  ;;  %1673 = vrcp.f32 %v926_v26  ;;  %v1352_v39 = vmul.f32 -1.442695, %v2191_v29 }
 0x157   : > { %v1656_v36 = vpop.eup %1655  ;;  %1176 = vst.msk [vmem:[%s1967_s25 + $0x188] sm:$0xff] %vm1126_vm3, %v1111_v54  ;;  %v1116_v49 = vmul.f32 %v1654_v3, %v2079_v0  ;;  %1675 = vpow2.f32 %v1317_v35  ;;  %v1318_v0 = vmul.f32 -1.442695, %v2194_v56 }
 0x158   : > { %v1658_v19 = vpop.eup %1657  ;;  %1149 = vst.msk [vmem:[%s1967_s25 + $0xb0] sm:$0xff] %vm1126_vm3, %v1084_v32  ;;  %v1082_v4 = vmul.f32 %v1656_v36, %v2082_v27  ;;  %1677 = vpow2.f32 %v1349_v37  ;;  %v1350_v27 = vmul.f32 -1.442695, %v2205_v55 }
 0x159   : > { %v1660_v45 = vpop.eup %1659  ;;  %1181 = vst.msk [vmem:[%s1967_s25 + $0x1b0] sm:$0xff] %vm1126_vm3, %v1116_v49  ;;  %v1114_v6 = vmul.f32 %v1658_v19, %v2090_v40  ;;  %1679 = vpow2.f32 %v1315_v46  ;;  %v1321_v40 = vmul.f32 -1.442695, %v2222_v11 }
 0x15a   : > { %v1662_v62 = vpop.eup %1661  ;;  %1147 = vst.msk [vmem:[%s1967_s25 + $0xa0] sm:$0xff] %vm1126_vm3, %v1082_v4  ;;  %v1085_v9 = vmul.f32 %v1660_v45, %v2104_v57  ;;  %1681 = vpow2.f32 %v1347_v13  ;;  %v1353_v57 = vmul.f32 -1.442695, %v2229_v25 }
 0x15b   : > { %v1664_v41 = vpop.eup %1663  ;;  %1179 = vst.msk [vmem:[%s1967_s25 + $0x1a0] sm:$0xff] %vm1126_vm3, %v1114_v6  ;;  %v1117_v21 = vmul.f32 %v1662_v62, %v2107_v58  ;;  %1683 = vpow2.f32 %v1320_v47  ;;  %v1319_v58 = vmul.f32 -1.442695, %v2232_v20 }
 0x15c   : > { %v1666_v34 = vpop.eup %1665  ;;  %1150 = vst.msk [vmem:[%s1967_s25 + $0xb8] sm:$0xff] %vm1126_vm3, %v1085_v9  ;;  %v1083_v38 = vmul.f32 %v1664_v41, %v2110_v1  ;;  %1685 = vpow2.f32 %v1352_v39  ;;  %v1351_v1 = vmul.f32 -1.442695, %v2239_v23 }
 0x15d   : > { %v1668_v59 = vpop.eup %1667  ;;  %1182 = vst.msk [vmem:[%s1967_s25 + $0x1b8] sm:$0xff] %vm1126_vm3, %v1117_v21  ;;  %v1115_v52 = vmul.f32 %v1666_v34, %v2117_v10  ;;  %1687 = vpow2.f32 %v1318_v0 }
 0x15e   : > { %v1670_v17 = vpop.eup %1669  ;;  %1148 = vst.msk [vmem:[%s1967_s25 + $0xa8] sm:$0xff] %vm1126_vm3, %v1083_v38  ;;  %v1088_v15 = vmul.f32 %v1668_v59, %v2130_v42  ;;  %1689 = vpow2.f32 %v1350_v27 }
 0x15f   : > { %v1672_v12 = vpop.eup %1671  ;;  %1180 = vst.msk [vmem:[%s1967_s25 + $0x1a8] sm:$0xff] %vm1126_vm3, %v1115_v52  ;;  %v1120_v2 = vmul.f32 %v1670_v17, %v2133_v8  ;;  %1691 = vpow2.f32 %v1321_v40 }
 0x160   : > { %v1674_v10 = vpop.eup %1673  ;;  %1153 = vst.msk [vmem:[%s1967_s25 + $0xd0] sm:$0xff] %vm1126_vm3, %v1088_v15  ;;  %v1086_v22 = vmul.f32 %v1672_v12, %v2136_v16  ;;  %1693 = vpow2.f32 %v1353_v57 }
 0x161   : > { %v1676_v51 = vpop.eup %1675  ;;  %1185 = vst.msk [vmem:[%s1967_s25 + $0x1d0] sm:$0xff] %vm1126_vm3, %v1120_v2  ;;  %v1118_v42 = vmul.f32 %v1674_v10, %v2142_v61  ;;  %1695 = vpow2.f32 %v1319_v58 }
 0x162   : > { %v1678_v53 = vpop.eup %1677  ;;  %1151 = vst.msk [vmem:[%s1967_s25 + $0xc0] sm:$0xff] %vm1126_vm3, %v1086_v22  ;;  %v897_v60 = vadd.f32 1.0, %v1676_v51  ;;  %1697 = vpow2.f32 %v1351_v1 }
 0x163   : > { %v1680_v44 = vpop.eup %1679  ;;  %1183 = vst.msk [vmem:[%s1967_s25 + $0x1c0] sm:$0xff] %vm1126_vm3, %v1118_v42  ;;  %v929_v8 = vadd.f32 1.0, %v1678_v53 }
 0x164   : > { %v1682_v31 = vpop.eup %1681  ;;  %1699 = vrcp.f32 %v897_v60  ;;  %v895_v5 = vadd.f32 1.0, %v1680_v44 }
 0x165   : > { %v1684_v16 = vpop.eup %1683  ;;  %1701 = vrcp.f32 %v929_v8  ;;  %v927_v14 = vadd.f32 1.0, %v1682_v31 }
 0x166   : > { %v1686_v7 = vpop.eup %1685  ;;  %1703 = vrcp.f32 %v895_v5  ;;  %v900_v18 = vadd.f32 1.0, %v1684_v16 }
 0x167   : > { %v1688_v61 = vpop.eup %1687  ;;  %1705 = vrcp.f32 %v927_v14  ;;  %v932_v30 = vadd.f32 1.0, %v1686_v7 }
 0x168   : > { %v1690_v35 = vpop.eup %1689  ;;  %1707 = vrcp.f32 %v900_v18  ;;  %v898_v24 = vadd.f32 1.0, %v1688_v61 }
 0x169   : > { %v1692_v26 = vpop.eup %1691  ;;  %1709 = vrcp.f32 %v932_v30  ;;  %v930_v37 = vadd.f32 1.0, %v1690_v35 }
 0x16a   : > { %v1694_v63 = vpop.eup %1693  ;;  %1711 = vrcp.f32 %v898_v24  ;;  %v901_v54 = vadd.f32 1.0, %v1692_v26 }
 0x16b   : > { %v1696_v46 = vpop.eup %1695  ;;  %1713 = vrcp.f32 %v930_v37  ;;  %v933_v3 = vadd.f32 1.0, %v1694_v63 }
 0x16c   : > { %v1698_v32 = vpop.eup %1697  ;;  %1715 = vrcp.f32 %v901_v54  ;;  %v899_v13 = vadd.f32 1.0, %v1696_v46 }
 0x16d   : > { %1717 = vrcp.f32 %v933_v3  ;;  %v931_v36 = vadd.f32 1.0, %v1698_v32 }
 0x16e   : > { %v1700_v49 = vpop.eup %1699  ;;  %1719 = vrcp.f32 %v899_v13 }
 0x16f   : > { %v1702_v47 = vpop.eup %1701  ;;  %v1089_v19 = vmul.f32 %v1700_v49, %v2156_v28  ;;  %1721 = vrcp.f32 %v931_v36 }
 0x170   : > { %v1704_v4 = vpop.eup %1703  ;;  %v1121_v39 = vmul.f32 %v1702_v47, %v2159_v33 }
 0x171   : > { %v1706_v45 = vpop.eup %1705  ;;  %1154 = vst.msk [vmem:[%s1967_s25 + $0xd8] sm:$0xff] %vm1126_vm3, %v1089_v19  ;;  %v1087_v6 = vmul.f32 %v1704_v4, %v2162_v43 }
 0x172   : > { %v1708_v0 = vpop.eup %1707  ;;  %1186 = vst.msk [vmem:[%s1967_s25 + $0x1d8] sm:$0xff] %vm1126_vm3, %v1121_v39  ;;  %v1119_v62 = vmul.f32 %v1706_v45, %v2170_v48 }
 0x173   : > { %v1710_v9 = vpop.eup %1709  ;;  %1152 = vst.msk [vmem:[%s1967_s25 + $0xc8] sm:$0xff] %vm1126_vm3, %v1087_v6  ;;  %v1092_v28 = vmul.f32 %v1708_v0, %v2184_v50 }
 0x174   : > { %v1712_v27 = vpop.eup %1711  ;;  %1184 = vst.msk [vmem:[%s1967_s25 + $0x1c8] sm:$0xff] %vm1126_vm3, %v1119_v62  ;;  %v1124_v33 = vmul.f32 %v1710_v9, %v2191_v29 }
 0x175   : > { %v1714_v43 = vpop.eup %1713  ;;  %1157 = vst.msk [vmem:[%s1967_s25 + $0xf0] sm:$0xff] %vm1126_vm3, %v1092_v28  ;;  %v1090_v41 = vmul.f32 %v1712_v27, %v2194_v56 }
 0x176   : > { %v1716_v48 = vpop.eup %1715  ;;  %1189 = vst.msk [vmem:[%s1967_s25 + $0x1f0] sm:$0xff] %vm1126_vm3, %v1124_v33  ;;  %v1122_v21 = vmul.f32 %v1714_v43, %v2205_v55 }
 0x177   : > { %v1718_v50 = vpop.eup %1717  ;;  %1155 = vst.msk [vmem:[%s1967_s25 + $0xe0] sm:$0xff] %vm1126_vm3, %v1090_v41  ;;  %v1093_v40 = vmul.f32 %v1716_v48, %v2222_v11 }
 0x178   : > { %v1720_v34 = vpop.eup %1719  ;;  %1187 = vst.msk [vmem:[%s1967_s25 + $0x1e0] sm:$0xff] %vm1126_vm3, %v1122_v21  ;;  %v1125_v29 = vmul.f32 %v1718_v50, %v2229_v25 }
 0x179   : > { %v1722_v38 = vpop.eup %1721  ;;  %1158 = vst.msk [vmem:[%s1967_s25 + $0xf8] sm:$0xff] %vm1126_vm3, %v1093_v40  ;;  %v1091_v56 = vmul.f32 %v1720_v34, %v2232_v20 }
 0x17a   : > { %1190 = vst.msk [vmem:[%s1967_s25 + $0x1f8] sm:$0xff] %vm1126_vm3, %v1125_v29  ;;  %v1123_v57 = vmul.f32 %v1722_v38, %v2239_v23 }
 0x17b   : > { %1156 = vst.msk [vmem:[%s1967_s25 + $0xe8] sm:$0xff] %vm1126_vm3, %v1091_v56 }
 0x17c   : > { %1188 = vst.msk [vmem:[%s1967_s25 + $0x1e8] sm:$0xff] %vm1126_vm3, %v1123_v57 }
 0x17d PF: > { %s13_s12 = sadd.s32 1, %s1729_s12  }
 0x17e   : > { %p10_p4 = scmp.ge.s32.totalorder %s13_s12, 5  }
 0x180   :  { %12 = sbr.rel (!%p10_p4) target bundleno = 1 (0x1), region = 62 }

// kernel: model_forward.12
= control target key start
LH: loop header
LB: loop body
LE: loop exit
PB: predicated region body
PF: predicated region fallthrough
CT: control target
= control target key end

     0   :  { %8 = vsyncpa [#allocation3], 0  ;;  %s2290_s12 = smov [#allocation2]   ;;  %s3767_s0 = inlined_call_operand.vmem [shape: f32[768,72], index: 0, kind: input, shape index: {}]   ;;  %s3768_s1 = inlined_call_operand.vmem [shape: bf16[72,16], index: 1, kind: input, shape index: {}]   ;;  %s3769_s2 = inlined_call_operand.hbm [shape: f32[1,16], index: 2, kind: input, shape index: {}]   ;;  %s3770_s3 = inlined_call_operand.vmem [shape: f32[768,16], index: 3, kind: output, shape index: {}]  }
   0x1   :  { %s19_s13 = sshll.u32 %s2290_s12, 4  ;;  %s2266_s16 = scalar_lea.hbm %s3769_s2, 16  ;;  %s20_s13 = int_to_ptr.vmem [resolvable:$true] %s19_s13 }
   0x2   :  { %p2267_p0 = scmp.ne.s32.totalorder %s3769_s2, %s2266_s16  ;;  %p2270_p1 = scmp.lt.u32.totalorder %s2266_s16, %s3769_s2 }
   0x4   :  { %p2272_p2 = pnand %p2270_p1, %p2267_p0 }
   0x6   :  { %2275 = shalt.err (!%p2272_p2)
}
   0x7   :  { %s2276_s21 = scalar_lea.vmem %s20_s13, 16  ;;  %s2280_s22 = scalar_lea.vmem %s20_s13, 32 }
   0x8   :  { %p2277_p3 = scmp.ne.s32.totalorder %s20_s13, %s2276_s21  ;;  %p2281_p4 = scmp.lt.s32.totalorder %s20_s13, %s20_s13 }
   0x9   :  { %p2282_p5 = scmp.lt.s32.totalorder %s2280_s22, %s2276_s21 }
   0xb   :  { %p2283_p6 = por %p2282_p5, %p2281_p4 }
   0xd   :  { %p2284_p7 = pnand %p2283_p6, %p2277_p3 }
   0xf   :  { %2287 = shalt.err (!%p2284_p7)
}
  0x10   :  { %22 = dma.hbm_to_vmem [thread:$0]  %s3769_s2, 16, %s20_s13, [#allocation3]  }
  0x11   :  { %2288 = dma.done.wait [#allocation3], 16  }
  0x12   :  { %2289 = vsyncadd [#allocation3], 4294967280  ;;  %v1876_v0 = vld [vmem:[%s3768_s1] sm:$0xff]   ;;  %v1877_v1 = vld [vmem:[%s3768_s1 + $0x8] sm:$0xff]   ;;  %vm214_vm0 = vcmask 588800   ;;  %vm359_vm1 = vcmask 1043456  }
  0x13   :  { %1757 = vmatprep.subr.bf16.mxu0 %v1876_v0  ;;  %1863 = vmatprep.subr.bf16.mxu1 %v1876_v0  ;;  %v1878_v2 = vld [vmem:[%s3768_s1 + $0x10] sm:$0xff]   ;;  %v27_v3 = vld [vmem:[%s3767_s0] sm:$0xff]  ;;  %v28_v4 = vld [vmem:[%s3767_s0 + $0x8] sm:$0xff]  ;;  %vm1452_vm2 = vcmask 130048  }
  0x14   :  { %1758 = vmatpush3.bf16.msra.mxu0 %v1876_v0  ;;  %1868 = vmatpush3.bf16.msra.mxu1 %v1876_v0  ;;  %v75_v5 = vld [vmem:[%s3767_s0 + $0x180] sm:$0xff]  ;;  %v76_v6 = vld [vmem:[%s3767_s0 + $0x188] sm:$0xff]  ;;  %v132_v7 = vpack.c.bf16 %v28_v4, %v27_v3  ;;  %v1879_v9 = vld [vmem:[%s3768_s1 + $0x18] sm:$0xff]  }
  0x15   :  { %1759 = vmatprep.subr.bf16.mxu0 %v1877_v1  ;;  %1864 = vmatprep.subr.bf16.mxu1 %v1877_v1  ;;  %v156_v8 = vpack.c.bf16 %v76_v6, %v75_v5  ;;  %v1880_v10 = vld [vmem:[%s3768_s1 + $0x20] ss:$0 sps:$4 sm:$0xff]   ;;  %v29_v11 = vld [vmem:[%s3767_s0 + $0x10] sm:$0xff]  ;;  %v30_v12 = vld [vmem:[%s3767_s0 + $0x18] sm:$0xff] }
  0x16   :  { %1767 = vmatprep.mubr.msk.bf16.mxu0 %vm214_vm0, %v132_v7  ;;  %v77_v13 = vld [vmem:[%s3767_s0 + $0x190] sm:$0xff]  ;;  %v78_v14 = vld [vmem:[%s3767_s0 + $0x198] sm:$0xff]  ;;  %v31_v15 = vld [vmem:[%s3767_s0 + $0x20] sm:$0xff]  ;;  %v361_v16 = vsel %vm359_vm1, %v1880_v10, 0  ;;  %v133_v20 = vpack.c.bf16 %v30_v12, %v29_v11 }
  0x17   :  { %1815 = vmatprep.mubr.msk.bf16.mxu1 %vm214_vm0, %v156_v8  ;;  %v32_v17 = vld [vmem:[%s3767_s0 + $0x28] sm:$0xff]  ;;  %v79_v18 = vld [vmem:[%s3767_s0 + $0x1a0] sm:$0xff]  ;;  %v157_v21 = vpack.c.bf16 %v78_v14, %v77_v13  ;;  %v33_v24 = vld [vmem:[%s3767_s0 + $0x30] sm:$0xff] }
  0x18   :  { %1760 = vmatpush3.bf16.msra.mxu0 %v1877_v1  ;;  %1869 = vmatpush3.bf16.msra.mxu1 %v1877_v1  ;;  %v80_v19 = vld [vmem:[%s3767_s0 + $0x1a8] sm:$0xff]  ;;  %v134_v22 = vpack.c.bf16 %v32_v17, %v31_v15  ;;  %v34_v25 = vld [vmem:[%s3767_s0 + $0x38] sm:$0xff]  ;;  %v81_v26 = vld [vmem:[%s3767_s0 + $0x1b0] sm:$0xff] }
  0x19   :  { %1761 = vmatprep.subr.bf16.mxu0 %v1878_v2  ;;  %1865 = vmatprep.subr.bf16.mxu1 %v1878_v2  ;;  %v158_v23 = vpack.c.bf16 %v80_v19, %v79_v18  ;;  %v82_v27 = vld [vmem:[%s3767_s0 + $0x1b8] sm:$0xff]  ;;  %v35_v28 = vld [vmem:[%s3767_s0 + $0x40] sm:$0xff]  ;;  %v36_v29 = vld [vmem:[%s3767_s0 + $0x48] sm:$0xff]  ;;  %v135_v32 = vpack.c.bf16 %v34_v25, %v33_v24 }
  0x1a   :  { %v83_v30 = vld [vmem:[%s3767_s0 + $0x1c0] sm:$0xff]  ;;  %v84_v31 = vld [vmem:[%s3767_s0 + $0x1c8] sm:$0xff]  ;;  %v159_v33 = vpack.c.bf16 %v82_v27, %v81_v26  ;;  %v136_v34 = vpack.c.bf16 %v36_v29, %v35_v28  ;;  %v37_v36 = vld [vmem:[%s3767_s0 + $0x50] sm:$0xff] }
  0x1b   :  { %v160_v35 = vpack.c.bf16 %v84_v31, %v83_v30  ;;  %v38_v37 = vld [vmem:[%s3767_s0 + $0x58] sm:$0xff]  ;;  %v85_v38 = vld [vmem:[%s3767_s0 + $0x1d0] sm:$0xff]  ;;  %v39_v40 = vld [vmem:[%s3767_s0 + $0x60] sm:$0xff] }
  0x1c   :  { %1762 = vmatpush3.bf16.msra.mxu0 %v1878_v2  ;;  %1870 = vmatpush3.bf16.msra.mxu1 %v1878_v2  ;;  %v86_v39 = vld [vmem:[%s3767_s0 + $0x1d8] sm:$0xff]  ;;  %v40_v41 = vld [vmem:[%s3767_s0 + $0x68] sm:$0xff]  ;;  %v87_v42 = vld [vmem:[%s3767_s0 + $0x1e0] sm:$0xff]  ;;  %v137_v44 = vpack.c.bf16 %v38_v37, %v37_v36 }
  0x1d   :  { %1763 = vmatprep.subr.bf16.mxu0 %v1879_v9  ;;  %1866 = vmatprep.subr.bf16.mxu1 %v1879_v9  ;;  %v88_v43 = vld [vmem:[%s3767_s0 + $0x1e8] sm:$0xff]  ;;  %v161_v45 = vpack.c.bf16 %v86_v39, %v85_v38  ;;  %v138_v46 = vpack.c.bf16 %v40_v41, %v39_v40  ;;  %v41_v48 = vld [vmem:[%s3767_s0 + $0x70] sm:$0xff]  ;;  %v42_v49 = vld [vmem:[%s3767_s0 + $0x78] sm:$0xff] }
  0x1e   :  { %v162_v47 = vpack.c.bf16 %v88_v43, %v87_v42  ;;  %v89_v50 = vld [vmem:[%s3767_s0 + $0x1f0] sm:$0xff]  ;;  %v90_v51 = vld [vmem:[%s3767_s0 + $0x1f8] sm:$0xff]  ;;  %v43_v52 = vld [vmem:[%s3767_s0 + $0x80] sm:$0xff]  ;;  %v139_v56 = vpack.c.bf16 %v42_v49, %v41_v48 }
  0x1f   :  { %v44_v53 = vld [vmem:[%s3767_s0 + $0x88] sm:$0xff]  ;;  %v91_v54 = vld [vmem:[%s3767_s0 + $0x200] sm:$0xff]  ;;  %v163_v57 = vpack.c.bf16 %v90_v51, %v89_v50  ;;  %v45_v60 = vld [vmem:[%s3767_s0 + $0x90] sm:$0xff] }
  0x20   :  { %1764 = vmatpush3.bf16.msra.mxu0 %v1879_v9  ;;  %1871 = vmatpush3.bf16.msra.mxu1 %v1879_v9  ;;  %v92_v55 = vld [vmem:[%s3767_s0 + $0x208] sm:$0xff]  ;;  %v140_v58 = vpack.c.bf16 %v44_v53, %v43_v52  ;;  %v46_v61 = vld [vmem:[%s3767_s0 + $0x98] sm:$0xff]  ;;  %v93_v62 = vld [vmem:[%s3767_s0 + $0x210] sm:$0xff] }
  0x21   :  { %1873 = vmatprep.subr.msk.bf16.mxu0 %vm359_vm1, %v1880_v10  ;;  %1874 = vmatprep.subr.msk.bf16.mxu1 %vm359_vm1, %v1880_v10  ;;  %v164_v59 = vpack.c.bf16 %v92_v55, %v91_v54  ;;  %v94_v63 = vld [vmem:[%s3767_s0 + $0x218] sm:$0xff]  ;;  %v47_v0 = vld [vmem:[%s3767_s0 + $0xa0] sm:$0xff]  ;;  %v48_v1 = vld [vmem:[%s3767_s0 + $0xa8] sm:$0xff]  ;;  %v141_v4 = vpack.c.bf16 %v46_v61, %v45_v60 }
  0x22   :  { %v95_v2 = vld [vmem:[%s3767_s0 + $0x220] sm:$0xff]  ;;  %v96_v3 = vld [vmem:[%s3767_s0 + $0x228] sm:$0xff]  ;;  %v165_v5 = vpack.c.bf16 %v94_v63, %v93_v62  ;;  %v142_v6 = vpack.c.bf16 %v48_v1, %v47_v0  ;;  %v49_v8 = vld [vmem:[%s3767_s0 + $0xb0] sm:$0xff] }
  0x23   :  { %v166_v7 = vpack.c.bf16 %v96_v3, %v95_v2  ;;  %v50_v9 = vld [vmem:[%s3767_s0 + $0xb8] sm:$0xff]  ;;  %v97_v10 = vld [vmem:[%s3767_s0 + $0x230] sm:$0xff]  ;;  %v51_v12 = vld [vmem:[%s3767_s0 + $0xc0] sm:$0xff] }
  0x24   :  { %1766 = vmatpush3.bf16.msra.mxu0 %v361_v16  ;;  %1872 = vmatpush3.bf16.msra.mxu1 %v361_v16  ;;  %v98_v11 = vld [vmem:[%s3767_s0 + $0x238] sm:$0xff]  ;;  %v52_v13 = vld [vmem:[%s3767_s0 + $0xc8] sm:$0xff]  ;;  %v99_v14 = vld [vmem:[%s3767_s0 + $0x240] sm:$0xff]  ;;  %v143_v16 = vpack.c.bf16 %v50_v9, %v49_v8 }
  0x25   :  { %v100_v15 = vld [vmem:[%s3767_s0 + $0x248] sm:$0xff]  ;;  %v167_v17 = vpack.c.bf16 %v98_v11, %v97_v10  ;;  %v144_v18 = vpack.c.bf16 %v52_v13, %v51_v12  ;;  %v55_v24 = vld [vmem:[%s3767_s0 + $0xe0] sm:$0xff] }
  0x26   :  { %v168_v19 = vpack.c.bf16 %v100_v15, %v99_v14  ;;  %v56_v25 = vld [vmem:[%s3767_s0 + $0xe8] sm:$0xff]  ;;  %v103_v26 = vld [vmem:[%s3767_s0 + $0x260] sm:$0xff] }
  0x27   :  { %1768 = vmatmul.mubr.msk.bf16.vlgmr.msra.gmra.mrb[0].mxu0 %vm214_vm0, %v133_v20  ;;  %1816 = vmatmul.mubr.msk.bf16.vlgmr.msra.gmra.mrb[0].mxu1 %vm214_vm0, %v157_v21  ;;  %v53_v20 = vld [vmem:[%s3767_s0 + $0xd0] sm:$0xff]  ;;  %v54_v21 = vld [vmem:[%s3767_s0 + $0xd8] sm:$0xff]  ;;  %v104_v27 = vld [vmem:[%s3767_s0 + $0x268] sm:$0xff]  ;;  %v146_v30 = vpack.c.bf16 %v56_v25, %v55_v24 }
  0x28   :  { %1771 = vmatprep.mubr.msk.bf16.mxu0 %vm214_vm0, %v134_v22  ;;  %1819 = vmatprep.mubr.msk.bf16.mxu1 %vm214_vm0, %v158_v23  ;;  %v101_v22 = vld [vmem:[%s3767_s0 + $0x250] sm:$0xff]  ;;  %v102_v23 = vld [vmem:[%s3767_s0 + $0x258] sm:$0xff]  ;;  %v145_v28 = vpack.c.bf16 %v54_v21, %v53_v20  ;;  %v170_v31 = vpack.c.bf16 %v104_v27, %v103_v26  ;;  %v59_v36 = vld [vmem:[%s3767_s0 + $0x100] sm:$0xff] }
  0x29   :  { %v169_v29 = vpack.c.bf16 %v102_v23, %v101_v22  ;;  %v60_v37 = vld [vmem:[%s3767_s0 + $0x108] sm:$0xff]  ;;  %v107_v38 = vld [vmem:[%s3767_s0 + $0x280] sm:$0xff] }
  0x2a   :  { %v108_v39 = vld [vmem:[%s3767_s0 + $0x288] sm:$0xff]  ;;  %v148_v42 = vpack.c.bf16 %v60_v37, %v59_v36  ;;  %v63_v48 = vld [vmem:[%s3767_s0 + $0x120] sm:$0xff] }
  0x2b   :  { %v172_v43 = vpack.c.bf16 %v108_v39, %v107_v38  ;;  %v64_v49 = vld [vmem:[%s3767_s0 + $0x128] sm:$0xff]  ;;  %v111_v50 = vld [vmem:[%s3767_s0 + $0x2a0] sm:$0xff] }
  0x2c   :  { %v112_v51 = vld [vmem:[%s3767_s0 + $0x2a8] sm:$0xff]  ;;  %v150_v54 = vpack.c.bf16 %v64_v49, %v63_v48  ;;  %v67_v60 = vld [vmem:[%s3767_s0 + $0x140] sm:$0xff] }
  0x2d   :  { %v174_v55 = vpack.c.bf16 %v112_v51, %v111_v50  ;;  %v68_v61 = vld [vmem:[%s3767_s0 + $0x148] sm:$0xff]  ;;  %v115_v62 = vld [vmem:[%s3767_s0 + $0x2c0] sm:$0xff] }
  0x2e   :  { %v116_v63 = vld [vmem:[%s3767_s0 + $0x2c8] sm:$0xff]  ;;  %v152_v2 = vpack.c.bf16 %v68_v61, %v67_v60  ;;  %v71_v8 = vld [vmem:[%s3767_s0 + $0x160] sm:$0xff] }
  0x2f   :  { %1772 = vmatmul.mubr.msk.bf16.gmra.mrb[4].mxu0 %vm214_vm0, %v135_v32  ;;  %1820 = vmatmul.mubr.msk.bf16.gmra.mrb[4].mxu1 %vm214_vm0, %v159_v33  ;;  %v57_v32 = vld [vmem:[%s3767_s0 + $0xf0] sm:$0xff]  ;;  %v58_v33 = vld [vmem:[%s3767_s0 + $0xf8] sm:$0xff]  ;;  %v176_v3 = vpack.c.bf16 %v116_v63, %v115_v62  ;;  %v72_v9 = vld [vmem:[%s3767_s0 + $0x168] sm:$0xff] }
  0x30   :  { %1775 = vmatprep.mubr.msk.bf16.mxu0 %vm214_vm0, %v136_v34  ;;  %1823 = vmatprep.mubr.msk.bf16.mxu1 %vm214_vm0, %v160_v35  ;;  %v105_v34 = vld [vmem:[%s3767_s0 + $0x270] sm:$0xff]  ;;  %v106_v35 = vld [vmem:[%s3767_s0 + $0x278] sm:$0xff]  ;;  %v147_v40 = vpack.c.bf16 %v58_v33, %v57_v32  ;;  %v119_v10 = vld [vmem:[%s3767_s0 + $0x2e0] sm:$0xff]  ;;  %v154_v14 = vpack.c.bf16 %v72_v9, %v71_v8 }
  0x31   :  { %v171_v41 = vpack.c.bf16 %v106_v35, %v105_v34  ;;  %v120_v11 = vld [vmem:[%s3767_s0 + $0x2e8] sm:$0xff]  ;;  %v2674_v22 = vld [vmem:[#allocation2] ss:$0 sm:$0xff] }
  0x32   :  { %v178_v15 = vpack.c.bf16 %v120_v11, %v119_v10 }
  0x37   :  { %1776 = vmatmul.mubr.msk.bf16.gmra.mrb[8].mxu0 %vm214_vm0, %v137_v44  ;;  %1824 = vmatmul.mubr.msk.bf16.gmra.mrb[8].mxu1 %vm214_vm0, %v161_v45  ;;  %v61_v44 = vld [vmem:[%s3767_s0 + $0x110] sm:$0xff]  ;;  %v62_v45 = vld [vmem:[%s3767_s0 + $0x118] sm:$0xff] }
  0x38   :  { %1779 = vmatprep.mubr.msk.bf16.mxu0 %vm214_vm0, %v138_v46  ;;  %1827 = vmatprep.mubr.msk.bf16.mxu1 %vm214_vm0, %v162_v47  ;;  %v109_v46 = vld [vmem:[%s3767_s0 + $0x290] sm:$0xff]  ;;  %v110_v47 = vld [vmem:[%s3767_s0 + $0x298] sm:$0xff]  ;;  %v149_v52 = vpack.c.bf16 %v62_v45, %v61_v44 }
  0x39   :  { %v173_v53 = vpack.c.bf16 %v110_v47, %v109_v46 }
  0x3f   :  { %1780 = vmatmul.mubr.msk.bf16.gmra.mrb[12].mxu0 %vm214_vm0, %v139_v56  ;;  %1828 = vmatmul.mubr.msk.bf16.gmra.mrb[12].mxu1 %vm214_vm0, %v163_v57  ;;  %v65_v56 = vld [vmem:[%s3767_s0 + $0x130] sm:$0xff]  ;;  %v66_v57 = vld [vmem:[%s3767_s0 + $0x138] sm:$0xff] }
  0x40   :  { %1783 = vmatprep.mubr.msk.bf16.mxu0 %vm214_vm0, %v140_v58  ;;  %1831 = vmatprep.mubr.msk.bf16.mxu1 %vm214_vm0, %v164_v59  ;;  %v113_v58 = vld [vmem:[%s3767_s0 + $0x2b0] sm:$0xff]  ;;  %v114_v59 = vld [vmem:[%s3767_s0 + $0x2b8] sm:$0xff]  ;;  %v151_v0 = vpack.c.bf16 %v66_v57, %v65_v56 }
  0x41   :  { %v175_v1 = vpack.c.bf16 %v114_v59, %v113_v58 }
  0x47   :  { %1784 = vmatmul.mubr.msk.bf16.gmra.mrb[16].mxu0 %vm214_vm0, %v141_v4  ;;  %1832 = vmatmul.mubr.msk.bf16.gmra.mrb[16].mxu1 %vm214_vm0, %v165_v5  ;;  %v69_v4 = vld [vmem:[%s3767_s0 + $0x150] sm:$0xff]  ;;  %v70_v5 = vld [vmem:[%s3767_s0 + $0x158] sm:$0xff] }
  0x48   :  { %1787 = vmatprep.mubr.msk.bf16.mxu0 %vm214_vm0, %v142_v6  ;;  %1835 = vmatprep.mubr.msk.bf16.mxu1 %vm214_vm0, %v166_v7  ;;  %v117_v6 = vld [vmem:[%s3767_s0 + $0x2d0] sm:$0xff]  ;;  %v118_v7 = vld [vmem:[%s3767_s0 + $0x2d8] sm:$0xff]  ;;  %v153_v12 = vpack.c.bf16 %v70_v5, %v69_v4 }
  0x49   :  { %v177_v13 = vpack.c.bf16 %v118_v7, %v117_v6 }
  0x4f   :  { %1788 = vmatmul.mubr.msk.bf16.gmra.mrb[20].mxu0 %vm214_vm0, %v143_v16  ;;  %1836 = vmatmul.mubr.msk.bf16.gmra.mrb[20].mxu1 %vm214_vm0, %v167_v17  ;;  %v73_v16 = vld [vmem:[%s3767_s0 + $0x170] sm:$0xff]  ;;  %v74_v17 = vld [vmem:[%s3767_s0 + $0x178] sm:$0xff] }
  0x50   :  { %1791 = vmatprep.mubr.msk.bf16.mxu0 %vm214_vm0, %v144_v18  ;;  %1839 = vmatprep.mubr.msk.bf16.mxu1 %vm214_vm0, %v168_v19  ;;  %v121_v18 = vld [vmem:[%s3767_s0 + $0x2f0] sm:$0xff]  ;;  %v122_v19 = vld [vmem:[%s3767_s0 + $0x2f8] sm:$0xff]  ;;  %v155_v20 = vpack.c.bf16 %v74_v17, %v73_v16 }
  0x51   :  { %v179_v21 = vpack.c.bf16 %v122_v19, %v121_v18 }
  0x57   :  { %1792 = vmatmul.mubr.msk.bf16.gmra.mrb[24].mxu0 %vm214_vm0, %v145_v28  ;;  %1840 = vmatmul.mubr.msk.bf16.gmra.mrb[24].mxu1 %vm214_vm0, %v169_v29 }
  0x58   :  { %1795 = vmatprep.mubr.msk.bf16.mxu0 %vm214_vm0, %v146_v30  ;;  %1843 = vmatprep.mubr.msk.bf16.mxu1 %vm214_vm0, %v170_v31 }
  0x5f   :  { %1796 = vmatmul.mubr.msk.bf16.gmra.mrb[28].mxu0 %vm214_vm0, %v147_v40  ;;  %1844 = vmatmul.mubr.msk.bf16.gmra.mrb[28].mxu1 %vm214_vm0, %v171_v41 }
  0x60   :  { %1799 = vmatprep.mubr.msk.bf16.mxu0 %vm214_vm0, %v148_v42  ;;  %1847 = vmatprep.mubr.msk.bf16.mxu1 %vm214_vm0, %v172_v43 }
  0x67   :  { %1800 = vmatmul.mubr.msk.bf16.gmra.mrb[32].mxu0 %vm214_vm0, %v149_v52  ;;  %1848 = vmatmul.mubr.msk.bf16.gmra.mrb[32].mxu1 %vm214_vm0, %v173_v53 }
  0x68   :  { %1803 = vmatprep.mubr.msk.bf16.mxu0 %vm214_vm0, %v150_v54  ;;  %1851 = vmatprep.mubr.msk.bf16.mxu1 %vm214_vm0, %v174_v55 }
  0x6f   :  { %1804 = vmatmul.mubr.msk.bf16.gmra.mrb[36].mxu0 %vm214_vm0, %v151_v0  ;;  %1852 = vmatmul.mubr.msk.bf16.gmra.mrb[36].mxu1 %vm214_vm0, %v175_v1 }
  0x70   :  { %1807 = vmatprep.mubr.msk.bf16.mxu0 %vm214_vm0, %v152_v2  ;;  %1855 = vmatprep.mubr.msk.bf16.mxu1 %vm214_vm0, %v176_v3 }
  0x77   :  { %1808 = vmatmul.mubr.msk.bf16.gmra.mrb[40].mxu0 %vm214_vm0, %v153_v12  ;;  %1856 = vmatmul.mubr.msk.bf16.gmra.mrb[40].mxu1 %vm214_vm0, %v177_v13 }
  0x78   :  { %1811 = vmatprep.mubr.msk.bf16.mxu0 %vm214_vm0, %v154_v14  ;;  %1859 = vmatprep.mubr.msk.bf16.mxu1 %vm214_vm0, %v178_v15 }
  0x7f   :  { %1812 = vmatmul.mubr.msk.bf16.gmra.mrb[44].mxu0 %vm214_vm0, %v155_v20  ;;  %1860 = vmatmul.mubr.msk.bf16.gmra.mrb[44].mxu1 %vm214_vm0, %v179_v21 }
  0xfa   :  { %v1769_v23 = vpop.f32.mrb[0].mxu0  ;;  %v1817_v24 = vpop.f32.mrb[0].mxu1 }
  0xfb   :  { %v2677_v25 = vadd.f32 %v1769_v23, %v2674_v22  ;;  %v2680_v26 = vadd.f32 %v1817_v24, %v2674_v22  ;;  %v397_v27 = vpop.f32.mrb[1].mxu0  ;;  %v589_v28 = vpop.f32.mrb[1].mxu1 }
  0xfc   :  { %v2683_v29 = vadd.f32 %v2674_v22, %v397_v27  ;;  %v2686_v30 = vadd.f32 %v2674_v22, %v589_v28  ;;  %v1770_v31 = vpop.f32.mrb[2].mxu0  ;;  %v1818_v32 = vpop.f32.mrb[2].mxu1 }
  0xfd   :  { %v1610_v33 = vmul.f32 -1.442695, %v2677_v25  ;;  %v1658_v34 = vmul.f32 -1.442695, %v2680_v26  ;;  %v2691_v35 = vadd.f32 %v1770_v31, %v2674_v22  ;;  %v2694_v36 = vadd.f32 %v1818_v32, %v2674_v22  ;;  %v400_v37 = vpop.f32.mrb[3].mxu0  ;;  %v592_v38 = vpop.f32.mrb[3].mxu1 }
  0xfe   :  { %v1608_v39 = vmul.f32 -1.442695, %v2683_v29  ;;  %v1656_v40 = vmul.f32 -1.442695, %v2686_v30  ;;  %v2699_v41 = vadd.f32 %v2674_v22, %v400_v37  ;;  %v2702_v42 = vadd.f32 %v2674_v22, %v592_v38 }
  0xff   :  { %1881 = vpow2.f32 %v1610_v33  ;;  %v1611_v43 = vmul.f32 -1.442695, %v2691_v35  ;;  %v1659_v44 = vmul.f32 -1.442695, %v2694_v36 }
 0x100   :  { %1883 = vpow2.f32 %v1658_v34  ;;  %v1609_v45 = vmul.f32 -1.442695, %v2699_v41  ;;  %v1657_v46 = vmul.f32 -1.442695, %v2702_v42 }
 0x101   :  { %1885 = vpow2.f32 %v1608_v39 }
 0x102   :  { %1887 = vpow2.f32 %v1656_v40  ;;  %v1773_v47 = vpop.f32.mrb[4].mxu0  ;;  %v1821_v48 = vpop.f32.mrb[4].mxu1 }
 0x103   :  { %1889 = vpow2.f32 %v1611_v43  ;;  %v2709_v49 = vadd.f32 %v1773_v47, %v2674_v22  ;;  %v2712_v50 = vadd.f32 %v1821_v48, %v2674_v22  ;;  %v413_v51 = vpop.f32.mrb[5].mxu0  ;;  %v605_v52 = vpop.f32.mrb[5].mxu1 }
 0x104   :  { %1891 = vpow2.f32 %v1659_v44  ;;  %v2715_v53 = vadd.f32 %v2674_v22, %v413_v51  ;;  %v2718_v54 = vadd.f32 %v2674_v22, %v605_v52  ;;  %v1774_v55 = vpop.f32.mrb[6].mxu0  ;;  %v1822_v56 = vpop.f32.mrb[6].mxu1 }
 0x105   :  { %1893 = vpow2.f32 %v1609_v45  ;;  %v1614_v57 = vmul.f32 -1.442695, %v2709_v49  ;;  %v1662_v58 = vmul.f32 -1.442695, %v2712_v50  ;;  %v2723_v59 = vadd.f32 %v1774_v55, %v2674_v22  ;;  %v416_v60 = vpop.f32.mrb[7].mxu0  ;;  %v608_v61 = vpop.f32.mrb[7].mxu1 }
 0x106   :  { %1895 = vpow2.f32 %v1657_v46  ;;  %v1612_v62 = vmul.f32 -1.442695, %v2715_v53  ;;  %v1660_v63 = vmul.f32 -1.442695, %v2718_v54  ;;  %v2735_v31 = vadd.f32 %v1822_v56, %v2674_v22 }
 0x107   :  { %1897 = vpow2.f32 %v1614_v57  ;;  %v1615_v0 = vmul.f32 -1.442695, %v2723_v59  ;;  %v2738_v34 = vadd.f32 %v2674_v22, %v416_v60  ;;  %v2743_v40 = vadd.f32 %v2674_v22, %v608_v61 }
 0x108   :  { %1899 = vpow2.f32 %v1662_v58  ;;  %v1663_v56 = vmul.f32 -1.442695, %v2735_v31 }
 0x109   :  { %v1882_v1 = vpop.eup %1881  ;;  %1901 = vpow2.f32 %v1612_v62 }
 0x10a   :  { %v1884_v2 = vpop.eup %1883  ;;  %v1070_v3 = vadd.f32 1.0, %v1882_v1  ;;  %1903 = vpow2.f32 %v1660_v63  ;;  %v1777_v4 = vpop.f32.mrb[8].mxu0  ;;  %v1613_v63 = vmul.f32 -1.442695, %v2738_v34 }
 0x10b   :  { %v1825_v5 = vpop.f32.mrb[8].mxu1  ;;  %v1886_v6 = vpop.eup %1885  ;;  %v1118_v7 = vadd.f32 1.0, %v1884_v2  ;;  %1905 = vpow2.f32 %v1615_v0  ;;  %v2750_v47 = vadd.f32 %v1777_v4, %v2674_v22  ;;  %v1661_v4 = vmul.f32 -1.442695, %v2743_v40 }
 0x10c   :  { %v429_v8 = vpop.f32.mrb[9].mxu0  ;;  %v621_v9 = vpop.f32.mrb[9].mxu1  ;;  %1907 = vrcp.f32 %v1070_v3  ;;  %v1068_v11 = vadd.f32 1.0, %v1886_v6  ;;  %v2758_v57 = vadd.f32 %v1825_v5, %v2674_v22 }
 0x10d   :  { %v1888_v10 = vpop.eup %1887  ;;  %v1778_v12 = vpop.f32.mrb[10].mxu0  ;;  %1909 = vrcp.f32 %v1118_v7  ;;  %v2766_v0 = vadd.f32 %v2674_v22, %v429_v8  ;;  %v2773_v5 = vadd.f32 %v2674_v22, %v621_v9 }
 0x10e   :  { %v2728_v13 = vpop.f32.mrb[10].mxu1  ;;  %v1890_v14 = vpop.eup %1889  ;;  %v1116_v15 = vadd.f32 1.0, %v1888_v10  ;;  %1911 = vrcp.f32 %v1068_v11  ;;  %v1618_v10 = vmul.f32 -1.442695, %v2750_v47  ;;  %v2778_v8 = vadd.f32 %v1778_v12, %v2674_v22 }
 0x10f   :  { %v2730_v16 = vpop.f32.mrb[11].mxu0  ;;  %v1892_v17 = vpop.eup %1891  ;;  %v1071_v18 = vadd.f32 1.0, %v1890_v14  ;;  %v1666_v9 = vmul.f32 -1.442695, %v2758_v57 }
 0x110   :  { %v2732_v19 = vpop.f32.mrb[11].mxu1  ;;  %v1894_v20 = vpop.eup %1893  ;;  %1913 = vrcp.f32 %v1116_v15  ;;  %v1119_v21 = vadd.f32 1.0, %v1892_v17  ;;  %v1616_v15 = vmul.f32 -1.442695, %v2766_v0 }
 0x111   :  { %v1896_v23 = vpop.eup %1895  ;;  %1915 = vrcp.f32 %v1071_v18  ;;  %v1069_v24 = vadd.f32 1.0, %v1894_v20 }
 0x112   :  { %v1898_v27 = vpop.eup %1897  ;;  %1917 = vrcp.f32 %v1119_v21  ;;  %v1117_v28 = vadd.f32 1.0, %v1896_v23  ;;  %v2740_v37 = vpop.f32.mrb[12].mxu0  ;;  %v2812_v21 = vadd.f32 %v2674_v22, %v2732_v19 }
 0x113   :  { %v1900_v32 = vpop.eup %1899  ;;  %1919 = vrcp.f32 %v1069_v24  ;;  %v1074_v33 = vadd.f32 1.0, %v1898_v27  ;;  %v2745_v43 = vpop.f32.mrb[12].mxu1 }
 0x114   :  { %v1902_v38 = vpop.eup %1901  ;;  %1921 = vrcp.f32 %v1117_v28  ;;  %v1122_v39 = vadd.f32 1.0, %v1900_v32  ;;  %v2747_v44 = vpop.f32.mrb[13].mxu0  ;;  %v2826_v28 = vadd.f32 %v2740_v37, %v2674_v22 }
 0x115   :  { %v1904_v45 = vpop.eup %1903  ;;  %1923 = vrcp.f32 %v1074_v33  ;;  %v1072_v46 = vadd.f32 1.0, %v1902_v38  ;;  %v2752_v48 = vpop.f32.mrb[13].mxu1 }
 0x116   :  { %v2754_v51 = vpop.f32.mrb[14].mxu0  ;;  %v1906_v52 = vpop.eup %1905  ;;  %1925 = vrcp.f32 %v1122_v39  ;;  %v1120_v55 = vadd.f32 1.0, %v1904_v45  ;;  %v2840_v39 = vadd.f32 %v2745_v43, %v2674_v22 }
 0x117   :  { %v2760_v58 = vpop.f32.mrb[14].mxu1  ;;  %v2762_v60 = vpop.f32.mrb[15].mxu0  ;;  %1927 = vrcp.f32 %v1072_v46  ;;  %v1075_v62 = vadd.f32 1.0, %v1906_v52 }
 0x118   :  { %v1908_v61 = vpop.eup %1907  ;;  %v2768_v1 = vpop.f32.mrb[15].mxu1  ;;  %1929 = vrcp.f32 %v1120_v55 }
 0x119   :  { %v1910_v2 = vpop.eup %1909  ;;  %v1358_v3 = vmul.f32 %v1908_v61, %v2677_v25  ;;  %1931 = vrcp.f32 %v1075_v62  ;;  %v1622_v62 = vmul.f32 -1.442695, %v2826_v28 }
 0x11a   :  { %v1912_v6 = vpop.eup %1911  ;;  %v1406_v7 = vmul.f32 %v1910_v2, %v2680_v26  ;;  %1933 = vpow2.f32 %v1663_v56  ;;  %v2788_v26 = vadd.f32 %v2728_v13, %v2674_v22  ;;  %v2800_v17 = vpop.f32.mrb[16].mxu0  ;;  %v1665_v56 = vmul.f32 -1.442695, %v2812_v21 }
 0x11b   :  { %v1914_v11 = vpop.eup %1913  ;;  %1455 = vst.msk [vmem:[%s3770_s3 + $0x10] sm:$0xff] %vm1452_vm2, %v1358_v3  ;;  %v1356_v25 = vmul.f32 %v1912_v6, %v2683_v29  ;;  %1935 = vpow2.f32 %v1613_v63  ;;  %v2798_v29 = vadd.f32 %v2674_v22, %v2730_v16  ;;  %v2802_v18 = vpop.f32.mrb[16].mxu1  ;;  %v1670_v2 = vmul.f32 -1.442695, %v2840_v39 }
 0x11c   :  { %v1916_v14 = vpop.eup %1915  ;;  %1503 = vst.msk [vmem:[%s3770_s3 + $0x190] sm:$0xff] %vm1452_vm2, %v1406_v7  ;;  %v1404_v12 = vmul.f32 %v1914_v11, %v2686_v30  ;;  %1937 = vpow2.f32 %v1661_v4  ;;  %v1664_v30 = vmul.f32 -1.442695, %v2773_v5  ;;  %v2814_v16 = vpop.f32.mrb[17].mxu0 }
 0x11d   :  { %v1918_v13 = vpop.eup %1917  ;;  %1453 = vst.msk [vmem:[%s3770_s3] sm:$0xff] %vm1452_vm2, %v1356_v25  ;;  %v1359_v20 = vmul.f32 %v1916_v14, %v2691_v35  ;;  %v2816_v23 = vpop.f32.mrb[17].mxu1  ;;  %1939 = vpow2.f32 %v1618_v10  ;;  %v1619_v35 = vmul.f32 -1.442695, %v2778_v8 }
 0x11e   :  { %v1920_v24 = vpop.eup %1919  ;;  %1501 = vst.msk [vmem:[%s3770_s3 + $0x180] sm:$0xff] %vm1452_vm2, %v1404_v12  ;;  %v1407_v27 = vmul.f32 %v1918_v13, %v2694_v36  ;;  %v2828_v19 = vpop.f32.mrb[18].mxu0  ;;  %1941 = vpow2.f32 %v1666_v9  ;;  %v1667_v36 = vmul.f32 -1.442695, %v2788_v26 }
 0x11f   :  { %v2830_v32 = vpop.f32.mrb[18].mxu1  ;;  %v1922_v33 = vpop.eup %1921  ;;  %1456 = vst.msk [vmem:[%s3770_s3 + $0x18] sm:$0xff] %vm1452_vm2, %v1359_v20  ;;  %v1357_v38 = vmul.f32 %v1920_v24, %v2699_v41  ;;  %1943 = vpow2.f32 %v1616_v15  ;;  %v1617_v41 = vmul.f32 -1.442695, %v2798_v29 }
 0x120   :  { %v2842_v37 = vpop.f32.mrb[19].mxu0  ;;  %v2844_v45 = vpop.f32.mrb[19].mxu1  ;;  %1504 = vst.msk [vmem:[%s3770_s3 + $0x198] sm:$0xff] %vm1452_vm2, %v1407_v27  ;;  %v1405_v52 = vmul.f32 %v1922_v33, %v2702_v42  ;;  %1945 = vpow2.f32 %v1664_v30 }
 0x121   :  { %v1924_v46 = vpop.eup %1923  ;;  %1454 = vst.msk [vmem:[%s3770_s3 + $0x8] sm:$0xff] %vm1452_vm2, %v1357_v38  ;;  %1947 = vpow2.f32 %v1619_v35 }
 0x122   :  { %v1926_v55 = vpop.eup %1925  ;;  %v1362_v43 = vmul.f32 %v1924_v46, %v2709_v49  ;;  %1502 = vst.msk [vmem:[%s3770_s3 + $0x188] sm:$0xff] %vm1452_vm2, %v1405_v52  ;;  %1949 = vpow2.f32 %v1667_v36  ;;  %v2875_v4 = vpop.f32.mrb[20].mxu0 }
 0x123   :  { %v1928_v61 = vpop.eup %1927  ;;  %v1410_v42 = vmul.f32 %v1926_v55, %v2712_v50  ;;  %1951 = vpow2.f32 %v1617_v41  ;;  %v2877_v6 = vpop.f32.mrb[20].mxu1 }
 0x124   :  { %v1930_v63 = vpop.eup %1929  ;;  %1459 = vst.msk [vmem:[%s3770_s3 + $0x30] sm:$0xff] %vm1452_vm2, %v1362_v43  ;;  %v1360_v49 = vmul.f32 %v1928_v61, %v2715_v53  ;;  %1953 = vpow2.f32 %v1665_v56  ;;  %v2884_v10 = vpop.f32.mrb[21].mxu0  ;;  %v2908_v56 = vadd.f32 %v2674_v22, %v2747_v44  ;;  %v2924_v44 = vadd.f32 %v2754_v51, %v2674_v22 }
 0x125   :  { %v1932_v3 = vpop.eup %1931  ;;  %1507 = vst.msk [vmem:[%s3770_s3 + $0x1b0] sm:$0xff] %vm1452_vm2, %v1410_v42  ;;  %v1408_v50 = vmul.f32 %v1930_v63, %v2718_v54  ;;  %v2886_v11 = vpop.f32.mrb[21].mxu1  ;;  %1955 = vpow2.f32 %v1622_v62  ;;  %v2939_v51 = vadd.f32 %v2674_v22, %v2762_v60 }
 0x126   :  { %v1934_v7 = vpop.eup %1933  ;;  %1457 = vst.msk [vmem:[%s3770_s3 + $0x20] sm:$0xff] %vm1452_vm2, %v1360_v49  ;;  %v1363_v53 = vmul.f32 %v1932_v3, %v2723_v59  ;;  %v2892_v9 = vpop.f32.mrb[22].mxu0  ;;  %1957 = vpow2.f32 %v1670_v2  ;;  %v2916_v49 = vadd.f32 %v2674_v22, %v2752_v48  ;;  %v2932_v48 = vadd.f32 %v2760_v58, %v2674_v22 }
 0x127   :  { %v1936_v25 = vpop.eup %1935  ;;  %1505 = vst.msk [vmem:[%s3770_s3 + $0x1a0] sm:$0xff] %vm1452_vm2, %v1408_v50  ;;  %v1123_v54 = vadd.f32 1.0, %v1934_v7  ;;  %v2894_v14 = vpop.f32.mrb[22].mxu1  ;;  %v2944_v58 = vadd.f32 %v2674_v22, %v2768_v1  ;;  %v2956_v1 = vadd.f32 %v2802_v18, %v2674_v22 }
 0x128   :  { %v1938_v12 = vpop.eup %1937  ;;  %1460 = vst.msk [vmem:[%s3770_s3 + $0x38] sm:$0xff] %vm1452_vm2, %v1363_v53  ;;  %v1073_v59 = vadd.f32 1.0, %v1936_v25  ;;  %v2900_v15 = vpop.f32.mrb[23].mxu0 }
 0x129   :  { %v2902_v13 = vpop.f32.mrb[23].mxu1  ;;  %v1940_v20 = vpop.eup %1939  ;;  %1959 = vrcp.f32 %v1123_v54  ;;  %v1121_v30 = vadd.f32 1.0, %v1938_v12 }
 0x12a   :  { %v1942_v24 = vpop.eup %1941  ;;  %1961 = vrcp.f32 %v1073_v59  ;;  %v1078_v27 = vadd.f32 1.0, %v1940_v20  ;;  %v2904_v41 = vpop.f32.mrb[24].mxu0 }
 0x12b   :  { %v1944_v35 = vpop.eup %1943  ;;  %1963 = vrcp.f32 %v1121_v30  ;;  %v1126_v33 = vadd.f32 1.0, %v1942_v24  ;;  %v2910_v61 = vpop.f32.mrb[24].mxu1  ;;  %v1620_v24 = vmul.f32 -1.442695, %v2908_v56 }
 0x12c   :  { %v1946_v38 = vpop.eup %1945  ;;  %1965 = vrcp.f32 %v1078_v27  ;;  %v1076_v36 = vadd.f32 1.0, %v1944_v35  ;;  %v2912_v42 = vpop.f32.mrb[25].mxu0 }
 0x12d   :  { %v1948_v46 = vpop.eup %1947  ;;  %1967 = vrcp.f32 %v1126_v33  ;;  %v1124_v52 = vadd.f32 1.0, %v1946_v38  ;;  %v2918_v2 = vpop.f32.mrb[25].mxu1  ;;  %v1668_v33 = vmul.f32 -1.442695, %v2916_v49 }
 0x12e   :  { %v1950_v55 = vpop.eup %1949  ;;  %1969 = vrcp.f32 %v1076_v36  ;;  %v1079_v43 = vadd.f32 1.0, %v1948_v46  ;;  %v2920_v3 = vpop.f32.mrb[26].mxu0  ;;  %v1623_v46 = vmul.f32 -1.442695, %v2924_v44 }
 0x12f   :  { %v1952_v62 = vpop.eup %1951  ;;  %1971 = vrcp.f32 %v1124_v52  ;;  %v1127_v63 = vadd.f32 1.0, %v1950_v55  ;;  %v2926_v53 = vpop.f32.mrb[26].mxu1  ;;  %v2950_v52 = vadd.f32 %v2800_v17, %v2674_v22 }
 0x130   :  { %v1954_v50 = vpop.eup %1953  ;;  %1973 = vrcp.f32 %v1079_v43  ;;  %v1077_v7 = vadd.f32 1.0, %v1952_v62  ;;  %v2928_v25 = vpop.f32.mrb[27].mxu0  ;;  %v1671_v43 = vmul.f32 -1.442695, %v2932_v48 }
 0x131   :  { %v1956_v54 = vpop.eup %1955  ;;  %1975 = vrcp.f32 %v1127_v63  ;;  %v1125_v12 = vadd.f32 1.0, %v1954_v50  ;;  %v2934_v59 = vpop.f32.mrb[27].mxu1  ;;  %v2970_v50 = vadd.f32 %v2674_v22, %v2814_v16 }
 0x132   :  { %v1958_v20 = vpop.eup %1957  ;;  %1977 = vrcp.f32 %v1077_v7  ;;  %v1082_v30 = vadd.f32 1.0, %v1956_v54  ;;  %v2958_v62 = vpop.f32.mrb[28].mxu0 }
 0x133   :  { %v1960_v27 = vpop.eup %1959  ;;  %1979 = vrcp.f32 %v1125_v12  ;;  %v1130_v35 = vadd.f32 1.0, %v1958_v20  ;;  %v2972_v18 = vpop.f32.mrb[29].mxu0  ;;  %v2984_v20 = vadd.f32 %v2674_v22, %v2816_v23 }
 0x134   :  { %v1962_v38 = vpop.eup %1961  ;;  %v1411_v36 = vmul.f32 %v1960_v27, %v2735_v31  ;;  %1981 = vrcp.f32 %v1082_v30  ;;  %v2960_v31 = vpop.f32.mrb[28].mxu1 }
 0x135   :  { %v1964_v60 = vpop.eup %1963  ;;  %v1361_v55 = vmul.f32 %v1962_v38, %v2738_v34  ;;  %1983 = vrcp.f32 %v1130_v35  ;;  %v1621_v34 = vmul.f32 -1.442695, %v2939_v51  ;;  %v2974_v7 = vpop.f32.mrb[29].mxu1  ;;  %v2998_v35 = vadd.f32 %v2828_v19, %v2674_v22 }
 0x136   :  { %v1966_v63 = vpop.eup %1965  ;;  %1508 = vst.msk [vmem:[%s3770_s3 + $0x1b8] sm:$0xff] %vm1452_vm2, %v1411_v36  ;;  %v1409_v17 = vmul.f32 %v1964_v60, %v2743_v40  ;;  %1985 = vpow2.f32 %v1620_v24  ;;  %v1669_v40 = vmul.f32 -1.442695, %v2944_v58  ;;  %v2986_v16 = vpop.f32.mrb[30].mxu0 }
 0x137   :  { %v1968_v54 = vpop.eup %1967  ;;  %1458 = vst.msk [vmem:[%s3770_s3 + $0x28] sm:$0xff] %vm1452_vm2, %v1361_v55  ;;  %v1366_v12 = vmul.f32 %v1966_v63, %v2750_v47  ;;  %1987 = vpow2.f32 %v1668_v33  ;;  %v2988_v30 = vpop.f32.mrb[30].mxu1  ;;  %v1626_v47 = vmul.f32 -1.442695, %v2950_v52  ;;  %v1624_v55 = vmul.f32 -1.442695, %v2970_v50 }
 0x138   :  { %v1970_v24 = vpop.eup %1969  ;;  %1506 = vst.msk [vmem:[%s3770_s3 + $0x1a8] sm:$0xff] %vm1452_vm2, %v1409_v17  ;;  %v1414_v27 = vmul.f32 %v1968_v54, %v2758_v57  ;;  %1989 = vpow2.f32 %v1623_v46  ;;  %v3000_v23 = vpop.f32.mrb[31].mxu0  ;;  %v1674_v57 = vmul.f32 -1.442695, %v2956_v1  ;;  %v3012_v46 = vadd.f32 %v2830_v32, %v2674_v22 }
 0x139   :  { %v3002_v33 = vpop.f32.mrb[31].mxu1  ;;  %v1972_v38 = vpop.eup %1971  ;;  %1463 = vst.msk [vmem:[%s3770_s3 + $0x50] sm:$0xff] %vm1452_vm2, %v1366_v12  ;;  %v1364_v36 = vmul.f32 %v1970_v24, %v2766_v0  ;;  %1991 = vpow2.f32 %v1671_v43  ;;  %v3022_v0 = vadd.f32 %v2674_v22, %v2842_v37  ;;  %v1672_v63 = vmul.f32 -1.442695, %v2984_v20 }
 0x13a   :  { %v1974_v19 = vpop.eup %1973  ;;  %1511 = vst.msk [vmem:[%s3770_s3 + $0x1d0] sm:$0xff] %vm1452_vm2, %v1414_v27  ;;  %v1412_v60 = vmul.f32 %v1972_v38, %v2773_v5  ;;  %1993 = vpow2.f32 %v1621_v34  ;;  %v1627_v37 = vmul.f32 -1.442695, %v2998_v35  ;;  %v1675_v54 = vmul.f32 -1.442695, %v3012_v46  ;;  %v3042_v12 = vpop.f32.mrb[32].mxu0 }
 0x13b   :  { %v1976_v43 = vpop.eup %1975  ;;  %1461 = vst.msk [vmem:[%s3770_s3 + $0x40] sm:$0xff] %vm1452_vm2, %v1364_v36  ;;  %v1367_v32 = vmul.f32 %v1974_v19, %v2778_v8  ;;  %1995 = vpow2.f32 %v1669_v40  ;;  %v3044_v40 = vpop.f32.mrb[32].mxu1  ;;  %v1625_v27 = vmul.f32 -1.442695, %v3022_v0 }
 0x13c   :  { %v1978_v17 = vpop.eup %1977  ;;  %1509 = vst.msk [vmem:[%s3770_s3 + $0x1c0] sm:$0xff] %vm1452_vm2, %v1412_v60  ;;  %v1415_v5 = vmul.f32 %v1976_v43, %v2788_v26  ;;  %1997 = vpow2.f32 %v1626_v47  ;;  %v3052_v47 = vpop.f32.mrb[33].mxu0 }
 0x13d   :  { %v1980_v34 = vpop.eup %1979  ;;  %1464 = vst.msk [vmem:[%s3770_s3 + $0x58] sm:$0xff] %vm1452_vm2, %v1367_v32  ;;  %v1365_v8 = vmul.f32 %v1978_v17, %v2798_v29  ;;  %1999 = vpow2.f32 %v1674_v57  ;;  %v3054_v29 = vpop.f32.mrb[33].mxu1 }
 0x13e   :  { %v1982_v24 = vpop.eup %1981  ;;  %1512 = vst.msk [vmem:[%s3770_s3 + $0x1d8] sm:$0xff] %vm1452_vm2, %v1415_v5  ;;  %v1413_v26 = vmul.f32 %v1980_v34, %v2812_v21  ;;  %2001 = vpow2.f32 %v1624_v55  ;;  %v3061_v57 = vpop.f32.mrb[34].mxu0 }
 0x13f   :  { %v1984_v38 = vpop.eup %1983  ;;  %1462 = vst.msk [vmem:[%s3770_s3 + $0x48] sm:$0xff] %vm1452_vm2, %v1365_v8  ;;  %v1370_v36 = vmul.f32 %v1982_v24, %v2826_v28  ;;  %2003 = vpow2.f32 %v1672_v63  ;;  %v3063_v19 = vpop.f32.mrb[34].mxu1 }
 0x140   :  { %v1986_v21 = vpop.eup %1985  ;;  %1510 = vst.msk [vmem:[%s3770_s3 + $0x1c8] sm:$0xff] %vm1452_vm2, %v1413_v26  ;;  %v1418_v60 = vmul.f32 %v1984_v38, %v2840_v39  ;;  %2005 = vpow2.f32 %v1627_v37  ;;  %v3070_v55 = vpop.f32.mrb[35].mxu0 }
 0x141   :  { %v3072_v43 = vpop.f32.mrb[35].mxu1  ;;  %v1988_v32 = vpop.eup %1987  ;;  %1467 = vst.msk [vmem:[%s3770_s3 + $0x70] sm:$0xff] %vm1452_vm2, %v1370_v36  ;;  %v1080_v28 = vadd.f32 1.0, %v1986_v21  ;;  %2007 = vpow2.f32 %v1675_v54 }
 0x142   :  { %v1990_v63 = vpop.eup %1989  ;;  %1515 = vst.msk [vmem:[%s3770_s3 + $0x1f0] sm:$0xff] %vm1452_vm2, %v1418_v60  ;;  %v1128_v39 = vadd.f32 1.0, %v1988_v32  ;;  %2009 = vpow2.f32 %v1625_v27  ;;  %v3082_v26 = vpop.f32.mrb[36].mxu0 }
 0x143   :  { %v1992_v17 = vpop.eup %1991  ;;  %2011 = vrcp.f32 %v1080_v28  ;;  %v1083_v5 = vadd.f32 1.0, %v1990_v63  ;;  %v3084_v36 = vpop.f32.mrb[36].mxu1 }
 0x144   :  { %v1994_v37 = vpop.eup %1993  ;;  %2013 = vrcp.f32 %v1128_v39  ;;  %v1131_v34 = vadd.f32 1.0, %v1992_v17  ;;  %v3086_v21 = vpop.f32.mrb[37].mxu0  ;;  %v3094_v17 = vadd.f32 %v2674_v22, %v2844_v45  ;;  %v3108_v45 = vadd.f32 %v2877_v6, %v2674_v22 }
 0x145   :  { %v1996_v8 = vpop.eup %1995  ;;  %2015 = vrcp.f32 %v1083_v5  ;;  %v1081_v24 = vadd.f32 1.0, %v1994_v37  ;;  %v3088_v32 = vpop.f32.mrb[37].mxu1 }
 0x146   :  { %v1998_v54 = vpop.eup %1997  ;;  %2017 = vrcp.f32 %v1131_v34  ;;  %v1129_v38 = vadd.f32 1.0, %v1996_v8  ;;  %3771 = vst [vmem:[#allocation5_spill] sm:$0xff] %v3088_v32  ;;  %v3090_v28 = vpop.f32.mrb[38].mxu0 }
 0x147   :  { %v2000_v60 = vpop.eup %1999  ;;  %2019 = vrcp.f32 %v1081_v24  ;;  %v1086_v27 = vadd.f32 1.0, %v1998_v54  ;;  %3772 = vst [vmem:[#allocation6_spill] sm:$0xff] %v3090_v28  ;;  %v3096_v5 = vpop.f32.mrb[38].mxu1  ;;  %v3102_v24 = vadd.f32 %v2875_v4, %v2674_v22 }
 0x148   :  { %v2002_v63 = vpop.eup %2001  ;;  %2021 = vrcp.f32 %v1129_v38  ;;  %v1134_v39 = vadd.f32 1.0, %v2000_v60  ;;  %3773 = vst [vmem:[#allocation7_spill] sm:$0xff] %v3096_v5  ;;  %v3098_v37 = vpop.f32.mrb[39].mxu0 }
 0x149   :  { %3774 = vst [vmem:[#allocation8_spill] sm:$0xff] %v3098_v37  ;;  %v2004_v34 = vpop.eup %2003  ;;  %2023 = vrcp.f32 %v1086_v27  ;;  %v1084_v8 = vadd.f32 1.0, %v2002_v63  ;;  %v3104_v54 = vpop.f32.mrb[39].mxu1  ;;  %v3112_v27 = vadd.f32 %v2674_v22, %v2884_v10  ;;  %v1673_v37 = vmul.f32 -1.442695, %v3094_v17 }
 0x14a   :  { %3775 = vst [vmem:[#allocation9_spill] sm:$0xff] %v3104_v54  ;;  %v2006_v28 = vpop.eup %2005  ;;  %2025 = vrcp.f32 %v1134_v39  ;;  %v1132_v38 = vadd.f32 1.0, %v2004_v34  ;;  %v3117_v39 = vadd.f32 %v2674_v22, %v2886_v11  ;;  %v1630_v54 = vmul.f32 -1.442695, %v3102_v24  ;;  %v3124_v10 = vpop.f32.mrb[40].mxu0 }
 0x14b   :  { %v2008_v60 = vpop.eup %2007  ;;  %2027 = vrcp.f32 %v1084_v8  ;;  %v1087_v5 = vadd.f32 1.0, %v2006_v28  ;;  %v3122_v28 = vadd.f32 %v2892_v9, %v2674_v22  ;;  %3776 = vst [vmem:[#allocation10_spill] sm:$0xff] %v3124_v10  ;;  %v3130_v11 = vadd.f32 %v2894_v14, %v2674_v22 }
 0x14c   :  { %v2010_v63 = vpop.eup %2009  ;;  %2029 = vrcp.f32 %v1132_v38  ;;  %v1135_v4 = vadd.f32 1.0, %v2008_v60  ;;  %v1678_v60 = vmul.f32 -1.442695, %v3108_v45  ;;  %v1628_v10 = vmul.f32 -1.442695, %v3112_v27 }
 0x14d   :  { %v2012_v34 = vpop.eup %2011  ;;  %2031 = vrcp.f32 %v1087_v5  ;;  %v1085_v6 = vadd.f32 1.0, %v2010_v63  ;;  %v3132_v5 = vpop.f32.mrb[40].mxu1 }
 0x14e   :  { %v2014_v8 = vpop.eup %2013  ;;  %v1368_v38 = vmul.f32 %v2012_v34, %v2908_v56  ;;  %2033 = vrcp.f32 %v1135_v4  ;;  %v3134_v63 = vpop.f32.mrb[41].mxu0  ;;  %v3140_v56 = vadd.f32 %v2674_v22, %v2900_v15 }
 0x14f   :  { %3777 = vst [vmem:[#allocation11_spill] sm:$0xff] %v3134_v63  ;;  %v2016_v32 = vpop.eup %2015  ;;  %v1416_v9 = vmul.f32 %v2014_v8, %v2916_v49  ;;  %2035 = vrcp.f32 %v1085_v6  ;;  %v3142_v4 = vpop.f32.mrb[41].mxu1  ;;  %v1676_v49 = vmul.f32 -1.442695, %v3117_v39  ;;  %v3154_v6 = vadd.f32 %v2674_v22, %v2902_v13 }
 0x150   :  { %v3144_v34 = vpop.f32.mrb[42].mxu0  ;;  %v2018_v14 = vpop.eup %2017  ;;  %1465 = vst.msk [vmem:[%s3770_s3 + $0x60] sm:$0xff] %vm1452_vm2, %v1368_v38  ;;  %v1371_v63 = vmul.f32 %v2016_v32, %v2924_v44  ;;  %2037 = vpow2.f32 %v1673_v37  ;;  %v1631_v44 = vmul.f32 -1.442695, %v3122_v28  ;;  %v3168_v32 = vadd.f32 %v2904_v41, %v2674_v22 }
 0x151   :  { %3778 = vst [vmem:[#allocation12_spill] sm:$0xff] %v3144_v34  ;;  %v3156_v15 = vpop.f32.mrb[42].mxu1  ;;  %v3158_v8 = vpop.f32.mrb[43].mxu0  ;;  %1513 = vst.msk [vmem:[%s3770_s3 + $0x1e0] sm:$0xff] %vm1452_vm2, %v1416_v9  ;;  %v1419_v38 = vmul.f32 %v2018_v14, %v2932_v48  ;;  %2039 = vpow2.f32 %v1630_v54  ;;  %v1679_v48 = vmul.f32 -1.442695, %v3130_v11  ;;  %v3180_v54 = vadd.f32 %v2910_v61, %v2674_v22 }
 0x152   :  { %3779 = vst [vmem:[#allocation13_spill] sm:$0xff] %v3158_v8  ;;  %v2020_v34 = vpop.eup %2019  ;;  %v3170_v13 = vpop.f32.mrb[43].mxu1  ;;  %1468 = vst.msk [vmem:[%s3770_s3 + $0x78] sm:$0xff] %vm1452_vm2, %v1371_v63  ;;  %2041 = vpow2.f32 %v1678_v60  ;;  %v1629_v63 = vmul.f32 -1.442695, %v3140_v56 }
 0x153   :  { %v2022_v37 = vpop.eup %2021  ;;  %v1369_v8 = vmul.f32 %v2020_v34, %v2939_v51  ;;  %1516 = vst.msk [vmem:[%s3770_s3 + $0x1f8] sm:$0xff] %vm1452_vm2, %v1419_v38  ;;  %2043 = vpow2.f32 %v1628_v10  ;;  %v3190_v51 = vadd.f32 %v2674_v22, %v2912_v42  ;;  %v1677_v34 = vmul.f32 -1.442695, %v3154_v6 }
 0x154   :  { %v2024_v9 = vpop.eup %2023  ;;  %v1417_v41 = vmul.f32 %v2022_v37, %v2944_v58  ;;  %2045 = vpow2.f32 %v1676_v49  ;;  %v3200_v58 = vadd.f32 %v2674_v22, %v2918_v2  ;;  %v1634_v14 = vmul.f32 -1.442695, %v3168_v32 }
 0x155   :  { %v2026_v60 = vpop.eup %2025  ;;  %1466 = vst.msk [vmem:[%s3770_s3 + $0x68] sm:$0xff] %vm1452_vm2, %v1369_v8  ;;  %v1374_v61 = vmul.f32 %v2024_v9, %v2950_v52  ;;  %2047 = vpow2.f32 %v1631_v44  ;;  %v3208_v8 = vpop.f32.mrb[44].mxu0  ;;  %v1682_v38 = vmul.f32 -1.442695, %v3180_v54 }
 0x156   :  { %v2028_v10 = vpop.eup %2027  ;;  %1514 = vst.msk [vmem:[%s3770_s3 + $0x1e8] sm:$0xff] %vm1452_vm2, %v1417_v41  ;;  %v1422_v42 = vmul.f32 %v2026_v60, %v2956_v1  ;;  %v3210_v52 = vpop.f32.mrb[44].mxu1  ;;  %2049 = vpow2.f32 %v1679_v48  ;;  %v1632_v41 = vmul.f32 -1.442695, %v3190_v51 }
 0x157   :  { %v2030_v49 = vpop.eup %2029  ;;  %1471 = vst.msk [vmem:[%s3770_s3 + $0x90] sm:$0xff] %vm1452_vm2, %v1374_v61  ;;  %v1372_v2 = vmul.f32 %v2028_v10, %v2970_v50  ;;  %v3218_v37 = vpop.f32.mrb[45].mxu0  ;;  %2051 = vpow2.f32 %v1629_v63  ;;  %v1680_v10 = vmul.f32 -1.442695, %v3200_v58 }
 0x158   :  { %v3220_v1 = vpop.f32.mrb[45].mxu1  ;;  %v2032_v44 = vpop.eup %2031  ;;  %1519 = vst.msk [vmem:[%s3770_s3 + $0x210] sm:$0xff] %vm1452_vm2, %v1422_v42  ;;  %v1420_v9 = vmul.f32 %v2030_v49, %v2984_v20  ;;  %2053 = vpow2.f32 %v1677_v34 }
 0x159   :  { %v3228_v60 = vpop.f32.mrb[46].mxu0  ;;  %v3230_v50 = vpop.f32.mrb[46].mxu1  ;;  %1469 = vst.msk [vmem:[%s3770_s3 + $0x80] sm:$0xff] %vm1452_vm2, %v1372_v2  ;;  %v1375_v61 = vmul.f32 %v2032_v44, %v2998_v35  ;;  %2055 = vpow2.f32 %v1634_v14 }
 0x15a   :  { %3780 = vst [vmem:[#allocation14_spill] sm:$0xff] %v3230_v50  ;;  %v2034_v48 = vpop.eup %2033  ;;  %v3238_v42 = vpop.f32.mrb[47].mxu0  ;;  %1517 = vst.msk [vmem:[%s3770_s3 + $0x200] sm:$0xff] %vm1452_vm2, %v1420_v9  ;;  %2057 = vpow2.f32 %v1682_v38 }
 0x15b   :  { %v3240_v20 = vpop.f32.mrb[47].mxu1  ;;  %v2036_v63 = vpop.eup %2035  ;;  %v1423_v49 = vmul.f32 %v2034_v48, %v3012_v46  ;;  %1472 = vst.msk [vmem:[%s3770_s3 + $0x98] sm:$0xff] %vm1452_vm2, %v1375_v61  ;;  %2059 = vpow2.f32 %v1632_v41 }
 0x15c   :  { %3781 = vst [vmem:[#allocation15_spill] sm:$0xff] %v3240_v20  ;;  %v2038_v50 = vpop.eup %2037  ;;  %v1373_v35 = vmul.f32 %v2036_v63, %v3022_v0  ;;  %2061 = vpow2.f32 %v1680_v10  ;;  %v3262_v10 = vadd.f32 %v2920_v3, %v2674_v22 }
 0x15d   :  { %v2040_v34 = vpop.eup %2039  ;;  %1520 = vst.msk [vmem:[%s3770_s3 + $0x218] sm:$0xff] %vm1452_vm2, %v1423_v49  ;;  %v1133_v2 = vadd.f32 1.0, %v2038_v50 }
 0x15e   :  { %v2042_v44 = vpop.eup %2041  ;;  %1470 = vst.msk [vmem:[%s3770_s3 + $0x88] sm:$0xff] %vm1452_vm2, %v1373_v35  ;;  %v1090_v46 = vadd.f32 1.0, %v2040_v34 }
 0x15f   :  { %v2044_v14 = vpop.eup %2043  ;;  %2063 = vrcp.f32 %v1133_v2  ;;  %v1138_v0 = vadd.f32 1.0, %v2042_v44  ;;  %v3264_v44 = vld [vmem:[#allocation2] ss:$0 sm:$0xff] }
 0x160   :  { %v2046_v38 = vpop.eup %2045  ;;  %2065 = vrcp.f32 %v1090_v46  ;;  %v1088_v9 = vadd.f32 1.0, %v2044_v14  ;;  %v3268_v46 = vadd.f32 %v3264_v44, %v2926_v53  ;;  %v3276_v3 = vadd.f32 %v3264_v44, %v2934_v59 }
 0x161   :  { %v2048_v48 = vpop.eup %2047  ;;  %2067 = vrcp.f32 %v1138_v0  ;;  %v1136_v61 = vadd.f32 1.0, %v2046_v38  ;;  %v3272_v38 = vadd.f32 %v3264_v44, %v2928_v25  ;;  %v1635_v53 = vmul.f32 -1.442695, %v3262_v10 }
 0x162   :  { %v2050_v63 = vpop.eup %2049  ;;  %2069 = vrcp.f32 %v1088_v9  ;;  %v1091_v41 = vadd.f32 1.0, %v2048_v48 }
 0x163   :  { %v2052_v50 = vpop.eup %2051  ;;  %2071 = vrcp.f32 %v1136_v61  ;;  %v1139_v49 = vadd.f32 1.0, %v2050_v63  ;;  %v3281_v61 = vadd.f32 %v3264_v44, %v2958_v62 }
 0x164   :  { %v2054_v20 = vpop.eup %2053  ;;  %2073 = vrcp.f32 %v1091_v41  ;;  %v1089_v35 = vadd.f32 1.0, %v2052_v50  ;;  %v1683_v41 = vmul.f32 -1.442695, %v3268_v46  ;;  %v3286_v50 = vadd.f32 %v3264_v44, %v2960_v31 }
 0x165   :  { %v2056_v34 = vpop.eup %2055  ;;  %2075 = vrcp.f32 %v1139_v49  ;;  %v1137_v2 = vadd.f32 1.0, %v2054_v20  ;;  %v3298_v31 = vadd.f32 %v3264_v44, %v2974_v7 }
 0x166   :  { %v2058_v14 = vpop.eup %2057  ;;  %2077 = vrcp.f32 %v1089_v35  ;;  %v1094_v0 = vadd.f32 1.0, %v2056_v34  ;;  %v1633_v35 = vmul.f32 -1.442695, %v3272_v38  ;;  %v3292_v34 = vadd.f32 %v3264_v44, %v2972_v18 }
 0x167   :  { %v2060_v9 = vpop.eup %2059  ;;  %2079 = vrcp.f32 %v1137_v2  ;;  %v1142_v22 = vadd.f32 1.0, %v2058_v14  ;;  %v1681_v14 = vmul.f32 -1.442695, %v3276_v3  ;;  %v1638_v18 = vmul.f32 -1.442695, %v3281_v61 }
 0x168   :  { %v2062_v20 = vpop.eup %2061  ;;  %2081 = vrcp.f32 %v1094_v0  ;;  %v1092_v48 = vadd.f32 1.0, %v2060_v9 }
 0x169   :  { %v2064_v63 = vpop.eup %2063  ;;  %2083 = vrcp.f32 %v1142_v22  ;;  %v1140_v25 = vadd.f32 1.0, %v2062_v20  ;;  %v1686_v22 = vmul.f32 -1.442695, %v3286_v50 }
 0x16a   :  { %v2066_v59 = vpop.eup %2065  ;;  %v1421_v49 = vmul.f32 %v2064_v63, %v3094_v17  ;;  %2085 = vrcp.f32 %v1092_v48  ;;  %v1636_v48 = vmul.f32 -1.442695, %v3292_v34  ;;  %v1684_v63 = vmul.f32 -1.442695, %v3298_v31 }
 0x16b   :  { %v2068_v62 = vpop.eup %2067  ;;  %v1378_v2 = vmul.f32 %v2066_v59, %v3102_v24  ;;  %2087 = vrcp.f32 %v1140_v25  ;;  %v3308_v24 = vadd.f32 %v3264_v44, %v2986_v16 }
 0x16c   :  { %v2070_v0 = vpop.eup %2069  ;;  %1518 = vst.msk [vmem:[%s3770_s3 + $0x208] sm:$0xff] %vm1452_vm2, %v1421_v49  ;;  %v1426_v17 = vmul.f32 %v2068_v62, %v3108_v45  ;;  %2089 = vpow2.f32 %v1635_v53  ;;  %v3318_v45 = vadd.f32 %v3264_v44, %v2988_v30 }
 0x16d   :  { %v2072_v9 = vpop.eup %2071  ;;  %1475 = vst.msk [vmem:[%s3770_s3 + $0xb0] sm:$0xff] %vm1452_vm2, %v1378_v2  ;;  %v1376_v7 = vmul.f32 %v2070_v0, %v3112_v27  ;;  %2091 = vpow2.f32 %v1683_v41  ;;  %v3328_v27 = vadd.f32 %v3264_v44, %v3000_v23  ;;  %v1639_v41 = vmul.f32 -1.442695, %v3308_v24 }
 0x16e   :  { %v2074_v20 = vpop.eup %2073  ;;  %1523 = vst.msk [vmem:[%s3770_s3 + $0x230] sm:$0xff] %vm1452_vm2, %v1426_v17  ;;  %v1424_v16 = vmul.f32 %v2072_v9, %v3117_v39  ;;  %2093 = vpow2.f32 %v1633_v35  ;;  %v3338_v39 = vadd.f32 %v3264_v44, %v3002_v33  ;;  %v1687_v49 = vmul.f32 -1.442695, %v3318_v45 }
 0x16f   :  { %v2076_v53 = vpop.eup %2075  ;;  %1473 = vst.msk [vmem:[%s3770_s3 + $0xa0] sm:$0xff] %vm1452_vm2, %v1376_v7  ;;  %v1379_v30 = vmul.f32 %v2074_v20, %v3122_v28  ;;  %2095 = vpow2.f32 %v1681_v14  ;;  %v3348_v28 = vadd.f32 %v3264_v44, %v3042_v12 }
 0x170   :  { %v2078_v25 = vpop.eup %2077  ;;  %1521 = vst.msk [vmem:[%s3770_s3 + $0x220] sm:$0xff] %vm1452_vm2, %v1424_v16  ;;  %v1427_v23 = vmul.f32 %v2076_v53, %v3130_v11  ;;  %2097 = vpow2.f32 %v1638_v18  ;;  %v1637_v11 = vmul.f32 -1.442695, %v3328_v27  ;;  %v1685_v2 = vmul.f32 -1.442695, %v3338_v39 }
 0x171   :  { %v2080_v59 = vpop.eup %2079  ;;  %1476 = vst.msk [vmem:[%s3770_s3 + $0xb8] sm:$0xff] %vm1452_vm2, %v1379_v30  ;;  %v1377_v33 = vmul.f32 %v2078_v25, %v3140_v56  ;;  %2099 = vpow2.f32 %v1686_v22  ;;  %v1642_v0 = vmul.f32 -1.442695, %v3348_v28 }
 0x172   :  { %v2082_v35 = vpop.eup %2081  ;;  %1524 = vst.msk [vmem:[%s3770_s3 + $0x238] sm:$0xff] %vm1452_vm2, %v1427_v23  ;;  %v1425_v12 = vmul.f32 %v2080_v59, %v3154_v6  ;;  %2101 = vpow2.f32 %v1636_v48 }
 0x173   :  { %v2084_v62 = vpop.eup %2083  ;;  %1474 = vst.msk [vmem:[%s3770_s3 + $0xa8] sm:$0xff] %vm1452_vm2, %v1377_v33  ;;  %v1382_v56 = vmul.f32 %v2082_v35, %v3168_v32  ;;  %2103 = vpow2.f32 %v1684_v63 }
 0x174   :  { %v2086_v14 = vpop.eup %2085  ;;  %1522 = vst.msk [vmem:[%s3770_s3 + $0x228] sm:$0xff] %vm1452_vm2, %v1425_v12  ;;  %v1430_v6 = vmul.f32 %v2084_v62, %v3180_v54  ;;  %2105 = vpow2.f32 %v1639_v41 }
 0x175   :  { %v2088_v17 = vpop.eup %2087  ;;  %1479 = vst.msk [vmem:[%s3770_s3 + $0xd0] sm:$0xff] %vm1452_vm2, %v1382_v56  ;;  %v1380_v32 = vmul.f32 %v2086_v14, %v3190_v51  ;;  %2107 = vpow2.f32 %v1687_v49  ;;  %v3394_v49 = vadd.f32 %v3264_v44, %v3044_v40  ;;  %v3406_v40 = vadd.f32 %v3264_v44, %v3061_v57 }
 0x176   :  { %v2090_v18 = vpop.eup %2089  ;;  %1527 = vst.msk [vmem:[%s3770_s3 + $0x250] sm:$0xff] %vm1452_vm2, %v1430_v6  ;;  %v1428_v54 = vmul.f32 %v2088_v17, %v3200_v58  ;;  %2109 = vpow2.f32 %v1637_v11  ;;  %v3398_v11 = vadd.f32 %v3264_v44, %v3052_v47 }
 0x177   :  { %v2092_v9 = vpop.eup %2091  ;;  %1477 = vst.msk [vmem:[%s3770_s3 + $0xc0] sm:$0xff] %vm1452_vm2, %v1380_v32  ;;  %v1095_v7 = vadd.f32 1.0, %v2090_v18  ;;  %2111 = vpow2.f32 %v1685_v2  ;;  %v3402_v2 = vadd.f32 %v3264_v44, %v3054_v29  ;;  %v1690_v47 = vmul.f32 -1.442695, %v3394_v49 }
 0x178   :  { %v2094_v22 = vpop.eup %2093  ;;  %1525 = vst.msk [vmem:[%s3770_s3 + $0x240] sm:$0xff] %vm1452_vm2, %v1428_v54  ;;  %v1143_v51 = vadd.f32 1.0, %v2092_v9  ;;  %2113 = vpow2.f32 %v1642_v0  ;;  %v3411_v32 = vadd.f32 %v3264_v44, %v3063_v19  ;;  %v1640_v54 = vmul.f32 -1.442695, %v3398_v11 }
 0x179   :  { %v2096_v20 = vpop.eup %2095  ;;  %2115 = vrcp.f32 %v1095_v7  ;;  %v1093_v58 = vadd.f32 1.0, %v2094_v22  ;;  %v3416_v9 = vadd.f32 %v3264_v44, %v3070_v55  ;;  %v1688_v22 = vmul.f32 -1.442695, %v3402_v2 }
 0x17a   :  { %v2098_v16 = vpop.eup %2097  ;;  %2117 = vrcp.f32 %v1143_v51  ;;  %v1141_v48 = vadd.f32 1.0, %v2096_v20  ;;  %v3422_v51 = vadd.f32 %v3264_v44, %v3072_v43  ;;  %v3428_v55 = vadd.f32 %v3264_v44, %v3082_v26 }
 0x17b   :  { %v2100_v53 = vpop.eup %2099  ;;  %2119 = vrcp.f32 %v1093_v58  ;;  %v1098_v30 = vadd.f32 1.0, %v2098_v16  ;;  %v1643_v58 = vmul.f32 -1.442695, %v3406_v40  ;;  %v1691_v43 = vmul.f32 -1.442695, %v3411_v32 }
 0x17c   :  { %v2102_v63 = vpop.eup %2101  ;;  %2121 = vrcp.f32 %v1141_v48  ;;  %v1146_v25 = vadd.f32 1.0, %v2100_v53  ;;  %v1641_v53 = vmul.f32 -1.442695, %v3416_v9 }
 0x17d   :  { %v2104_v23 = vpop.eup %2103  ;;  %2123 = vrcp.f32 %v1098_v30  ;;  %v1096_v41 = vadd.f32 1.0, %v2102_v63  ;;  %v1689_v63 = vmul.f32 -1.442695, %v3422_v51 }
 0x17e   :  { %v2106_v59 = vpop.eup %2105  ;;  %2125 = vrcp.f32 %v1146_v25  ;;  %v1144_v33 = vadd.f32 1.0, %v2104_v23  ;;  %v3782_v25 = vld [vmem:[#allocation5_spill] sm:$0xff] }
 0x17f   :  { %v2108_v35 = vpop.eup %2107  ;;  %2127 = vrcp.f32 %v1096_v41  ;;  %v1099_v12 = vadd.f32 1.0, %v2106_v59  ;;  %v1646_v41 = vmul.f32 -1.442695, %v3428_v55  ;;  %v3783_v59 = vld [vmem:[#allocation6_spill] sm:$0xff] }
 0x180   :  { %v2110_v62 = vpop.eup %2109  ;;  %2129 = vrcp.f32 %v1144_v33  ;;  %v1147_v56 = vadd.f32 1.0, %v2108_v35 }
 0x181   :  { %v2112_v14 = vpop.eup %2111  ;;  %2131 = vrcp.f32 %v1099_v12  ;;  %v1097_v6 = vadd.f32 1.0, %v2110_v62  ;;  %v3784_v62 = vld [vmem:[#allocation7_spill] sm:$0xff] }
 0x182   :  { %v2114_v0 = vpop.eup %2113  ;;  %2133 = vrcp.f32 %v1147_v56  ;;  %v1145_v17 = vadd.f32 1.0, %v2112_v14 }
 0x183   :  { %v2116_v18 = vpop.eup %2115  ;;  %2135 = vrcp.f32 %v1097_v6  ;;  %v1102_v29 = vadd.f32 1.0, %v2114_v0 }
 0x184   :  { %v2118_v57 = vpop.eup %2117  ;;  %v1383_v7 = vmul.f32 %v2116_v18, %v3262_v10  ;;  %2137 = vrcp.f32 %v1145_v17 }
 0x185   :  { %v2120_v19 = vpop.eup %2119  ;;  %v1431_v20 = vmul.f32 %v2118_v57, %v3268_v46  ;;  %2139 = vrcp.f32 %v1102_v29  ;;  %v3438_v46 = vadd.f32 %v3264_v44, %v3084_v36 }
 0x186   :  { %v2122_v16 = vpop.eup %2121  ;;  %1480 = vst.msk [vmem:[%s3770_s3 + $0xd8] sm:$0xff] %vm1452_vm2, %v1383_v7  ;;  %v1381_v10 = vmul.f32 %v2120_v19, %v3272_v38  ;;  %2141 = vpow2.f32 %v1690_v47  ;;  %v3448_v38 = vadd.f32 %v3264_v44, %v3086_v21 }
 0x187   :  { %v2124_v48 = vpop.eup %2123  ;;  %1528 = vst.msk [vmem:[%s3770_s3 + $0x258] sm:$0xff] %vm1452_vm2, %v1431_v20  ;;  %v1429_v26 = vmul.f32 %v2122_v16, %v3276_v3  ;;  %2143 = vpow2.f32 %v1640_v54  ;;  %v3458_v3 = vadd.f32 %v3264_v44, %v3782_v25  ;;  %v1694_v12 = vmul.f32 -1.442695, %v3438_v46 }
 0x188   :  { %v2126_v30 = vpop.eup %2125  ;;  %1478 = vst.msk [vmem:[%s3770_s3 + $0xc8] sm:$0xff] %vm1452_vm2, %v1381_v10  ;;  %v1386_v36 = vmul.f32 %v2124_v48, %v3281_v61  ;;  %2145 = vpow2.f32 %v1688_v22  ;;  %v3468_v61 = vadd.f32 %v3264_v44, %v3783_v59  ;;  %v1644_v6 = vmul.f32 -1.442695, %v3448_v38 }
 0x189   :  { %v2128_v23 = vpop.eup %2127  ;;  %1526 = vst.msk [vmem:[%s3770_s3 + $0x248] sm:$0xff] %vm1452_vm2, %v1429_v26  ;;  %v1434_v21 = vmul.f32 %v2126_v30, %v3286_v50  ;;  %2147 = vpow2.f32 %v1643_v58  ;;  %v3478_v50 = vadd.f32 %v3264_v44, %v3784_v62  ;;  %v1692_v17 = vmul.f32 -1.442695, %v3458_v3 }
 0x18a   :  { %v2130_v33 = vpop.eup %2129  ;;  %1483 = vst.msk [vmem:[%s3770_s3 + $0xf0] sm:$0xff] %vm1452_vm2, %v1386_v36  ;;  %v1384_v35 = vmul.f32 %v2128_v23, %v3292_v34  ;;  %2149 = vpow2.f32 %v1691_v43  ;;  %v1647_v18 = vmul.f32 -1.442695, %v3468_v61  ;;  %v3785_v23 = vld [vmem:[#allocation8_spill] sm:$0xff] }
 0x18b   :  { %v2132_v56 = vpop.eup %2131  ;;  %1531 = vst.msk [vmem:[%s3770_s3 + $0x270] sm:$0xff] %vm1452_vm2, %v1434_v21  ;;  %v1432_v14 = vmul.f32 %v2130_v33, %v3298_v31  ;;  %2151 = vpow2.f32 %v1641_v53  ;;  %v1695_v54 = vmul.f32 -1.442695, %v3478_v50  ;;  %v3524_v21 = vadd.f32 %v3264_v44, %v3785_v23  ;;  %v3786_v33 = vld [vmem:[#allocation9_spill] sm:$0xff] }
 0x18c   :  { %v2134_v0 = vpop.eup %2133  ;;  %1481 = vst.msk [vmem:[%s3770_s3 + $0xe0] sm:$0xff] %vm1452_vm2, %v1384_v35  ;;  %v1387_v34 = vmul.f32 %v2132_v56, %v3308_v24  ;;  %2153 = vpow2.f32 %v1689_v63  ;;  %v3528_v35 = vadd.f32 %v3264_v44, %v3786_v33  ;;  %v3787_v56 = vld [vmem:[#allocation10_spill] sm:$0xff] }
 0x18d   :  { %v2136_v47 = vpop.eup %2135  ;;  %1529 = vst.msk [vmem:[%s3770_s3 + $0x260] sm:$0xff] %vm1452_vm2, %v1432_v14  ;;  %v1435_v31 = vmul.f32 %v2134_v0, %v3318_v45  ;;  %2155 = vpow2.f32 %v1646_v41  ;;  %v3532_v14 = vadd.f32 %v3264_v44, %v3787_v56 }
 0x18e   :  { %v2138_v29 = vpop.eup %2137  ;;  %1484 = vst.msk [vmem:[%s3770_s3 + $0xf8] sm:$0xff] %vm1452_vm2, %v1387_v34  ;;  %v1385_v24 = vmul.f32 %v2136_v47, %v3328_v27  ;;  %2157 = vpow2.f32 %v1694_v12  ;;  %v3536_v34 = vadd.f32 %v3264_v44, %v3132_v5 }
 0x18f   :  { %v2140_v57 = vpop.eup %2139  ;;  %1532 = vst.msk [vmem:[%s3770_s3 + $0x278] sm:$0xff] %vm1452_vm2, %v1435_v31  ;;  %v1433_v45 = vmul.f32 %v2138_v29, %v3338_v39  ;;  %2159 = vpow2.f32 %v1644_v6  ;;  %v1645_v31 = vmul.f32 -1.442695, %v3524_v21 }
 0x190   :  { %v2142_v7 = vpop.eup %2141  ;;  %1482 = vst.msk [vmem:[%s3770_s3 + $0xe8] sm:$0xff] %vm1452_vm2, %v1385_v24  ;;  %v1390_v27 = vmul.f32 %v2140_v57, %v3348_v28  ;;  %2161 = vpow2.f32 %v1692_v17  ;;  %v1693_v57 = vmul.f32 -1.442695, %v3528_v35 }
 0x191   :  { %v2144_v22 = vpop.eup %2143  ;;  %1530 = vst.msk [vmem:[%s3770_s3 + $0x268] sm:$0xff] %vm1452_vm2, %v1433_v45  ;;  %v1150_v19 = vadd.f32 1.0, %v2142_v7  ;;  %2163 = vpow2.f32 %v1647_v18  ;;  %v3788_v18 = vld [vmem:[#allocation11_spill] sm:$0xff]  ;;  %v3546_v45 = vadd.f32 %v3264_v44, %v3142_v4  ;;  %v3558_v4 = vadd.f32 %v3264_v44, %v3156_v15 }
 0x192   :  { %v2146_v20 = vpop.eup %2145  ;;  %1487 = vst.msk [vmem:[%s3770_s3 + $0x110] sm:$0xff] %vm1452_vm2, %v1390_v27  ;;  %v1100_v39 = vadd.f32 1.0, %v2144_v22  ;;  %2165 = vpow2.f32 %v1695_v54  ;;  %v3541_v29 = vadd.f32 %v3264_v44, %v3788_v18  ;;  %v1650_v27 = vmul.f32 -1.442695, %v3532_v14  ;;  %v3789_v22 = vld [vmem:[#allocation12_spill] sm:$0xff] }
 0x193   :  { %v2148_v58 = vpop.eup %2147  ;;  %2167 = vrcp.f32 %v1150_v19  ;;  %v1148_v28 = vadd.f32 1.0, %v2146_v20  ;;  %v3552_v19 = vadd.f32 %v3264_v44, %v3789_v22 }
 0x194   :  { %v2150_v16 = vpop.eup %2149  ;;  %2169 = vrcp.f32 %v1100_v39  ;;  %v1103_v10 = vadd.f32 1.0, %v2148_v58  ;;  %v1698_v58 = vmul.f32 -1.442695, %v3536_v34 }
 0x195   :  { %v2152_v43 = vpop.eup %2151  ;;  %2171 = vrcp.f32 %v1148_v28  ;;  %v1151_v48 = vadd.f32 1.0, %v2150_v16  ;;  %v1648_v16 = vmul.f32 -1.442695, %v3541_v29 }
 0x196   :  { %v2154_v26 = vpop.eup %2153  ;;  %2173 = vrcp.f32 %v1103_v10  ;;  %v1101_v53 = vadd.f32 1.0, %v2152_v43  ;;  %v3790_v10 = vld [vmem:[#allocation13_spill] sm:$0xff] }
 0x197   :  { %v2156_v30 = vpop.eup %2155  ;;  %2175 = vrcp.f32 %v1151_v48  ;;  %v1149_v36 = vadd.f32 1.0, %v2154_v26  ;;  %v1696_v48 = vmul.f32 -1.442695, %v3546_v45 }
 0x198   :  { %v2158_v63 = vpop.eup %2157  ;;  %2177 = vrcp.f32 %v1101_v53  ;;  %v1106_v25 = vadd.f32 1.0, %v2156_v30  ;;  %v1651_v30 = vmul.f32 -1.442695, %v3552_v19 }
 0x199   :  { %v2160_v41 = vpop.eup %2159  ;;  %2179 = vrcp.f32 %v1149_v36  ;;  %v1154_v59 = vadd.f32 1.0, %v2158_v63  ;;  %v1699_v63 = vmul.f32 -1.442695, %v3558_v4 }
 0x19a   :  { %v2162_v12 = vpop.eup %2161  ;;  %2181 = vrcp.f32 %v1106_v25  ;;  %v1104_v62 = vadd.f32 1.0, %v2160_v41 }
 0x19b   :  { %v2164_v6 = vpop.eup %2163  ;;  %2183 = vrcp.f32 %v1154_v59  ;;  %v1152_v0 = vadd.f32 1.0, %v2162_v12 }
 0x19c   :  { %v2166_v17 = vpop.eup %2165  ;;  %2185 = vrcp.f32 %v1104_v62  ;;  %v1107_v47 = vadd.f32 1.0, %v2164_v6 }
 0x19d   :  { %v2168_v24 = vpop.eup %2167  ;;  %2187 = vrcp.f32 %v1152_v0  ;;  %v1155_v54 = vadd.f32 1.0, %v2166_v17 }
 0x19e   :  { %v2170_v5 = vpop.eup %2169  ;;  %v1438_v7 = vmul.f32 %v2168_v24, %v3394_v49  ;;  %2189 = vrcp.f32 %v1107_v47 }
 0x19f   :  { %v2172_v20 = vpop.eup %2171  ;;  %v1388_v39 = vmul.f32 %v2170_v5, %v3398_v11  ;;  %2191 = vrcp.f32 %v1155_v54  ;;  %v3568_v11 = vadd.f32 %v3264_v44, %v3790_v10 }
 0x1a0   :  { %v2174_v28 = vpop.eup %2173  ;;  %1535 = vst.msk [vmem:[%s3770_s3 + $0x290] sm:$0xff] %vm1452_vm2, %v1438_v7  ;;  %v1436_v49 = vmul.f32 %v2172_v20, %v3402_v2  ;;  %2193 = vpow2.f32 %v1645_v31  ;;  %v3578_v2 = vadd.f32 %v3264_v44, %v3170_v13 }
 0x1a1   :  { %v2176_v43 = vpop.eup %2175  ;;  %1485 = vst.msk [vmem:[%s3770_s3 + $0x100] sm:$0xff] %vm1452_vm2, %v1388_v39  ;;  %v1391_v15 = vmul.f32 %v2174_v28, %v3406_v40  ;;  %2195 = vpow2.f32 %v1693_v57  ;;  %v3588_v40 = vadd.f32 %v3264_v44, %v3208_v8  ;;  %v1649_v23 = vmul.f32 -1.442695, %v3568_v11 }
 0x1a2   :  { %v2178_v26 = vpop.eup %2177  ;;  %1533 = vst.msk [vmem:[%s3770_s3 + $0x280] sm:$0xff] %vm1452_vm2, %v1436_v49  ;;  %v1439_v53 = vmul.f32 %v2176_v43, %v3411_v32  ;;  %2197 = vpow2.f32 %v1650_v27  ;;  %v3598_v32 = vadd.f32 %v3264_v44, %v3210_v52  ;;  %v1697_v59 = vmul.f32 -1.442695, %v3578_v2 }
 0x1a3   :  { %v2180_v36 = vpop.eup %2179  ;;  %1488 = vst.msk [vmem:[%s3770_s3 + $0x118] sm:$0xff] %vm1452_vm2, %v1391_v15  ;;  %v1389_v13 = vmul.f32 %v2178_v26, %v3416_v9  ;;  %2199 = vpow2.f32 %v1698_v58  ;;  %v3608_v9 = vadd.f32 %v3264_v44, %v3218_v37  ;;  %v3654_v49 = vadd.f32 %v3264_v44, %v3220_v1  ;;  %v3791_v26 = vld [vmem:[#allocation14_spill] sm:$0xff] }
 0x1a4   :  { %v2182_v25 = vpop.eup %2181  ;;  %1536 = vst.msk [vmem:[%s3770_s3 + $0x298] sm:$0xff] %vm1452_vm2, %v1439_v53  ;;  %v1437_v8 = vmul.f32 %v2180_v36, %v3422_v51  ;;  %2201 = vpow2.f32 %v1648_v16  ;;  %v1654_v51 = vmul.f32 -1.442695, %v3588_v40  ;;  %v1702_v62 = vmul.f32 -1.442695, %v3598_v32 }
 0x1a5   :  { %v2184_v41 = vpop.eup %2183  ;;  %1486 = vst.msk [vmem:[%s3770_s3 + $0x108] sm:$0xff] %vm1452_vm2, %v1389_v13  ;;  %v1394_v52 = vmul.f32 %v2182_v25, %v3428_v55  ;;  %2203 = vpow2.f32 %v1696_v48  ;;  %v1652_v6 = vmul.f32 -1.442695, %v3608_v9  ;;  %v3658_v43 = vadd.f32 %v3264_v44, %v3228_v60  ;;  %v3792_v25 = vld [vmem:[#allocation15_spill] sm:$0xff] }
 0x1a6   :  { %v2186_v33 = vpop.eup %2185  ;;  %1534 = vst.msk [vmem:[%s3770_s3 + $0x288] sm:$0xff] %vm1452_vm2, %v1437_v8  ;;  %v1442_v37 = vmul.f32 %v2184_v41, %v3438_v46  ;;  %2205 = vpow2.f32 %v1651_v30  ;;  %v3662_v53 = vadd.f32 %v3264_v44, %v3791_v26  ;;  %v3666_v1 = vadd.f32 %v3264_v44, %v3238_v42 }
 0x1a7   :  { %v2188_v12 = vpop.eup %2187  ;;  %1491 = vst.msk [vmem:[%s3770_s3 + $0x130] sm:$0xff] %vm1452_vm2, %v1394_v52  ;;  %v1392_v55 = vmul.f32 %v2186_v33, %v3448_v38  ;;  %2207 = vpow2.f32 %v1699_v63  ;;  %v1700_v60 = vmul.f32 -1.442695, %v3654_v49  ;;  %v3671_v8 = vadd.f32 %v3264_v44, %v3792_v25 }
 0x1a8   :  { %v2190_v56 = vpop.eup %2189  ;;  %1539 = vst.msk [vmem:[%s3770_s3 + $0x2b0] sm:$0xff] %vm1452_vm2, %v1442_v37  ;;  %v1440_v46 = vmul.f32 %v2188_v12, %v3458_v3  ;;  %2209 = vpow2.f32 %v1649_v23  ;;  %v1655_v52 = vmul.f32 -1.442695, %v3658_v43  ;;  %v1703_v42 = vmul.f32 -1.442695, %v3662_v53 }
 0x1a9   :  { %v2192_v0 = vpop.eup %2191  ;;  %1489 = vst.msk [vmem:[%s3770_s3 + $0x120] sm:$0xff] %vm1452_vm2, %v1392_v55  ;;  %v1395_v38 = vmul.f32 %v2190_v56, %v3468_v61  ;;  %2211 = vpow2.f32 %v1697_v59  ;;  %v1653_v12 = vmul.f32 -1.442695, %v3666_v1 }
 0x1aa   :  { %v2194_v17 = vpop.eup %2193  ;;  %1537 = vst.msk [vmem:[%s3770_s3 + $0x2a0] sm:$0xff] %vm1452_vm2, %v1440_v46  ;;  %v1443_v3 = vmul.f32 %v2192_v0, %v3478_v50  ;;  %2213 = vpow2.f32 %v1654_v51 }
 0x1ab   :  { %v2196_v47 = vpop.eup %2195  ;;  %1492 = vst.msk [vmem:[%s3770_s3 + $0x138] sm:$0xff] %vm1452_vm2, %v1395_v38  ;;  %v1105_v31 = vadd.f32 1.0, %v2194_v17  ;;  %2215 = vpow2.f32 %v1702_v62 }
 0x1ac   :  { %v2198_v18 = vpop.eup %2197  ;;  %1540 = vst.msk [vmem:[%s3770_s3 + $0x2b8] sm:$0xff] %vm1452_vm2, %v1443_v3  ;;  %v1153_v61 = vadd.f32 1.0, %v2196_v47  ;;  %2217 = vpow2.f32 %v1652_v6 }
 0x1ad   :  { %v2200_v24 = vpop.eup %2199  ;;  %2219 = vrcp.f32 %v1105_v31  ;;  %v1110_v50 = vadd.f32 1.0, %v2198_v18 }
 0x1ae   :  { %v2202_v54 = vpop.eup %2201  ;;  %2221 = vrcp.f32 %v1153_v61  ;;  %v1158_v57 = vadd.f32 1.0, %v2200_v24 }
 0x1af   :  { %v2204_v5 = vpop.eup %2203  ;;  %2223 = vrcp.f32 %v1110_v50  ;;  %v1108_v7 = vadd.f32 1.0, %v2202_v54 }
 0x1b0   :  { %v2206_v27 = vpop.eup %2205  ;;  %2225 = vrcp.f32 %v1158_v57  ;;  %v1156_v22 = vadd.f32 1.0, %v2204_v5 }
 0x1b1   :  { %v2208_v20 = vpop.eup %2207  ;;  %2227 = vrcp.f32 %v1108_v7  ;;  %v1111_v39 = vadd.f32 1.0, %v2206_v27 }
 0x1b2   :  { %v2210_v58 = vpop.eup %2209  ;;  %2229 = vrcp.f32 %v1156_v22  ;;  %v1159_v28 = vadd.f32 1.0, %v2208_v20 }
 0x1b3   :  { %v2212_v16 = vpop.eup %2211  ;;  %2231 = vrcp.f32 %v1111_v39  ;;  %v1109_v10 = vadd.f32 1.0, %v2210_v58 }
 0x1b4   :  { %v2214_v15 = vpop.eup %2213  ;;  %2233 = vrcp.f32 %v1159_v28  ;;  %v1157_v48 = vadd.f32 1.0, %v2212_v16 }
 0x1b5   :  { %v2216_v30 = vpop.eup %2215  ;;  %2235 = vrcp.f32 %v1109_v10  ;;  %v1114_v36 = vadd.f32 1.0, %v2214_v15 }
 0x1b6   :  { %v2218_v13 = vpop.eup %2217  ;;  %2237 = vrcp.f32 %v1157_v48  ;;  %v1162_v63 = vadd.f32 1.0, %v2216_v30 }
 0x1b7   :  { %v2220_v23 = vpop.eup %2219  ;;  %2239 = vrcp.f32 %v1114_v36  ;;  %v1112_v41 = vadd.f32 1.0, %v2218_v13 }
 0x1b8   :  { %v2222_v59 = vpop.eup %2221  ;;  %v1393_v33 = vmul.f32 %v2220_v23, %v3524_v21  ;;  %2241 = vrcp.f32 %v1162_v63  ;;  %v1701_v21 = vmul.f32 -1.442695, %v3671_v8 }
 0x1b9   :  { %v2224_v37 = vpop.eup %2223  ;;  %v1441_v51 = vmul.f32 %v2222_v59, %v3528_v35  ;;  %2243 = vrcp.f32 %v1112_v41 }
 0x1ba   :  { %v2226_v55 = vpop.eup %2225  ;;  %1490 = vst.msk [vmem:[%s3770_s3 + $0x128] sm:$0xff] %vm1452_vm2, %v1393_v33  ;;  %v1398_v44 = vmul.f32 %v2224_v37, %v3532_v14  ;;  %2245 = vpow2.f32 %v1700_v60 }
 0x1bb   :  { %v2228_v62 = vpop.eup %2227  ;;  %1538 = vst.msk [vmem:[%s3770_s3 + $0x2a8] sm:$0xff] %vm1452_vm2, %v1441_v51  ;;  %v1446_v35 = vmul.f32 %v2226_v55, %v3536_v34  ;;  %2247 = vpow2.f32 %v1655_v52 }
 0x1bc   :  { %v2230_v56 = vpop.eup %2229  ;;  %1495 = vst.msk [vmem:[%s3770_s3 + $0x150] sm:$0xff] %vm1452_vm2, %v1398_v44  ;;  %v1396_v14 = vmul.f32 %v2228_v62, %v3541_v29  ;;  %2249 = vpow2.f32 %v1703_v42 }
 0x1bd   :  { %v2232_v46 = vpop.eup %2231  ;;  %1543 = vst.msk [vmem:[%s3770_s3 + $0x2d0] sm:$0xff] %vm1452_vm2, %v1446_v35  ;;  %v1444_v6 = vmul.f32 %v2230_v56, %v3546_v45  ;;  %2251 = vpow2.f32 %v1653_v12 }
 0x1be   :  { %v2234_v34 = vpop.eup %2233  ;;  %1493 = vst.msk [vmem:[%s3770_s3 + $0x140] sm:$0xff] %vm1452_vm2, %v1396_v14  ;;  %v1399_v0 = vmul.f32 %v2232_v46, %v3552_v19  ;;  %2253 = vpow2.f32 %v1701_v21 }
 0x1bf   :  { %v2236_v29 = vpop.eup %2235  ;;  %1541 = vst.msk [vmem:[%s3770_s3 + $0x2c0] sm:$0xff] %vm1452_vm2, %v1444_v6  ;;  %v1447_v38 = vmul.f32 %v2234_v34, %v3558_v4 }
 0x1c0   :  { %v2238_v17 = vpop.eup %2237  ;;  %1496 = vst.msk [vmem:[%s3770_s3 + $0x158] sm:$0xff] %vm1452_vm2, %v1399_v0  ;;  %v1397_v45 = vmul.f32 %v2236_v29, %v3568_v11 }
 0x1c1   :  { %v2240_v3 = vpop.eup %2239  ;;  %1544 = vst.msk [vmem:[%s3770_s3 + $0x2d8] sm:$0xff] %vm1452_vm2, %v1447_v38  ;;  %v1445_v19 = vmul.f32 %v2238_v17, %v3578_v2 }
 0x1c2   :  { %v2242_v47 = vpop.eup %2241  ;;  %1494 = vst.msk [vmem:[%s3770_s3 + $0x148] sm:$0xff] %vm1452_vm2, %v1397_v45  ;;  %v1402_v4 = vmul.f32 %v2240_v3, %v3588_v40 }
 0x1c3   :  { %v2244_v31 = vpop.eup %2243  ;;  %1542 = vst.msk [vmem:[%s3770_s3 + $0x2c8] sm:$0xff] %vm1452_vm2, %v1445_v19  ;;  %v1450_v11 = vmul.f32 %v2242_v47, %v3598_v32 }
 0x1c4   :  { %v2246_v18 = vpop.eup %2245  ;;  %1499 = vst.msk [vmem:[%s3770_s3 + $0x170] sm:$0xff] %vm1452_vm2, %v1402_v4  ;;  %v1400_v2 = vmul.f32 %v2244_v31, %v3608_v9 }
 0x1c5   :  { %v2248_v61 = vpop.eup %2247  ;;  %1547 = vst.msk [vmem:[%s3770_s3 + $0x2f0] sm:$0xff] %vm1452_vm2, %v1450_v11  ;;  %v1160_v40 = vadd.f32 1.0, %v2246_v18 }
 0x1c6   :  { %v2250_v24 = vpop.eup %2249  ;;  %1497 = vst.msk [vmem:[%s3770_s3 + $0x160] sm:$0xff] %vm1452_vm2, %v1400_v2  ;;  %v1115_v32 = vadd.f32 1.0, %v2248_v61 }
 0x1c7   :  { %v2252_v50 = vpop.eup %2251  ;;  %2255 = vrcp.f32 %v1160_v40  ;;  %v1163_v54 = vadd.f32 1.0, %v2250_v24 }
 0x1c8   :  { %v2254_v57 = vpop.eup %2253  ;;  %2257 = vrcp.f32 %v1115_v32  ;;  %v1113_v9 = vadd.f32 1.0, %v2252_v50 }
 0x1c9   :  { %2259 = vrcp.f32 %v1163_v54  ;;  %v1161_v5 = vadd.f32 1.0, %v2254_v57 }
 0x1ca   :  { %2261 = vrcp.f32 %v1113_v9 }
 0x1cb   :  { %2263 = vrcp.f32 %v1161_v5 }
 0x1d1   :  { %v2256_v7 = vpop.eup %2255 }
 0x1d2   :  { %v2258_v27 = vpop.eup %2257  ;;  %v1448_v22 = vmul.f32 %v2256_v7, %v3654_v49 }
 0x1d3   :  { %v2260_v20 = vpop.eup %2259  ;;  %v1403_v39 = vmul.f32 %v2258_v27, %v3658_v43 }
 0x1d4   :  { %v2262_v58 = vpop.eup %2261  ;;  %1545 = vst.msk [vmem:[%s3770_s3 + $0x2e0] sm:$0xff] %vm1452_vm2, %v1448_v22  ;;  %v1451_v28 = vmul.f32 %v2260_v20, %v3662_v53 }
 0x1d5   :  { %v2264_v16 = vpop.eup %2263  ;;  %1500 = vst.msk [vmem:[%s3770_s3 + $0x178] sm:$0xff] %vm1452_vm2, %v1403_v39  ;;  %v1401_v10 = vmul.f32 %v2262_v58, %v3666_v1 }
 0x1d6   :  { %1548 = vst.msk [vmem:[%s3770_s3 + $0x2f8] sm:$0xff] %vm1452_vm2, %v1451_v28  ;;  %v1449_v49 = vmul.f32 %v2264_v16, %v3671_v8 }
 0x1d7   :  { %1498 = vst.msk [vmem:[%s3770_s3 + $0x168] sm:$0xff] %vm1452_vm2, %v1401_v10 }
 0x1d8   :  { %1546 = vst.msk [vmem:[%s3770_s3 + $0x2e8] sm:$0xff] %vm1452_vm2, %v1449_v49 }
 0x1d9   :  { %1553 = vsyncpa [#allocation3], 1 }

// kernel: model_forward.13
= control target key start
LH: loop header
LB: loop body
LE: loop exit
PB: predicated region body
PF: predicated region fallthrough
CT: control target
= control target key end

     0   :  { %8 = vsyncpa [#allocation3], 0  ;;  %s983_s12 = smov [#allocation2]   ;;  %s1262_s0 = inlined_call_operand.vmem [shape: f32[12,1024], index: 0, kind: input, shape index: {}]   ;;  %s1263_s1 = inlined_call_operand.vmem [shape: bf16[1024,128], index: 1, kind: input, shape index: {}]   ;;  %s1264_s2 = inlined_call_operand.hbm [shape: f32[1,128], index: 2, kind: input, shape index: {}]   ;;  %s1265_s3 = inlined_call_operand.vmem [shape: f32[12,128], index: 3, kind: output, shape index: {}]  }
   0x1   :  { %s19_s13 = sshll.u32 %s983_s12, 4  ;;  %s959_s16 = scalar_lea.hbm %s1264_s2, 16  ;;  %s20_s13 = int_to_ptr.vmem [resolvable:$true] %s19_s13 }
   0x2   :  { %p960_p0 = scmp.ne.s32.totalorder %s1264_s2, %s959_s16  ;;  %p963_p1 = scmp.lt.u32.totalorder %s959_s16, %s1264_s2 }
   0x4   :  { %p965_p2 = pnand %p963_p1, %p960_p0 }
   0x6   :  { %968 = shalt.err (!%p965_p2)
}
   0x7   :  { %s969_s21 = scalar_lea.vmem %s20_s13, 16  ;;  %s973_s22 = scalar_lea.vmem %s20_s13, 32 }
   0x8   :  { %p970_p3 = scmp.ne.s32.totalorder %s20_s13, %s969_s21  ;;  %p974_p4 = scmp.lt.s32.totalorder %s20_s13, %s20_s13 }
   0x9   :  { %p975_p5 = scmp.lt.s32.totalorder %s973_s22, %s969_s21 }
   0xb   :  { %p976_p6 = por %p975_p5, %p974_p4 }
   0xd   :  { %p977_p7 = pnand %p976_p6, %p970_p3 }
   0xf   :  { %980 = shalt.err (!%p977_p7)
}
  0x10   :  { %22 = dma.hbm_to_vmem [thread:$0]  %s1264_s2, 16, %s20_s13, [#allocation3]  }
  0x11   :  { %981 = dma.done.wait [#allocation3], 16  }
  0x12   :  { %982 = vsyncadd [#allocation3], 4294967280  ;;  %v895_v0 = vld [vmem:[%s1263_s1 + $0x40] sm:$0xff]   ;;  %v899_v4 = vld [vmem:[%s1263_s1 + $0x48] sm:$0xff]  }
  0x13   :  { %v896_v1 = vld [vmem:[%s1263_s1 + $0xc0] sm:$0xff]   ;;  %806 = vmatprep.subr.bf16.mxu0 %v895_v0  ;;  %v900_v5 = vld [vmem:[%s1263_s1 + $0xc8] sm:$0xff]   ;;  %v903_v8 = vld [vmem:[%s1263_s1 + $0x50] sm:$0xff]  }
  0x14   :  { %v897_v2 = vld [vmem:[%s1263_s1] sm:$0xff]   ;;  %828 = vmatprep.subr.bf16.mxu1 %v896_v1  ;;  %v901_v6 = vld [vmem:[%s1263_s1 + $0x8] sm:$0xff]   ;;  %v904_v9 = vld [vmem:[%s1263_s1 + $0xd0] sm:$0xff]  }
  0x15   :  { %v898_v3 = vld [vmem:[%s1263_s1 + $0x80] sm:$0xff]   ;;  %807 = vmatpush3.bf16.msra.mxu0 %v897_v2  ;;  %v902_v7 = vld [vmem:[%s1263_s1 + $0x88] sm:$0xff]   ;;  %v905_v10 = vld [vmem:[%s1263_s1 + $0x10] sm:$0xff]  }
  0x16   :  { %829 = vmatpush3.bf16.msra.mxu1 %v898_v3  ;;  %808 = vmatprep.subr.bf16.mxu0 %v899_v4  ;;  %v906_v11 = vld [vmem:[%s1263_s1 + $0x90] sm:$0xff]   ;;  %v907_v12 = vld [vmem:[%s1263_s1 + $0x58] sm:$0xff]   ;;  %v911_v16 = vld [vmem:[%s1263_s1 + $0x60] sm:$0xff]  }
  0x17   :  { %830 = vmatprep.subr.bf16.mxu1 %v900_v5  ;;  %v908_v13 = vld [vmem:[%s1263_s1 + $0xd8] sm:$0xff]   ;;  %v912_v17 = vld [vmem:[%s1263_s1 + $0xe0] sm:$0xff]   ;;  %v915_v20 = vld [vmem:[%s1263_s1 + $0x68] sm:$0xff]  }
  0x18   :  { %v909_v14 = vld [vmem:[%s1263_s1 + $0x18] sm:$0xff]   ;;  %v913_v18 = vld [vmem:[%s1263_s1 + $0x20] sm:$0xff]   ;;  %v916_v21 = vld [vmem:[%s1263_s1 + $0xe8] sm:$0xff]  }
  0x19   :  { %809 = vmatpush3.bf16.msra.mxu0 %v901_v6  ;;  %v910_v15 = vld [vmem:[%s1263_s1 + $0x98] sm:$0xff]   ;;  %v914_v19 = vld [vmem:[%s1263_s1 + $0xa0] sm:$0xff]   ;;  %v917_v22 = vld [vmem:[%s1263_s1 + $0x28] sm:$0xff]  }
  0x1a   :  { %831 = vmatpush3.bf16.msra.mxu1 %v902_v7  ;;  %810 = vmatprep.subr.bf16.mxu0 %v903_v8  ;;  %v918_v23 = vld [vmem:[%s1263_s1 + $0xa8] sm:$0xff]   ;;  %v919_v24 = vld [vmem:[%s1263_s1 + $0x70] sm:$0xff]   ;;  %v923_v28 = vld [vmem:[%s1263_s1 + $0x78] sm:$0xff]  }
  0x1b   :  { %832 = vmatprep.subr.bf16.mxu1 %v904_v9  ;;  %v920_v25 = vld [vmem:[%s1263_s1 + $0xf0] sm:$0xff]   ;;  %v924_v29 = vld [vmem:[%s1263_s1 + $0xf8] sm:$0xff]   ;;  %v28_v32 = vld [vmem:[%s1262_s0 + $0x8] sm:$0xff] }
  0x1c   :  { %v921_v26 = vld [vmem:[%s1263_s1 + $0x30] sm:$0xff]   ;;  %v925_v30 = vld [vmem:[%s1263_s1 + $0x38] sm:$0xff]   ;;  %v36_v33 = vld [vmem:[%s1262_s0 + $0x48] sm:$0xf] }
  0x1d   :  { %811 = vmatpush3.bf16.msra.mxu0 %v905_v10  ;;  %v922_v27 = vld [vmem:[%s1263_s1 + $0xb0] sm:$0xff]   ;;  %v926_v31 = vld [vmem:[%s1263_s1 + $0xb8] sm:$0xff]   ;;  %v172_v35 = vpack.c.bf16 %v36_v33, %v28_v32  ;;  %v27_v37 = vld [vmem:[%s1262_s0] sm:$0xff] }
  0x1e   :  { %833 = vmatpush3.bf16.msra.mxu1 %v906_v11  ;;  %812 = vmatprep.subr.bf16.mxu0 %v907_v12  ;;  %v30_v34 = vld [vmem:[%s1262_s0 + $0x18] sm:$0xff]  ;;  %v35_v38 = vld [vmem:[%s1262_s0 + $0x40] sm:$0xf]  ;;  %v29_v41 = vld [vmem:[%s1262_s0 + $0x10] sm:$0xff] }
  0x1f   :  { %834 = vmatprep.subr.bf16.mxu1 %v908_v13  ;;  %v38_v36 = vld [vmem:[%s1262_s0 + $0x58] sm:$0xf]  ;;  %v171_v40 = vpack.c.bf16 %v35_v38, %v27_v37  ;;  %v37_v42 = vld [vmem:[%s1262_s0 + $0x50] sm:$0xf]  ;;  %602 = vmatprep.mubr.bf16.mxu0 %v172_v35  ;;  %v927_v44 = vld [vmem:[%s1263_s1 + $0x140] sm:$0xff]  }
  0x20   :  { %v174_v39 = vpack.c.bf16 %v38_v36, %v30_v34  ;;  %v173_v43 = vpack.c.bf16 %v37_v42, %v29_v41  ;;  %v928_v45 = vld [vmem:[%s1263_s1 + $0x1c0] sm:$0xff]   ;;  %v931_v48 = vld [vmem:[%s1263_s1 + $0x148] sm:$0xff]   ;;  %v935_v52 = vld [vmem:[%s1263_s1 + $0x150] sm:$0xff]  }
  0x21   :  { %813 = vmatpush3.bf16.msra.mxu0 %v909_v14  ;;  %v929_v46 = vld [vmem:[%s1263_s1 + $0x100] sm:$0xff]   ;;  %v932_v49 = vld [vmem:[%s1263_s1 + $0x1c8] sm:$0xff]   ;;  %v936_v53 = vld [vmem:[%s1263_s1 + $0x1d0] sm:$0xff]  }
  0x22   :  { %835 = vmatpush3.bf16.msra.mxu1 %v910_v15  ;;  %814 = vmatprep.subr.bf16.mxu0 %v911_v16  ;;  %v930_v47 = vld [vmem:[%s1263_s1 + $0x180] sm:$0xff]   ;;  %v933_v50 = vld [vmem:[%s1263_s1 + $0x108] sm:$0xff]   ;;  %v937_v54 = vld [vmem:[%s1263_s1 + $0x110] sm:$0xff]  }
  0x23   :  { %836 = vmatprep.subr.bf16.mxu1 %v912_v17  ;;  %643 = vmatprep.mubr.bf16.mxu1 %v174_v39  ;;  %v934_v51 = vld [vmem:[%s1263_s1 + $0x188] sm:$0xff]   ;;  %v938_v55 = vld [vmem:[%s1263_s1 + $0x190] sm:$0xff]   ;;  %v939_v56 = vld [vmem:[%s1263_s1 + $0x158] sm:$0xff]  }
  0x24   :  { %v940_v57 = vld [vmem:[%s1263_s1 + $0x1d8] sm:$0xff]   ;;  %v943_v60 = vld [vmem:[%s1263_s1 + $0x160] sm:$0xff]   ;;  %v947_v0 = vld [vmem:[%s1263_s1 + $0x168] sm:$0xff]  }
  0x25   :  { %815 = vmatpush3.bf16.msra.mxu0 %v913_v18  ;;  %v941_v58 = vld [vmem:[%s1263_s1 + $0x118] sm:$0xff]   ;;  %v944_v61 = vld [vmem:[%s1263_s1 + $0x1e0] sm:$0xff]   ;;  %v948_v1 = vld [vmem:[%s1263_s1 + $0x1e8] sm:$0xff]  }
  0x26   :  { %837 = vmatpush3.bf16.msra.mxu1 %v914_v19  ;;  %816 = vmatprep.subr.bf16.mxu0 %v915_v20  ;;  %v942_v59 = vld [vmem:[%s1263_s1 + $0x198] sm:$0xff]   ;;  %v945_v62 = vld [vmem:[%s1263_s1 + $0x120] sm:$0xff]   ;;  %v949_v2 = vld [vmem:[%s1263_s1 + $0x128] sm:$0xff]  }
  0x27   :  { %838 = vmatprep.subr.bf16.mxu1 %v916_v21  ;;  %v946_v63 = vld [vmem:[%s1263_s1 + $0x1a0] sm:$0xff]   ;;  %v950_v3 = vld [vmem:[%s1263_s1 + $0x1a8] sm:$0xff]   ;;  %v951_v4 = vld [vmem:[%s1263_s1 + $0x170] sm:$0xff]  }
  0x28   :  { %v952_v5 = vld [vmem:[%s1263_s1 + $0x1f0] sm:$0xff]   ;;  %v955_v8 = vld [vmem:[%s1263_s1 + $0x178] sm:$0xff]   ;;  %v32_v12 = vld [vmem:[%s1262_s0 + $0x28] sm:$0xff] }
  0x29   :  { %817 = vmatpush3.bf16.msra.mxu0 %v917_v22  ;;  %v953_v6 = vld [vmem:[%s1263_s1 + $0x130] sm:$0xff]   ;;  %v956_v9 = vld [vmem:[%s1263_s1 + $0x1f8] sm:$0xff]   ;;  %v40_v13 = vld [vmem:[%s1262_s0 + $0x68] sm:$0xf] }
  0x2a   :  { %839 = vmatpush3.bf16.msra.mxu1 %v918_v23  ;;  %818 = vmatprep.subr.bf16.mxu0 %v919_v24  ;;  %v954_v7 = vld [vmem:[%s1263_s1 + $0x1b0] sm:$0xff]   ;;  %v957_v10 = vld [vmem:[%s1263_s1 + $0x138] sm:$0xff]   ;;  %v176_v16 = vpack.c.bf16 %v40_v13, %v32_v12  ;;  %v31_v18 = vld [vmem:[%s1262_s0 + $0x20] sm:$0xff] }
  0x2b   :  { %840 = vmatprep.subr.bf16.mxu1 %v920_v25  ;;  %v958_v11 = vld [vmem:[%s1263_s1 + $0x1b8] sm:$0xff]   ;;  %v39_v19 = vld [vmem:[%s1262_s0 + $0x60] sm:$0xf]  ;;  %v33_v20 = vld [vmem:[%s1262_s0 + $0x30] sm:$0xff] }
  0x2c   :  { %v34_v14 = vld [vmem:[%s1262_s0 + $0x38] sm:$0xff]  ;;  %v175_v21 = vpack.c.bf16 %v39_v19, %v31_v18  ;;  %v41_v22 = vld [vmem:[%s1262_s0 + $0x70] sm:$0xf] }
  0x2d   :  { %819 = vmatpush3.bf16.msra.mxu0 %v921_v26  ;;  %v42_v15 = vld [vmem:[%s1262_s0 + $0x78] sm:$0xf]  ;;  %v177_v23 = vpack.c.bf16 %v41_v22, %v33_v20  ;;  %v741_v26 = vld [vmem:[#allocation2] ss:$0 sm:$0xff] }
  0x2e   :  { %841 = vmatpush3.bf16.msra.mxu1 %v922_v27  ;;  %820 = vmatprep.subr.bf16.mxu0 %v923_v28  ;;  %v178_v17 = vpack.c.bf16 %v42_v15, %v34_v14 }
  0x2f   :  { %842 = vmatprep.subr.bf16.mxu1 %v924_v29 }
  0x31   :  { %821 = vmatpush3.bf16.msra.mxu0 %v925_v30 }
  0x32   :  { %843 = vmatpush3.bf16.msra.mxu1 %v926_v31  ;;  %850 = vmatprep.subr.bf16.mxu0 %v927_v44 }
  0x33   :  { %872 = vmatprep.subr.bf16.mxu1 %v928_v45 }
  0x34   :  { %603 = vmatmul.mubr.bf16.vlgmr.msra.gmra.mrb[0].mxu0 %v171_v40 }
  0x35   :  { %644 = vmatmul.mubr.bf16.vlgmr.msra.gmra.mrb[0].mxu1 %v173_v43  ;;  %851 = vmatpush3.bf16.msra.mxu0 %v929_v46 }
  0x36   :  { %873 = vmatpush3.bf16.msra.mxu1 %v930_v47  ;;  %852 = vmatprep.subr.bf16.mxu0 %v931_v48 }
  0x37   :  { %874 = vmatprep.subr.bf16.mxu1 %v932_v49  ;;  %684 = vmatprep.mubr.bf16.mxu0 %v176_v16 }
  0x38   :  { %725 = vmatprep.mubr.bf16.mxu1 %v178_v17 }
  0x39   :  { %853 = vmatpush3.bf16.msra.mxu0 %v933_v50 }
  0x3a   :  { %875 = vmatpush3.bf16.msra.mxu1 %v934_v51  ;;  %854 = vmatprep.subr.bf16.mxu0 %v935_v52 }
  0x3b   :  { %876 = vmatprep.subr.bf16.mxu1 %v936_v53 }
  0x3d   :  { %855 = vmatpush3.bf16.msra.mxu0 %v937_v54 }
  0x3e   :  { %877 = vmatpush3.bf16.msra.mxu1 %v938_v55  ;;  %856 = vmatprep.subr.bf16.mxu0 %v939_v56 }
  0x3f   :  { %878 = vmatprep.subr.bf16.mxu1 %v940_v57 }
  0x41   :  { %857 = vmatpush3.bf16.msra.mxu0 %v941_v58 }
  0x42   :  { %879 = vmatpush3.bf16.msra.mxu1 %v942_v59  ;;  %858 = vmatprep.subr.bf16.mxu0 %v943_v60 }
  0x43   :  { %880 = vmatprep.subr.bf16.mxu1 %v944_v61 }
  0x45   :  { %859 = vmatpush3.bf16.msra.mxu0 %v945_v62 }
  0x46   :  { %881 = vmatpush3.bf16.msra.mxu1 %v946_v63  ;;  %860 = vmatprep.subr.bf16.mxu0 %v947_v0 }
  0x47   :  { %882 = vmatprep.subr.bf16.mxu1 %v948_v1 }
  0x49   :  { %861 = vmatpush3.bf16.msra.mxu0 %v949_v2 }
  0x4a   :  { %883 = vmatpush3.bf16.msra.mxu1 %v950_v3  ;;  %862 = vmatprep.subr.bf16.mxu0 %v951_v4 }
  0x4b   :  { %884 = vmatprep.subr.bf16.mxu1 %v952_v5 }
  0x4d   :  { %863 = vmatpush3.bf16.msra.mxu0 %v953_v6 }
  0x4e   :  { %885 = vmatpush3.bf16.msra.mxu1 %v954_v7  ;;  %864 = vmatprep.subr.bf16.mxu0 %v955_v8 }
  0x4f   :  { %886 = vmatprep.subr.bf16.mxu1 %v956_v9 }
  0x51   :  { %865 = vmatpush3.bf16.msra.mxu0 %v957_v10 }
  0x52   :  { %887 = vmatpush3.bf16.msra.mxu1 %v958_v11 }
  0x54   :  { %685 = vmatmul.mubr.bf16.vlgmr.msra.gmra.mrb[4].mxu0 %v175_v21 }
  0x55   :  { %726 = vmatmul.mubr.bf16.vlgmr.msra.gmra.mrb[4].mxu1 %v177_v23 }
 0x107   :  { %v822_v24 = vpop.f32.mrb[0].mxu0 }
 0x108   :  { %v844_v25 = vpop.f32.mrb[0].mxu1  ;;  %v823_v27 = vpop.f32.mrb[1].mxu0 }
 0x109   :  { %v824_v28 = vadd.f32 %v823_v27, %v822_v24  ;;  %v845_v29 = vpop.f32.mrb[1].mxu1  ;;  %v825_v30 = vpop.f32.mrb[2].mxu0 }
 0x10a   :  { %v846_v31 = vadd.f32 %v845_v29, %v844_v25  ;;  %v847_v32 = vpop.f32.mrb[2].mxu1  ;;  %v826_v33 = vpop.f32.mrb[3].mxu0 }
 0x10b   :  { %v605_v34 = vadd.f32 %v824_v28, %v741_v26  ;;  %v827_v35 = vadd.f32 %v826_v33, %v825_v30  ;;  %v848_v36 = vpop.f32.mrb[3].mxu1 }
 0x10c   :  { %v849_v37 = vadd.f32 %v848_v36, %v847_v32 }
 0x10d   :  { %v646_v38 = vadd.f32 %v846_v31, %v605_v34  ;;  %v608_v39 = vadd.f32 %v827_v35, %v741_v26 }
 0x10f   :  { %v649_v40 = vadd.f32 %v849_v37, %v608_v39 }
 0x127   :  { %v866_v41 = vpop.f32.mrb[4].mxu0 }
 0x128   :  { %v888_v42 = vpop.f32.mrb[4].mxu1  ;;  %v867_v43 = vpop.f32.mrb[5].mxu0 }
 0x129   :  { %v868_v44 = vadd.f32 %v867_v43, %v866_v41  ;;  %v889_v45 = vpop.f32.mrb[5].mxu1  ;;  %v869_v46 = vpop.f32.mrb[6].mxu0 }
 0x12a   :  { %v890_v47 = vadd.f32 %v889_v45, %v888_v42  ;;  %v891_v48 = vpop.f32.mrb[6].mxu1  ;;  %v870_v49 = vpop.f32.mrb[7].mxu0 }
 0x12b   :  { %v687_v50 = vadd.f32 %v868_v44, %v646_v38  ;;  %v871_v51 = vadd.f32 %v870_v49, %v869_v46  ;;  %v892_v52 = vpop.f32.mrb[7].mxu1 }
 0x12c   :  { %v893_v53 = vadd.f32 %v892_v52, %v891_v48 }
 0x12d   :  { %v728_v54 = vadd.f32 %v890_v47, %v687_v50  ;;  %v690_v55 = vadd.f32 %v871_v51, %v649_v40 }
 0x12f   :  { %734 = vst [vmem:[%s1265_s3] sm:$0xff] %v728_v54  ;;  %v731_v56 = vadd.f32 %v893_v53, %v690_v55 }
 0x131   :  { %735 = vst [vmem:[%s1265_s3 + $0x8] sm:$0xf] %v731_v56 }
 0x132   :  { %740 = vsyncpa [#allocation3], 1 }

// kernel: model_forward.15
= control target key start
LH: loop header
LB: loop body
LE: loop exit
PB: predicated region body
PF: predicated region fallthrough
CT: control target
= control target key end

     0   :  { %12 = vsyncpa [#allocation3], 0  ;;  %s594_s0 = inlined_call_operand.vmem [shape: f32[12,128], index: 0, kind: input, shape index: {}]   ;;  %s595_s1 = inlined_call_operand.vmem [shape: bf16[128,128], index: 1, kind: input, shape index: {}]   ;;  %s596_s2 = inlined_call_operand.hbm [shape: f32[1,128], index: 2, kind: input, shape index: {}]   ;;  %s597_s3 = inlined_call_operand.vmem [shape: bf16[128,128], index: 3, kind: input, shape index: {}]   ;;  %s598_s4 = inlined_call_operand.hbm [shape: f32[1,128], index: 4, kind: input, shape index: {}]   ;;  %s599_s5 = inlined_call_operand.vmem [shape: f32[12,128], index: 5, kind: output, shape index: {0}]   ;;  %s600_s6 = inlined_call_operand.vmem [shape: f32[12,128], index: 6, kind: output, shape index: {1}]  }
   0x1   :  { %13 = vsyncpa [#allocation5], 0  ;;  %s463_s21 = smov [#allocation2]   ;;  %s464_s23 = smov [#allocation4]  }
   0x2   :  { %s24_s22 = sshll.u32 %s463_s21, 4  ;;  %s36_s24 = sshll.u32 %s464_s23, 4  ;;  %s25_s22 = int_to_ptr.vmem [resolvable:$true] %s24_s22  ;;  %s37_s24 = int_to_ptr.vmem [resolvable:$true] %s36_s24 }
   0x3   :  { %s415_s27 = scalar_lea.hbm %s596_s2, 16 }
   0x4   :  { %p416_p0 = scmp.ne.s32.totalorder %s596_s2, %s415_s27  ;;  %p419_p1 = scmp.lt.u32.totalorder %s415_s27, %s596_s2 }
   0x6   :  { %p421_p2 = pnand %p419_p1, %p416_p0 }
   0x8   :  { %424 = shalt.err (!%p421_p2)
}
   0x9   :  { %s425_s8 = scalar_lea.vmem %s25_s22, 16  ;;  %s429_s9 = scalar_lea.vmem %s25_s22, 32 }
   0xa   :  { %p426_p3 = scmp.ne.s32.totalorder %s25_s22, %s425_s8  ;;  %p430_p4 = scmp.lt.s32.totalorder %s25_s22, %s25_s22 }
   0xb   :  { %p431_p5 = scmp.lt.s32.totalorder %s429_s9, %s425_s8 }
   0xd   :  { %p432_p6 = por %p431_p5, %p430_p4 }
   0xf   :  { %p433_p7 = pnand %p432_p6, %p426_p3 }
  0x11   :  { %436 = shalt.err (!%p433_p7)
}
  0x12   :  { %27 = dma.hbm_to_vmem [thread:$0]  %s596_s2, 16, %s25_s22, [#allocation3]  }
  0x13   :  { %s437_s14 = scalar_lea.hbm %s598_s4, 16 }
  0x14   :  { %p438_p8 = scmp.ne.s32.totalorder %s598_s4, %s437_s14  ;;  %p441_p9 = scmp.lt.u32.totalorder %s437_s14, %s598_s4 }
  0x16   :  { %p443_p10 = pnand %p441_p9, %p438_p8 }
  0x18   :  { %446 = shalt.err (!%p443_p10)
}
  0x19   :  { %s447_s19 = scalar_lea.vmem %s37_s24, 16  ;;  %s451_s20 = scalar_lea.vmem %s37_s24, 32 }
  0x1a   :  { %p448_p11 = scmp.ne.s32.totalorder %s37_s24, %s447_s19  ;;  %p452_p12 = scmp.lt.s32.totalorder %s37_s24, %s37_s24 }
  0x1b   :  { %p453_p13 = scmp.lt.s32.totalorder %s451_s20, %s447_s19 }
  0x1d   :  { %p454_p0 = por %p453_p13, %p452_p12 }
  0x1f   :  { %p455_p1 = pnand %p454_p0, %p448_p11 }
  0x21   :  { %458 = shalt.err (!%p455_p1)
}
  0x22   :  { %39 = dma.hbm_to_vmem [thread:$0]  %s598_s4, 16, %s37_s24, [#allocation5]  }
  0x23   :  { %459 = dma.done.wait [#allocation3], 16  }
  0x24   :  { %460 = vsyncadd [#allocation3], 4294967280 }
  0x25   :  { %461 = dma.done.wait [#allocation5], 16  }
  0x26   :  { %462 = vsyncadd [#allocation5], 4294967280  ;;  %v465_v0 = vmov 0.0   ;;  %vm466_vm0 = vmmov 0   ;;  %v391_v1 = vld [vmem:[%s597_s3] sm:$0xff]   ;;  %v392_v2 = vld [vmem:[%s597_s3 + $0x8] sm:$0xff]  }
  0x27   :  { %367 = vmatprep.subr.bf16.mxu1 %v465_v0  ;;  %383 = vmatprep.mubr.msk.bf16.mxu1 %vm466_vm0, %v465_v0  ;;  %v393_v3 = vld [vmem:[%s597_s3 + $0x10] sm:$0xff]   ;;  %v394_v4 = vld [vmem:[%s597_s3 + $0x18] sm:$0xff]   ;;  %v395_v5 = vld [vmem:[%s597_s3 + $0x20] sm:$0xff]   ;;  %vm278_vm1 = vcmask 1043456  }
  0x28   :  { %347 = vmatprep.subr.bf16.mxu0 %v465_v0  ;;  %363 = vmatprep.mubr.msk.bf16.mxu0 %vm466_vm0, %v465_v0  ;;  %v396_v6 = vld [vmem:[%s597_s3 + $0x28] sm:$0xff]   ;;  %v397_v7 = vld [vmem:[%s597_s3 + $0x30] sm:$0xff]   ;;  %v398_v8 = vld [vmem:[%s597_s3 + $0x38] sm:$0xff]  }
  0x29   :  { %368 = vmatpush3.bf16.msra.mxu1 %v391_v1  ;;  %v47_v9 = vld [vmem:[%s594_s0] sm:$0xff]  ;;  %v48_v10 = vld [vmem:[%s594_s0 + $0x8] sm:$0xf]  ;;  %v401_v14 = vld [vmem:[%s595_s1 + $0x10] sm:$0xff]  }
  0x2a   :  { %369 = vmatprep.subr.bf16.mxu1 %v465_v0  ;;  %v49_v11 = vpack.c.bf16 %v48_v10, %v47_v9  ;;  %v399_v12 = vld [vmem:[%s595_s1] sm:$0xff]   ;;  %v400_v13 = vld [vmem:[%s595_s1 + $0x8] sm:$0xff]   ;;  %v402_v15 = vld [vmem:[%s595_s1 + $0x18] sm:$0xff]  }
  0x2b   :  { %348 = vmatpush3.bf16.msra.mxu0 %v399_v12  ;;  %v403_v16 = vld [vmem:[%s595_s1 + $0x20] sm:$0xff]   ;;  %v404_v17 = vld [vmem:[%s595_s1 + $0x28] sm:$0xff]   ;;  %v405_v18 = vld [vmem:[%s595_s1 + $0x30] sm:$0xff]  }
  0x2c   :  { %349 = vmatprep.subr.bf16.mxu0 %v465_v0  ;;  %v406_v19 = vld [vmem:[%s595_s1 + $0x38] sm:$0xff]   ;;  %v320_v22 = vld [vmem:[#allocation4] ss:$0 sm:$0xff]  ;;  %v311_v40 = vld [vmem:[#allocation2] ss:$0 sm:$0xff] }
  0x2d   :  { %370 = vmatpush3.bf16.msra.mxu1 %v392_v2 }
  0x2e   :  { %371 = vmatprep.subr.bf16.mxu1 %v465_v0 }
  0x2f   :  { %350 = vmatpush3.bf16.msra.mxu0 %v400_v13 }
  0x30   :  { %351 = vmatprep.subr.bf16.mxu0 %v465_v0 }
  0x31   :  { %372 = vmatpush3.bf16.msra.mxu1 %v393_v3 }
  0x32   :  { %373 = vmatprep.subr.bf16.mxu1 %v465_v0 }
  0x33   :  { %352 = vmatpush3.bf16.msra.mxu0 %v401_v14 }
  0x34   :  { %353 = vmatprep.subr.bf16.mxu0 %v465_v0 }
  0x35   :  { %374 = vmatpush3.bf16.msra.mxu1 %v394_v4 }
  0x36   :  { %375 = vmatprep.subr.bf16.mxu1 %v465_v0 }
  0x37   :  { %354 = vmatpush3.bf16.msra.mxu0 %v402_v15 }
  0x38   :  { %355 = vmatprep.subr.bf16.mxu0 %v465_v0 }
  0x39   :  { %376 = vmatpush3.bf16.msra.mxu1 %v395_v5 }
  0x3a   :  { %377 = vmatprep.subr.bf16.mxu1 %v465_v0 }
  0x3b   :  { %356 = vmatpush3.bf16.msra.mxu0 %v403_v16 }
  0x3c   :  { %357 = vmatprep.subr.bf16.mxu0 %v465_v0 }
  0x3d   :  { %378 = vmatpush3.bf16.msra.mxu1 %v396_v6 }
  0x3e   :  { %379 = vmatprep.subr.bf16.mxu1 %v465_v0 }
  0x3f   :  { %358 = vmatpush3.bf16.msra.mxu0 %v404_v17 }
  0x40   :  { %359 = vmatprep.subr.bf16.mxu0 %v465_v0 }
  0x41   :  { %380 = vmatpush3.bf16.msra.mxu1 %v397_v7 }
  0x42   :  { %381 = vmatprep.subr.bf16.mxu1 %v465_v0 }
  0x43   :  { %360 = vmatpush3.bf16.msra.mxu0 %v405_v18 }
  0x44   :  { %361 = vmatprep.subr.bf16.mxu0 %v465_v0 }
  0x45   :  { %382 = vmatpush3.bf16.msra.mxu1 %v398_v8 }
  0x47   :  { %362 = vmatpush3.bf16.msra.mxu0 %v406_v19 }
  0x48   :  { %384 = vmatmul.mubr.bf16.vlgmr.msra.gmra.mrb[0].mxu1 %v49_v11 }
  0x4a   :  { %364 = vmatmul.mubr.bf16.vlgmr.msra.gmra.mrb[0].mxu0 %v49_v11 }
 0x11b   :  { %v269_v20 = vpop.f32.mrb[0].mxu1 }
 0x11c   :  { %v385_v21 = vpop.f32.mrb[1].mxu1  ;;  %v270_v27 = vadd.f32 %v320_v22, %v269_v20 }
 0x11d   :  { %v272_v23 = vpop.f32.mrb[2].mxu1  ;;  %v155_v37 = vpop.f32.mrb[0].mxu0 }
 0x11e   :  { %v273_v24 = vadd.f32 %v320_v22, %v272_v23  ;;  %v386_v25 = vpop.f32.mrb[3].mxu1  ;;  %v365_v38 = vpop.f32.mrb[1].mxu0  ;;  %v156_v42 = vadd.f32 %v311_v40, %v155_v37 }
 0x11f   :  { %v158_v39 = vpop.f32.mrb[2].mxu0 }
 0x120   :  { %v279_v26 = vsel %vm278_vm1, %v273_v24, -inf  ;;  %v366_v41 = vpop.f32.mrb[3].mxu0  ;;  %v159_v43 = vadd.f32 %v311_v40, %v158_v39  ;;  %162 = vst [vmem:[%s599_s5] sm:$0xff] %v156_v42 }
 0x121   :  { %280 = vmax.xlane.f32.xlu0 %v279_v26 }
 0x122   :  { %163 = vst [vmem:[%s599_s5 + $0x8] sm:$0xf] %v159_v43 }
 0x125   :  { %276 = vmax.xlane.f32.xlu0 %v270_v27 }
 0x1ae   :  { %v281_v28 = vpop.xlane.xlu0 %280 }
 0x1af   :  { %v283_v29 = vsub.f32 %v273_v24, %v281_v28 }
 0x1b1   :  { %v286_v32 = vmul.f32 1.442695, %v283_v29 }
 0x1b2   :  { %v277_v30 = vpop.xlane.xlu0 %276 }
 0x1b3   :  { %v282_v31 = vsub.f32 %v270_v27, %v277_v30 }
 0x1b5   :  { %v284_v33 = vmul.f32 1.442695, %v282_v31 }
 0x1b7   :  { %407 = vpow2.f32 %v284_v33 }
 0x1b8   :  { %409 = vpow2.f32 %v286_v32 }
 0x1c1   :  { %v408_v34 = vpop.eup %407 }
 0x1c2   :  { %v410_v35 = vpop.eup %409  ;;  %288 = vadd.xlane.f32.xlu1 %v408_v34 }
 0x1c3   :  { %v290_v36 = vsel %vm278_vm1, %v410_v35, 0.0 }
 0x1c6   :  { %291 = vadd.xlane.f32.xlu1 %v290_v36 }
 0x24f   :  { %v289_v44 = vpop.xlane.xlu1 %288 }
 0x250   :  { %411 = vlog2.f32 %v289_v44 }
 0x253   :  { %v292_v45 = vpop.xlane.xlu1 %291 }
 0x254   :  { %413 = vlog2.f32 %v292_v45 }
 0x25a   :  { %v412_v46 = vpop.eup %411 }
 0x25b   :  { %v294_v47 = vmul.f32 0.6931472, %v412_v46 }
 0x25d   :  { %v297_v48 = vsub.f32 %v282_v31, %v294_v47 }
 0x25e   :  { %v414_v49 = vpop.eup %413 }
 0x25f   :  { %299 = vst [vmem:[%s600_s6] sm:$0xff] %v297_v48  ;;  %v296_v50 = vmul.f32 0.6931472, %v414_v49 }
 0x261   :  { %v298_v51 = vsub.f32 %v283_v29, %v296_v50 }
 0x263   :  { %300 = vst [vmem:[%s600_s6 + $0x8] sm:$0xf] %v298_v51 }
 0x264   :  { %309 = vsyncpa [#allocation3], 1 }
 0x265   :  { %310 = vsyncpa [#allocation5], 1 }

// kernel: model_forward.16
= control target key start
LH: loop header
LB: loop body
LE: loop exit
PB: predicated region body
PF: predicated region fallthrough
CT: control target
= control target key end

     0   :  { %8 = vsyncpa [#allocation3], 0  ;;  %s193_s12 = smov [#allocation2]   ;;  %s269_s0 = inlined_call_operand.vmem [shape: f32[10,64], index: 0, kind: input, shape index: {}]   ;;  %s270_s1 = inlined_call_operand.vmem [shape: bf16[64,256], index: 1, kind: input, shape index: {}]   ;;  %s271_s2 = inlined_call_operand.hbm [shape: f32[1,256], index: 2, kind: input, shape index: {}]   ;;  %s272_s3 = inlined_call_operand.vmem [shape: f32[10,256], index: 3, kind: output, shape index: {}]  }
   0x1   :  { %s19_s13 = sshll.u32 %s193_s12, 4  ;;  %s169_s16 = scalar_lea.hbm %s271_s2, 32  ;;  %s20_s13 = int_to_ptr.vmem [resolvable:$true] %s19_s13 }
   0x2   :  { %p170_p0 = scmp.ne.s32.totalorder %s271_s2, %s169_s16  ;;  %p173_p1 = scmp.lt.u32.totalorder %s169_s16, %s271_s2 }
   0x4   :  { %p175_p2 = pnand %p173_p1, %p170_p0 }
   0x6   :  { %178 = shalt.err (!%p175_p2)
}
   0x7   :  { %s179_s21 = scalar_lea.vmem %s20_s13, 32  ;;  %p184_p4 = scmp.lt.s32.totalorder %s20_s13, %s20_s13 }
   0x8   :  { %p180_p3 = scmp.ne.s32.totalorder %s20_s13, %s179_s21  ;;  %p185_p5 = scmp.lt.s32.totalorder %s179_s21, %s179_s21 }
   0xa   :  { %p186_p6 = por %p185_p5, %p184_p4 }
   0xc   :  { %p187_p7 = pnand %p186_p6, %p180_p3 }
   0xe   :  { %190 = shalt.err (!%p187_p7)
}
   0xf   :  { %22 = dma.hbm_to_vmem [thread:$0]  %s271_s2, 32, %s20_s13, [#allocation3]  }
  0x10   :  { %191 = dma.done.wait [#allocation3], 32  }
  0x11   :  { %192 = vsyncadd [#allocation3], 4294967264  ;;  %v194_v0 = vmov 0   ;;  %v157_v1 = vld [vmem:[%s270_s1 + $0x4] ss:$8 sps:$4 sm:$0xff]   ;;  %vm90_vm0 = vcmask 523264   ;;  %v40_v12 = vlaneseq }
  0x12   :  { %126 = vmatprep.mubr.bf16.mxu0 %v194_v0  ;;  %v159_v2 = vld [vmem:[%s270_s1] ss:$8 sps:$4 sm:$0xff]   ;;  %94 = vmatprep.subr.bf16.mxu0 %v157_v1  ;;  %v160_v3 = vld [vmem:[%s270_s1 + $0x14] ss:$8 sps:$4 sm:$0xff]   ;;  %v162_v4 = vld [vmem:[%s270_s1 + $0x10] ss:$8 sps:$4 sm:$0xff]  }
  0x13   :  { %95 = vmatpush1.bf16.msra.mxu0 %v159_v2  ;;  %v163_v5 = vld [vmem:[%s270_s1 + $0x24] ss:$8 sps:$4 sm:$0xff]   ;;  %v165_v6 = vld [vmem:[%s270_s1 + $0x20] ss:$8 sps:$4 sm:$0xff]   ;;  %v166_v7 = vld [vmem:[%s270_s1 + $0x34] ss:$8 sps:$4 sm:$0xff]  }
  0x14   :  { %96 = vmatprep.subr.bf16.mxu0 %v160_v3  ;;  %v168_v8 = vld [vmem:[%s270_s1 + $0x30] ss:$8 sps:$4 sm:$0xff]   ;;  %v27_v9 = vld [vmem:[%s269_s0] sm:$0xff]  ;;  %v28_v10 = vld [vmem:[%s269_s0 + $0x8] sm:$0x3]  ;;  %v41_v13 = vshrl.u32 %v40_v12, 7 }
  0x15   :  { %v37_v11 = vpack.c.bf16 %v28_v10, %v27_v9  ;;  %v38_v15 = vld [vmem:[#allocation2] sm:$0x3] }
  0x16   :  { %v42_v14 = vsub.s32 0, %v41_v13  ;;  %v46_v16 = vsub.s32 1, %v41_v13 }
  0x17   :  { %97 = vmatpush1.bf16.msra.mxu0 %v162_v4 }
  0x18   :  { %98 = vmatprep.subr.bf16.mxu0 %v163_v5  ;;  %v43_v17 = vrot.slane %v38_v15, %v42_v14  ;;  %v47_v18 = vrot.slane %v38_v15, %v46_v16 }
  0x1b   :  { %99 = vmatpush1.bf16.msra.mxu0 %v165_v6 }
  0x1c   :  { %100 = vmatprep.subr.bf16.mxu0 %v166_v7 }
  0x1f   :  { %101 = vmatpush1.bf16.msra.mxu0 %v168_v8 }
  0x22   :  { %154 = vmatmul.mubr.msk.bf16.vlgmr.msra.gmra.mrb[0].mxu0 %vm90_vm0, %v37_v11 }
  0xf5   :  { %v128_v19 = vpop.f32.mrb[0].mxu0 }
  0xf6   :  { %v129_v20 = vadd.f32 %v128_v19, %v43_v17  ;;  %v130_v21 = vpop.f32.mrb[1].mxu0 }
  0xf7   :  { %v131_v22 = vadd.f32 %v130_v21, %v47_v18  ;;  %v132_v23 = vpop.f32.mrb[2].mxu0 }
  0xf8   :  { %137 = vst [vmem:[%s272_s3] sm:$0xff] %v129_v20  ;;  %v133_v24 = vadd.f32 %v132_v23, %v43_v17  ;;  %v134_v25 = vpop.f32.mrb[3].mxu0 }
  0xf9   :  { %138 = vst [vmem:[%s272_s3 + $0x8] sm:$0xff] %v131_v22  ;;  %v135_v26 = vadd.f32 %v134_v25, %v47_v18 }
  0xfa   :  { %139 = vst [vmem:[%s272_s3 + $0x10] sm:$0x3] %v133_v24 }
  0xfb   :  { %140 = vst [vmem:[%s272_s3 + $0x18] sm:$0x3] %v135_v26 }
  0xfc   :  { %145 = vsyncpa [#allocation3], 1 }

// kernel: model_forward.18
= control target key start
LH: loop header
LB: loop body
LE: loop exit
PB: predicated region body
PF: predicated region fallthrough
CT: control target
= control target key end

     0   :  { %10 = vsyncpa [#allocation3], 0  ;;  %s400_s0 = inlined_call_operand.vmem [shape: f32[10,64], index: 0, kind: input, shape index: {}]   ;;  %s401_s1 = inlined_call_operand.vmem [shape: bf16[64,128], index: 1, kind: input, shape index: {}]   ;;  %s402_s2 = inlined_call_operand.hbm [shape: f32[1,128], index: 2, kind: input, shape index: {}]   ;;  %s403_s3 = inlined_call_operand.hbm [shape: f32[1,128], index: 3, kind: input, shape index: {}]   ;;  %s404_s4 = inlined_call_operand.hbm [shape: f32[1,128], index: 4, kind: input, shape index: {}]   ;;  %s405_s5 = inlined_call_operand.vmem [shape: f32[10,128], index: 5, kind: output, shape index: {}]  }
   0x1   :  { %11 = vsyncpa [#allocation5], 0  ;;  %s303_s18 = smov [#allocation4]   ;;  %s304_s20 = smov [#allocation2]  }
   0x2   :  { %s32_s19 = sshll.u32 %s303_s18, 4  ;;  %s22_s21 = sshll.u32 %s304_s20, 4  ;;  %s33_s19 = int_to_ptr.vmem [resolvable:$true] %s32_s19  ;;  %s23_s21 = int_to_ptr.vmem [resolvable:$true] %s22_s21 }
   0x3   :  { %s233_s24 = scalar_lea.hbm %s403_s3, 16 }
   0x4   :  { %p234_p0 = scmp.ne.s32.totalorder %s403_s3, %s233_s24  ;;  %p237_p1 = scmp.lt.u32.totalorder %s233_s24, %s403_s3 }
   0x6   :  { %p239_p2 = pnand %p237_p1, %p234_p0 }
   0x8   :  { %242 = shalt.err (!%p239_p2)
}
   0x9   :  { %s243_s29 = scalar_lea.vmem %s33_s19, 16  ;;  %s247_s30 = scalar_lea.vmem %s33_s19, 32 }
   0xa   :  { %p244_p3 = scmp.ne.s32.totalorder %s33_s19, %s243_s29  ;;  %p248_p4 = scmp.lt.s32.totalorder %s33_s19, %s33_s19 }
   0xb   :  { %p249_p5 = scmp.lt.s32.totalorder %s247_s30, %s243_s29 }
   0xd   :  { %p250_p6 = por %p249_p5, %p248_p4 }
   0xf   :  { %p251_p7 = pnand %p250_p6, %p244_p3 }
  0x11   :  { %254 = shalt.err (!%p251_p7)
}
  0x12   :  { %35 = dma.hbm_to_vmem [thread:$0]  %s403_s3, 16, %s33_s19, [#allocation5]  }
  0x13   :  { %s255_s10 = scalar_lea.hbm %s402_s2, 16 }
  0x14   :  { %p256_p8 = scmp.ne.s32.totalorder %s402_s2, %s255_s10  ;;  %p259_p9 = scmp.lt.u32.totalorder %s255_s10, %s402_s2 }
  0x16   :  { %p261_p10 = pnand %p259_p9, %p256_p8 }
  0x18   :  { %264 = shalt.err (!%p261_p10)
}
  0x19   :  { %s265_s15 = scalar_lea.vmem %s23_s21, 16  ;;  %s269_s16 = scalar_lea.vmem %s23_s21, 32 }
  0x1a   :  { %p266_p11 = scmp.ne.s32.totalorder %s23_s21, %s265_s15  ;;  %p270_p12 = scmp.lt.s32.totalorder %s23_s21, %s23_s21 }
  0x1b   :  { %p271_p13 = scmp.lt.s32.totalorder %s269_s16, %s265_s15 }
  0x1d   :  { %p272_p0 = por %p271_p13, %p270_p12 }
  0x1f   :  { %p273_p1 = pnand %p272_p0, %p266_p11 }
  0x21   :  { %276 = shalt.err (!%p273_p1)
}
  0x22   :  { %25 = dma.hbm_to_vmem [thread:$0]  %s402_s2, 16, %s23_s21, [#allocation3]  }
  0x23   :  { %s305_s18 = smov [#allocation6]   ;;  %s277_s23 = scalar_lea.hbm %s404_s4, 16 }
  0x24   :  { %s42_s19 = sshll.u32 %s305_s18, 4  ;;  %p278_p2 = scmp.ne.s32.totalorder %s404_s4, %s277_s23  ;;  %s43_s19 = int_to_ptr.vmem [resolvable:$true] %s42_s19 }
  0x25   :  { %p281_p3 = scmp.lt.u32.totalorder %s277_s23, %s404_s4 }
  0x27   :  { %p283_p4 = pnand %p281_p3, %p278_p2 }
  0x29   :  { %286 = shalt.err (!%p283_p4)
}
  0x2a   :  { %s287_s28 = scalar_lea.vmem %s43_s19, 16  ;;  %s291_s2 = scalar_lea.vmem %s43_s19, 32 }
  0x2b   :  { %p288_p5 = scmp.ne.s32.totalorder %s43_s19, %s287_s28  ;;  %p292_p6 = scmp.lt.s32.totalorder %s43_s19, %s43_s19 }
  0x2c   :  { %p293_p7 = scmp.lt.s32.totalorder %s291_s2, %s287_s28 }
  0x2e   :  { %p294_p8 = por %p293_p7, %p292_p6 }
  0x30   :  { %p295_p9 = pnand %p294_p8, %p288_p5 }
  0x32   :  { %298 = shalt.err (!%p295_p9)
}
  0x33   :  { %45 = dma.hbm_to_vmem [thread:$0]  %s404_s4, 16, %s43_s19, [#allocation5]  }
  0x34   :  { %299 = dma.done.wait [#allocation3], 16  }
  0x35   :  { %300 = vsyncadd [#allocation3], 4294967280 }
  0x36   :  { %301 = dma.done.wait [#allocation5], 32  }
  0x37   :  { %302 = vsyncadd [#allocation5], 4294967264  ;;  %v306_v0 = vmov 0.0   ;;  %vm307_vm0 = vmmov 0   ;;  %v225_v1 = vld [vmem:[%s401_s1] sm:$0xff]   ;;  %v226_v2 = vld [vmem:[%s401_s1 + $0x8] sm:$0xff]  }
  0x38   :  { %208 = vmatprep.subr.bf16.mxu0 %v306_v0  ;;  %216 = vmatprep.mubr.msk.bf16.mxu0 %vm307_vm0, %v306_v0  ;;  %v227_v3 = vld [vmem:[%s401_s1 + $0x10] sm:$0xff]   ;;  %v228_v4 = vld [vmem:[%s401_s1 + $0x18] sm:$0xff]   ;;  %v56_v5 = vld [vmem:[%s400_s0] sm:$0xff]  ;;  %vm98_vm1 = vcmask 523264   ;;  %vm147_vm2 = vcmask 1041408  }
  0x39   :  { %209 = vmatpush3.bf16.msra.mxu0 %v225_v1  ;;  %v57_v6 = vld [vmem:[%s400_s0 + $0x8] sm:$0x3]  ;;  %v195_v10 = vld [vmem:[#allocation2] ss:$0 sm:$0xff]  ;;  %v201_v32 = vld [vmem:[#allocation4] ss:$0 sm:$0xff] }
  0x3a   :  { %210 = vmatprep.subr.bf16.mxu0 %v306_v0  ;;  %v58_v7 = vpack.c.bf16 %v57_v6, %v56_v5  ;;  %v202_v34 = vld [vmem:[#allocation6] ss:$0 sm:$0xff] }
  0x3d   :  { %211 = vmatpush3.bf16.msra.mxu0 %v226_v2 }
  0x3e   :  { %212 = vmatprep.subr.bf16.mxu0 %v306_v0 }
  0x41   :  { %213 = vmatpush3.bf16.msra.mxu0 %v227_v3 }
  0x42   :  { %214 = vmatprep.subr.bf16.mxu0 %v306_v0 }
  0x45   :  { %215 = vmatpush3.bf16.msra.mxu0 %v228_v4 }
  0x48   :  { %217 = vmatmul.mubr.msk.bf16.vlgmr.msra.gmra.mrb[0].mxu0 %vm98_vm1, %v58_v7 }
 0x11b   :  { %v136_v8 = vpop.f32.mrb[0].mxu0 }
 0x11c   :  { %v218_v9 = vpop.f32.mrb[1].mxu0  ;;  %v137_v15 = vadd.f32 %v195_v10, %v136_v8 }
 0x11d   :  { %v139_v11 = vpop.f32.mrb[2].mxu0 }
 0x11e   :  { %v140_v12 = vadd.f32 %v195_v10, %v139_v11  ;;  %v219_v13 = vpop.f32.mrb[3].mxu0 }
 0x120   :  { %v148_v14 = vsel %vm147_vm2, %v140_v12, 0.0 }
 0x121   :  { %149 = vadd.xlane.f32.xlu0 %v148_v14 }
 0x125   :  { %145 = vadd.xlane.f32.xlu0 %v137_v15 }
 0x1ae   :  { %v150_v16 = vpop.xlane.xlu0 %149 }
 0x1af   :  { %v153_v17 = vmul.f32 0.0078125, %v150_v16 }
 0x1b1   :  { %v155_v20 = vsub.f32 %v140_v12, %v153_v17 }
 0x1b2   :  { %v146_v18 = vpop.xlane.xlu0 %145 }
 0x1b3   :  { %v152_v19 = vmul.f32 0.0078125, %v146_v18  ;;  %v157_v23 = vmul.f32 %v155_v20, %v155_v20 }
 0x1b5   :  { %v154_v21 = vsub.f32 %v137_v15, %v152_v19  ;;  %v160_v24 = vsel %vm147_vm2, %v157_v23, 0.0 }
 0x1b7   :  { %v156_v22 = vmul.f32 %v154_v21, %v154_v21 }
 0x1b9   :  { %158 = vadd.xlane.f32.xlu1 %v156_v22 }
 0x1bd   :  { %161 = vadd.xlane.f32.xlu1 %v160_v24 }
 0x246   :  { %v159_v25 = vpop.xlane.xlu1 %158 }
 0x247   :  { %v163_v26 = vmul.f32 0.0078125, %v159_v25 }
 0x249   :  { %v165_v27 = vadd.f32 1e-05, %v163_v26 }
 0x24a   :  { %v162_v28 = vpop.xlane.xlu1 %161 }
 0x24b   :  { %229 = vrsqrt.f32 %v165_v27  ;;  %v164_v29 = vmul.f32 0.0078125, %v162_v28 }
 0x24d   :  { %v166_v30 = vadd.f32 1e-05, %v164_v29 }
 0x24f   :  { %231 = vrsqrt.f32 %v166_v30 }
 0x255   :  { %v230_v31 = vpop.eup %229 }
 0x256   :  { %v169_v33 = vmul.f32 %v230_v31, %v154_v21 }
 0x258   :  { %v177_v35 = vmul.f32 %v201_v32, %v169_v33 }
 0x259   :  { %v232_v36 = vpop.eup %231 }
 0x25a   :  { %v185_v37 = vadd.f32 %v202_v34, %v177_v35  ;;  %v170_v38 = vmul.f32 %v232_v36, %v155_v20 }
 0x25c   :  { %187 = vst [vmem:[%s405_s5] sm:$0xff] %v185_v37  ;;  %v178_v39 = vmul.f32 %v201_v32, %v170_v38 }
 0x25e   :  { %v186_v40 = vadd.f32 %v202_v34, %v178_v39 }
 0x260   :  { %188 = vst [vmem:[%s405_s5 + $0x8] sm:$0x3] %v186_v40 }
 0x261   :  { %193 = vsyncpa [#allocation3], 1 }
 0x262   :  { %194 = vsyncpa [#allocation5], 1 }

// kernel: model_forward.17
= control target key start
LH: loop header
LB: loop body
LE: loop exit
PB: predicated region body
PF: predicated region fallthrough
CT: control target
= control target key end

     0   :  { %v638_v1 = vmov 0   ;;  %v639_v9 = vmov 1983009808   ;;  %v112_v11 = vlaneseq  ;;  %s640_s26 = smov 64   ;;  %vm151_vm0 = vcmask 517120   ;;  %s796_s1 = inlined_call_operand.vmem [shape: bf16[64,256], index: 1, kind: input, shape index: {}]   ;;  %s797_s0 = inlined_call_operand.vmem [shape: f32[5,2,256], index: 0, kind: input, shape index: {}]   ;;  %s798_s2 = inlined_call_operand.vmem [shape: f32[5,2,64], index: 2, kind: output, shape index: {}]  }
   0x1   :  { %v566_v0 = vld [vmem:[%s796_s1 + $0x4] ss:$8 sps:$4 sm:$0xff]   ;;  %97 = vmatprep.mubr.bf16.mxu0 %v638_v1  ;;  %191 = vmatprep.mubr.bf16.mxu1 %v638_v1  ;;  %v664_v2 = vld [vmem:[%s796_s1] ss:$8 sps:$4 sm:$0xff]   ;;  %v669_v3 = vld [vmem:[%s796_s1 + $0x14] ss:$8 sps:$4 sm:$0xff]   ;;  %v110_v10 = vunpack.c.l.s4 %v639_v9 }
   0x2   :  { %65 = vmatprep.subr.bf16.mxu0 %v566_v0  ;;  %159 = vmatprep.subr.bf16.mxu1 %v566_v0  ;;  %v675_v4 = vld [vmem:[%s796_s1 + $0x10] ss:$8 sps:$4 sm:$0xff]   ;;  %v682_v5 = vld [vmem:[%s796_s1 + $0x24] ss:$8 sps:$4 sm:$0xff]   ;;  %v689_v6 = vld [vmem:[%s796_s1 + $0x20] ss:$8 sps:$4 sm:$0xff]  }
   0x3   :  { %66 = vmatpush1.bf16.msra.mxu0 %v664_v2  ;;  %160 = vmatpush1.bf16.msra.mxu1 %v664_v2  ;;  %v696_v7 = vld [vmem:[%s796_s1 + $0x34] ss:$8 sps:$4 sm:$0xff]   ;;  %v703_v8 = vld [vmem:[%s796_s1 + $0x30] ss:$8 sps:$4 sm:$0xff]   ;;  %v111_v12 = vunpack.c.0.s8 %v110_v10  ;;  %v113_v13 = vshrl.u32 %v112_v11, 7  ;;  %vm61_vm1 = vcmask 523264  }
   0x4   :  { %67 = vmatprep.subr.bf16.mxu0 %v669_v3  ;;  %161 = vmatprep.subr.bf16.mxu1 %v669_v3  ;;  %v20_v19 = vld [vmem:[%s797_s0] sm:$0xf]  ;;  %v543_v48 = vld [vmem:[%s797_s0 + $0x4] sm:$0xf] }
   0x5   :  { %v719_v15 = vsub.s32 %v111_v12, %v113_v13 }
   0x7   :  { %68 = vmatpush1.bf16.msra.mxu0 %v675_v4  ;;  %162 = vmatpush1.bf16.msra.mxu1 %v675_v4 }
   0x8   :  { %69 = vmatprep.subr.bf16.mxu0 %v682_v5  ;;  %163 = vmatprep.subr.bf16.mxu1 %v682_v5 }
   0xb   :  { %70 = vmatpush1.bf16.msra.mxu0 %v689_v6  ;;  %164 = vmatpush1.bf16.msra.mxu1 %v689_v6 }
   0xc   :  { %71 = vmatprep.subr.bf16.mxu0 %v696_v7  ;;  %165 = vmatprep.subr.bf16.mxu1 %v696_v7 }
   0xf   :  { %72 = vmatpush1.bf16.msra.mxu0 %v703_v8  ;;  %166 = vmatpush1.bf16.msra.mxu1 %v703_v8 }
  0x10   :  { %253 = vmatprep.subr.bf16.mxu0 %v566_v0  ;;  %347 = vmatprep.subr.bf16.mxu1 %v566_v0 }
  0x12   :  { %98 = vmatmul.mubr.bf16.vlgmr.msra.gmra.mrb[0].mxu0 %v638_v1 }
  0x13   :  { %254 = vmatpush1.bf16.msra.mxu0 %v664_v2  ;;  %285 = vmatprep.mubr.bf16.mxu0 %v638_v1 }
  0x14   :  { %255 = vmatprep.subr.bf16.mxu0 %v669_v3 }
  0x17   :  { %256 = vmatpush1.bf16.msra.mxu0 %v675_v4 }
  0x18   :  { %257 = vmatprep.subr.bf16.mxu0 %v682_v5 }
  0x1b   :  { %258 = vmatpush1.bf16.msra.mxu0 %v689_v6 }
  0x1c   :  { %259 = vmatprep.subr.bf16.mxu0 %v696_v7 }
  0x1f   :  { %260 = vmatpush1.bf16.msra.mxu0 %v703_v8 }
  0x20   :  { %441 = vmatprep.subr.bf16.mxu0 %v566_v0 }
  0xe5   :  { %v99_v14 = vpop.f32.mrb[0].mxu0 }
  0xe6   :  { %v101_v16 = vpop.f32.mrb[1].mxu0 }
  0xe7   :  { %v108_v17 = vcombine.low %v99_v14, %v101_v16  ;;  %v103_v18 = vpop.f32.mrb[2].mxu0 }
  0xe8   :  { %v104_v20 = vpop.f32.mrb[3].mxu0 }
  0xe9   :  { %v115_v21 = vrot.slane %v108_v17, %v719_v15 }
  0xeb   :  { %v117_v22 = vadd.f32 %v115_v21, %v20_v19 }
  0xed   :  { %v541_v23 = vmul.f32 -1.442695, %v117_v22  ;;  %v125_v24 = vrot.slane %v117_v22, 2 }
  0xef   :  { %578 = vpow2.f32 %v541_v23 }
  0xf0   :  { %580 = vtanh.f32 %v125_v24 }
  0xf9   :  { %v579_v25 = vpop.eup %578 }
  0xfa   :  { %v121_v26 = vadd.f32 1.0, %v579_v25  ;;  %v581_v27 = vpop.eup %580 }
  0xfc   :  { %582 = vrcp.f32 %v121_v26 }
 0x106   :  { %v583_v28 = vpop.eup %582 }
 0x107   :  { %v139_v29 = vmul.f32 %v583_v28, %v581_v27  ;;  %v138_v30 = vmul.f32 0.0, %v583_v28 }
 0x109   :  { %141 = vrot.lane.b32.xlu0 %v139_v29, %s640_s26 }
 0x10d   :  { %128 = vrot.lane.b32.xlu0 %v117_v22, %s640_s26 }
 0x17b   :  { %v142_v31 = vpop.permute.xlu0 %141 }
 0x17c   :  { %v144_v32 = vadd.f32 %v142_v31, %v138_v30 }
 0x17e   :  { %584 = vtanh.f32 %v144_v32 }
 0x17f   :  { %v129_v34 = vpop.permute.xlu0 %128 }
 0x180   :  { %v130_v35 = vrot.slane %v129_v34, 2 }
 0x182   :  { %v542_v36 = vmul.f32 -1.442695, %v130_v35 }
 0x184   :  { %586 = vpow2.f32 %v542_v36 }
 0x188   :  { %v585_v33 = vpop.eup %584 }
 0x189   :  { %147 = vrot.lane.b32.xlu1 %v585_v33, %s640_s26 }
 0x18e   :  { %v587_v37 = vpop.eup %586 }
 0x18f   :  { %v135_v38 = vadd.f32 1.0, %v587_v37 }
 0x191   :  { %588 = vrcp.f32 %v135_v38 }
 0x19b   :  { %v589_v39 = vpop.eup %588 }
 0x1fb   :  { %v148_v40 = vpop.permute.xlu1 %147 }
 0x1fc   :  { %v150_v41 = vmul.f32 %v589_v39, %v148_v40 }
 0x1fe   :  { %152 = vst.msk [vmem:[%s798_s2] sm:$0x3] %vm151_vm0, %v150_v41  ;;  %v155_v42 = vpack.c.bf16 %v150_v41, %v150_v41  ;;  %v553_v41 = vld [vmem:[%s797_s0 + $0xc] sm:$0xf] }
 0x200   :  { %544 = vmatmul.mubr.msk.bf16.vlgmr.msra.gmra.mrb[0].mxu1 %vm61_vm1, %v155_v42 }
 0x201   :  { %348 = vmatpush1.bf16.msra.mxu1 %v664_v2  ;;  %379 = vmatprep.mubr.bf16.mxu1 %v638_v1 }
 0x202   :  { %349 = vmatprep.subr.bf16.mxu1 %v669_v3 }
 0x205   :  { %350 = vmatpush1.bf16.msra.mxu1 %v675_v4 }
 0x206   :  { %351 = vmatprep.subr.bf16.mxu1 %v682_v5 }
 0x209   :  { %352 = vmatpush1.bf16.msra.mxu1 %v689_v6 }
 0x20a   :  { %353 = vmatprep.subr.bf16.mxu1 %v696_v7 }
 0x20d   :  { %354 = vmatpush1.bf16.msra.mxu1 %v703_v8 }
 0x2d3   :  { %v193_v43 = vpop.f32.mrb[0].mxu1 }
 0x2d4   :  { %v195_v44 = vpop.f32.mrb[1].mxu1 }
 0x2d5   :  { %v202_v45 = vcombine.low %v193_v43, %v195_v44  ;;  %v197_v46 = vpop.f32.mrb[2].mxu1 }
 0x2d6   :  { %v198_v47 = vpop.f32.mrb[3].mxu1 }
 0x2d7   :  { %v209_v49 = vrot.slane %v202_v45, %v719_v15 }
 0x2d9   :  { %v211_v50 = vadd.f32 %v543_v48, %v209_v49 }
 0x2db   :  { %222 = vrot.lane.b32.xlu0 %v211_v50, %s640_s26  ;;  %v545_v51 = vmul.f32 -1.442695, %v211_v50  ;;  %v219_v52 = vrot.slane %v211_v50, 2 }
 0x2dd   :  { %590 = vpow2.f32 %v545_v51 }
 0x2de   :  { %592 = vtanh.f32 %v219_v52 }
 0x2e7   :  { %v591_v53 = vpop.eup %590 }
 0x2e8   :  { %v215_v54 = vadd.f32 1.0, %v591_v53  ;;  %v593_v55 = vpop.eup %592 }
 0x2ea   :  { %594 = vrcp.f32 %v215_v54 }
 0x2f4   :  { %v595_v56 = vpop.eup %594 }
 0x2f5   :  { %v233_v57 = vmul.f32 %v595_v56, %v593_v55  ;;  %v232_v58 = vmul.f32 %v595_v56, %v144_v32 }
 0x2f7   :  { %235 = vrot.lane.b32.xlu1 %v233_v57, %s640_s26 }
 0x34d   :  { %v223_v62 = vpop.permute.xlu0 %222 }
 0x34e   :  { %v224_v63 = vrot.slane %v223_v62, 2 }
 0x350   :  { %v546_v0 = vmul.f32 -1.442695, %v224_v63 }
 0x369   :  { %v236_v59 = vpop.permute.xlu1 %235 }
 0x36a   :  { %v238_v60 = vadd.f32 %v236_v59, %v232_v58 }
 0x36c   :  { %596 = vtanh.f32 %v238_v60 }
 0x36d   :  { %598 = vpow2.f32 %v546_v0 }
 0x376   :  { %v597_v61 = vpop.eup %596 }
 0x377   :  { %241 = vrot.lane.b32.xlu1 %v597_v61, %s640_s26  ;;  %v599_v9 = vpop.eup %598 }
 0x378   :  { %v229_v10 = vadd.f32 1.0, %v599_v9 }
 0x37a   :  { %600 = vrcp.f32 %v229_v10 }
 0x384   :  { %v601_v11 = vpop.eup %600 }
 0x3e9   :  { %v242_v12 = vpop.permute.xlu1 %241 }
 0x3ea   :  { %v244_v13 = vmul.f32 %v601_v11, %v242_v12 }
 0x3ec   :  { %547 = vst.msk [vmem:[%s798_s2 + $0x2] sm:$0x3] %vm151_vm0, %v244_v13  ;;  %v249_v14 = vpack.c.bf16 %v244_v13, %v244_v13  ;;  %v558_v13 = vld [vmem:[%s797_s0 + $0x10] sm:$0xf] }
 0x3ee   :  { %549 = vmatmul.mubr.msk.bf16.vlgmr.msra.gmra.mrb[4].mxu0 %vm61_vm1, %v249_v14 }
 0x3ef   :  { %442 = vmatpush1.bf16.msra.mxu0 %v664_v2  ;;  %473 = vmatprep.mubr.bf16.mxu0 %v638_v1  ;;  %v548_v1 = vld [vmem:[%s797_s0 + $0x8] sm:$0xf] }
 0x3f0   :  { %443 = vmatprep.subr.bf16.mxu0 %v669_v3 }
 0x3f3   :  { %444 = vmatpush1.bf16.msra.mxu0 %v675_v4 }
 0x3f4   :  { %445 = vmatprep.subr.bf16.mxu0 %v682_v5 }
 0x3f7   :  { %446 = vmatpush1.bf16.msra.mxu0 %v689_v6 }
 0x3f8   :  { %447 = vmatprep.subr.bf16.mxu0 %v696_v7 }
 0x3fb   :  { %448 = vmatpush1.bf16.msra.mxu0 %v703_v8 }
 0x4c1   :  { %v287_v16 = vpop.f32.mrb[4].mxu0 }
 0x4c2   :  { %v289_v17 = vpop.f32.mrb[5].mxu0 }
 0x4c3   :  { %v296_v18 = vcombine.low %v287_v16, %v289_v17  ;;  %v291_v19 = vpop.f32.mrb[6].mxu0 }
 0x4c4   :  { %v292_v20 = vpop.f32.mrb[7].mxu0 }
 0x4c5   :  { %v303_v2 = vrot.slane %v296_v18, %v719_v15 }
 0x4c7   :  { %v305_v3 = vadd.f32 %v548_v1, %v303_v2 }
 0x4c9   :  { %316 = vrot.lane.b32.xlu1 %v305_v3, %s640_s26  ;;  %v550_v4 = vmul.f32 -1.442695, %v305_v3  ;;  %v313_v5 = vrot.slane %v305_v3, 2 }
 0x4cb   :  { %602 = vpow2.f32 %v550_v4 }
 0x4cc   :  { %604 = vtanh.f32 %v313_v5 }
 0x4d5   :  { %v603_v6 = vpop.eup %602 }
 0x4d6   :  { %v309_v7 = vadd.f32 1.0, %v603_v6  ;;  %v605_v8 = vpop.eup %604 }
 0x4d8   :  { %606 = vrcp.f32 %v309_v7 }
 0x4e2   :  { %v607_v21 = vpop.eup %606 }
 0x4e3   :  { %v327_v22 = vmul.f32 %v607_v21, %v605_v8  ;;  %v326_v23 = vmul.f32 %v607_v21, %v238_v60 }
 0x4e5   :  { %329 = vrot.lane.b32.xlu0 %v327_v22, %s640_s26 }
 0x53b   :  { %v317_v27 = vpop.permute.xlu1 %316 }
 0x53c   :  { %v318_v28 = vrot.slane %v317_v27, 2 }
 0x53e   :  { %v551_v29 = vmul.f32 -1.442695, %v318_v28 }
 0x557   :  { %v330_v24 = vpop.permute.xlu0 %329 }
 0x558   :  { %v332_v25 = vadd.f32 %v330_v24, %v326_v23 }
 0x55a   :  { %608 = vtanh.f32 %v332_v25 }
 0x55b   :  { %610 = vpow2.f32 %v551_v29 }
 0x564   :  { %v609_v26 = vpop.eup %608 }
 0x565   :  { %335 = vrot.lane.b32.xlu0 %v609_v26, %s640_s26  ;;  %v611_v30 = vpop.eup %610 }
 0x566   :  { %v323_v31 = vadd.f32 1.0, %v611_v30 }
 0x568   :  { %612 = vrcp.f32 %v323_v31 }
 0x572   :  { %v613_v32 = vpop.eup %612 }
 0x5d7   :  { %v336_v33 = vpop.permute.xlu0 %335 }
 0x5d8   :  { %v338_v34 = vmul.f32 %v613_v32, %v336_v33 }
 0x5da   :  { %552 = vst.msk [vmem:[%s798_s2 + $0x4] sm:$0x3] %vm151_vm0, %v338_v34  ;;  %v343_v35 = vpack.c.bf16 %v338_v34, %v338_v34 }
 0x5dc   :  { %554 = vmatmul.mubr.msk.bf16.vlgmr.msra.gmra.mrb[4].mxu1 %vm61_vm1, %v343_v35 }
 0x6af   :  { %v381_v36 = vpop.f32.mrb[4].mxu1 }
 0x6b0   :  { %v383_v37 = vpop.f32.mrb[5].mxu1 }
 0x6b1   :  { %v390_v38 = vcombine.low %v381_v36, %v383_v37  ;;  %v385_v39 = vpop.f32.mrb[6].mxu1 }
 0x6b2   :  { %v386_v40 = vpop.f32.mrb[7].mxu1 }
 0x6b3   :  { %v397_v42 = vrot.slane %v390_v38, %v719_v15 }
 0x6b5   :  { %v399_v43 = vadd.f32 %v553_v41, %v397_v42 }
 0x6b7   :  { %410 = vrot.lane.b32.xlu0 %v399_v43, %s640_s26  ;;  %v555_v44 = vmul.f32 -1.442695, %v399_v43  ;;  %v407_v45 = vrot.slane %v399_v43, 2 }
 0x6b9   :  { %614 = vpow2.f32 %v555_v44 }
 0x6ba   :  { %616 = vtanh.f32 %v407_v45 }
 0x6c3   :  { %v615_v46 = vpop.eup %614 }
 0x6c4   :  { %v403_v47 = vadd.f32 1.0, %v615_v46  ;;  %v617_v48 = vpop.eup %616 }
 0x6c6   :  { %618 = vrcp.f32 %v403_v47 }
 0x6d0   :  { %v619_v49 = vpop.eup %618 }
 0x6d1   :  { %v421_v50 = vmul.f32 %v619_v49, %v617_v48  ;;  %v420_v51 = vmul.f32 %v619_v49, %v332_v25 }
 0x6d3   :  { %423 = vrot.lane.b32.xlu1 %v421_v50, %s640_s26 }
 0x729   :  { %v411_v55 = vpop.permute.xlu0 %410 }
 0x72a   :  { %v412_v56 = vrot.slane %v411_v55, 2 }
 0x72c   :  { %v556_v57 = vmul.f32 -1.442695, %v412_v56 }
 0x745   :  { %v424_v52 = vpop.permute.xlu1 %423 }
 0x746   :  { %v426_v53 = vadd.f32 %v424_v52, %v420_v51 }
 0x748   :  { %620 = vtanh.f32 %v426_v53 }
 0x749   :  { %622 = vpow2.f32 %v556_v57 }
 0x752   :  { %v621_v54 = vpop.eup %620 }
 0x753   :  { %429 = vrot.lane.b32.xlu1 %v621_v54, %s640_s26  ;;  %v623_v58 = vpop.eup %622 }
 0x754   :  { %v417_v59 = vadd.f32 1.0, %v623_v58 }
 0x756   :  { %624 = vrcp.f32 %v417_v59 }
 0x760   :  { %v625_v60 = vpop.eup %624 }
 0x7c5   :  { %v430_v61 = vpop.permute.xlu1 %429 }
 0x7c6   :  { %v432_v62 = vmul.f32 %v625_v60, %v430_v61 }
 0x7c8   :  { %557 = vst.msk [vmem:[%s798_s2 + $0x6] sm:$0x3] %vm151_vm0, %v432_v62  ;;  %v437_v63 = vpack.c.bf16 %v432_v62, %v432_v62 }
 0x7ca   :  { %559 = vmatmul.mubr.msk.bf16.vlgmr.msra.gmra.mrb[8].mxu0 %vm61_vm1, %v437_v63 }
 0x89d   :  { %v475_v0 = vpop.f32.mrb[8].mxu0 }
 0x89e   :  { %v477_v9 = vpop.f32.mrb[9].mxu0 }
 0x89f   :  { %v484_v10 = vcombine.low %v475_v0, %v477_v9  ;;  %v479_v11 = vpop.f32.mrb[10].mxu0 }
 0x8a0   :  { %v480_v12 = vpop.f32.mrb[11].mxu0 }
 0x8a1   :  { %v491_v14 = vrot.slane %v484_v10, %v719_v15 }
 0x8a3   :  { %v493_v16 = vadd.f32 %v558_v13, %v491_v14 }
 0x8a5   :  { %504 = vrot.lane.b32.xlu1 %v493_v16, %s640_s26  ;;  %v560_v17 = vmul.f32 -1.442695, %v493_v16  ;;  %v501_v18 = vrot.slane %v493_v16, 2 }
 0x8a7   :  { %626 = vpow2.f32 %v560_v17 }
 0x8a8   :  { %628 = vtanh.f32 %v501_v18 }
 0x8b1   :  { %v627_v19 = vpop.eup %626 }
 0x8b2   :  { %v497_v20 = vadd.f32 1.0, %v627_v19  ;;  %v629_v1 = vpop.eup %628 }
 0x8b4   :  { %630 = vrcp.f32 %v497_v20 }
 0x8be   :  { %v631_v2 = vpop.eup %630 }
 0x8bf   :  { %v515_v3 = vmul.f32 %v631_v2, %v629_v1  ;;  %v514_v4 = vmul.f32 %v631_v2, %v426_v53 }
 0x8c1   :  { %517 = vrot.lane.b32.xlu0 %v515_v3, %s640_s26 }
 0x917   :  { %v505_v7 = vpop.permute.xlu1 %504 }
 0x918   :  { %v506_v8 = vrot.slane %v505_v7, 2 }
 0x91a   :  { %v561_v21 = vmul.f32 -1.442695, %v506_v8 }
 0x933   :  { %v518_v5 = vpop.permute.xlu0 %517 }
 0x934   :  { %v520_v6 = vadd.f32 %v518_v5, %v514_v4 }
 0x936   :  { %632 = vtanh.f32 %v520_v6 }
 0x937   :  { %634 = vpow2.f32 %v561_v21 }
 0x940   :  { %v633_v15 = vpop.eup %632 }
 0x941   :  { %523 = vrot.lane.b32.xlu0 %v633_v15, %s640_s26  ;;  %v635_v22 = vpop.eup %634 }
 0x942   :  { %v511_v23 = vadd.f32 1.0, %v635_v22 }
 0x944   :  { %636 = vrcp.f32 %v511_v23 }
 0x94e   :  { %v637_v24 = vpop.eup %636 }
 0x9b3   :  { %v524_v25 = vpop.permute.xlu0 %523 }
 0x9b4   :  { %v526_v26 = vmul.f32 %v637_v24, %v524_v25 }
 0x9b6   :  { %562 = vst.msk [vmem:[%s798_s2 + $0x8] sm:$0x3] %vm151_vm0, %v526_v26 }

// kernel: model_forward.14
= control target key start
LH: loop header
LB: loop body
LE: loop exit
PB: predicated region body
PF: predicated region fallthrough
CT: control target
= control target key end

     0   :  { %s5740_s6 = smov 1   ;;  %s5741_s10 = smov 2   ;;  %s6745_s0 = inlined_call_operand.smem [shape: u32[40], index: -1, kind: input, shape index: {}] }
   0x1   :  { %s5798_s5 = sld [smem:[%s6745_s0]]   ;;  %s5742_s14 = smov 3  }
   0x2   :  { %s5803_s9 = sld [smem:[%s6745_s0 + %s5740_s6]]   ;;  %s5743_s18 = smov 4  }
   0x3   :  { %s5808_s13 = sld [smem:[%s6745_s0 + %s5741_s10]]   ;;  %s5744_s22 = smov 5  }
   0x4   :  { %s5813_s17 = sld [smem:[%s6745_s0 + %s5742_s14]]   ;;  %s5745_s26 = smov 6  }
   0x5   :  { %s5818_s21 = sld [smem:[%s6745_s0 + %s5743_s18]]   ;;  %s5746_s30 = smov 7  }
   0x6   :  { %s5823_s25 = sld [smem:[%s6745_s0 + %s5744_s22]]   ;;  %s5747_s4 = smov 8  }
   0x7   :  { %6775 = sst [smem:[#allocation14_spill]] %s5798_s5  ;;  %s5748_s10 = smov 9  }
   0x8   :  { %6776 = sst [smem:[#allocation15_spill]] %s5803_s9  ;;  %s5749_s15 = smov 10  }
   0x9   :  { %6777 = sst [smem:[#allocation16_spill]] %s5808_s13  ;;  %s5750_s20 = smov 11  }
   0xa   :  { %6778 = sst [smem:[#allocation17_spill]] %s5813_s17  ;;  %s5752_s1 = smov 13  }
   0xb   :  { %6779 = sst [smem:[#allocation18_spill]] %s5818_s21  ;;  %s5753_s7 = smov 14  }
   0xc   :  { %6780 = sst [smem:[#allocation19_spill]] %s5823_s25  ;;  %s5755_s22 = smov 16  }
   0xd   :  { %s5828_s29 = sld [smem:[%s6745_s0 + %s5745_s26]]   ;;  %s5751_s26 = smov 12  }
   0xe   :  { %s5833_s3 = sld [smem:[%s6745_s0 + %s5746_s30]]   ;;  %s5756_s28 = smov 17  }
   0xf   :  { %s5838_s8 = sld [smem:[%s6745_s0 + %s5747_s4]]  }
  0x10   :  { %s5843_s14 = sld [smem:[%s6745_s0 + %s5748_s10]]  }
  0x11   :  { %s5848_s19 = sld [smem:[%s6745_s0 + %s5749_s15]]   ;;  %s5754_s15 = smov 15  }
  0x12   :  { %s5853_s24 = sld [smem:[%s6745_s0 + %s5750_s20]]  }
  0x13   :  { %6781 = sst [smem:[#allocation20_spill]] %s5828_s29 }
  0x14   :  { %6782 = sst [smem:[#allocation21_spill]] %s5833_s3 }
  0x15   :  { %6783 = sst [smem:[#allocation22_spill]] %s5838_s8 }
  0x16   :  { %6784 = sst [smem:[#allocation23_spill]] %s5843_s14 }
  0x17   :  { %6785 = sst [smem:[#allocation24_spill]] %s5848_s19 }
  0x18   :  { %6786 = sst [smem:[#allocation25_spill]] %s5853_s24 }
  0x19   :  { %s5858_s30 = sld [smem:[%s6745_s0 + %s5751_s26]]  }
  0x1a   :  { %s5863_s6 = sld [smem:[%s6745_s0 + %s5752_s1]]  }
  0x1b   :  { %s5868_s12 = sld [smem:[%s6745_s0 + %s5753_s7]]   ;;  %s5757_s7 = smov 18  }
  0x1c   :  { %s5873_s20 = sld [smem:[%s6745_s0 + %s5754_s15]]   ;;  %s5758_s15 = smov 19  }
  0x1d   :  { %s5878_s27 = sld [smem:[%s6745_s0 + %s5755_s22]]   ;;  %s5759_s22 = smov 20  }
  0x1e   :  { %s5883_s4 = sld [smem:[%s6745_s0 + %s5756_s28]]   ;;  %s5760_s28 = smov 21  }
  0x1f   :  { %6787 = sst [smem:[#allocation26_spill]] %s5858_s30 }
  0x20   :  { %6788 = sst [smem:[#allocation27_spill]] %s5863_s6 }
  0x21   :  { %6789 = sst [smem:[#allocation28_spill]] %s5868_s12 }
  0x22   :  { %6790 = sst [smem:[#allocation29_spill]] %s5873_s20 }
  0x23   :  { %6791 = sst [smem:[#allocation30_spill]] %s5878_s27 }
  0x24   :  { %6792 = sst [smem:[#allocation31_spill]] %s5883_s4 }
  0x25   :  { %s5888_s6 = sld [smem:[%s6745_s0 + %s5757_s7]]   ;;  %s5761_s7 = smov 22  }
  0x26   :  { %s5893_s20 = sld [smem:[%s6745_s0 + %s5758_s15]]   ;;  %s5762_s15 = smov 23  }
  0x27   :  { %s5898_s27 = sld [smem:[%s6745_s0 + %s5759_s22]]   ;;  %s5763_s22 = smov 24  }
  0x28   :  { %s5903_s4 = sld [smem:[%s6745_s0 + %s5760_s28]]   ;;  %s5764_s28 = smov 25  }
  0x2b   :  { %6793 = sst [smem:[#allocation32_spill]] %s5888_s6 }
  0x2c   :  { %6794 = sst [smem:[#allocation33_spill]] %s5893_s20 }
  0x2d   :  { %6795 = sst [smem:[#allocation34_spill]] %s5898_s27 }
  0x2e   :  { %6796 = sst [smem:[#allocation35_spill]] %s5903_s4 }
  0x2f   :  { %s5908_s6 = sld [smem:[%s6745_s0 + %s5761_s7]]   ;;  %s5765_s7 = smov 26  }
  0x30   :  { %s5913_s20 = sld [smem:[%s6745_s0 + %s5762_s15]]   ;;  %s5766_s15 = smov 27  }
  0x31   :  { %s5918_s27 = sld [smem:[%s6745_s0 + %s5763_s22]]   ;;  %s5767_s22 = smov 28  }
  0x32   :  { %s5923_s4 = sld [smem:[%s6745_s0 + %s5764_s28]]   ;;  %s5768_s28 = smov 29  }
  0x35   :  { %6797 = sst [smem:[#allocation36_spill]] %s5908_s6 }
  0x36   :  { %6798 = sst [smem:[#allocation37_spill]] %s5913_s20 }
  0x37   :  { %6799 = sst [smem:[#allocation38_spill]] %s5918_s27 }
  0x38   :  { %6800 = sst [smem:[#allocation39_spill]] %s5923_s4 }
  0x39   :  { %s5928_s6 = sld [smem:[%s6745_s0 + %s5765_s7]]   ;;  %s5769_s7 = smov 30  }
  0x3a   :  { %s5933_s20 = sld [smem:[%s6745_s0 + %s5766_s15]]   ;;  %s5770_s15 = smov 31  }
  0x3b   :  { %s5938_s27 = sld [smem:[%s6745_s0 + %s5767_s22]]   ;;  %s5771_s22 = smov 32  }
  0x3c   :  { %s5943_s4 = sld [smem:[%s6745_s0 + %s5768_s28]]   ;;  %s5772_s28 = smov 33  }
  0x3f   :  { %6801 = sst [smem:[#allocation40_spill]] %s5928_s6 }
  0x40   :  { %6802 = sst [smem:[#allocation41_spill]] %s5933_s20 }
  0x41   :  { %6803 = sst [smem:[#allocation42_spill]] %s5938_s27 }
  0x42   :  { %6804 = sst [smem:[#allocation43_spill]] %s5943_s4 }
  0x43   :  { %s5948_s6 = sld [smem:[%s6745_s0 + %s5769_s7]]   ;;  %s5773_s7 = smov 34  }
  0x44   :  { %s5953_s20 = sld [smem:[%s6745_s0 + %s5770_s15]]   ;;  %s5774_s15 = smov 35  }
  0x45   :  { %s5958_s27 = sld [smem:[%s6745_s0 + %s5771_s22]]   ;;  %s5775_s22 = smov 36  }
  0x46   :  { %s5963_s4 = sld [smem:[%s6745_s0 + %s5772_s28]]   ;;  %s5776_s28 = smov 37  }
  0x47   :  { %s5973_s30 = sld [smem:[%s6745_s0 + %s5774_s15]]   ;;  %s5778_s15 = smov 39  }
  0x48   :  { %s5978_s24 = sld [smem:[%s6745_s0 + %s5775_s22]]  }
  0x49   :  { %6805 = sst [smem:[#allocation44_spill]] %s5948_s6 }
  0x4a   :  { %6806 = sst [smem:[#allocation45_spill]] %s5953_s20 }
  0x4b   :  { %6807 = sst [smem:[#allocation46_spill]] %s5958_s27 }
  0x4c   :  { %6808 = sst [smem:[#allocation47_spill]] %s5963_s4 }
  0x4d   :  { %s5968_s6 = sld [smem:[%s6745_s0 + %s5773_s7]]   ;;  %s5777_s7 = smov 38  }
  0x4e   :  { %6810 = sst [smem:[#allocation49_spill]] %s5973_s30 }
  0x4f   :  { %6811 = sst [smem:[#allocation50_spill]] %s5978_s24 }
  0x50   :  { %s5983_s4 = sld [smem:[%s6745_s0 + %s5776_s28]]  }
  0x51   :  { %s5993_s30 = sld [smem:[%s6745_s0 + %s5778_s15]]  }
  0x53   :  { %6809 = sst [smem:[#allocation48_spill]] %s5968_s6 }
  0x54   :  { %s5988_s6 = sld [smem:[%s6745_s0 + %s5777_s7]]  }
  0x56   :  { %6812 = sst [smem:[#allocation51_spill]] %s5983_s4 }
  0x57   :  { %6814 = sst [smem:[#allocation53_spill]] %s5993_s30 }
  0x5a   :  { %6813 = sst [smem:[#allocation52_spill]] %s5988_s6 }
  0x5b   :  { %84 = vsyncpa [#allocation4], 0 }
  0x5c   :  { %86 = vsyncpa [#allocation4 + $0x1], 0 }
  0x5d   :  { %87 = vsyncpa [#allocation6], 0 }
  0x5e   :  { %89 = vsyncpa [#allocation6 + $0x1], 0 }
  0x5f   :  { %90 = vsyncpa [#allocation9], 0 }
  0x60   :  { %92 = vsyncpa [#allocation9 + $0x1], 0  ;;  %s5995_s22 = smov 0   ;;  %s5997_s23 = smov 0  }
  0x61   :  { %s5999_s26 = smov 0   ;;  %s6001_s28 = smov 0  }
  0x62   :  { %s6003_s1 = smov 0   ;;  %s6005_s2 = smov 0  }
  0x63   :  { %s6007_s0 = smov 0   ;;  %s6009_s7 = smov 0  }
  0x64 LB: > { %s6815_s24 = sld [smem:[#allocation50_spill]]  ;;  %s6816_s20 = sld [smem:[#allocation45_spill]]  ;;  %s5726_s1 = sphi %s6003_s1, %s6955_s1   ;;  %s5722_s28 = sphi %s6001_s28, %s6954_s28   ;;  %s5718_s26 = sphi %s5999_s26, %s6953_s26   ;;  %s5714_s23 = sphi %s5997_s23, %s6952_s23   ;;  %s5710_s22 = sphi %s5995_s22, %s6951_s22   ;;  %s5738_s7 = sphi %s6009_s7, %s98_s7   ;;  %s5734_s0 = sphi %s6007_s0, %s6957_s0   ;;  %s5730_s2 = sphi %s6005_s2, %s6956_s2  }
  0x65   : > { %s6817_s6 = sld [smem:[#allocation52_spill]]  ;;  %s6818_s4 = sld [smem:[#allocation51_spill]] }
  0x66   : > { %s6819_s27 = sld [smem:[#allocation46_spill]]  ;;  %6821 = sst [smem:[#allocation55_spill]] %s5718_s26 }
  0x67   : > { %6820 = sst [smem:[#allocation54_spill]] %s5714_s23  ;;  %s107_s11 = sadd.s32 1, %s5730_s2 }
  0x68   : > { %6822 = sst [smem:[#allocation56_spill]] %s5722_s28  ;;  %p108_p0 = scmp.ge.s32.totalorder %s107_s11, 2 }
  0x69   : > { %6823 = sst [smem:[#allocation57_spill]] %s5730_s2  ;;  %s110_s15 = sadd.s32 1, %s5734_s0 }
  0x6a   : > { %6824 = sst [smem:[#allocation58_spill]] %s5734_s0  ;;  %s923_s16 = sadd.s32 1, %s5718_s26 }
  0x6b   : > { %6825 = sst [smem:[#allocation59_spill]] %s5738_s7  ;;  %p930_p1 = scmp.ne.s32.totalorder %s5718_s26, %s5714_s23 }
  0x6c   : > { %s6959_s11 = smov (%p108_p0, %s107_s11), 0  ;;  %s6961_s15 = smov (!%p108_p0, %s110_s15), %s5734_s0 }
  0x6d   : > { %6826 = sst [smem:[#allocation60_spill]] %s6959_s11  ;;  %s920_s18 = ssub.s32 %s5730_s2, %s6959_s11 }
  0x6e   : > { %p931_p2 = scmp.eq.s32.totalorder %s5738_s7, 0  ;;  %p112_p3 = scmp.ge.s32.totalorder %s6961_s15, 2 }
  0x6f   : > { %p921_p4 = scmp.eq.s32.totalorder %s920_s18, 0  ;;  %p936_p6 = scmp.ne.s32.totalorder %s5714_s23, %s5710_s22 }
  0x70   : > { %p932_p5 = por %p931_p2, %p930_p1  ;;  %s6963_s15 = smov (%p112_p3, %s6961_s15), 0 }
  0x71   : > { %6827 = sst [smem:[#allocation61_spill]] %s6963_s15  ;;  %s6829_s30 = sadd.s32 4294967295, %s5738_s7  }
  0x72   : > { %s6049_s10 = scalar_select %p921_p4, %s5718_s26, %s923_s16  }
  0x73   : > { %p937_p7 = scmp.eq.s32.totalorder %s6829_s30, 0  ;;  %p5215_p8 = scmp.lt.s32.totalorder %s5738_s7, 4 }
  0x74   : > { %6828 = sst [smem:[#allocation62_spill]] %s6049_s10  ;;  %s6055_s12 = sand.u32 1, %s5718_s26  }
  0x75   : > { %p6057_p9 = por %p937_p7, %p936_p6  ;;  %s6062_s18 = sshll.u32 %s5730_s2, 4 }
  0x76   : > { %p6064_p10 = pnand %p5215_p8, %p932_p5  ;;  %s6751_s16 = sand.u32 1, %s5738_s7  }
  0x77   : > { %s6830_s11 = scalar_select %p6057_p9, 1, 0 }
  0x78   : > { %s6831_s22 = scalar_select %p6064_p10, 1, 0 }
  0x79   : > { %s6071_s30 = scalar_lea.hbm %s6819_s27, %s6062_s18  ;;  %s1396_s15 = scalar_lea.vmem [#allocation5], %s6055_s12 }
  0x7a   : > { %s1403_s0 = sshll.u32 %s1396_s15, 4  ;;  %s6080_s2 = scalar_lea.sflag [#allocation6], %s6751_s16  ;;  %s6075_s0 = int_to_ptr.vmem [resolvable:$true] %s1403_s0 }
  0x7b   : > { %s5514_s10 = scalar_lea.hbm %s6071_s30, 16  ;;  %p6086_p0 = pneg %p6064_p10 }
  0x7c   : > { %p5515_p13 = scmp.ne.s32.totalorder %s6071_s30, %s5514_s10  ;;  %s5519_s19 = scalar_lea.hbm %s6819_s27, 32 }
  0x7d   : > { %p5520_p3 = scmp.lt.u32.totalorder %s6071_s30, %s6819_s27  ;;  %p5521_p4 = scmp.lt.u32.totalorder %s5519_s19, %s5514_s10 }
  0x7e   : > { %p5517_p1 = pnand %p6086_p0, %p5515_p13  ;;  %p5523_p6 = scmp.lt.u32.totalorder %s5514_s10, %s6071_s30 }
  0x7f   : > { %p5522_p5 = por %p5521_p4, %p5520_p3 }
  0x80   : > { %p5518_p2 = pneg %p5517_p1 }
  0x81   : > { %p5524_p7 = por %p5523_p6, %p5522_p5 }
  0x83   : > { %p5525_p8 = pnand %p5524_p7, %p5518_p2 }
  0x85   : > { %5528 = shalt.err (!%p5525_p8)
}
  0x86   : > { %s5529_s15 = scalar_lea.vmem %s6075_s0, 16  ;;  %s5779_s16 = smov [#allocation5]  }
  0x87   : > { %p5530_p11 = scmp.ne.s32.totalorder %s6075_s0, %s5529_s15  ;;  %s5534_s14 = sshll.u32 %s5779_s16, 4  ;;  %s5535_s14 = int_to_ptr.vmem [resolvable:$false] %s5534_s14 }
  0x88   : > { %s5536_s8 = scalar_lea.vmem %s5535_s14, 32  ;;  %p5537_p13 = scmp.lt.s32.totalorder %s6075_s0, %s5535_s14 }
  0x89   : > { %p5532_p12 = pnand %p5530_p11, %p6086_p0  ;;  %p5538_p1 = scmp.lt.s32.totalorder %s5536_s8, %s5529_s15 }
  0x8b   : > { %p5533_p9 = pneg %p5532_p12  ;;  %p5539_p3 = por %p5538_p1, %p5537_p13 }
  0x8d   : > { %p5540_p4 = pnand %p5539_p3, %p5533_p9 }
  0x8f   : > { %5543 = shalt.err (!%p5540_p4)
}
  0x90   : > { %5205 = dma.hbm_to_vmem [thread:$0]  (!%p6064_p10), %s6071_s30, 16, %s6075_s0, %s6080_s2  }
  0x91   : > { %p6833_p11 = scmp.lt.s32.totalorder %s5738_s7, 5  ;;  %p6834_p12 = scmp.ge.s32.totalorder %s5738_s7, 1 }
  0x92   : > { %s6116_s14 = scalar_lea.hbm %s6818_s4, %s6062_s18  ;;  %s1453_s19 = scalar_lea.vmem [#allocation8], %s6055_s12 }
  0x93   : > { %p6110_p2 = pnand %p6834_p12, %p6833_p11  ;;  %s1460_s10 = sshll.u32 %s1453_s19, 4  ;;  %s1461_s10 = int_to_ptr.vmem [resolvable:$true] %s1460_s10 }
  0x94   : > { %s6836_s16 = sand.u32 1, %s5738_s7   ;;  %s5544_s27 = scalar_lea.hbm %s6116_s14, 16 }
  0x95   : > { %s6835_s8 = scalar_select %p6110_p2, 1, 0 }
  0x96   : > { %s6121_s15 = scalar_lea.sflag [#allocation9], %s6836_s16  ;;  %p5545_p9 = scmp.ne.s32.totalorder %s6116_s14, %s5544_s27 }
  0x97   : > { %s5549_s0 = scalar_lea.hbm %s6818_s4, 32  ;;  %p5550_p7 = scmp.lt.u32.totalorder %s6116_s14, %s6818_s4 }
  0x98   : > { %p5547_p5 = pnand %p5545_p9, %p6086_p0  ;;  %p5551_p8 = scmp.lt.u32.totalorder %s5549_s0, %s5544_s27 }
  0x99   : > { %p5553_p1 = scmp.lt.u32.totalorder %s5544_s27, %s6116_s14 }
  0x9a   : > { %p5548_p6 = pneg %p5547_p5  ;;  %p5552_p13 = por %p5551_p8, %p5550_p7 }
  0x9c   : > { %p5554_p3 = por %p5553_p1, %p5552_p13 }
  0x9e   : > { %p5555_p4 = pnand %p5554_p3, %p5548_p6 }
  0xa0   : > { %5558 = shalt.err (!%p5555_p4)
}
  0xa1   : > { %s5559_s30 = scalar_lea.vmem %s1461_s10, 16  ;;  %s5780_s19 = smov [#allocation8]  }
  0xa2   : > { %p5560_p11 = scmp.ne.s32.totalorder %s1461_s10, %s5559_s30  ;;  %s5564_s16 = sshll.u32 %s5780_s19, 4  ;;  %s5565_s16 = int_to_ptr.vmem [resolvable:$false] %s5564_s16 }
  0xa3   : > { %s5566_s3 = scalar_lea.vmem %s5565_s16, 32  ;;  %p5567_p9 = scmp.lt.s32.totalorder %s1461_s10, %s5565_s16 }
  0xa4   : > { %p5562_p12 = pnand %p5560_p11, %p6086_p0  ;;  %p5568_p5 = scmp.lt.s32.totalorder %s5566_s3, %s5559_s30 }
  0xa6   : > { %p5563_p2 = pneg %p5562_p12  ;;  %p5569_p10 = por %p5568_p5, %p5567_p9 }
  0xa8   : > { %p5570_p7 = pnand %p5569_p10, %p5563_p2 }
  0xaa   : > { %5573 = shalt.err (!%p5570_p7)
}
  0xab   : > { %p6837_p8 = scmp.ne.s32.totalorder %s6831_s22, 0  ;;  %s6139_s27 = scalar_lea.hbm %s6816_s20, %s6062_s18 }
  0xac   : > { %s1379_s3 = scalar_lea.vmem [#allocation3], %s6055_s12  ;;  %s1377_s30 = scalar_lea.sflag [#allocation4], %s6055_s12 }
  0xad   : > { %5211 = dma.hbm_to_vmem [thread:$0]  (!%p6837_p8), %s6116_s14, 16, %s1461_s10, %s6121_s15  }
  0xae   : > { %s1386_s0 = sshll.u32 %s1379_s3, 4  ;;  %s5574_s19 = scalar_lea.hbm %s6139_s27, 16  ;;  %s1387_s0 = int_to_ptr.vmem [resolvable:$true] %s1386_s0 }
  0xaf   : > { %p5575_p10 = scmp.ne.s32.totalorder %s6139_s27, %s5574_s19  ;;  %s5579_s16 = scalar_lea.hbm %s6816_s20, 32 }
  0xb0   : > { %p5580_p13 = scmp.lt.u32.totalorder %s6139_s27, %s6816_s20  ;;  %p5581_p1 = scmp.lt.u32.totalorder %s5579_s16, %s5574_s19 }
  0xb1   : > { %p5577_p2 = pnand %p5575_p10, %p6086_p0  ;;  %p5583_p4 = scmp.lt.u32.totalorder %s5574_s19, %s6139_s27 }
  0xb2   : > { %p5582_p3 = por %p5581_p1, %p5580_p13 }
  0xb3   : > { %p5578_p6 = pneg %p5577_p2 }
  0xb4   : > { %p5584_p11 = por %p5583_p4, %p5582_p3 }
  0xb6   : > { %p5585_p12 = pnand %p5584_p11, %p5578_p6 }
  0xb8   : > { %5588 = shalt.err (!%p5585_p12)
}
  0xb9   : > { %s5589_s14 = scalar_lea.vmem %s1387_s0, 16  ;;  %s5781_s10 = smov [#allocation3]  }
  0xba   : > { %p5590_p9 = scmp.ne.s32.totalorder %s1387_s0, %s5589_s14  ;;  %s5594_s3 = sshll.u32 %s5781_s10, 4  ;;  %s5595_s3 = int_to_ptr.vmem [resolvable:$false] %s5594_s3 }
  0xbb   : > { %s5596_s4 = scalar_lea.vmem %s5595_s3, 32  ;;  %p5597_p10 = scmp.lt.s32.totalorder %s1387_s0, %s5595_s3 }
  0xbc   : > { %p5592_p5 = pnand %p5590_p9, %p6086_p0  ;;  %p5598_p2 = scmp.lt.s32.totalorder %s5596_s4, %s5589_s14 }
  0xbe   : > { %p5593_p7 = pneg %p5592_p5  ;;  %p5599_p8 = por %p5598_p2, %p5597_p10 }
  0xc0   : > { %p5600_p1 = pnand %p5599_p8, %p5593_p7 }
  0xc2   : > { %5603 = shalt.err (!%p5600_p1)
}
  0xc3   : > { %p6838_p13 = scmp.ne.s32.totalorder %s6831_s22, 0  ;;  %s6158_s19 = scalar_lea.hbm %s6815_s24, %s6062_s18 }
  0xc4   : > { %s1436_s4 = scalar_lea.vmem [#allocation7], %s6055_s12  ;;  %s5604_s14 = scalar_lea.hbm %s6158_s19, 16 }
  0xc5   : > { %5202 = dma.hbm_to_vmem [thread:$0]  (!%p6838_p13), %s6139_s27, 16, %s1387_s0, %s1377_s30  }
  0xc6   : > { %s1443_s16 = sshll.u32 %s1436_s4, 4  ;;  %p5605_p8 = scmp.ne.s32.totalorder %s6158_s19, %s5604_s14  ;;  %s1444_s16 = int_to_ptr.vmem [resolvable:$true] %s1443_s16 }
  0xc7   : > { %s5609_s10 = scalar_lea.hbm %s6815_s24, 32  ;;  %p5610_p4 = scmp.lt.u32.totalorder %s6158_s19, %s6815_s24 }
  0xc8   : > { %p5607_p6 = pnand %p5605_p8, %p6086_p0  ;;  %p5611_p11 = scmp.lt.u32.totalorder %s5609_s10, %s5604_s14 }
  0xc9   : > { %p5613_p9 = scmp.lt.u32.totalorder %s5604_s14, %s6158_s19 }
  0xca   : > { %p5608_p3 = pneg %p5607_p6  ;;  %p5612_p12 = por %p5611_p11, %p5610_p4 }
  0xcc   : > { %p5614_p5 = por %p5613_p9, %p5612_p12 }
  0xce   : > { %p5615_p7 = pnand %p5614_p5, %p5608_p3 }
  0xd0   : > { %5618 = shalt.err (!%p5615_p7)
}
  0xd1   : > { %s5619_s27 = scalar_lea.vmem %s1444_s16, 16  ;;  %s5782_s0 = smov [#allocation7]  }
  0xd2   : > { %p5620_p10 = scmp.ne.s32.totalorder %s1444_s16, %s5619_s27  ;;  %s5624_s30 = sshll.u32 %s5782_s0, 4  ;;  %s5625_s30 = int_to_ptr.vmem [resolvable:$false] %s5624_s30 }
  0xd3   : > { %s5626_s3 = scalar_lea.vmem %s5625_s30, 32  ;;  %p5627_p8 = scmp.lt.s32.totalorder %s1444_s16, %s5625_s30 }
  0xd4   : > { %p5622_p2 = pnand %p5620_p10, %p6086_p0  ;;  %p5628_p6 = scmp.lt.s32.totalorder %s5626_s3, %s5619_s27 }
  0xd6   : > { %p5623_p1 = pneg %p5622_p2  ;;  %p5629_p13 = por %p5628_p6, %p5627_p8 }
  0xd8   : > { %p5630_p4 = pnand %p5629_p13, %p5623_p1 }
  0xda   : > { %5633 = shalt.err (!%p5630_p4)
}
  0xdb   : > { %p6839_p11 = scmp.ne.s32.totalorder %s6831_s22, 0  ;;  %s6177_s4 = scalar_lea.hbm %s6817_s6, %s6062_s18 }
  0xdc   : > { %s1470_s14 = scalar_lea.vmem [#allocation10], %s6055_s12  ;;  %s5634_s27 = scalar_lea.hbm %s6177_s4, 16 }
  0xdd   : > { %5208 = dma.hbm_to_vmem [thread:$0]  (!%p6839_p11), %s6158_s19, 16, %s1444_s16, %s6080_s2  }
  0xde   : > { %s1477_s10 = sshll.u32 %s1470_s14, 4  ;;  %p5635_p13 = scmp.ne.s32.totalorder %s6177_s4, %s5634_s27  ;;  %s1478_s10 = int_to_ptr.vmem [resolvable:$true] %s1477_s10 }
  0xdf   : > { %s5639_s0 = scalar_lea.hbm %s6817_s6, 32  ;;  %p5640_p9 = scmp.lt.u32.totalorder %s6177_s4, %s6817_s6 }
  0xe0   : > { %p5637_p3 = pnand %p5635_p13, %p6086_p0  ;;  %p5641_p5 = scmp.lt.u32.totalorder %s5639_s0, %s5634_s27 }
  0xe1   : > { %p5643_p10 = scmp.lt.u32.totalorder %s5634_s27, %s6177_s4 }
  0xe2   : > { %p5638_p12 = pneg %p5637_p3  ;;  %p5642_p7 = por %p5641_p5, %p5640_p9 }
  0xe4   : > { %p5644_p2 = por %p5643_p10, %p5642_p7 }
  0xe6   : > { %p5645_p1 = pnand %p5644_p2, %p5638_p12 }
  0xe8   : > { %5648 = shalt.err (!%p5645_p1)
}
  0xe9   : > { %s5649_s2 = scalar_lea.vmem %s1478_s10, 16  ;;  %s5783_s12 = smov [#allocation10]  }
  0xea   : > { %p5650_p8 = scmp.ne.s32.totalorder %s1478_s10, %s5649_s2  ;;  %s5654_s18 = sshll.u32 %s5783_s12, 4  ;;  %s5655_s18 = int_to_ptr.vmem [resolvable:$false] %s5654_s18 }
  0xeb   : > { %s5656_s19 = scalar_lea.vmem %s5655_s18, 32  ;;  %p5657_p13 = scmp.lt.s32.totalorder %s1478_s10, %s5655_s18 }
  0xec   : > { %p5652_p6 = pnand %p5650_p8, %p6086_p0  ;;  %p5658_p3 = scmp.lt.s32.totalorder %s5656_s19, %s5649_s2 }
  0xee   : > { %p5653_p4 = pneg %p5652_p6  ;;  %p5659_p11 = por %p5658_p3, %p5657_p13 }
  0xf0   : > { %p5660_p5 = pnand %p5659_p11, %p5653_p4 }
  0xf2   : > { %5663 = shalt.err (!%p5660_p5)
}
  0xf3   : > { %p6840_p9 = scmp.ne.s32.totalorder %s6831_s22, 0  ;;  %p6841_p12 = scmp.ne.s32.totalorder %s6835_s8, 0 }
  0xf5   : > { %5214 = dma.hbm_to_vmem [thread:$0]  (!%p6840_p9), %s6177_s4, 16, %s1478_s10, %s6121_s15  }
  0xf6   : > { %1486 = sbr.rel (%p6841_p12) target bundleno = 5494 (0x1576), region = 176 }
  0xfd   : > { %s6197_s26 = sand.u32 1, %s5714_s23   ;;  %p6843_p0 = scmp.ne.s32.totalorder %s6830_s11, 0 }
  0xfe   : > { %6842 = sst [smem:[#allocation63_spill]] %s6197_s26  ;;  %s1489_s16 = scalar_lea.sflag [#allocation4], %s6197_s26 }
  0xff   : > { %5697 = dma.done.wait (%p6843_p0), %s1489_s16, 16  }
 0x100   : > { %5699 = vsyncadd (%p6843_p0), %s1489_s16, 4294967280  ;;  %s6844_s22 = sadd.s32 4294967295, %s5738_s7  }
 0x101   : > { %s1496_s15 = sand.u32 1, %s6844_s22  }
 0x102   : > { %s1497_s8 = scalar_lea.sflag [#allocation6], %s1496_s15 }
 0x103   : > { %5701 = dma.done.wait (%p6843_p0), %s1497_s8, 32  }
 0x104   : > { %5703 = vsyncadd (%p6843_p0), %s1497_s8, 4294967264  ;;  %s1513_s14 = scalar_lea.sflag [#allocation9], %s1496_s15 }
 0x105   : > { %5705 = dma.done.wait (%p6843_p0), %s1513_s14, 32  }
 0x106   : > { %5707 = vsyncadd (%p6843_p0), %s1513_s14, 4294967264  ;;  %s6850_s25 = sld [smem:[#allocation19_spill]]  ;;  %s6851_s29 = sld [smem:[#allocation20_spill]] }
 0x107   : > { %s6852_s27 = sld [smem:[#allocation21_spill]]  ;;  %p1761_p11 = scmp.lt.s32.totalorder %s5726_s1, 1 }
 0x108   : > { %p1772_p7 = scmp.lt.s32.totalorder %s5722_s28, 1  ;;  %s6859_s16 = sld [smem:[#allocation25_spill]] }
 0x109   : > { %s6965_s1 = smov (!%p1761_p11, %s5726_s1), 1  ;;  %s6860_s15 = sld [smem:[#allocation26_spill]] }
 0x10a   : > { %6856 = sst [smem:[#allocation64_spill]] %s6965_s1  ;;  %s6227_s19 = sshll.u32 %s6965_s1, 3 }
 0x10b   : > { %s6224_s11 = scalar_select %p1772_p7, %s5722_s28, 1 }
 0x10c   : > { %6858 = sst [smem:[#allocation65_spill]] %s6227_s19  ;;  %s6861_s14 = sld [smem:[#allocation27_spill]] }
 0x10d   : > { %s6864_s20 = sld [smem:[#allocation31_spill]]  ;;  %s6240_s24 = sshll.u32 %s6224_s11, 7 }
 0x10e   : > { %s6767_s7 = sshll.u32 %s6224_s11, 1  ;;  %s6245_s1 = scalar_lea.vmem %s6850_s25, %s6240_s24 }
 0x10f   : > { %6867 = sst [smem:[#allocation66_spill]] %s6245_s1  ;;  %s6250_s8 = scalar_lea.vmem %s6851_s29, %s6767_s7 }
 0x110   : > { %6869 = sst [smem:[#allocation67_spill]] %s6250_s8  ;;  %s6254_s9 = scalar_lea.vmem %s6852_s27, %s6240_s24 }
 0x111   : > { %s6870_s3 = sld [smem:[#allocation35_spill]]  ;;  %6871 = sst [smem:[#allocation68_spill]] %s6254_s9 }
 0x112   : > { %s6873_s21 = sld [smem:[#allocation37_spill]]  ;;  %s6874_s5 = sld [smem:[#allocation38_spill]] }
 0x113   : > { %s4869_s26 = sshll.u32 %s6224_s11, 6  ;;  %s6875_s25 = sld [smem:[#allocation39_spill]] }
 0x114   : > { %s6876_s19 = sld [smem:[#allocation40_spill]]  ;;  %s6266_s7 = scalar_lea.vmem %s6859_s16, %s4869_s26 }
 0x115   : > { %6877 = sst [smem:[#allocation69_spill]] %s6266_s7  ;;  %s6878_s29 = sld [smem:[#allocation41_spill]] }
 0x116   : > { %s6269_s27 = scalar_lea.vmem %s6860_s15, %s4869_s26  ;;  %s6880_s8 = sld [smem:[#allocation42_spill]] }
 0x117   : > { %6879 = sst [smem:[#allocation70_spill]] %s6269_s27  ;;  %s6272_s0 = scalar_lea.vmem %s6861_s14, %s4869_s26 }
 0x118   : > { %6881 = sst [smem:[#allocation71_spill]] %s6272_s0  ;;  %s6882_s2 = sld [smem:[#allocation43_spill]] }
 0x119   : > { %s6883_s12 = sld [smem:[#allocation44_spill]]  ;;  %s6884_s13 = sld [smem:[#allocation47_spill]] }
 0x11a   : > { %s6279_s18 = scalar_lea.vmem %s6864_s20, %s4869_s26  ;;  %s6886_s16 = sld [smem:[#allocation48_spill]] }
 0x11b   : > { %6885 = sst [smem:[#allocation72_spill]] %s6279_s18  ;;  %s6887_s7 = sld [smem:[#allocation49_spill]] }
 0x11c   : > { %s6888_s27 = sld [smem:[#allocation65_spill]]  ;;  %s6889_s9 = sld [smem:[#allocation53_spill]] }
 0x11d   : > { %s6890_s0 = sld [smem:[#allocation63_spill]]  ;;  %s6288_s4 = scalar_lea.vmem %s6870_s3, %s4869_s26 }
 0x11e   : > { %6891 = sst [smem:[#allocation73_spill]] %s6288_s4  ;;  %s6293_s28 = scalar_lea.vmem %s6873_s21, %s4869_s26 }
 0x11f   : > { %6892 = sst [smem:[#allocation74_spill]] %s6293_s28  ;;  %s1854_s30 = scalar_lea.vmem %s6874_s5, %s6224_s11 }
 0x120   : > { %s4697_s20 = sshll.u32 %s6224_s11, 3  ;;  %s1861_s1 = scalar_lea.vmem %s6876_s19, %s6224_s11 }
 0x121   : > { %s6299_s18 = scalar_lea.vmem %s6875_s25, %s4697_s20  ;;  %s1864_s23 = scalar_lea.vmem %s6878_s29, %s6224_s11 }
 0x122   : > { %s1867_s15 = scalar_lea.vmem %s6880_s8, %s6224_s11  ;;  %s6308_s22 = scalar_lea.vmem %s6882_s2, %s4869_s26 }
 0x123   : > { %s1875_s10 = scalar_lea.vmem %s6883_s12, %s6224_s11  ;;  %s6314_s14 = scalar_lea.vmem %s6884_s13, %s6240_s24 }
 0x124   : > { %s6893_s3 = sshll.u32 %s6224_s11, 1  ;;  %s6323_s6 = scalar_lea.vmem %s6887_s7, %s6240_s24 }
 0x125   : > { %s6319_s4 = scalar_lea.vmem %s6886_s16, %s6893_s3  ;;  %s1893_s17 = scalar_lea.vmem %s6889_s9, %s6888_s27 }
 0x126   : > { %s1523_s21 = scalar_lea.vmem [#allocation10], %s6890_s0  ;;  %s6894_s28 = sld [smem:[#allocation56_spill]] }
 0x12c   : > { %p4706_p10 = scmp.ne.s32.totalorder %s6894_s28, 0 }
 0x12d   : > { %s6895_s5 = sld [smem:[#allocation14_spill]] (!%p4706_p10)  ;;  %s6896_s25 = sld [smem:[#allocation65_spill]] (!%p4706_p10) }
 0x12e   : > { %1898 = sbr.rel (%p4706_p10) target bundleno = 310 (0x136), region = 200 }
 0x133   : > { %s6897_s19 = scalar_lea.vmem (!%p4706_p10), %s6895_s5, %s6896_s25 }
 0x134   : > { %v1899_v0 = vld [vmem:[%s6897_s19] sm:$0xff] (!%p4706_p10) }
 0x135   : > { %1900 = vst [vmem:[#allocation2] sm:$0xff] %v1899_v0 }
 0x136 PF: > { %s6898_s13 = sld [smem:[#allocation66_spill]]  ;;  %v5784_v17 = vmov 0   ;;  %s6899_s9 = sld [smem:[#allocation17_spill]]  ;;  %v1951_v49 = vlaneseq  ;;  %vm5786_vm0 = vmmov 0   ;;  %vm2644_vm1 = vcmask 261120  }
 0x137   : > { %2073 = vmatprep.mubr.bf16.mxu0 %v5784_v17  ;;  %5325 = vset.pattern.permute.xlu0 %v5784_v17  ;;  %s6900_s29 = sld [smem:[#allocation18_spill]]  ;;  %s6901_s24 = sld [smem:[#allocation68_spill]]  ;;  %vm2709_vm2 = vcmask 1043456   ;;  %vm2691_vm3 = vcmask 64512   ;;  %vm3102_vm4 = vcmask 523264   ;;  %vm3104_vm5 = vcmask 785408  }
 0x138   : > { %s6904_s26 = sld [smem:[#allocation67_spill]]  ;;  %v6376_v50 = vshrl.u32 %v1951_v49, 7  ;;  %s6905_s8 = sld [smem:[#allocation22_spill]] }
 0x139   : > { %s6906_s27 = sld [smem:[#allocation69_spill]]  ;;  %s6907_s0 = sld [smem:[#allocation70_spill]] }
 0x13a   : > { %v6379_v51 = vsub.s32 0, %v6376_v50  ;;  %v6383_v53 = vsub.s32 1, %v6376_v50  ;;  %s6909_s12 = sld [smem:[#allocation23_spill]]  ;;  %s6910_s16 = sld [smem:[#allocation24_spill]]  ;;  %vm3485_vm6 = vcmp.lt.s32.totalorder %v6376_v50, 6 }
 0x13b   : > { %s6911_s20 = sld [smem:[#allocation71_spill]]  ;;  %s6914_s25 = sld [smem:[#allocation29_spill]] }
 0x13c   : > { %v6332_v1 = vld [vmem:[#allocation2] sm:$0xff]  ;;  %v5329_v4 = vld [vmem:[%s6898_s13 + $0x14] ss:$8 sps:$4 sm:$0xff]   ;;  %v5331_v5 = vld [vmem:[%s6898_s13 + $0x10] ss:$8 sps:$4 sm:$0xff]   ;;  %s6902_s28 = scalar_lea.vmem %s6899_s9, %s6224_s11  ;;  %s6915_s19 = sld [smem:[#allocation28_spill]] }
 0x13d   : > { %1906 = vadd.xlane.f32.xlu0 %v6332_v1  ;;  %v5326_v2 = vld [vmem:[%s6898_s13 + $0x4] ss:$8 sps:$4 sm:$0xff]   ;;  %v5328_v3 = vld [vmem:[%s6898_s13] ss:$8 sps:$4 sm:$0xff]   ;;  %v5335_v12 = vld [vmem:[%s6898_s13 + $0x34] ss:$8 sps:$4 sm:$0xff]   ;;  %s6903_s7 = scalar_lea.vmem %s6900_s29, %s6224_s11 }
 0x13e   : > { %2041 = vmatprep.subr.bf16.mxu0 %v5326_v2  ;;  %v5332_v6 = vld [vmem:[%s6898_s13 + $0x24] ss:$8 sps:$4 sm:$0xff]   ;;  %v5334_v11 = vld [vmem:[%s6898_s13 + $0x20] ss:$8 sps:$4 sm:$0xff]   ;;  %v5337_v13 = vld [vmem:[%s6898_s13 + $0x30] ss:$8 sps:$4 sm:$0xff]   ;;  %s6908_s2 = scalar_lea.vmem %s6905_s8, %s6224_s11 }
 0x13f   : > { %2042 = vmatpush1.bf16.msra.mxu0 %v5328_v3  ;;  %v5338_v14 = vld [vmem:[%s6898_s13 + $0x44] ss:$8 sps:$4 sm:$0xff]   ;;  %v5340_v15 = vld [vmem:[%s6898_s13 + $0x40] ss:$8 sps:$4 sm:$0xff]   ;;  %v5341_v16 = vld [vmem:[%s6898_s13 + $0x54] ss:$8 sps:$4 sm:$0xff]  }
 0x140   : > { %2043 = vmatprep.subr.bf16.mxu0 %v5329_v4  ;;  %v5343_v18 = vld [vmem:[%s6898_s13 + $0x50] ss:$8 sps:$4 sm:$0xff]   ;;  %v5344_v19 = vld [vmem:[%s6898_s13 + $0x64] ss:$8 sps:$4 sm:$0xff]   ;;  %v5346_v20 = vld [vmem:[%s6898_s13 + $0x60] ss:$8 sps:$4 sm:$0xff]   ;;  %s6912_s3 = scalar_lea.vmem %s6909_s12, %s6224_s11  ;;  %s6913_s5 = scalar_lea.vmem %s6910_s16, %s6224_s11 }
 0x141   : > { %v5347_v21 = vld [vmem:[%s6898_s13 + $0x74] ss:$8 sps:$4 sm:$0xff]   ;;  %v5349_v22 = vld [vmem:[%s6898_s13 + $0x70] ss:$8 sps:$4 sm:$0xff]   ;;  %v4707_v27 = vld [vmem:[%s6902_s28] ss:$0 sm:$0xff]  ;;  %s6916_s13 = scalar_lea.vmem %s6914_s25, %s6224_s11 }
 0x142   : > { %v4708_v29 = vld [vmem:[%s6903_s7] ss:$0 sm:$0xff]  ;;  %v5352_v35 = vld [vmem:[%s6901_s24 + $0x48] sm:$0xff]   ;;  %v5354_v37 = vld [vmem:[%s6901_s24 + $0x50] sm:$0xff]   ;;  %s6917_s9 = sld [smem:[#allocation30_spill]]  ;;  %s6918_s29 = scalar_lea.vmem %s6915_s19, %s6224_s11 }
 0x143   : > { %2044 = vmatpush1.bf16.msra.mxu0 %v5331_v5  ;;  %v5350_v33 = vld [vmem:[%s6901_s24 + $0x40] sm:$0xff]   ;;  %v5353_v36 = vld [vmem:[%s6901_s24 + $0x8] sm:$0xff]   ;;  %v5355_v38 = vld [vmem:[%s6901_s24 + $0x10] sm:$0xff]   ;;  %s6920_s28 = sld [smem:[#allocation64_spill]]  ;;  %s5787_s8 = smov 96  }
 0x144   : > { %2045 = vmatprep.subr.bf16.mxu0 %v5332_v6  ;;  %v5351_v34 = vld [vmem:[%s6901_s24] sm:$0xff]   ;;  %4878 = vmatprep.subr.bf16.mxu1 %v5350_v33  ;;  %v5356_v39 = vld [vmem:[%s6901_s24 + $0x58] sm:$0xff]   ;;  %v5360_v43 = vld [vmem:[%s6901_s24 + $0x68] sm:$0xff]   ;;  %s6924_s12 = sld [smem:[#allocation15_spill]]  ;;  %s6925_s16 = sld [smem:[#allocation65_spill]] }
 0x145   : > { %4879 = vmatpush3.bf16.msra.mxu1 %v5351_v34  ;;  %v5357_v40 = vld [vmem:[%s6901_s24 + $0x18] sm:$0xff]   ;;  %v5358_v41 = vld [vmem:[%s6901_s24 + $0x60] sm:$0xff]   ;;  %v5361_v44 = vld [vmem:[%s6901_s24 + $0x28] sm:$0xff]   ;;  %s6929_s25 = sld [smem:[#allocation74_spill]] }
 0x146   : > { %4880 = vmatprep.subr.bf16.mxu1 %v5352_v35  ;;  %v5359_v42 = vld [vmem:[%s6901_s24 + $0x20] sm:$0xff]   ;;  %v5362_v45 = vld [vmem:[%s6901_s24 + $0x70] sm:$0xff]   ;;  %v5364_v47 = vld [vmem:[%s6901_s24 + $0x78] sm:$0xff]  }
 0x147   : > { %2046 = vmatpush1.bf16.msra.mxu0 %v5334_v11  ;;  %v5363_v46 = vld [vmem:[%s6901_s24 + $0x30] sm:$0xff]   ;;  %v5365_v48 = vld [vmem:[%s6901_s24 + $0x38] sm:$0xff]   ;;  %v1949_v52 = vld [vmem:[%s6904_s26] sm:$0x3]  ;;  %s6919_s24 = sld [smem:[#allocation16_spill]] }
 0x148   : > { %2047 = vmatprep.subr.bf16.mxu0 %v5335_v12  ;;  %v1954_v54 = vrot.slane %v1949_v52, %v6379_v51  ;;  %v1958_v55 = vrot.slane %v1949_v52, %v6383_v53  ;;  %v4727_v12 = vld [vmem:[%s6908_s2] ss:$0 sm:$0xff]  ;;  %v5376_v35 = vld [vmem:[%s6906_s27 + $0x28] sm:$0xff]   ;;  %s6921_s7 = scalar_lea.vmem %s6917_s9, %s6224_s11  ;;  %s6923_s2 = sld [smem:[#allocation72_spill]] }
 0x149   : > { %4881 = vmatpush3.bf16.msra.mxu1 %v5353_v36  ;;  %v5374_v33 = vld [vmem:[%s6906_s27 + $0x20] sm:$0xff]   ;;  %v5377_v36 = vld [vmem:[%s6907_s0 + $0x28] sm:$0xff]   ;;  %s6932_s9 = sld [smem:[#allocation34_spill]] }
 0x14a   : > { %4882 = vmatprep.subr.bf16.mxu1 %v5354_v37  ;;  %v5375_v34 = vld [vmem:[%s6907_s0 + $0x20] sm:$0xff]   ;;  %v5378_v37 = vld [vmem:[%s6906_s27 + $0x30] sm:$0xff]  }
 0x14b   : > { %2048 = vmatpush1.bf16.msra.mxu0 %v5337_v13  ;;  %v5382_v52 = vld [vmem:[%s6911_s20] sm:$0xff]  }
 0x14c   : > { %2049 = vmatprep.subr.bf16.mxu0 %v5338_v14 }
 0x14d   : > { %4883 = vmatpush3.bf16.msra.mxu1 %v5355_v38  ;;  %v5379_v38 = vld [vmem:[%s6907_s0 + $0x30] sm:$0xff]   ;;  %s6922_s26 = scalar_lea.vmem %s6919_s24, %s6920_s28 }
 0x14e   : > { %4884 = vmatprep.subr.bf16.mxu1 %v5356_v39  ;;  %v5380_v39 = vld [vmem:[%s6906_s27 + $0x38] sm:$0xff]  }
 0x14f   : > { %2050 = vmatpush1.bf16.msra.mxu0 %v5340_v15  ;;  %s6935_s28 = scalar_lea.vmem %s6932_s9, %s6224_s11 }
 0x150   : > { %2051 = vmatprep.subr.bf16.mxu0 %v5341_v16 }
 0x151   : > { %4885 = vmatpush3.bf16.msra.mxu1 %v5357_v40  ;;  %v5381_v40 = vld [vmem:[%s6907_s0 + $0x38] sm:$0xff]  }
 0x152   : > { %4886 = vmatprep.subr.bf16.mxu1 %v5358_v41 }
 0x153   : > { %2052 = vmatpush1.bf16.msra.mxu0 %v5343_v18 }
 0x154   : > { %2053 = vmatprep.subr.bf16.mxu0 %v5344_v19 }
 0x155   : > { %4887 = vmatpush3.bf16.msra.mxu1 %v5359_v42 }
 0x156   : > { %4888 = vmatprep.subr.bf16.mxu1 %v5360_v43 }
 0x157   : > { %2054 = vmatpush1.bf16.msra.mxu0 %v5346_v20 }
 0x158   : > { %2055 = vmatprep.subr.bf16.mxu0 %v5347_v21  ;;  %v5366_v21 = vld [vmem:[%s6906_s27] sm:$0xff]  }
 0x159   : > { %4889 = vmatpush3.bf16.msra.mxu1 %v5361_v44 }
 0x15a   : > { %4890 = vmatprep.subr.bf16.mxu1 %v5362_v45  ;;  %v4744_v45 = vld [vmem:[%s6912_s3] ss:$0 sm:$0xff]  ;;  %s6927_s3 = sld [smem:[#allocation32_spill]] }
 0x15b   : > { %2056 = vmatpush1.bf16.msra.mxu0 %v5349_v22  ;;  %v5367_v22 = vld [vmem:[%s6907_s0] sm:$0xff]  }
 0x15d   : > { %4891 = vmatpush3.bf16.msra.mxu1 %v5363_v46 }
 0x15e   : > { %4892 = vmatprep.subr.bf16.mxu1 %v5364_v47  ;;  %v4745_v47 = vld [vmem:[%s6913_s5] ss:$0 sm:$0xff]  ;;  %s6928_s5 = sld [smem:[#allocation73_spill]] }
 0x160   : > { %s6930_s19 = scalar_lea.vmem %s6927_s3, %s6224_s11 }
 0x161   : > { %4893 = vmatpush3.bf16.msra.mxu1 %v5365_v48 }
 0x1ca   : > { %v1907_v7 = vpop.xlane.xlu0 %1906 }
 0x1cb   : > { %v1909_v8 = vmul.f32 0.0078125, %v1907_v7 }
 0x1cd   : > { %v1910_v9 = vsub.f32 %v6332_v1, %v1909_v8 }
 0x1cf   : > { %v1911_v10 = vmul.f32 %v1910_v9, %v1910_v9 }
 0x1d1   : > { %1912 = vadd.xlane.f32.xlu0 %v1911_v10 }
 0x25e   : > { %v1913_v23 = vpop.xlane.xlu0 %1912 }
 0x25f   : > { %v1914_v24 = vmul.f32 0.0078125, %v1913_v23  ;;  %v5785_v23 = vmov 0.0  }
 0x260   : > { %5001 = vmatprep.subr.bf16.mxu0 %v5785_v23  ;;  %5021 = vmatprep.subr.bf16.mxu1 %v5785_v23 }
 0x261   : > { %v1915_v25 = vadd.f32 1e-05, %v1914_v24  ;;  %v5368_v24 = vld [vmem:[%s6906_s27 + $0x8] sm:$0xff]  }
 0x263   : > { %5462 = vrsqrt.f32 %v1915_v25  ;;  %v5369_v25 = vld [vmem:[%s6907_s0 + $0x8] sm:$0xff]  }
 0x26d   : > { %v5463_v26 = vpop.eup %5462 }
 0x26e   : > { %v1917_v28 = vmul.f32 %v5463_v26, %v1910_v9 }
 0x270   : > { %v1924_v30 = vmul.f32 %v4707_v27, %v1917_v28 }
 0x272   : > { %v1931_v31 = vadd.f32 %v4708_v29, %v1924_v30  ;;  %v5371_v30 = vld [vmem:[%s6907_s0 + $0x10] sm:$0xff]  }
 0x274   : > { %v1932_v32 = vpack.c.bf16 %v1931_v31, %v1931_v31  ;;  %v5372_v31 = vld [vmem:[%s6906_s27 + $0x18] sm:$0xff]  }
 0x276   : > { %2074 = vmatmul.mubr.bf16.vlgmr.msra.gmra.mrb[0].mxu0 %v1932_v32  ;;  %v5373_v32 = vld [vmem:[%s6907_s0 + $0x18] sm:$0xff]   ;;  %s5789_s0 = smov 64  }
 0x277   : > { %5002 = vmatpush3.bf16.msra.mxu0 %v5366_v21  ;;  %5017 = vmatprep.mubr.msk.bf16.mxu0 %vm5786_vm0, %v5785_v23 }
 0x278   : > { %5003 = vmatprep.subr.bf16.mxu0 %v5785_v23 }
 0x27b   : > { %5004 = vmatpush3.bf16.msra.mxu0 %v5368_v24 }
 0x27c   : > { %5005 = vmatprep.subr.bf16.mxu0 %v5785_v23 }
 0x349   : > { %v2075_v56 = vpop.f32.mrb[0].mxu0 }
 0x34a   : > { %v2076_v57 = vadd.f32 %v2075_v56, %v1954_v54  ;;  %v2077_v58 = vpop.f32.mrb[1].mxu0  ;;  %v5384_v56 = vld [vmem:[%s6911_s20 + $0x10] sm:$0xff]  }
 0x34b   : > { %v2078_v59 = vadd.f32 %v2077_v58, %v1958_v55  ;;  %v2079_v60 = vpop.f32.mrb[2].mxu0  ;;  %v5383_v55 = vld [vmem:[%s6911_s20 + $0x8] sm:$0xff]   ;;  %v5386_v58 = vld [vmem:[%s6911_s20 + $0x20] sm:$0xff]  }
 0x34c   : > { %v4725_v61 = vmul.f32 -1.442695, %v2076_v57  ;;  %v2080_v62 = vpop.f32.mrb[3].mxu0  ;;  %v5388_v60 = vld [vmem:[%s6911_s20 + $0x30] sm:$0xff]  }
 0x34d   : > { %v4726_v63 = vmul.f32 -1.442695, %v2078_v59  ;;  %v4755_v62 = vld [vmem:[%s6916_s13] ss:$0 sm:$0xff]  ;;  %s6931_s13 = sld [smem:[#allocation33_spill]] }
 0x34e   : > { %5464 = vpow2.f32 %v4725_v61  ;;  %v5389_v61 = vld [vmem:[%s6911_s20 + $0x38] sm:$0xff]  }
 0x34f   : > { %5466 = vpow2.f32 %v4726_v63 }
 0x353   : > { %s6934_s24 = scalar_lea.vmem %s6931_s13, %s6224_s11 }
 0x358   : > { %v5465_v0 = vpop.eup %5464 }
 0x359   : > { %v5467_v2 = vpop.eup %5466  ;;  %v2088_v3 = vadd.f32 1.0, %v5465_v0 }
 0x35a   : > { %v2089_v4 = vadd.f32 1.0, %v5467_v2 }
 0x35b   : > { %5468 = vrcp.f32 %v2088_v3 }
 0x35c   : > { %5470 = vrcp.f32 %v2089_v4 }
 0x365   : > { %v5469_v5 = vpop.eup %5468 }
 0x366   : > { %v5471_v6 = vpop.eup %5470  ;;  %v2094_v7 = vmul.f32 %v5469_v5, %v2076_v57  ;;  %v5385_v57 = vld [vmem:[%s6911_s20 + $0x18] sm:$0xff]  }
 0x367   : > { %v2095_v8 = vmul.f32 %v5471_v6, %v2078_v59  ;;  %v5387_v59 = vld [vmem:[%s6911_s20 + $0x28] sm:$0xff]   ;;  %s6926_s20 = scalar_lea.vmem %s6924_s12, %s6925_s16 }
 0x368   : > { %v2096_v10 = vpack.c.bf16 %v2094_v7, %v2094_v7 }
 0x369   : > { %v2097_v9 = vpack.c.bf16 %v2095_v8, %v2095_v8 }
 0x36b   : > { %2265 = vmatprep.mubr.bf16.mxu1 %v2097_v9 }
 0x36c   : > { %2266 = vmatmul.mubr.bf16.vlgmr.msra.gmra.mrb[0].mxu1 %v2096_v10  ;;  %v4746_v10 = vld [vmem:[%s6918_s29] ss:$0 sm:$0xff] }
 0x36d   : > { %5022 = vmatpush3.bf16.msra.mxu1 %v5367_v22  ;;  %5037 = vmatprep.mubr.msk.bf16.mxu1 %vm5786_vm0, %v5785_v23 }
 0x36e   : > { %5023 = vmatprep.subr.bf16.mxu1 %v5785_v23 }
 0x371   : > { %5024 = vmatpush3.bf16.msra.mxu1 %v5369_v25  ;;  %v6483_v25 = vld [vmem:[%s6922_s26] ss:$0 sm:$0xff] }
 0x372   : > { %5025 = vmatprep.subr.bf16.mxu1 %v5785_v23 }
 0x375   : > { %5026 = vmatpush3.bf16.msra.mxu1 %v5371_v30 }
 0x376   : > { %5027 = vmatprep.subr.bf16.mxu1 %v5785_v23 }
 0x379   : > { %5028 = vmatpush3.bf16.msra.mxu1 %v5373_v32 }
 0x37a   : > { %5029 = vmatprep.subr.bf16.mxu1 %v5785_v23 }
 0x37d   : > { %5030 = vmatpush3.bf16.msra.mxu1 %v5375_v34 }
 0x37e   : > { %5031 = vmatprep.subr.bf16.mxu1 %v5785_v23 }
 0x381   : > { %5032 = vmatpush3.bf16.msra.mxu1 %v5377_v36 }
 0x382   : > { %5033 = vmatprep.subr.bf16.mxu1 %v5785_v23 }
 0x385   : > { %5034 = vmatpush3.bf16.msra.mxu1 %v5379_v38 }
 0x386   : > { %5035 = vmatprep.subr.bf16.mxu1 %v5785_v23 }
 0x389   : > { %5036 = vmatpush3.bf16.msra.mxu1 %v5381_v40 }
 0x38a   : > { %5061 = vmatprep.subr.bf16.mxu1 %v5785_v23 }
 0x43f   : > { %v4894_v11 = vpop.f32.mrb[0].mxu1 }
 0x440   : > { %v4895_v13 = vpop.f32.mrb[1].mxu1 }
 0x441   : > { %v4896_v14 = vadd.f32 %v4895_v13, %v4894_v11  ;;  %v4897_v15 = vpop.f32.mrb[2].mxu1 }
 0x442   : > { %v4898_v16 = vpop.f32.mrb[3].mxu1 }
 0x443   : > { %v2268_v18 = vadd.f32 %v4896_v14, %v4727_v12  ;;  %v4764_v14 = vld [vmem:[%s6921_s7] ss:$0 sm:$0xff]  ;;  %s6936_s7 = sld [smem:[#allocation36_spill]] }
 0x445   : > { %v2273_v19 = vmul.f32 0.5, %v2268_v18 }
 0x447   : > { %v6391_v20 = vadd.f32 %v2273_v19, %v6332_v1  ;;  %v5370_v1 = vld [vmem:[%s6906_s27 + $0x10] sm:$0xff]   ;;  %s5788_s27 = smov 32  }
 0x448   : > { %5006 = vmatpush3.bf16.msra.mxu0 %v5370_v1 }
 0x449   : > { %2277 = vadd.xlane.f32.xlu1 %v6391_v20  ;;  %5007 = vmatprep.subr.bf16.mxu0 %v5785_v23  ;;  %s6937_s26 = scalar_lea.vmem %s6936_s7, %s6224_s11  ;;  %s6942_s11 = sld [smem:[#allocation63_spill]] }
 0x44c   : > { %5008 = vmatpush3.bf16.msra.mxu0 %v5372_v31 }
 0x44d   : > { %5009 = vmatprep.subr.bf16.mxu0 %v5785_v23 }
 0x450   : > { %5010 = vmatpush3.bf16.msra.mxu0 %v5374_v33 }
 0x451   : > { %5011 = vmatprep.subr.bf16.mxu0 %v5785_v23 }
 0x454   : > { %5012 = vmatpush3.bf16.msra.mxu0 %v5376_v35 }
 0x455   : > { %5013 = vmatprep.subr.bf16.mxu0 %v5785_v23 }
 0x458   : > { %5014 = vmatpush3.bf16.msra.mxu0 %v5378_v37 }
 0x459   : > { %5015 = vmatprep.subr.bf16.mxu0 %v5785_v23 }
 0x45c   : > { %5016 = vmatpush3.bf16.msra.mxu0 %v5380_v39 }
 0x45d   : > { %5041 = vmatprep.subr.bf16.mxu0 %v5785_v23 }
 0x4d6   : > { %v2278_v26 = vpop.xlane.xlu1 %2277 }
 0x4d7   : > { %v2279_v27 = vmul.f32 0.0078125, %v2278_v26 }
 0x4d9   : > { %v2280_v28 = vsub.f32 %v6391_v20, %v2279_v27 }
 0x4db   : > { %v2281_v29 = vmul.f32 %v2280_v28, %v2280_v28 }
 0x4dd   : > { %2282 = vadd.xlane.f32.xlu1 %v2281_v29 }
 0x56a   : > { %v2283_v41 = vpop.xlane.xlu1 %2282 }
 0x56b   : > { %v2284_v42 = vmul.f32 0.0078125, %v2283_v41 }
 0x56d   : > { %v2285_v43 = vadd.f32 1e-05, %v2284_v42 }
 0x56f   : > { %5472 = vrsqrt.f32 %v2285_v43 }
 0x579   : > { %v5473_v44 = vpop.eup %5472 }
 0x57a   : > { %v2287_v46 = vmul.f32 %v5473_v44, %v2280_v28 }
 0x57c   : > { %v2294_v48 = vmul.f32 %v4744_v45, %v2287_v46 }
 0x57e   : > { %v2301_v49 = vadd.f32 %v4745_v47, %v2294_v48 }
 0x580   : > { %v2302_v54 = vpack.c.bf16 %v2301_v49, %v2301_v49 }
 0x582   : > { %5018 = vmatmul.mubr.bf16.vlgmr.msra.gmra.mrb[4].mxu0 %v2302_v54  ;;  %5038 = vmatmul.mubr.bf16.vlgmr.msra.gmra.mrb[4].mxu1 %v2302_v54 }
 0x583   : > { %5042 = vmatpush3.bf16.msra.mxu0 %v5382_v52  ;;  %5057 = vmatprep.mubr.msk.bf16.mxu0 %vm5786_vm0, %v5785_v23 }
 0x584   : > { %5043 = vmatprep.subr.bf16.mxu0 %v5785_v23  ;;  %5063 = vmatprep.mubr.msk.bf16.mxu1 %vm5786_vm0, %v5785_v23 }
 0x587   : > { %5044 = vmatpush3.bf16.msra.mxu0 %v5383_v55 }
 0x588   : > { %5045 = vmatprep.subr.bf16.mxu0 %v5785_v23 }
 0x58b   : > { %5046 = vmatpush3.bf16.msra.mxu0 %v5384_v56 }
 0x58c   : > { %5047 = vmatprep.subr.bf16.mxu0 %v5785_v23 }
 0x58f   : > { %5048 = vmatpush3.bf16.msra.mxu0 %v5385_v57 }
 0x590   : > { %5049 = vmatprep.subr.bf16.mxu0 %v5785_v23 }
 0x593   : > { %5050 = vmatpush3.bf16.msra.mxu0 %v5386_v58 }
 0x594   : > { %5051 = vmatprep.subr.bf16.mxu0 %v5785_v23 }
 0x597   : > { %5052 = vmatpush3.bf16.msra.mxu0 %v5387_v59 }
 0x598   : > { %5053 = vmatprep.subr.bf16.mxu0 %v5785_v23 }
 0x59b   : > { %5054 = vmatpush3.bf16.msra.mxu0 %v5388_v60 }
 0x59c   : > { %5055 = vmatprep.subr.bf16.mxu0 %v5785_v23 }
 0x59f   : > { %5056 = vmatpush3.bf16.msra.mxu0 %v5389_v61 }
 0x5a0   : > { %5085 = vmatprep.subr.bf16.mxu0 %v5785_v23 }
 0x5a2   : > { %5058 = vmatmul.mubr.bf16.vlgmr.msra.gmra.mrb[8].mxu0 %v2302_v54 }
 0x5a3   : > { %5087 = vmatprep.mubr.msk.bf16.mxu0 %vm5786_vm0, %v5785_v23 }
 0x655   : > { %v2408_v63 = vpop.f32.mrb[4].mxu0  ;;  %v2519_v0 = vpop.f32.mrb[4].mxu1 }
 0x656   : > { %v2520_v2 = vadd.f32 %v4755_v62, %v2519_v0  ;;  %v5019_v3 = vpop.f32.mrb[5].mxu0  ;;  %v5039_v4 = vpop.f32.mrb[5].mxu1  ;;  %v2409_v12 = vadd.f32 %v4746_v10, %v2408_v63 }
 0x657   : > { %v2411_v5 = vpop.f32.mrb[6].mxu0  ;;  %v2522_v6 = vpop.f32.mrb[6].mxu1 }
 0x658   : > { %v2637_v7 = vpack.c.bf16 %v2520_v2, %v2520_v2  ;;  %v5020_v8 = vpop.f32.mrb[7].mxu0  ;;  %v5040_v9 = vpop.f32.mrb[7].mxu1  ;;  %v2636_v13 = vpack.c.bf16 %v2409_v12, %v2409_v12 }
 0x65a   : > { %v2649_v11 = vsel %vm2644_vm1, %v2637_v7, 0 }
 0x65b   : > { %5062 = vmatpush3.bf16.xpose.msra.mxu1 %v2649_v11 }
 0x65c   : > { %5067 = vmatprep.subr.bf16.mxu1 %v5785_v23 }
 0x662   : > { %5064 = vmatmul.mubr.msk.bf16.vlgmr.msra.gmra.mrb[8].mxu1 %vm2644_vm1, %v2636_v13 }
 0x663   : > { %5069 = vmatprep.mubr.msk.bf16.mxu1 %vm5786_vm0, %v5785_v23 }
 0x675   : > { %v2630_v15 = vpop.f32.mrb[8].mxu0 }
 0x676   : > { %v2631_v16 = vadd.f32 %v4764_v14, %v2630_v15  ;;  %v5059_v18 = vpop.f32.mrb[9].mxu0 }
 0x677   : > { %v2633_v19 = vpop.f32.mrb[10].mxu0 }
 0x678   : > { %v6475_v21 = vpack.c.bf16 %v2631_v16, %v2631_v16  ;;  %v5060_v22 = vpop.f32.mrb[11].mxu0 }
 0x67a   : > { %v2711_v24 = vsel %vm2709_vm2, %v6475_v21, 0 }
 0x67b   : > { %5068 = vmatpush3.bf16.msra.mxu1 %v2711_v24 }
 0x67c   : > { %5073 = vmatprep.subr.bf16.mxu1 %v5785_v23 }
 0x735   : > { %v2685_v1 = vpop.f32.mrb[8].mxu1 }
 0x736   : > { %v2686_v26 = vadd.f32 %v6483_v25, %v2685_v1  ;;  %v5065_v27 = vpop.f32.mrb[9].mxu1 }
 0x737   : > { %v2688_v28 = vpop.f32.mrb[10].mxu1 }
 0x738   : > { %v5066_v29 = vpop.f32.mrb[11].mxu1  ;;  %v2692_v30 = vsel %vm2691_vm3, %v2686_v26, -inf }
 0x739   : > { %2693 = vmax.xlane.f32.xlu0 %v2692_v30 }
 0x74f   : > { %2757 = vrot.lane.b32.xlu0 %v2637_v7, %s5787_s8 }
 0x753   : > { %2980 = vrot.lane.b32.xlu0 %v2637_v7, %s5788_s27 }
 0x7c6   : > { %v2694_v31 = vpop.xlane.xlu0 %2693 }
 0x7c7   : > { %v2695_v32 = vsub.f32 %v2686_v26, %v2694_v31 }
 0x7c9   : > { %v2696_v33 = vmul.f32 1.442695, %v2695_v32 }
 0x7ca   : > { %v2758_v39 = vpop.permute.xlu0 %2757 }
 0x7cb   : > { %5474 = vpow2.f32 %v2696_v33  ;;  %v2763_v48 = vsel %vm2644_vm1, %v2758_v39, 0 }
 0x7ce   : > { %v2981_v43 = vpop.permute.xlu0 %2980 }
 0x7cf   : > { %v2986_v47 = vsel %vm2644_vm1, %v2981_v43, 0 }
 0x7d5   : > { %v5475_v34 = vpop.eup %5474 }
 0x7d6   : > { %v2698_v35 = vsel %vm2691_vm3, %v5475_v34, 0.0 }
 0x7d7   : > { %2699 = vadd.xlane.f32.xlu1 %v2698_v35 }
 0x7e8   : > { %2754 = vrot.lane.b32.xlu1 %v2636_v13, %s5787_s8 }
 0x7ec   : > { %2869 = vrot.lane.b32.xlu1 %v2637_v7, %s5789_s0 }
 0x7f0   : > { %2867 = vrot.lane.b32.xlu1 %v2636_v13, %s5789_s0 }
 0x7f4   : > { %2978 = vrot.lane.b32.xlu1 %v2636_v13, %s5788_s27 }
 0x864   : > { %v2700_v36 = vpop.xlane.xlu1 %2699 }
 0x865   : > { %v2701_v37 = vmax.f32 %v2700_v36, 1e-30 }
 0x867   : > { %5476 = vrcp.f32 %v2701_v37 }
 0x868   : > { %v2755_v38 = vpop.permute.xlu1 %2754 }
 0x86c   : > { %v2870_v40 = vpop.permute.xlu1 %2869 }
 0x86d   : > { %v2875_v41 = vsel %vm2644_vm1, %v2870_v40, 0 }
 0x86e   : > { %5086 = vmatpush3.bf16.xpose.msra.mxu0 %v2875_v41 }
 0x86f   : > { %5097 = vmatprep.subr.bf16.mxu0 %v5785_v23 }
 0x870   : > { %v2868_v45 = vpop.permute.xlu1 %2867 }
 0x871   : > { %v5477_v42 = vpop.eup %5476 }
 0x872   : > { %v2703_v44 = vmul.f32 %v5477_v42, %v5475_v34 }
 0x874   : > { %v2704_v46 = vpack.c.bf16 %v2703_v44, %v2703_v44  ;;  %v2979_v49 = vpop.permute.xlu1 %2978 }
 0x875   : > { %5088 = vmatmul.mubr.msk.bf16.vlgmr.msra.gmra.mrb[12].mxu0 %vm2644_vm1, %v2868_v45 }
 0x876   : > { %5070 = vmatmul.mubr.msk.bf16.vlgmr.msra.gmra.mrb[12].mxu1 %vm2691_vm3, %v2704_v46  ;;  %5098 = vmatpush3.bf16.xpose.msra.mxu0 %v2986_v47 }
 0x877   : > { %5074 = vmatpush3.bf16.xpose.msra.mxu1 %v2763_v48  ;;  %5099 = vmatprep.mubr.msk.bf16.mxu0 %vm5786_vm0, %v5785_v23 }
 0x878   : > { %5075 = vmatprep.mubr.msk.bf16.mxu1 %vm5786_vm0, %v5785_v23  ;;  %5079 = vmatprep.subr.bf16.mxu1 %v5785_v23 }
 0x879   : > { %5109 = vmatprep.subr.bf16.mxu0 %v5785_v23 }
 0x87d   : > { %5100 = vmatmul.mubr.msk.bf16.vlgmr.msra.gmra.mrb[16].mxu0 %vm2644_vm1, %v2979_v49 }
 0x87e   : > { %5076 = vmatmul.mubr.msk.bf16.vlgmr.msra.gmra.mrb[16].mxu1 %vm2644_vm1, %v2755_v38  ;;  %5125 = vmatprep.mubr.msk.bf16.mxu0 %vm5786_vm0, %v5785_v23 }
 0x87f   : > { %5081 = vmatprep.mubr.msk.bf16.mxu1 %vm5786_vm0, %v5785_v23 }
 0x948   : > { %v2911_v52 = vpop.f32.mrb[12].mxu0 }
 0x949   : > { %v2912_v54 = vadd.f32 %v6483_v25, %v2911_v52  ;;  %v6513_v55 = vpop.f32.mrb[12].mxu1  ;;  %v5089_v56 = vpop.f32.mrb[13].mxu0  ;;  %v5390_v52 = vld [vmem:[%s6923_s2] sm:$0xff]  }
 0x94a   : > { %v5071_v57 = vpop.f32.mrb[13].mxu1  ;;  %v2914_v58 = vpop.f32.mrb[14].mxu0  ;;  %5110 = vmatpush3.bf16.msra.mxu0 %v5390_v52  ;;  %v5392_v56 = vld [vmem:[%s6923_s2 + $0x10] sm:$0xff]  }
 0x94b   : > { %v2750_v59 = vpop.f32.mrb[14].mxu1  ;;  %v5090_v60 = vpop.f32.mrb[15].mxu0  ;;  %v2917_v61 = vsel %vm2691_vm3, %v2912_v54, -inf  ;;  %5111 = vmatprep.subr.bf16.mxu0 %v5785_v23  ;;  %v5393_v57 = vld [vmem:[%s6923_s2 + $0x18] sm:$0xff]   ;;  %v5394_v58 = vld [vmem:[%s6923_s2 + $0x20] sm:$0xff]  }
 0x94c   : > { %v5072_v62 = vpop.f32.mrb[15].mxu1  ;;  %2918 = vmax.xlane.f32.xlu1 %v2917_v61  ;;  %v5395_v59 = vld [vmem:[%s6923_s2 + $0x28] sm:$0xff]   ;;  %v5396_v60 = vld [vmem:[%s6923_s2 + $0x30] sm:$0xff]  }
 0x950   : > { %v3022_v63 = vpop.f32.mrb[16].mxu0 }
 0x951   : > { %v2799_v0 = vpop.f32.mrb[16].mxu1  ;;  %v5101_v2 = vpop.f32.mrb[17].mxu0  ;;  %v3023_v8 = vadd.f32 %v6483_v25, %v3022_v63 }
 0x952   : > { %v2800_v3 = vadd.f32 %v6483_v25, %v2799_v0  ;;  %v5077_v4 = vpop.f32.mrb[17].mxu1  ;;  %v3025_v5 = vpop.f32.mrb[18].mxu0  ;;  %v5397_v2 = vld [vmem:[%s6923_s2 + $0x38] sm:$0xff]  }
 0x953   : > { %v2802_v6 = vpop.f32.mrb[18].mxu1  ;;  %v5102_v7 = vpop.f32.mrb[19].mxu0  ;;  %v3028_v11 = vsel %vm2691_vm3, %v3023_v8, -inf }
 0x954   : > { %v5078_v9 = vpop.f32.mrb[19].mxu1  ;;  %v2805_v10 = vsel %vm2691_vm3, %v2800_v3, -inf  ;;  %v1902_v6 = vld [vmem:[%s6926_s20] sm:$0xff] }
 0x955   : > { %2806 = vmax.xlane.f32.xlu0 %v2805_v10 }
 0x959   : > { %3029 = vmax.xlane.f32.xlu0 %v3028_v11 }
 0x9d9   : > { %v2919_v12 = vpop.xlane.xlu1 %2918 }
 0x9da   : > { %v2920_v13 = vsub.f32 %v2912_v54, %v2919_v12  ;;  %v5391_v54 = vld [vmem:[%s6923_s2 + $0x8] sm:$0xff]  }
 0x9db   : > { %5112 = vmatpush3.bf16.msra.mxu0 %v5391_v54 }
 0x9dc   : > { %v2921_v14 = vmul.f32 1.442695, %v2920_v13  ;;  %5113 = vmatprep.subr.bf16.mxu0 %v5785_v23 }
 0x9de   : > { %5478 = vpow2.f32 %v2921_v14 }
 0x9df   : > { %5114 = vmatpush3.bf16.msra.mxu0 %v5392_v56  ;;  %v4791_v56 = vld [vmem:[%s6934_s24] ss:$0 sm:$0xff] }
 0x9e0   : > { %5115 = vmatprep.subr.bf16.mxu0 %v5785_v23 }
 0x9e2   : > { %v2807_v15 = vpop.xlane.xlu0 %2806 }
 0x9e3   : > { %v2808_v16 = vsub.f32 %v2800_v3, %v2807_v15  ;;  %5116 = vmatpush3.bf16.msra.mxu0 %v5393_v57 }
 0x9e4   : > { %5117 = vmatprep.subr.bf16.mxu0 %v5785_v23 }
 0x9e5   : > { %v2809_v18 = vmul.f32 1.442695, %v2808_v16 }
 0x9e6   : > { %v3030_v19 = vpop.xlane.xlu0 %3029 }
 0x9e7   : > { %5480 = vpow2.f32 %v2809_v18  ;;  %v3031_v22 = vsub.f32 %v3023_v8, %v3030_v19  ;;  %5118 = vmatpush3.bf16.msra.mxu0 %v5394_v58  ;;  %v4792_v58 = vld [vmem:[%s6935_s28] ss:$0 sm:$0xff] }
 0x9e8   : > { %v5479_v24 = vpop.eup %5478  ;;  %5119 = vmatprep.subr.bf16.mxu0 %v5785_v23 }
 0x9e9   : > { %v3032_v1 = vmul.f32 1.442695, %v3031_v22  ;;  %v2923_v25 = vsel %vm2691_vm3, %v5479_v24, 0.0 }
 0x9ea   : > { %2924 = vadd.xlane.f32.xlu0 %v2923_v25 }
 0x9eb   : > { %5482 = vpow2.f32 %v3032_v1  ;;  %5120 = vmatpush3.bf16.msra.mxu0 %v5395_v59 }
 0x9ec   : > { %5121 = vmatprep.subr.bf16.mxu0 %v5785_v23 }
 0x9ef   : > { %5122 = vmatpush3.bf16.msra.mxu0 %v5396_v60 }
 0x9f0   : > { %5123 = vmatprep.subr.bf16.mxu0 %v5785_v23 }
 0x9f1   : > { %v5481_v26 = vpop.eup %5480 }
 0x9f2   : > { %v2811_v27 = vsel %vm2691_vm3, %v5481_v26, 0.0 }
 0x9f3   : > { %2812 = vadd.xlane.f32.xlu0 %v2811_v27  ;;  %5124 = vmatpush3.bf16.msra.mxu0 %v5397_v2 }
 0x9f4   : > { %5149 = vmatprep.subr.bf16.mxu0 %v5785_v23 }
 0x9f5   : > { %v5483_v28 = vpop.eup %5482 }
 0x9f6   : > { %v3034_v29 = vsel %vm2691_vm3, %v5483_v28, 0.0 }
 0x9f7   : > { %3035 = vadd.xlane.f32.xlu1 %v3034_v29 }
 0xa08   : > { %2930 = vrot.lane.b32.xlu1 %v6475_v21, %s5789_s0 }
 0xa09   : > { %2819 = vrot.lane.b32.xlu0 %v6475_v21, %s5787_s8 }
 0xa0c   : > { %3041 = vrot.lane.b32.xlu1 %v6475_v21, %s5788_s27 }
 0xa77   : > { %v2925_v30 = vpop.xlane.xlu0 %2924 }
 0xa78   : > { %v2926_v33 = vmax.f32 %v2925_v30, 1e-30  ;;  %v5398_v30 = vld [vmem:[%s6928_s5] sm:$0xff]  }
 0xa80   : > { %v2813_v31 = vpop.xlane.xlu0 %2812 }
 0xa81   : > { %v2814_v32 = vmax.f32 %v2813_v31, 1e-30  ;;  %v5399_v31 = vld [vmem:[%s6929_s25] sm:$0xff]  }
 0xa83   : > { %5484 = vrcp.f32 %v2814_v32  ;;  %v5400_v32 = vld [vmem:[%s6928_s5 + $0x8] sm:$0xff]  }
 0xa84   : > { %v2820_v34 = vpop.permute.xlu0 %2819  ;;  %5486 = vrcp.f32 %v2926_v33  ;;  %v3036_v36 = vpop.xlane.xlu1 %3035  ;;  %v5401_v33 = vld [vmem:[%s6929_s25 + $0x8] sm:$0xff]  }
 0xa85   : > { %v2825_v35 = vsel %vm2709_vm2, %v2820_v34, 0  ;;  %v3037_v37 = vmax.f32 %v3036_v36, 1e-30 }
 0xa86   : > { %5080 = vmatpush3.bf16.msra.mxu1 %v2825_v35 }
 0xa87   : > { %5091 = vmatprep.subr.bf16.mxu1 %v5785_v23  ;;  %5488 = vrcp.f32 %v3037_v37  ;;  %v5402_v37 = vld [vmem:[%s6928_s5 + $0x10] sm:$0xff]  }
 0xa88   : > { %v2931_v40 = vpop.permute.xlu1 %2930 }
 0xa89   : > { %v2936_v42 = vsel %vm2709_vm2, %v2931_v40, 0  ;;  %v5405_v40 = vld [vmem:[%s6929_s25 + $0x18] sm:$0xff]  }
 0xa8c   : > { %v3042_v44 = vpop.permute.xlu1 %3041 }
 0xa8d   : > { %v5485_v38 = vpop.eup %5484  ;;  %v3047_v47 = vsel %vm2709_vm2, %v3042_v44, 0  ;;  %v5410_v44 = vld [vmem:[%s6928_s5 + $0x30] sm:$0xff]  }
 0xa8e   : > { %v2816_v39 = vmul.f32 %v5485_v38, %v5481_v26  ;;  %v5487_v21 = vpop.eup %5486  ;;  %v5403_v38 = vld [vmem:[%s6929_s25 + $0x10] sm:$0xff]  }
 0xa8f   : > { %v2928_v43 = vmul.f32 %v5487_v21, %v5479_v24  ;;  %v4790_v24 = vld [vmem:[%s6930_s19] ss:$0 sm:$0xff] }
 0xa90   : > { %v2817_v41 = vpack.c.bf16 %v2816_v39, %v2816_v39  ;;  %v5404_v39 = vld [vmem:[%s6928_s5 + $0x18] sm:$0xff]   ;;  %v5407_v21 = vld [vmem:[%s6929_s25 + $0x20] sm:$0xff]  }
 0xa91   : > { %v2929_v45 = vpack.c.bf16 %v2928_v43, %v2928_v43  ;;  %v5489_v46 = vpop.eup %5488  ;;  %v5409_v43 = vld [vmem:[%s6929_s25 + $0x28] sm:$0xff]  }
 0xa92   : > { %5082 = vmatmul.mubr.msk.bf16.vlgmr.msra.gmra.mrb[20].mxu1 %vm2691_vm3, %v2817_v41  ;;  %v3039_v48 = vmul.f32 %v5489_v46, %v5483_v28  ;;  %v5406_v41 = vld [vmem:[%s6928_s5 + $0x20] sm:$0xff]   ;;  %v5412_v46 = vld [vmem:[%s6928_s5 + $0x38] sm:$0xff]  }
 0xa93   : > { %5092 = vmatpush3.bf16.msra.mxu1 %v2936_v42  ;;  %5093 = vmatprep.mubr.msk.bf16.mxu1 %vm5786_vm0, %v5785_v23  ;;  %v5408_v42 = vld [vmem:[%s6928_s5 + $0x28] sm:$0xff]  }
 0xa94   : > { %5103 = vmatprep.subr.bf16.mxu1 %v5785_v23  ;;  %v3040_v49 = vpack.c.bf16 %v3039_v48, %v3039_v48 }
 0xa9a   : > { %5094 = vmatmul.mubr.msk.bf16.vlgmr.msra.gmra.mrb[24].mxu1 %vm2691_vm3, %v2929_v45  ;;  %v5411_v45 = vld [vmem:[%s6929_s25 + $0x30] sm:$0xff]  }
 0xa9b   : > { %5104 = vmatpush3.bf16.msra.mxu1 %v3047_v47  ;;  %5105 = vmatprep.mubr.msk.bf16.mxu1 %vm5786_vm0, %v5785_v23  ;;  %v5413_v47 = vld [vmem:[%s6929_s25 + $0x38] sm:$0xff]  }
 0xa9c   : > { %5129 = vmatprep.subr.bf16.mxu1 %v5785_v23 }
 0xaa2   : > { %5106 = vmatmul.mubr.msk.bf16.vlgmr.msra.gmra.mrb[28].mxu1 %vm2691_vm3, %v3040_v49 }
 0xaa3   : > { %5145 = vmatprep.mubr.msk.bf16.mxu1 %vm5786_vm0, %v5785_v23  ;;  %5130 = vmatpush3.bf16.msra.mxu1 %v5398_v30 }
 0xaa4   : > { %5131 = vmatprep.subr.bf16.mxu1 %v5785_v23 }
 0xaa7   : > { %5132 = vmatpush3.bf16.msra.mxu1 %v5400_v32 }
 0xaa8   : > { %5133 = vmatprep.subr.bf16.mxu1 %v5785_v23 }
 0xaab   : > { %5134 = vmatpush3.bf16.msra.mxu1 %v5402_v37 }
 0xaac   : > { %5135 = vmatprep.subr.bf16.mxu1 %v5785_v23 }
 0xaaf   : > { %5136 = vmatpush3.bf16.msra.mxu1 %v5404_v39 }
 0xab0   : > { %5137 = vmatprep.subr.bf16.mxu1 %v5785_v23 }
 0xab3   : > { %5138 = vmatpush3.bf16.msra.mxu1 %v5406_v41  ;;  %v3559_v41 = vadd.s32 3, %v6376_v50 }
 0xab4   : > { %5139 = vmatprep.subr.bf16.mxu1 %v5785_v23 }
 0xab5   : > { %vm3561_vm12 = vcmp.lt.s32.totalorder %v3559_v41, 8  ;;  %v5430_v41 = vld [vmem:[%s6314_s14 + $0x24] ss:$8 sps:$4 sm:$0xff]  }
 0xab7   : > { %5140 = vmatpush3.bf16.msra.mxu1 %v5408_v42 }
 0xab8   : > { %5141 = vmatprep.subr.bf16.mxu1 %v5785_v23 }
 0xabb   : > { %5142 = vmatpush3.bf16.msra.mxu1 %v5410_v44 }
 0xabc   : > { %5143 = vmatprep.subr.bf16.mxu1 %v5785_v23 }
 0xabf   : > { %5144 = vmatpush3.bf16.msra.mxu1 %v5412_v46 }
 0xac0   : > { %5169 = vmatprep.subr.bf16.mxu1 %v5785_v23 }
 0xb65   : > { %v2861_v61 = vpop.f32.mrb[20].mxu1 }
 0xb66   : > { %3090 = vrot.lane.b32.xlu1 %v2861_v61, %s5788_s27  ;;  %v5083_v62 = vpop.f32.mrb[21].mxu1 }
 0xb67   : > { %v2864_v63 = vpop.f32.mrb[22].mxu1  ;;  %v4802_v62 = vld [vmem:[%s1854_s30] ss:$0 sm:$0xff] }
 0xb68   : > { %v5084_v0 = vpop.f32.mrb[23].mxu1 }
 0xb6d   : > { %v2972_v3 = vpop.f32.mrb[24].mxu1 }
 0xb6e   : > { %3094 = vrot.lane.b32.xlu0 %v2972_v3, %s5789_s0  ;;  %v5095_v4 = vpop.f32.mrb[25].mxu1 }
 0xb6f   : > { %v2975_v5 = vpop.f32.mrb[26].mxu1 }
 0xb70   : > { %v5096_v7 = vpop.f32.mrb[27].mxu1 }
 0xb72   : > { %3222 = vperm.xlu0 %5325, %v1902_v6  }
 0xb75   : > { %v3083_v8 = vpop.f32.mrb[28].mxu1 }
 0xb76   : > { %3098 = vrot.lane.b32.xlu1 %v3083_v8, %s5787_s8  ;;  %v5107_v9 = vpop.f32.mrb[29].mxu1 }
 0xb77   : > { %v3086_v10 = vpop.f32.mrb[30].mxu1 }
 0xb78   : > { %v5108_v11 = vpop.f32.mrb[31].mxu1 }
 0xbd8   : > { %v3091_v12 = vpop.permute.xlu1 %3090 }
 0xbd9   : > { %v3101_v14 = vsel %vm2644_vm1, %v6513_v55, %v3091_v12 }
 0xbe0   : > { %v3095_v13 = vpop.permute.xlu0 %3094 }
 0xbe1   : > { %v3103_v15 = vsel %vm3102_vm4, %v3101_v14, %v3095_v13  ;;  %v3489_v13 = vadd.s32 4294967293, %v6376_v50  ;;  %v3501_v14 = vadd.s32 4294967294, %v6376_v50 }
 0xbe3   : > { %vm3490_vm7 = vcmp.ge.s32.totalorder %v3489_v13, 0  ;;  %vm3502_vm8 = vcmp.ge.s32.totalorder %v3501_v14, 0  ;;  %v5421_v13 = vld [vmem:[%s6308_s22 + $0x38] sm:$0xff]  }
 0xbe8   : > { %v3099_v16 = vpop.permute.xlu1 %3098 }
 0xbe9   : > { %v3105_v18 = vsel %vm3104_vm5, %v3103_v15, %v3099_v16  ;;  %v3513_v15 = vadd.s32 4294967295, %v6376_v50 }
 0xbea   : > { %v3106_v19 = vpack.c.bf16 %v3105_v18, %v3105_v18  ;;  %v3487_v18 = vld [vmem:[%s6299_s18] sm:$0x7f] }
 0xbeb   : > { %vm3514_vm9 = vcmp.ge.s32.totalorder %v3513_v15, 0 }
 0xbec   : > { %5126 = vmatmul.mubr.bf16.vlgmr.msra.gmra.mrb[20].mxu0 %v3106_v19 }
 0xbed   : > { %5165 = vmatprep.mubr.msk.bf16.mxu0 %vm5786_vm0, %v5785_v23  ;;  %5150 = vmatpush3.bf16.msra.mxu0 %v5399_v31  ;;  %v3542_v31 = vsub.s32 4, %v6376_v50 }
 0xbee   : > { %5151 = vmatprep.subr.bf16.mxu0 %v5785_v23 }
 0xbf1   : > { %v3223_v55 = vpop.permute.xlu0 %3222  ;;  %5152 = vmatpush3.bf16.msra.mxu0 %v5401_v33 }
 0xbf2   : > { %5153 = vmatprep.subr.bf16.mxu0 %v5785_v23 }
 0xbf5   : > { %5154 = vmatpush3.bf16.msra.mxu0 %v5403_v38 }
 0xbf6   : > { %5155 = vmatprep.subr.bf16.mxu0 %v5785_v23 }
 0xbf9   : > { %5156 = vmatpush3.bf16.msra.mxu0 %v5405_v40 }
 0xbfa   : > { %5157 = vmatprep.subr.bf16.mxu0 %v5785_v23 }
 0xbfd   : > { %5158 = vmatpush3.bf16.msra.mxu0 %v5407_v21  ;;  %v3543_v21 = vrot.slane %v3487_v18, %v3542_v31  ;;  %v4816_v31 = vld [vmem:[%s1875_s10] ss:$0 sm:$0xff] }
 0xbfe   : > { %5159 = vmatprep.subr.bf16.mxu0 %v5785_v23 }
 0xc01   : > { %5160 = vmatpush3.bf16.msra.mxu0 %v5409_v43 }
 0xc02   : > { %5161 = vmatprep.subr.bf16.mxu0 %v5785_v23 }
 0xc05   : > { %5162 = vmatpush3.bf16.msra.mxu0 %v5411_v45  ;;  %v3566_v45 = vsub.s32 6, %v6376_v50 }
 0xc06   : > { %5163 = vmatprep.subr.bf16.mxu0 %v5785_v23 }
 0xc09   : > { %5164 = vmatpush3.bf16.msra.mxu0 %v5413_v47 }
 0xcbf   : > { %v3205_v22 = vpop.f32.mrb[20].mxu0 }
 0xcc0   : > { %v3211_v1 = vadd.f32 %v3205_v22, %v6391_v20  ;;  %v5127_v25 = vpop.f32.mrb[21].mxu0  ;;  %v3520_v22 = vsub.s32 2, %v6376_v50 }
 0xcc1   : > { %v3208_v26 = vpop.f32.mrb[22].mxu0  ;;  %v3509_v25 = vrot.slane %v3487_v18, %v6383_v53 }
 0xcc2   : > { %v5128_v27 = vpop.f32.mrb[23].mxu0  ;;  %v3219_v28 = vadd.f32 %v4790_v24, %v3211_v1  ;;  %v3530_v24 = vsub.s32 3, %v6376_v50  ;;  %v3497_v1 = vrot.slane %v3487_v18, %v6379_v51  ;;  %v3535_v26 = vadd.s32 1, %v6376_v50 }
 0xcc3   : > { %v3521_v32 = vrot.slane %v3487_v18, %v3520_v22 }
 0xcc4   : > { %v6574_v29 = vmul.f32 %v3223_v55, %v3219_v28  ;;  %v3531_v33 = vrot.slane %v3487_v18, %v3530_v24  ;;  %vm3537_vm10 = vcmp.lt.s32.totalorder %v3535_v26, 8  ;;  %v4814_v24 = vld [vmem:[%s1867_s15] ss:$0 sm:$0xff]  ;;  %s6943_s15 = scalar_lea.vmem [#allocation3], %s6942_s11 }
 0xcc6   : > { %3228 = vadd.xlane.f32.xlu1 %v6574_v29 }
 0xd53   : > { %v3229_v20 = vpop.xlane.xlu1 %3228 }
 0xd54   : > { %v3230_v34 = vmul.f32 0.0078125, %v3229_v20  ;;  %v3547_v20 = vadd.s32 2, %v6376_v50 }
 0xd56   : > { %v3231_v35 = vsub.f32 %v6574_v29, %v3230_v34  ;;  %v3554_v34 = vsub.s32 5, %v6376_v50  ;;  %vm3549_vm11 = vcmp.lt.s32.totalorder %v3547_v20, 8 }
 0xd58   : > { %v3232_v36 = vmul.f32 %v3231_v35, %v3231_v35 }
 0xd5a   : > { %3233 = vadd.xlane.f32.xlu0 %v3232_v36 }
 0xde7   : > { %v3234_v48 = vpop.xlane.xlu0 %3233 }
 0xde8   : > { %v3235_v49 = vmul.f32 0.0078125, %v3234_v48 }
 0xdea   : > { %v3236_v52 = vadd.f32 1e-05, %v3235_v49 }
 0xdec   : > { %5490 = vrsqrt.f32 %v3236_v52  ;;  %v3555_v52 = vrot.slane %v3487_v18, %v3554_v34 }
 0xdf6   : > { %v5491_v54 = vpop.eup %5490 }
 0xdf7   : > { %v3238_v57 = vmul.f32 %v5491_v54, %v3231_v35 }
 0xdf9   : > { %v3245_v59 = vmul.f32 %v4791_v56, %v3238_v57 }
 0xdfb   : > { %v3252_v60 = vadd.f32 %v4792_v58, %v3245_v59  ;;  %v3567_v58 = vrot.slane %v3487_v18, %v3566_v45  ;;  %v5433_v45 = vld [vmem:[%s6314_s14 + $0x34] ss:$8 sps:$4 sm:$0xff]  }
 0xdfd   : > { %v3253_v61 = vpack.c.bf16 %v3252_v60, %v3252_v60 }
 0xdff   : > { %5146 = vmatmul.mubr.bf16.vlgmr.msra.gmra.mrb[32].mxu1 %v3253_v61  ;;  %5166 = vmatmul.mubr.bf16.vlgmr.msra.gmra.mrb[24].mxu0 %v3253_v61 }
 0xe00   : > { %5185 = vmatprep.mubr.msk.bf16.mxu1 %vm5786_vm0, %v5785_v23  ;;  %3893 = vmatprep.mubr.bf16.mxu0 %v5784_v17  ;;  %v4793_v17 = vld [vmem:[%s6937_s26] ss:$0 sm:$0xff] }
 0xed2   : > { %v3359_v63 = vpop.f32.mrb[32].mxu1  ;;  %v3470_v0 = vpop.f32.mrb[24].mxu0 }
 0xed3   : > { %v3471_v2 = vadd.f32 %v4802_v62, %v3470_v0  ;;  %v5147_v3 = vpop.f32.mrb[33].mxu1  ;;  %v5167_v4 = vpop.f32.mrb[25].mxu0  ;;  %v3360_v12 = vadd.f32 %v4793_v17, %v3359_v63  ;;  %v4812_v63 = vld [vmem:[%s1861_s1] ss:$0 sm:$0xff]  ;;  %v5419_v17 = vld [vmem:[%s6308_s22 + $0x28] sm:$0xff]  }
 0xed4   : > { %v3362_v5 = vpop.f32.mrb[34].mxu1  ;;  %v3473_v6 = vpop.f32.mrb[26].mxu0 }
 0xed5   : > { %v4811_v7 = vmul.f32 -1.442695, %v3471_v2  ;;  %v5148_v8 = vpop.f32.mrb[35].mxu1  ;;  %v5168_v9 = vpop.f32.mrb[27].mxu0 }
 0xed6   : > { %v5415_v8 = vld [vmem:[%s6308_s22 + $0x8] sm:$0xff]   ;;  %v5416_v9 = vld [vmem:[%s6308_s22 + $0x10] sm:$0xff]  }
 0xed7   : > { %5492 = vpow2.f32 %v4811_v7  ;;  %v5414_v7 = vld [vmem:[%s6308_s22] sm:$0xff]  }
 0xed8   : > { %5170 = vmatpush3.bf16.msra.mxu1 %v5414_v7  ;;  %v5448_v7 = vld [vmem:[%s6323_s6 + $0x48] sm:$0xff]  }
 0xed9   : > { %5171 = vmatprep.subr.bf16.mxu1 %v5785_v23 }
 0xedc   : > { %5172 = vmatpush3.bf16.msra.mxu1 %v5415_v8  ;;  %v5449_v8 = vld [vmem:[%s6323_s6 + $0x8] sm:$0xff]  }
 0xedd   : > { %5173 = vmatprep.subr.bf16.mxu1 %v5785_v23 }
 0xee0   : > { %5174 = vmatpush3.bf16.msra.mxu1 %v5416_v9  ;;  %v5450_v9 = vld [vmem:[%s6323_s6 + $0x50] sm:$0xff]  }
 0xee1   : > { %v5493_v10 = vpop.eup %5492  ;;  %5175 = vmatprep.subr.bf16.mxu1 %v5785_v23 }
 0xee2   : > { %v3479_v11 = vadd.f32 1.0, %v5493_v10  ;;  %v5417_v10 = vld [vmem:[%s6308_s22 + $0x18] sm:$0xff]  }
 0xee4   : > { %5494 = vrcp.f32 %v3479_v11  ;;  %5176 = vmatpush3.bf16.msra.mxu1 %v5417_v10  ;;  %v5418_v11 = vld [vmem:[%s6308_s22 + $0x20] sm:$0xff]   ;;  %v5451_v10 = vld [vmem:[%s6323_s6 + $0x10] sm:$0xff]  }
 0xee5   : > { %5177 = vmatprep.subr.bf16.mxu1 %v5785_v23 }
 0xee8   : > { %5178 = vmatpush3.bf16.msra.mxu1 %v5418_v11  ;;  %v5452_v11 = vld [vmem:[%s6323_s6 + $0x58] sm:$0xff]  }
 0xee9   : > { %5179 = vmatprep.subr.bf16.mxu1 %v5785_v23 }
 0xeec   : > { %5180 = vmatpush3.bf16.msra.mxu1 %v5419_v17  ;;  %v5453_v17 = vld [vmem:[%s6323_s6 + $0x18] sm:$0xff]  }
 0xeed   : > { %5181 = vmatprep.subr.bf16.mxu1 %v5785_v23 }
 0xeee   : > { %v5495_v16 = vpop.eup %5494 }
 0xeef   : > { %v3482_v19 = vmul.f32 %v5495_v16, %v3360_v12  ;;  %v5420_v12 = vld [vmem:[%s6308_s22 + $0x30] sm:$0xff]   ;;  %s6947_s22 = sld [smem:[#allocation56_spill]] }
 0xef0   : > { %5182 = vmatpush3.bf16.msra.mxu1 %v5420_v12  ;;  %v5454_v12 = vld [vmem:[%s6323_s6 + $0x60] sm:$0xff]  }
 0xef1   : > { %v3486_v55 = vsel %vm3485_vm6, %v3482_v19, 0.0  ;;  %5183 = vmatprep.subr.bf16.mxu1 %v5785_v23  ;;  %v4813_v19 = vld [vmem:[%s1864_s23] ss:$0 sm:$0xff]  ;;  %s6944_s23 = scalar_lea.vmem [#allocation5], %s6942_s11 }
 0xef2   : > { %v3488_v27 = vrot.slane %v3486_v55, 5  ;;  %v3500_v28 = vrot.slane %v3486_v55, 6  ;;  %v3512_v30 = vrot.slane %v3486_v55, 7  ;;  %v3534_v38 = vrot.slane %v3486_v55, 1 }
 0xef3   : > { %v3546_v42 = vrot.slane %v3486_v55, 2  ;;  %v3558_v47 = vrot.slane %v3486_v55, 3  ;;  %v3532_v49 = vmul.f32 %v3531_v33, %v3486_v55 }
 0xef4   : > { %v3493_v35 = vsel %vm3490_vm7, %v3488_v27, 0.0  ;;  %v3505_v36 = vsel %vm3502_vm8, %v3500_v28, 0.0  ;;  %v3517_v37 = vsel %vm3514_vm9, %v3512_v30, 0.0  ;;  %v3539_v46 = vsel %vm3537_vm10, %v3534_v38, 0.0  ;;  %5184 = vmatpush3.bf16.msra.mxu1 %v5421_v13  ;;  %v5424_v38 = vld [vmem:[%s6314_s14 + $0x4] ss:$8 sps:$4 sm:$0xff]  }
 0xef5   : > { %v3498_v39 = vmul.f32 %v3497_v1, %v3493_v35  ;;  %v3510_v40 = vmul.f32 %v3509_v25, %v3505_v36  ;;  %v3522_v44 = vmul.f32 %v3521_v32, %v3517_v37  ;;  %v3551_v54 = vsel %vm3549_vm11, %v3546_v42, 0.0  ;;  %v5422_v37 = vld [vmem:[%s6314_s14] ss:$8 sps:$4 sm:$0xff]   ;;  %3861 = vmatprep.subr.bf16.mxu0 %v5424_v38  ;;  %p4864_p2 = scmp.ne.s32.totalorder %s6947_s22, 1 }
 0xef6   : > { %v3544_v57 = vmul.f32 %v3543_v21, %v3539_v46  ;;  %v3563_v59 = vsel %vm3561_vm12, %v3558_v47, 0.0  ;;  %v3556_v61 = vmul.f32 %v3555_v52, %v3551_v54  ;;  %3862 = vmatpush1.bf16.msra.mxu0 %v5422_v37  ;;  %v5428_v21 = vld [vmem:[%s6314_s14 + $0x20] ss:$8 sps:$4 sm:$0xff]   ;;  %v5431_v46 = vld [vmem:[%s6314_s14 + $0x30] ss:$8 sps:$4 sm:$0xff]  }
 0xef7   : > { %v3511_v43 = vadd.f32 %v3510_v40, %v3498_v39  ;;  %v3568_v50 = vmul.f32 %v3567_v58, %v3563_v59  ;;  %v5427_v39 = vld [vmem:[%s6314_s14 + $0x14] ss:$8 sps:$4 sm:$0xff]   ;;  %v5425_v40 = vld [vmem:[%s6314_s14 + $0x10] ss:$8 sps:$4 sm:$0xff]   ;;  %v5436_v47 = vld [vmem:[%s6314_s14 + $0x44] ss:$8 sps:$4 sm:$0xff]  }
 0xef8   : > { %3863 = vmatprep.subr.bf16.mxu0 %v5427_v39  ;;  %v5437_v52 = vld [vmem:[%s6314_s14 + $0x50] ss:$8 sps:$4 sm:$0xff]   ;;  %v5442_v54 = vld [vmem:[%s6314_s14 + $0x64] ss:$8 sps:$4 sm:$0xff]  }
 0xef9   : > { %v3523_v48 = vadd.f32 %v3522_v44, %v3511_v43  ;;  %v5443_v58 = vld [vmem:[%s6314_s14 + $0x70] ss:$8 sps:$4 sm:$0xff]   ;;  %v5455_v13 = vld [vmem:[%s6323_s6 + $0x20] sm:$0xff]  }
 0xefa   : > { %3864 = vmatpush1.bf16.msra.mxu0 %v5425_v40 }
 0xefb   : > { %v3533_v56 = vadd.f32 %v3532_v49, %v3523_v48  ;;  %3865 = vmatprep.subr.bf16.mxu0 %v5430_v41  ;;  %v5434_v48 = vld [vmem:[%s6314_s14 + $0x40] ss:$8 sps:$4 sm:$0xff]   ;;  %v5439_v49 = vld [vmem:[%s6314_s14 + $0x54] ss:$8 sps:$4 sm:$0xff]  }
 0xefd   : > { %v3545_v60 = vadd.f32 %v3544_v57, %v3533_v56  ;;  %v5440_v56 = vld [vmem:[%s6314_s14 + $0x60] ss:$8 sps:$4 sm:$0xff]   ;;  %v5445_v57 = vld [vmem:[%s6314_s14 + $0x74] ss:$8 sps:$4 sm:$0xff]   ;;  %s6945_s14 = scalar_lea.vmem [#allocation7], %s6942_s11 }
 0xefe   : > { %3866 = vmatpush1.bf16.msra.mxu0 %v5428_v21  ;;  %v4845_v21 = vld [vmem:[%s6945_s14] ss:$0 sm:$0xff] }
 0xeff   : > { %v3557_v62 = vadd.f32 %v3556_v61, %v3545_v60  ;;  %3867 = vmatprep.subr.bf16.mxu0 %v5433_v45 }
 0xf01   : > { %v3569_v0 = vadd.f32 %v3568_v50, %v3557_v62  ;;  %v4825_v50 = vld [vmem:[%s6943_s15] ss:$0 sm:$0xff] }
 0xf02   : > { %3868 = vmatpush1.bf16.msra.mxu0 %v5431_v46 }
 0xf03   : > { %v3577_v2 = vadd.f32 %v4812_v63, %v3569_v0  ;;  %3869 = vmatprep.subr.bf16.mxu0 %v5436_v47  ;;  %v4826_v0 = vld [vmem:[%s6944_s23] ss:$0 sm:$0xff] }
 0xf05   : > { %3580 = vadd.xlane.f32.xlu0 %v3577_v2 }
 0xf06   : > { %3870 = vmatpush1.bf16.msra.mxu0 %v5434_v48 }
 0xf07   : > { %3871 = vmatprep.subr.bf16.mxu0 %v5439_v49 }
 0xf0a   : > { %3872 = vmatpush1.bf16.msra.mxu0 %v5437_v52 }
 0xf0b   : > { %3873 = vmatprep.subr.bf16.mxu0 %v5442_v54 }
 0xf0e   : > { %3874 = vmatpush1.bf16.msra.mxu0 %v5440_v56 }
 0xf0f   : > { %3875 = vmatprep.subr.bf16.mxu0 %v5445_v57 }
 0xf12   : > { %3876 = vmatpush1.bf16.msra.mxu0 %v5443_v58 }
 0xf92   : > { %v3581_v3 = vpop.xlane.xlu0 %3580 }
 0xf93   : > { %v3582_v4 = vmul.f32 0.0078125, %v3581_v3 }
 0xf95   : > { %v3583_v5 = vsub.f32 %v3577_v2, %v3582_v4 }
 0xf97   : > { %v3584_v6 = vmul.f32 %v3583_v5, %v3583_v5 }
 0xf99   : > { %3585 = vadd.xlane.f32.xlu1 %v3584_v6  ;;  %v5447_v6 = vld [vmem:[%s6323_s6] sm:$0xff]  }
0x1026   : > { %v3586_v14 = vpop.xlane.xlu1 %3585 }
0x1027   : > { %v3587_v15 = vmul.f32 0.0078125, %v3586_v14  ;;  %v5456_v14 = vld [vmem:[%s6323_s6 + $0x68] sm:$0xff]  }
0x1029   : > { %v3588_v16 = vadd.f32 1e-05, %v3587_v15  ;;  %v5457_v15 = vld [vmem:[%s6323_s6 + $0x28] sm:$0xff]  }
0x102b   : > { %5496 = vrsqrt.f32 %v3588_v16  ;;  %v5458_v16 = vld [vmem:[%s6323_s6 + $0x70] sm:$0xff]  }
0x1035   : > { %v5497_v18 = vpop.eup %5496 }
0x1036   : > { %v3590_v22 = vmul.f32 %v5497_v18, %v3583_v5  ;;  %v5446_v5 = vld [vmem:[%s6323_s6 + $0x40] sm:$0xff]   ;;  %v5459_v18 = vld [vmem:[%s6323_s6 + $0x30] sm:$0xff]  }
0x1037   : > { %4979 = vmatprep.subr.bf16.mxu1 %v5446_v5 }
0x1038   : > { %v3597_v1 = vmul.f32 %v4813_v19, %v3590_v22  ;;  %v5460_v19 = vld [vmem:[%s6323_s6 + $0x78] sm:$0xff]  }
0x1039   : > { %v5461_v22 = vld [vmem:[%s6323_s6 + $0x38] sm:$0xff]  }
0x103a   : > { %v3604_v25 = vadd.f32 %v4814_v24, %v3597_v1  ;;  %v3769_v24 = vld [vmem:[%s6319_s4] sm:$0x3]  ;;  %s6946_s4 = scalar_lea.vmem [#allocation8], %s6942_s11 }
0x103b   : > { %v3774_v1 = vrot.slane %v3769_v24, %v6379_v51 }
0x103c   : > { %v4815_v26 = vmul.f32 -1.442695, %v3604_v25 }
0x103e   : > { %5498 = vpow2.f32 %v4815_v26 }
0x1048   : > { %v5499_v55 = vpop.eup %5498 }
0x1049   : > { %v3608_v23 = vadd.f32 1.0, %v5499_v55 }
0x104b   : > { %5500 = vrcp.f32 %v3608_v23 }
0x1055   : > { %v5501_v27 = vpop.eup %5500 }
0x1056   : > { %v3611_v28 = vmul.f32 %v5501_v27, %v3604_v25  ;;  %v3778_v25 = vrot.slane %v3769_v24, %v6383_v53 }
0x1058   : > { %v3612_v30 = vpack.c.bf16 %v3611_v28, %v3611_v28 }
0x105a   : > { %5186 = vmatmul.mubr.bf16.vlgmr.msra.gmra.mrb[36].mxu1 %v3612_v30 }
0x105b   : > { %4980 = vmatpush3.bf16.msra.mxu1 %v5447_v6 }
0x105c   : > { %4981 = vmatprep.subr.bf16.mxu1 %v5448_v7 }
0x105f   : > { %4982 = vmatpush3.bf16.msra.mxu1 %v5449_v8 }
0x1060   : > { %4983 = vmatprep.subr.bf16.mxu1 %v5450_v9 }
0x1063   : > { %4984 = vmatpush3.bf16.msra.mxu1 %v5451_v10 }
0x1064   : > { %4985 = vmatprep.subr.bf16.mxu1 %v5452_v11 }
0x1067   : > { %4986 = vmatpush3.bf16.msra.mxu1 %v5453_v17 }
0x1068   : > { %4987 = vmatprep.subr.bf16.mxu1 %v5454_v12 }
0x106b   : > { %4988 = vmatpush3.bf16.msra.mxu1 %v5455_v13 }
0x106c   : > { %4989 = vmatprep.subr.bf16.mxu1 %v5456_v14 }
0x106f   : > { %4990 = vmatpush3.bf16.msra.mxu1 %v5457_v15 }
0x1070   : > { %4991 = vmatprep.subr.bf16.mxu1 %v5458_v16 }
0x1073   : > { %4992 = vmatpush3.bf16.msra.mxu1 %v5459_v18 }
0x1074   : > { %4993 = vmatprep.subr.bf16.mxu1 %v5460_v19 }
0x1077   : > { %4994 = vmatpush3.bf16.msra.mxu1 %v5461_v22 }
0x112d   : > { %v3718_v32 = vpop.f32.mrb[36].mxu1 }
0x112e   : > { %v3719_v33 = vadd.f32 %v4816_v31, %v3718_v32  ;;  %v5187_v20 = vpop.f32.mrb[37].mxu1 }
0x112f   : > { %v3721_v34 = vpop.f32.mrb[38].mxu1 }
0x1130   : > { %v6667_v35 = vadd.f32 %v3719_v33, %v6574_v29  ;;  %v5188_v36 = vpop.f32.mrb[39].mxu1 }
0x1132   : > { %3727 = vadd.xlane.f32.xlu0 %v6667_v35 }
0x11bf   : > { %v3728_v29 = vpop.xlane.xlu0 %3727 }
0x11c0   : > { %v3729_v42 = vmul.f32 0.0078125, %v3728_v29 }
0x11c2   : > { %v3730_v43 = vsub.f32 %v6667_v35, %v3729_v42 }
0x11c4   : > { %v3731_v44 = vmul.f32 %v3730_v43, %v3730_v43 }
0x11c6   : > { %3732 = vadd.xlane.f32.xlu1 %v3731_v44 }
0x1253   : > { %v3733_v59 = vpop.xlane.xlu1 %3732 }
0x1254   : > { %v3734_v60 = vmul.f32 0.0078125, %v3733_v59 }
0x1256   : > { %v3735_v61 = vadd.f32 1e-05, %v3734_v60  ;;  %v4862_v60 = vld [vmem:[%s6946_s4] ss:$0 sm:$0xff] }
0x1258   : > { %5502 = vrsqrt.f32 %v3735_v61 }
0x1262   : > { %v5503_v62 = vpop.eup %5502 }
0x1263   : > { %v3737_v63 = vmul.f32 %v5503_v62, %v3730_v43  ;;  %v4863_v62 = vld [vmem:[%s1523_s21] ss:$0 sm:$0xff] }
0x1265   : > { %v3744_v2 = vmul.f32 %v4825_v50, %v3737_v63 }
0x1267   : > { %v3751_v3 = vadd.f32 %v4826_v0, %v3744_v2 }
0x1269   : > { %v3752_v4 = vpack.c.bf16 %v3751_v3, %v3751_v3 }
0x126b   : > { %3894 = vmatmul.mubr.bf16.vlgmr.msra.gmra.mrb[28].mxu0 %v3752_v4 }
0x133e   : > { %v3895_v26 = vpop.f32.mrb[28].mxu0 }
0x133f   : > { %v3896_v55 = vadd.f32 %v3895_v26, %v3774_v1  ;;  %v3897_v23 = vpop.f32.mrb[29].mxu0 }
0x1340   : > { %v3898_v27 = vadd.f32 %v3897_v23, %v3778_v25  ;;  %v3899_v28 = vpop.f32.mrb[30].mxu0 }
0x1341   : > { %v4843_v30 = vmul.f32 -1.442695, %v3896_v55  ;;  %v3900_v31 = vpop.f32.mrb[31].mxu0 }
0x1342   : > { %v4844_v32 = vmul.f32 -1.442695, %v3898_v27 }
0x1343   : > { %5504 = vpow2.f32 %v4843_v30 }
0x1344   : > { %5506 = vpow2.f32 %v4844_v32 }
0x134d   : > { %v5505_v33 = vpop.eup %5504 }
0x134e   : > { %v5507_v20 = vpop.eup %5506  ;;  %v3908_v34 = vadd.f32 1.0, %v5505_v33 }
0x134f   : > { %v3909_v36 = vadd.f32 1.0, %v5507_v20 }
0x1350   : > { %5508 = vrcp.f32 %v3908_v34 }
0x1351   : > { %5510 = vrcp.f32 %v3909_v36 }
0x135a   : > { %v5509_v51 = vpop.eup %5508 }
0x135b   : > { %v5511_v37 = vpop.eup %5510  ;;  %v3914_v53 = vmul.f32 %v5509_v51, %v3896_v55 }
0x135c   : > { %v3915_v38 = vmul.f32 %v5511_v37, %v3898_v27 }
0x135d   : > { %v3916_v40 = vpack.c.bf16 %v3914_v53, %v3914_v53 }
0x135e   : > { %v3917_v39 = vpack.c.bf16 %v3915_v38, %v3915_v38 }
0x1360   : > { %4085 = vmatprep.mubr.bf16.mxu1 %v3917_v39 }
0x1361   : > { %4086 = vmatmul.mubr.bf16.vlgmr.msra.gmra.mrb[40].mxu1 %v3916_v40 }
0x1434   : > { %v4995_v41 = vpop.f32.mrb[40].mxu1 }
0x1435   : > { %v4996_v29 = vpop.f32.mrb[41].mxu1 }
0x1436   : > { %v4997_v42 = vadd.f32 %v4996_v29, %v4995_v41  ;;  %v4998_v43 = vpop.f32.mrb[42].mxu1 }
0x1437   : > { %v4999_v44 = vpop.f32.mrb[43].mxu1 }
0x1438   : > { %v4088_v45 = vadd.f32 %v4997_v42, %v4845_v21 }
0x143a   : > { %v4093_v46 = vmul.f32 0.5, %v4088_v45 }
0x143c   : > { %v4094_v47 = vadd.f32 %v4093_v46, %v6667_v35 }
0x143e   : > { %4097 = vadd.xlane.f32.xlu0 %v4094_v47 }
0x14cb   : > { %v4098_v48 = vpop.xlane.xlu0 %4097 }
0x14cc   : > { %v4099_v49 = vmul.f32 0.0078125, %v4098_v48 }
0x14ce   : > { %v4100_v52 = vsub.f32 %v4094_v47, %v4099_v49 }
0x14d0   : > { %v4101_v54 = vmul.f32 %v4100_v52, %v4100_v52 }
0x14d2   : > { %4102 = vadd.xlane.f32.xlu1 %v4101_v54 }
0x155f   : > { %v4103_v56 = vpop.xlane.xlu1 %4102 }
0x1560   : > { %v4104_v57 = vmul.f32 0.0078125, %v4103_v56 }
0x1562   : > { %v4105_v58 = vadd.f32 1e-05, %v4104_v57 }
0x1564   : > { %5512 = vrsqrt.f32 %v4105_v58 }
0x156e   : > { %v5513_v59 = vpop.eup %5512 }
0x156f   : > { %v4107_v61 = vmul.f32 %v5513_v59, %v4100_v52  ;;  %4126 = sbr.rel (%p4864_p2) target bundleno = 5494 (0x1576), region = 204 }
0x1571   : > { %v4114_v50 = vmul.f32 %v4862_v60, %v4107_v61 }
0x1573   : > { %v4121_v63 = vadd.f32 %v4863_v62, %v4114_v50 }
0x1575   : > { %4122 = vst [vmem:[#allocation2] sm:$0xff] %v4121_v63  ;;  %4127 = vst [vmem:[%s1893_s17] sm:$0xff] (!%p4864_p2), %v4121_v63 }
0x1576 PF: > { %s6950_s27 = sld [smem:[#allocation59_spill]]  ;;  %s6951_s22 = sld [smem:[#allocation54_spill]] }
0x1577   : > { %s6952_s23 = sld [smem:[#allocation55_spill]]  ;;  %s6953_s26 = sld [smem:[#allocation62_spill]] }
0x1578   : > { %s6954_s28 = sld [smem:[#allocation57_spill]]  ;;  %s6955_s1 = sld [smem:[#allocation58_spill]] }
0x1579   : > { %s6956_s2 = sld [smem:[#allocation60_spill]]  ;;  %s6957_s0 = sld [smem:[#allocation61_spill]] }
0x157c   : > { %s98_s7 = sadd.s32 1, %s6950_s27  }
0x157d   : > { %p95_p1 = scmp.ge.s32.totalorder %s98_s7, 6  }
0x157f   :  { %97 = sbr.rel (!%p95_p1) target bundleno = 100 (0x64), region = 413 }
0x1586   :  { %4147 = vsyncpa [#allocation4], 1 }
0x1587   :  { %4149 = vsyncpa [#allocation4 + $0x1], 1 }
0x1588   :  { %4150 = vsyncpa [#allocation6], 1 }
0x1589   :  { %4152 = vsyncpa [#allocation6 + $0x1], 1 }
0x158a   :  { %4153 = vsyncpa [#allocation9], 1 }
0x158b   :  { %4155 = vsyncpa [#allocation9 + $0x1], 1 }

// kernel: model_forward.19
= control target key start
LH: loop header
LB: loop body
LE: loop exit
PB: predicated region body
PF: predicated region fallthrough
CT: control target
= control target key end

     0   :  { %9 = vsyncpa [#allocation3], 0  ;;  %s899_s15 = smov 0   ;;  %s1109_s0 = inlined_call_operand.vmem [shape: f32[2,6,128], index: 0, kind: input, shape index: {}]   ;;  %s1110_s1 = inlined_call_operand.vmem [shape: f32[2,5,128], index: 1, kind: input, shape index: {}]   ;;  %s1111_s2 = inlined_call_operand.vmem [shape: bf16[128,128], index: 2, kind: input, shape index: {}]   ;;  %s1112_s3 = inlined_call_operand.hbm [shape: f32[1,128], index: 3, kind: input, shape index: {}]   ;;  %s1113_s4 = inlined_call_operand.vmem [shape: f32[2,5,6,128], index: 4, kind: output, shape index: {}]  }
   0x1 LB: > { %s905_s16 = sadd.s32 4294967295, %s869_s15   ;;  %p628_p0 = scmp.ge.s32.totalorder %s869_s15, 1  ;;  %s869_s15 = sphi %s899_s15, %s15_s15  }
   0x2   : > { %p140_p1 = scmp.lt.s32.totalorder %s869_s15, 3  ;;  %p1114_p3 = scmp.eq.s32.totalorder %s905_s16, 0 }
   0x3   : > { %s871_s18 = smov [#allocation2]   ;;  %s831_s23 = scalar_lea.hbm %s1112_s3, 16 }
   0x4   : > { %p909_p2 = pnand %p628_p0, %p140_p1  ;;  %s156_s19 = sshll.u32 %s871_s18, 4  ;;  %s157_s19 = int_to_ptr.vmem [resolvable:$true] %s156_s19 }
   0x5   : > { %p832_p6 = scmp.ne.s32.totalorder %s1112_s3, %s831_s23  ;;  %p838_p10 = scmp.lt.u32.totalorder %s831_s23, %s1112_s3 }
   0x6   : > { %s1116_s17 = scalar_select %p909_p2, 1, 0 }
   0x7   : > { %p806_p4 = pneg %p909_p2 }
   0x9   : > { %p918_p5 = pnand %p1114_p3, %p806_p4 }
   0xb   : > { %p833_p7 = pneg %p918_p5 }
   0xd   : > { %p834_p8 = pnand %p833_p7, %p832_p6 }
   0xf   : > { %p835_p9 = pneg %p834_p8 }
  0x11   : > { %p840_p11 = pnand %p838_p10, %p835_p9 }
  0x13   : > { %843 = shalt.err (!%p840_p11)
}
  0x14   : > { %s844_s28 = scalar_lea.vmem %s157_s19, 16  ;;  %s851_s29 = scalar_lea.vmem %s157_s19, 32 }
  0x15   : > { %p845_p12 = scmp.ne.s32.totalorder %s157_s19, %s844_s28  ;;  %p852_p1 = scmp.lt.s32.totalorder %s157_s19, %s157_s19 }
  0x16   : > { %p853_p4 = scmp.lt.s32.totalorder %s851_s29, %s844_s28 }
  0x17   : > { %p847_p13 = pnand %p845_p12, %p833_p7 }
  0x18   : > { %p854_p3 = por %p853_p4, %p852_p1 }
  0x19   : > { %p848_p0 = pneg %p847_p13 }
  0x1b   : > { %p855_p2 = pnand %p854_p3, %p848_p0 }
  0x1d   : > { %858 = shalt.err (!%p855_p2)
}
  0x1e   : > { %809 = dma.hbm_to_vmem [thread:$0]  (!%p918_p5), %s1112_s3, 16, %s157_s19, [#allocation3]  }
  0x1f   : > { %p1118_p6 = scmp.ne.s32.totalorder %s1116_s17, 0 }
  0x20   : > { %p1119_p8 = scmp.eq.s32.totalorder (!%p1118_p6), %s905_s16, 0 }
  0x21   : > { %183 = sbr.rel (%p1118_p6) target bundleno = 354 (0x162), region = 36 }
  0x28   : > { %864 = dma.done.wait (%p1119_p8), [#allocation3], 16   ;;  %p1120_p7 = pmov %p1119_p8 }
  0x29   : > { %v872_v0 = vmov 0.0   ;;  %vm873_vm0 = vmmov 0   ;;  %p212_p2 = scmp.lt.s32.totalorder %s905_s16, 1  ;;  %v957_v1 = vld [vmem:[%s1111_s2] sm:$0xff]   ;;  %v963_v2 = vld [vmem:[%s1111_s2 + $0x8] sm:$0xff]   ;;  %v973_v3 = vld [vmem:[%s1111_s2 + $0x10] sm:$0xff]  }
  0x2a   : > { %866 = vsyncadd (%p1120_p7), [#allocation3], 4294967280  ;;  %701 = vmatprep.subr.bf16.mxu0 %v872_v0  ;;  %721 = vmatprep.subr.bf16.mxu1 %v872_v0  ;;  %v993_v6 = vld [vmem:[%s1111_s2 + $0x18] sm:$0xff]   ;;  %v1005_v8 = vld [vmem:[%s1111_s2 + $0x20] sm:$0xff]  }
  0x2b   : > { %717 = vmatprep.mubr.msk.bf16.mxu0 %vm873_vm0, %v872_v0  ;;  %737 = vmatprep.mubr.msk.bf16.mxu1 %vm873_vm0, %v872_v0  ;;  %s1122_s16 = smov (!%p212_p2, %s905_s16), 1  ;;  %v1014_v9 = vld [vmem:[%s1111_s2 + $0x28] sm:$0xff]   ;;  %v1027_v14 = vld [vmem:[%s1111_s2 + $0x30] sm:$0xff]   ;;  %v1036_v17 = vld [vmem:[%s1111_s2 + $0x38] sm:$0xff]  }
  0x2c   : > { %702 = vmatpush3.bf16.msra.mxu0 %v957_v1  ;;  %722 = vmatpush3.bf16.msra.mxu1 %v957_v1  ;;  %s633_s10 = sshll.u32 %s1122_s16, 3  ;;  %s801_s5 = smul.u32 40, %s1122_s16  ;;  %v637_v30 = vld [vmem:[#allocation2] ss:$0 sm:$0xff] }
  0x2d   : > { %703 = vmatprep.subr.bf16.mxu0 %v872_v0  ;;  %723 = vmatprep.subr.bf16.mxu1 %v872_v0  ;;  %s215_s17 = scalar_lea.vmem %s1109_s0, %s633_s10  ;;  %s984_s20 = scalar_lea.vmem %s1110_s1, %s633_s10 }
  0x2e   : > { %v986_v4 = vld [vmem:[%s215_s17] sm:$0x3f]  ;;  %s224_s8 = scalar_lea.vmem %s1113_s4, %s801_s5 }
  0x2f   : > { %v652_v5 = vld [vmem:[%s984_s20 + $0x4] ss:$0 sm:$0xff]  ;;  %v636_v10 = vld [vmem:[%s984_s20] ss:$0 sm:$0xff]  ;;  %v646_v11 = vld [vmem:[%s984_s20 + $0x1] ss:$0 sm:$0xff] }
  0x30   : > { %704 = vmatpush3.bf16.msra.mxu0 %v963_v2  ;;  %724 = vmatpush3.bf16.msra.mxu1 %v963_v2  ;;  %v997_v7 = vadd.f32 %v652_v5, %v986_v4  ;;  %v249_v12 = vadd.f32 %v636_v10, %v986_v4  ;;  %v352_v13 = vadd.f32 %v646_v11, %v986_v4  ;;  %v648_v20 = vld [vmem:[%s984_s20 + $0x2] ss:$0 sm:$0xff]  ;;  %v650_v21 = vld [vmem:[%s984_s20 + $0x3] ss:$0 sm:$0xff] }
  0x31   : > { %705 = vmatprep.subr.bf16.mxu0 %v872_v0  ;;  %725 = vmatprep.subr.bf16.mxu1 %v872_v0  ;;  %v402_v22 = vadd.f32 %v648_v20, %v986_v4  ;;  %v452_v23 = vadd.f32 %v650_v21, %v986_v4 }
  0x32   : > { %v250_v15 = vmax.f32 %v249_v12, 0.0  ;;  %v353_v16 = vmax.f32 %v352_v13, 0.0  ;;  %v503_v28 = vmax.f32 %v997_v7, 0.0 }
  0x33   : > { %v403_v24 = vmax.f32 %v402_v22, 0.0  ;;  %v453_v25 = vmax.f32 %v452_v23, 0.0 }
  0x34   : > { %706 = vmatpush3.bf16.msra.mxu0 %v973_v3  ;;  %726 = vmatpush3.bf16.msra.mxu1 %v973_v3  ;;  %v251_v18 = vpack.c.bf16 %v250_v15, %v250_v15  ;;  %v354_v19 = vpack.c.bf16 %v353_v16, %v353_v16  ;;  %v504_v29 = vpack.c.bf16 %v503_v28, %v503_v28 }
  0x35   : > { %707 = vmatprep.subr.bf16.mxu0 %v872_v0  ;;  %727 = vmatprep.subr.bf16.mxu1 %v872_v0  ;;  %v404_v26 = vpack.c.bf16 %v403_v24, %v403_v24  ;;  %v454_v27 = vpack.c.bf16 %v453_v25, %v453_v25 }
  0x38   : > { %708 = vmatpush3.bf16.msra.mxu0 %v993_v6  ;;  %728 = vmatpush3.bf16.msra.mxu1 %v993_v6 }
  0x39   : > { %709 = vmatprep.subr.bf16.mxu0 %v872_v0  ;;  %729 = vmatprep.subr.bf16.mxu1 %v872_v0 }
  0x3c   : > { %710 = vmatpush3.bf16.msra.mxu0 %v1005_v8  ;;  %730 = vmatpush3.bf16.msra.mxu1 %v1005_v8 }
  0x3d   : > { %711 = vmatprep.subr.bf16.mxu0 %v872_v0  ;;  %731 = vmatprep.subr.bf16.mxu1 %v872_v0 }
  0x40   : > { %712 = vmatpush3.bf16.msra.mxu0 %v1014_v9  ;;  %732 = vmatpush3.bf16.msra.mxu1 %v1014_v9 }
  0x41   : > { %713 = vmatprep.subr.bf16.mxu0 %v872_v0  ;;  %733 = vmatprep.subr.bf16.mxu1 %v872_v0 }
  0x44   : > { %714 = vmatpush3.bf16.msra.mxu0 %v1027_v14  ;;  %734 = vmatpush3.bf16.msra.mxu1 %v1027_v14 }
  0x45   : > { %715 = vmatprep.subr.bf16.mxu0 %v872_v0  ;;  %735 = vmatprep.subr.bf16.mxu1 %v872_v0 }
  0x48   : > { %716 = vmatpush3.bf16.msra.mxu0 %v1036_v17  ;;  %736 = vmatpush3.bf16.msra.mxu1 %v1036_v17 }
  0x49   : > { %741 = vmatprep.subr.bf16.mxu0 %v872_v0  ;;  %761 = vmatprep.subr.bf16.mxu1 %v872_v0 }
  0x4b   : > { %718 = vmatmul.mubr.bf16.vlgmr.msra.gmra.mrb[0].mxu0 %v251_v18  ;;  %738 = vmatmul.mubr.bf16.vlgmr.msra.gmra.mrb[0].mxu1 %v354_v19 }
  0x4c   : > { %742 = vmatpush3.bf16.msra.mxu0 %v957_v1  ;;  %762 = vmatpush3.bf16.msra.mxu1 %v957_v1 }
  0x4d   : > { %743 = vmatprep.subr.bf16.mxu0 %v872_v0  ;;  %757 = vmatprep.mubr.msk.bf16.mxu0 %vm873_vm0, %v872_v0 }
  0x4e   : > { %763 = vmatprep.subr.bf16.mxu1 %v872_v0  ;;  %777 = vmatprep.mubr.msk.bf16.mxu1 %vm873_vm0, %v872_v0 }
  0x50   : > { %744 = vmatpush3.bf16.msra.mxu0 %v963_v2  ;;  %764 = vmatpush3.bf16.msra.mxu1 %v963_v2 }
  0x51   : > { %745 = vmatprep.subr.bf16.mxu0 %v872_v0  ;;  %765 = vmatprep.subr.bf16.mxu1 %v872_v0 }
  0x54   : > { %746 = vmatpush3.bf16.msra.mxu0 %v973_v3  ;;  %766 = vmatpush3.bf16.msra.mxu1 %v973_v3 }
  0x55   : > { %747 = vmatprep.subr.bf16.mxu0 %v872_v0  ;;  %767 = vmatprep.subr.bf16.mxu1 %v872_v0 }
  0x58   : > { %748 = vmatpush3.bf16.msra.mxu0 %v993_v6  ;;  %768 = vmatpush3.bf16.msra.mxu1 %v993_v6 }
  0x59   : > { %749 = vmatprep.subr.bf16.mxu0 %v872_v0  ;;  %769 = vmatprep.subr.bf16.mxu1 %v872_v0 }
  0x5c   : > { %750 = vmatpush3.bf16.msra.mxu0 %v1005_v8  ;;  %770 = vmatpush3.bf16.msra.mxu1 %v1005_v8 }
  0x5d   : > { %751 = vmatprep.subr.bf16.mxu0 %v872_v0  ;;  %771 = vmatprep.subr.bf16.mxu1 %v872_v0 }
  0x60   : > { %752 = vmatpush3.bf16.msra.mxu0 %v1014_v9  ;;  %772 = vmatpush3.bf16.msra.mxu1 %v1014_v9 }
  0x61   : > { %753 = vmatprep.subr.bf16.mxu0 %v872_v0  ;;  %773 = vmatprep.subr.bf16.mxu1 %v872_v0 }
  0x64   : > { %754 = vmatpush3.bf16.msra.mxu0 %v1027_v14  ;;  %774 = vmatpush3.bf16.msra.mxu1 %v1027_v14 }
  0x65   : > { %755 = vmatprep.subr.bf16.mxu0 %v872_v0  ;;  %775 = vmatprep.subr.bf16.mxu1 %v872_v0 }
  0x68   : > { %756 = vmatpush3.bf16.msra.mxu0 %v1036_v17  ;;  %776 = vmatpush3.bf16.msra.mxu1 %v1036_v17 }
  0x69   : > { %781 = vmatprep.subr.bf16.mxu0 %v872_v0 }
  0x6b   : > { %758 = vmatmul.mubr.bf16.vlgmr.msra.gmra.mrb[4].mxu0 %v404_v26  ;;  %778 = vmatmul.mubr.bf16.vlgmr.msra.gmra.mrb[4].mxu1 %v454_v27 }
  0x6c   : > { %782 = vmatpush3.bf16.msra.mxu0 %v957_v1  ;;  %797 = vmatprep.mubr.msk.bf16.mxu0 %vm873_vm0, %v872_v0 }
  0x6d   : > { %783 = vmatprep.subr.bf16.mxu0 %v872_v0 }
  0x70   : > { %784 = vmatpush3.bf16.msra.mxu0 %v963_v2 }
  0x71   : > { %785 = vmatprep.subr.bf16.mxu0 %v872_v0 }
  0x74   : > { %786 = vmatpush3.bf16.msra.mxu0 %v973_v3 }
  0x75   : > { %787 = vmatprep.subr.bf16.mxu0 %v872_v0 }
  0x78   : > { %788 = vmatpush3.bf16.msra.mxu0 %v993_v6 }
  0x79   : > { %789 = vmatprep.subr.bf16.mxu0 %v872_v0 }
  0x7c   : > { %790 = vmatpush3.bf16.msra.mxu0 %v1005_v8 }
  0x7d   : > { %791 = vmatprep.subr.bf16.mxu0 %v872_v0 }
  0x80   : > { %792 = vmatpush3.bf16.msra.mxu0 %v1014_v9 }
  0x81   : > { %793 = vmatprep.subr.bf16.mxu0 %v872_v0 }
  0x84   : > { %794 = vmatpush3.bf16.msra.mxu0 %v1027_v14 }
  0x85   : > { %795 = vmatprep.subr.bf16.mxu0 %v872_v0 }
  0x88   : > { %796 = vmatpush3.bf16.msra.mxu0 %v1036_v17 }
  0x8b   : > { %798 = vmatmul.mubr.bf16.vlgmr.msra.gmra.mrb[8].mxu0 %v504_v29 }
 0x11e   : > { %v340_v31 = vpop.f32.mrb[0].mxu0  ;;  %v389_v32 = vpop.f32.mrb[0].mxu1 }
 0x11f   : > { %v341_v33 = vadd.f32 %v637_v30, %v340_v31  ;;  %v719_v34 = vpop.f32.mrb[1].mxu0  ;;  %v390_v35 = vadd.f32 %v637_v30, %v389_v32  ;;  %v739_v36 = vpop.f32.mrb[1].mxu1 }
 0x120   : > { %v343_v37 = vpop.f32.mrb[2].mxu0  ;;  %v392_v38 = vpop.f32.mrb[2].mxu1 }
 0x121   : > { %346 = vst [vmem:[%s224_s8] sm:$0x3f] %v341_v33  ;;  %v720_v39 = vpop.f32.mrb[3].mxu0  ;;  %647 = vst [vmem:[%s224_s8 + $0x8] sm:$0x3f] %v390_v35  ;;  %v740_v40 = vpop.f32.mrb[3].mxu1 }
 0x13e   : > { %v439_v41 = vpop.f32.mrb[4].mxu0  ;;  %v489_v42 = vpop.f32.mrb[4].mxu1 }
 0x13f   : > { %v440_v43 = vadd.f32 %v637_v30, %v439_v41  ;;  %v759_v44 = vpop.f32.mrb[5].mxu0  ;;  %v490_v45 = vadd.f32 %v637_v30, %v489_v42  ;;  %v779_v46 = vpop.f32.mrb[5].mxu1 }
 0x140   : > { %v442_v47 = vpop.f32.mrb[6].mxu0  ;;  %v492_v48 = vpop.f32.mrb[6].mxu1 }
 0x141   : > { %649 = vst [vmem:[%s224_s8 + $0x10] sm:$0x3f] %v440_v43  ;;  %v760_v49 = vpop.f32.mrb[7].mxu0  ;;  %651 = vst [vmem:[%s224_s8 + $0x18] sm:$0x3f] %v490_v45  ;;  %v780_v50 = vpop.f32.mrb[7].mxu1 }
 0x15e   : > { %v539_v51 = vpop.f32.mrb[8].mxu0 }
 0x15f   : > { %v540_v52 = vadd.f32 %v637_v30, %v539_v51  ;;  %v799_v53 = vpop.f32.mrb[9].mxu0 }
 0x160   : > { %v542_v54 = vpop.f32.mrb[10].mxu0 }
 0x161   : > { %653 = vst [vmem:[%s224_s8 + $0x20] sm:$0x3f] %v540_v52  ;;  %v800_v55 = vpop.f32.mrb[11].mxu0 }
 0x162 PF: > { %s15_s15 = sadd.s32 1, %s869_s15  }
 0x163   : > { %p12_p3 = scmp.ge.s32.totalorder %s15_s15, 4  }
 0x165   :  { %14 = sbr.rel (!%p12_p3) target bundleno = 1 (0x1), region = 78 }
 0x16c   :  { %568 = vsyncpa [#allocation3], 1 }
 0x16d   :  { %570 = vsyncpa [#allocation3 + $0x1], 1 }

</bundles_post_ra>
